<compile_context>
chip_gen: v7x
topology: tpu7x:2x2x1
jax: 0.10.0
libtpu: 0.0.40
codegen_flags: <defaults>
</compile_context>

<pallas_src>
import math
import jax
import jax.numpy as jnp
from jax import lax
from jax.experimental import pallas as pl
from jax.experimental.pallas import tpu as pltpu


_EPS = 1e-5
_NEG_SLOPE = 0.01  # PyTorch nn.LeakyReLU default


# ---------------------------- in-kernel helpers ----------------------------

def _bn_leaky(x, gamma, beta):
    # x: (rows, C) f32.  Training-mode BatchNorm (biased variance over rows,
    # i.e. over N*H*W) followed by LeakyReLU(0.01), fused on the VPU/EUP.
    m = jnp.mean(x, axis=0, keepdims=True)
    v = jnp.mean((x - m) ** 2, axis=0, keepdims=True)
    y = (x - m) * lax.rsqrt(v + _EPS) * gamma + beta
    return jnp.where(y >= 0.0, y, _NEG_SLOPE * y)


# ---------------------------- fused Ghost-module kernel ----------------------------

def _make_ghost_kernel(num_in, in_chans, init_c, new_c, oup, N, H, W):
    cin = sum(in_chans)

    def kernel(*refs):
        x_refs = refs[:num_in]
        w1_ref, g1_ref, b1_ref, wd_ref, g2_ref, b2_ref = refs[num_in:num_in + 6]
        o_ref = refs[num_in + 6]
        xp_ref, patch_ref, x1p_ref = refs[num_in + 7:]

        # ---- stage the (channel-concatenated) input, zero padded, in VMEM ----
        xp_ref[...] = jnp.zeros_like(xp_ref)
        off = 0
        for r, c in zip(x_refs, in_chans):
            xp_ref[:, 1:H + 1, 1:W + 1, off:off + c] = r[...]
            off += c

        # ---- im2col: 9 shifted windows -> (N*H*W, 9*cin) bf16 patch matrix ----
        for k in range(9):
            dy, dx = k // 3, k % 3
            win = xp_ref[:, dy:dy + H, dx:dx + W, :]
            patch_ref[:, k * cin:(k + 1) * cin] = (
                win.reshape(N * H * W, cin).astype(jnp.bfloat16))

        # ---- primary 3x3 conv: ONE MXU matmul (bf16 operands, f32 accumulate) ----
        x1 = jnp.dot(patch_ref[...], w1_ref[...],
                     preferred_element_type=jnp.float32)            # (NHW, init_c)

        # ---- BN1 (batch stats) + LeakyReLU, fused ----
        x1a = _bn_leaky(x1, g1_ref[...], b1_ref[...])

        # ---- stage zero-padded x1 for the depthwise conv ----
        x1p_ref[...] = jnp.zeros_like(x1p_ref)
        x1p_ref[:, 1:H + 1, 1:W + 1, :] = x1a.reshape(N, H, W, init_c)

        # ---- depthwise 3x3 (groups == channels): f32 VPU multiply-accumulate ----
        # TODO(synk): valid only for ratio=2 (new_c == init_c); other ratios need the
        # grouped channel-multiplier mapping of PyTorch's grouped Conv2d.
        acc = jnp.zeros((N, H, W, new_c), jnp.float32)
        for dy in range(3):
            for dx in range(3):
                acc = acc + x1p_ref[:, dy:dy + H, dx:dx + W, :] * wd_ref[dy, dx]

        # ---- BN2 + LeakyReLU ----
        x2a = _bn_leaky(acc.reshape(N * H * W, new_c), g2_ref[...], b2_ref[...])

        # ---- ghost output: concat([x1, x2], channel)[..., :oup], written in place ----
        o_ref[:, :, :, :init_c] = x1a.reshape(N, H, W, init_c)
        keep = oup - init_c
        if keep == new_c:
            o_ref[:, :, :, init_c:oup] = x2a.reshape(N, H, W, new_c)
        else:
            o_ref[:, :, :, init_c:oup] = x2a[:, :keep].reshape(N, H, W, keep)

    return kernel


def ghost_module(xs, p):
    """Fused GhostModule.  `xs` is a list of NHWC tensors whose channel concat is
    the module input (decoder passes [upsampled, skip] -> no wrapper concat)."""
    N, H, W = (int(d) for d in xs[0].shape[:3])
    in_chans = tuple(int(x.shape[-1]) for x in xs)
    cin = sum(in_chans)
    init_c, new_c, oup = p["init_c"], p["new_c"], p["oup"]
    assert new_c == init_c, "kernel assumes GhostModule ratio == 2"

    # (3,3,cin,init_c) -> im2col weight (9*cin, init_c), row index = (dy*3+dx)*cin + ci
    w1 = p["conv_w"].reshape(9 * cin, init_c).astype(jnp.bfloat16)
    kernel = _make_ghost_kernel(len(xs), in_chans, init_c, new_c, oup, N, H, W)

    return pl.pallas_call(
        kernel,
        out_shape=jax.ShapeDtypeStruct((N, H, W, oup), jnp.float32),
        scratch_shapes=[
            pltpu.VMEM((N, H + 2, W + 2, cin), jnp.float32),      # padded input
            pltpu.VMEM((N * H * W, 9 * cin), jnp.bfloat16),       # im2col patches
            pltpu.VMEM((N, H + 2, W + 2, init_c), jnp.float32),   # padded x1
        ],
    )(*xs, w1, p["bn1_g"], p["bn1_b"], p["dw_w"], p["bn2_g"], p["bn2_b"])


# ---------------------------- ConvTranspose2d (k=2, s=2) ----------------------------

def _convT2x2_kernel(x_ref, w_ref, b_ref, o_ref):
    # x_ref: (N, H, W, Cin); w_ref: (Cin, 4*Cout) bf16; b_ref: (1, 4*Cout) f32
    # o_ref: (N, H, W, 4*Cout) lane-dense (tap index packed into channels)
    N, H, W, Cin = x_ref.shape
    C4 = o_ref.shape[-1]
    xf = x_ref[...].reshape(N * H * W, Cin).astype(jnp.bfloat16)
    y = jnp.dot(xf, w_ref[...], preferred_element_type=jnp.float32) + b_ref[...]
    o_ref[...] = y.reshape(N, H, W, C4)


def convT2x2(x, w, b):
    # x: (N, H, W, Cin), w: (2, 2, Cin, Cout), b: (1, Cout)  -> (N, 2H, 2W, Cout)
    N, H, W, Cin = x.shape
    Cout = w.shape[-1]
    wf = jnp.transpose(w, (2, 0, 1, 3)).reshape(Cin, 4 * Cout).astype(jnp.bfloat16)
    b4 = jnp.tile(b, (1, 4))
    y4 = pl.pallas_call(
        _convT2x2_kernel,
        out_shape=jax.ShapeDtypeStruct((N, H, W, 4 * Cout), jnp.float32),
    )(x, wf, b4)
    # glue: interleave the 4 taps into the (2H, 2W) output grid
    y = y4.reshape(N, H, W, 2, 2, Cout).transpose(0, 1, 3, 2, 4, 5)
    return y.reshape(N, 2 * H, 2 * W, Cout)


# ---------------------------- 1x1 classifier conv ----------------------------

def _conv1x1_kernel(x_ref, w_ref, b_ref, o_ref):
    N, H, W, Cin = x_ref.shape
    Cout = o_ref.shape[-1]
    xf = x_ref[...].reshape(N * H * W, Cin).astype(jnp.bfloat16)
    y = jnp.dot(xf, w_ref[...], preferred_element_type=jnp.float32) + b_ref[...]
    o_ref[...] = y.reshape(N, H, W, Cout)


def conv1x1(x, w, b):
    N, H, W, Cin = x.shape
    Cout = w.shape[-1]
    return pl.pallas_call(
        _conv1x1_kernel,
        out_shape=jax.ShapeDtypeStruct((N, H, W, Cout), jnp.float32),
    )(x, w.astype(jnp.bfloat16), b)


# ---------------------------- model (glue around the fused kernels) ----------------------------

def maxpool2(x):
    # glue: trivial 2x2 max pool (memory reshuffle), kept in plain JAX.
    N, H, W, C = x.shape
    return jnp.max(x.reshape(N, H // 2, 2, W // 2, 2, C), axis=(2, 4))


def encoder_block(x, p):
    s = ghost_module([x], p)
    return s, maxpool2(s)


def decoder_block(x, skip, p):
    up = convT2x2(x, p["up_w"], p["up_b"])
    # skip-concat is fused into the ghost kernel (two inputs, channel-offset staging)
    return ghost_module([up, skip], p["ghost"])


def gunet_forward(params, x_nchw):
    x = jnp.transpose(x_nchw, (0, 2, 3, 1))       # NCHW -> NHWC
    s1, p1 = encoder_block(x, params["e1"])
    s2, p2 = encoder_block(p1, params["e2"])
    s3, p3 = encoder_block(p2, params["e3"])
    b = ghost_module([p3], params["b"])
    d1 = decoder_block(b, s3, params["d1"])
    d2 = decoder_block(d1, s2, params["d2"])
    d3 = decoder_block(d2, s1, params["d3"])
    out = conv1x1(d3, params["out_w"], params["out_b"])
    return jnp.transpose(out, (0, 3, 1, 2))       # NHWC -> NCHW


# ---------------------------- deterministic parameter init ----------------------------

def _init_ghost(key, in_c, out_c, ratio=2):
    init_c = math.ceil(out_c / ratio)
    new_c = init_c * (ratio - 1)
    k1, k2 = jax.random.split(key)
    return dict(
        oup=out_c, init_c=init_c, new_c=new_c,
        conv_w=jax.random.normal(k1, (3, 3, in_c, init_c), jnp.float32) * 0.1,
        dw_w=jax.random.normal(k2, (3, 3, 1, new_c), jnp.float32) * 0.1,
        bn1_g=jnp.ones((1, init_c), jnp.float32),
        bn1_b=jnp.zeros((1, init_c), jnp.float32),
        bn2_g=jnp.ones((1, new_c), jnp.float32),
        bn2_b=jnp.zeros((1, new_c), jnp.float32),
    )


def _init_decoder(key, in_c, out_c):
    k1, k2, k3 = jax.random.split(key, 3)
    return dict(
        up_w=jax.random.normal(k1, (2, 2, in_c, out_c), jnp.float32) * 0.1,
        up_b=jax.random.normal(k2, (1, out_c), jnp.float32) * 0.1,
        ghost=_init_ghost(k3, out_c + out_c, out_c),
    )


def init_gunet_params(key):
    ks = jax.random.split(key, 8)
    return dict(
        e1=_init_ghost(ks[0], 3, 32),
        e2=_init_ghost(ks[1], 32, 64),
        e3=_init_ghost(ks[2], 64, 128),
        b=_init_ghost(ks[3], 128, 256),
        d1=_init_decoder(ks[4], 256, 128),
        d2=_init_decoder(ks[5], 128, 64),
        d3=_init_decoder(ks[6], 64, 32),
        out_w=jax.random.normal(ks[7], (32, 1), jnp.float32) * 0.1,
        out_b=jnp.zeros((1, 1), jnp.float32),
    )


if __name__ == "__main__":
    key = jax.random.PRNGKey(0)
    pk, xk = jax.random.split(key)
    params = init_gunet_params(pk)

    # PyTorch-style NCHW input: batch=2, channels=3, spatial 16x16.
    x = jax.random.normal(xk, (2, 3, 16, 16), jnp.float32)

    y = gunet_forward(params, x)
    y = jax.block_until_ready(y)
    assert y.shape == (2, 1, 16, 16), y.shape
    assert bool(jnp.all(jnp.isfinite(y)))
    print("KERNEL_OK")
</pallas_src>

<mosaic_0001>
module attributes {stable_mosaic.version = 11 : i64} {
  func.func @kernel(%arg0: memref<2x16x16x3xf32, #tpu.memory_space<vmem>>, %arg1: memref<27x16xbf16, #tpu.memory_space<vmem>>, %arg2: memref<1x16xf32, #tpu.memory_space<vmem>>, %arg3: memref<1x16xf32, #tpu.memory_space<vmem>>, %arg4: memref<3x3x1x16xf32, #tpu.memory_space<vmem>>, %arg5: memref<1x16xf32, #tpu.memory_space<vmem>>, %arg6: memref<1x16xf32, #tpu.memory_space<vmem>>, %arg7: memref<2x16x16x32xf32, #tpu.memory_space<vmem>>, %arg8: memref<2x18x18x3xf32, #tpu.memory_space<vmem>>, %arg9: memref<512x27xbf16, #tpu.memory_space<vmem>>, %arg10: memref<2x18x18x16xf32, #tpu.memory_space<vmem>>) attributes {dimension_semantics = [], scalar_prefetch = 0 : i64, scratch_operands = 3 : i64, tpu.core_type = #tpu.core_type<tc>} {
    %cst = arith.constant 0.000000e+00 : f32
    %0 = vector.broadcast %cst : f32 to vector<2x18x18x3xf32>
    %c0 = arith.constant 0 : index
    %c0_0 = arith.constant 0 : index
    %c0_1 = arith.constant 0 : index
    %c0_2 = arith.constant 0 : index
    %1 = vector.load %arg8[%c0, %c0_0, %c0_1, %c0_2] : memref<2x18x18x3xf32, #tpu.memory_space<vmem>>, vector<2x18x18x3xf32>
    tpu.vector_store %arg8[%c0, %c0_0, %c0_1, %c0_2], %0 {strides = array<i32>} : memref<2x18x18x3xf32, #tpu.memory_space<vmem>>, vector<2x18x18x3xf32>,
    %c0_3 = arith.constant 0 : index
    %c0_4 = arith.constant 0 : index
    %c0_5 = arith.constant 0 : index
    %c0_6 = arith.constant 0 : index
    %2 = vector.load %arg0[%c0_3, %c0_4, %c0_5, %c0_6] : memref<2x16x16x3xf32, #tpu.memory_space<vmem>>, vector<2x16x16x3xf32>
    %c0_7 = arith.constant 0 : index
    %c1 = arith.constant 1 : index
    %c1_8 = arith.constant 1 : index
    %c0_9 = arith.constant 0 : index
    %3 = vector.load %arg8[%c0_7, %c1, %c1_8, %c0_9] : memref<2x18x18x3xf32, #tpu.memory_space<vmem>>, vector<2x16x16x3xf32>
    tpu.vector_store %arg8[%c0_7, %c1, %c1_8, %c0_9], %2 {strides = array<i32>} : memref<2x18x18x3xf32, #tpu.memory_space<vmem>>, vector<2x16x16x3xf32>,
    %c0_10 = arith.constant 0 : index
    %c0_11 = arith.constant 0 : index
    %c0_12 = arith.constant 0 : index
    %c0_13 = arith.constant 0 : index
    %4 = vector.load %arg8[%c0_10, %c0_11, %c0_12, %c0_13] : memref<2x18x18x3xf32, #tpu.memory_space<vmem>>, vector<2x16x16x3xf32>
    %5 = vector.shape_cast %4 : vector<2x16x16x3xf32> to vector<512x3xf32>
    %6 = arith.truncf %5 : vector<512x3xf32> to vector<512x3xbf16>
    %c0_14 = arith.constant 0 : index
    %c0_15 = arith.constant 0 : index
    %7 = vector.load %arg9[%c0_14, %c0_15] : memref<512x27xbf16, #tpu.memory_space<vmem>>, vector<512x3xbf16>
    tpu.vector_store %arg9[%c0_14, %c0_15], %6 {strides = array<i32>} : memref<512x27xbf16, #tpu.memory_space<vmem>>, vector<512x3xbf16>,
    %c0_16 = arith.constant 0 : index
    %c0_17 = arith.constant 0 : index
    %c1_18 = arith.constant 1 : index
    %c0_19 = arith.constant 0 : index
    %8 = vector.load %arg8[%c0_16, %c0_17, %c1_18, %c0_19] : memref<2x18x18x3xf32, #tpu.memory_space<vmem>>, vector<2x16x16x3xf32>
    %9 = vector.shape_cast %8 : vector<2x16x16x3xf32> to vector<512x3xf32>
    %10 = arith.truncf %9 : vector<512x3xf32> to vector<512x3xbf16>
    %c0_20 = arith.constant 0 : index
    %c3 = arith.constant 3 : index
    %11 = vector.load %arg9[%c0_20, %c3] : memref<512x27xbf16, #tpu.memory_space<vmem>>, vector<512x3xbf16>
    tpu.vector_store %arg9[%c0_20, %c3], %10 {strides = array<i32>} : memref<512x27xbf16, #tpu.memory_space<vmem>>, vector<512x3xbf16>,
    %c0_21 = arith.constant 0 : index
    %c0_22 = arith.constant 0 : index
    %c2 = arith.constant 2 : index
    %c0_23 = arith.constant 0 : index
    %12 = vector.load %arg8[%c0_21, %c0_22, %c2, %c0_23] : memref<2x18x18x3xf32, #tpu.memory_space<vmem>>, vector<2x16x16x3xf32>
    %13 = vector.shape_cast %12 : vector<2x16x16x3xf32> to vector<512x3xf32>
    %14 = arith.truncf %13 : vector<512x3xf32> to vector<512x3xbf16>
    %c0_24 = arith.constant 0 : index
    %c6 = arith.constant 6 : index
    %15 = vector.load %arg9[%c0_24, %c6] : memref<512x27xbf16, #tpu.memory_space<vmem>>, vector<512x3xbf16>
    tpu.vector_store %arg9[%c0_24, %c6], %14 {strides = array<i32>} : memref<512x27xbf16, #tpu.memory_space<vmem>>, vector<512x3xbf16>,
    %c0_25 = arith.constant 0 : index
    %c1_26 = arith.constant 1 : index
    %c0_27 = arith.constant 0 : index
    %c0_28 = arith.constant 0 : index
    %16 = vector.load %arg8[%c0_25, %c1_26, %c0_27, %c0_28] : memref<2x18x18x3xf32, #tpu.memory_space<vmem>>, vector<2x16x16x3xf32>
    %17 = vector.shape_cast %16 : vector<2x16x16x3xf32> to vector<512x3xf32>
    %18 = arith.truncf %17 : vector<512x3xf32> to vector<512x3xbf16>
    %c0_29 = arith.constant 0 : index
    %c9 = arith.constant 9 : index
    %19 = vector.load %arg9[%c0_29, %c9] : memref<512x27xbf16, #tpu.memory_space<vmem>>, vector<512x3xbf16>
    tpu.vector_store %arg9[%c0_29, %c9], %18 {strides = array<i32>} : memref<512x27xbf16, #tpu.memory_space<vmem>>, vector<512x3xbf16>,
    %c0_30 = arith.constant 0 : index
    %c1_31 = arith.constant 1 : index
    %c1_32 = arith.constant 1 : index
    %c0_33 = arith.constant 0 : index
    %20 = vector.load %arg8[%c0_30, %c1_31, %c1_32, %c0_33] : memref<2x18x18x3xf32, #tpu.memory_space<vmem>>, vector<2x16x16x3xf32>
    %21 = vector.shape_cast %20 : vector<2x16x16x3xf32> to vector<512x3xf32>
    %22 = arith.truncf %21 : vector<512x3xf32> to vector<512x3xbf16>
    %c0_34 = arith.constant 0 : index
    %c12 = arith.constant 12 : index
    %23 = vector.load %arg9[%c0_34, %c12] : memref<512x27xbf16, #tpu.memory_space<vmem>>, vector<512x3xbf16>
    tpu.vector_store %arg9[%c0_34, %c12], %22 {strides = array<i32>} : memref<512x27xbf16, #tpu.memory_space<vmem>>, vector<512x3xbf16>,
    %c0_35 = arith.constant 0 : index
    %c1_36 = arith.constant 1 : index
    %c2_37 = arith.constant 2 : index
    %c0_38 = arith.constant 0 : index
    %24 = vector.load %arg8[%c0_35, %c1_36, %c2_37, %c0_38] : memref<2x18x18x3xf32, #tpu.memory_space<vmem>>, vector<2x16x16x3xf32>
    %25 = vector.shape_cast %24 : vector<2x16x16x3xf32> to vector<512x3xf32>
    %26 = arith.truncf %25 : vector<512x3xf32> to vector<512x3xbf16>
    %c0_39 = arith.constant 0 : index
    %c15 = arith.constant 15 : index
    %27 = vector.load %arg9[%c0_39, %c15] : memref<512x27xbf16, #tpu.memory_space<vmem>>, vector<512x3xbf16>
    tpu.vector_store %arg9[%c0_39, %c15], %26 {strides = array<i32>} : memref<512x27xbf16, #tpu.memory_space<vmem>>, vector<512x3xbf16>,
    %c0_40 = arith.constant 0 : index
    %c2_41 = arith.constant 2 : index
    %c0_42 = arith.constant 0 : index
    %c0_43 = arith.constant 0 : index
    %28 = vector.load %arg8[%c0_40, %c2_41, %c0_42, %c0_43] : memref<2x18x18x3xf32, #tpu.memory_space<vmem>>, vector<2x16x16x3xf32>
    %29 = vector.shape_cast %28 : vector<2x16x16x3xf32> to vector<512x3xf32>
    %30 = arith.truncf %29 : vector<512x3xf32> to vector<512x3xbf16>
    %c0_44 = arith.constant 0 : index
    %c18 = arith.constant 18 : index
    %31 = vector.load %arg9[%c0_44, %c18] : memref<512x27xbf16, #tpu.memory_space<vmem>>, vector<512x3xbf16>
    tpu.vector_store %arg9[%c0_44, %c18], %30 {strides = array<i32>} : memref<512x27xbf16, #tpu.memory_space<vmem>>, vector<512x3xbf16>,
    %c0_45 = arith.constant 0 : index
    %c2_46 = arith.constant 2 : index
    %c1_47 = arith.constant 1 : index
    %c0_48 = arith.constant 0 : index
    %32 = vector.load %arg8[%c0_45, %c2_46, %c1_47, %c0_48] : memref<2x18x18x3xf32, #tpu.memory_space<vmem>>, vector<2x16x16x3xf32>
    %33 = vector.shape_cast %32 : vector<2x16x16x3xf32> to vector<512x3xf32>
    %34 = arith.truncf %33 : vector<512x3xf32> to vector<512x3xbf16>
    %c0_49 = arith.constant 0 : index
    %c21 = arith.constant 21 : index
    %35 = vector.load %arg9[%c0_49, %c21] : memref<512x27xbf16, #tpu.memory_space<vmem>>, vector<512x3xbf16>
    tpu.vector_store %arg9[%c0_49, %c21], %34 {strides = array<i32>} : memref<512x27xbf16, #tpu.memory_space<vmem>>, vector<512x3xbf16>,
    %c0_50 = arith.constant 0 : index
    %c2_51 = arith.constant 2 : index
    %c2_52 = arith.constant 2 : index
    %c0_53 = arith.constant 0 : index
    %36 = vector.load %arg8[%c0_50, %c2_51, %c2_52, %c0_53] : memref<2x18x18x3xf32, #tpu.memory_space<vmem>>, vector<2x16x16x3xf32>
    %37 = vector.shape_cast %36 : vector<2x16x16x3xf32> to vector<512x3xf32>
    %38 = arith.truncf %37 : vector<512x3xf32> to vector<512x3xbf16>
    %c0_54 = arith.constant 0 : index
    %c24 = arith.constant 24 : index
    %39 = vector.load %arg9[%c0_54, %c24] : memref<512x27xbf16, #tpu.memory_space<vmem>>, vector<512x3xbf16>
    tpu.vector_store %arg9[%c0_54, %c24], %38 {strides = array<i32>} : memref<512x27xbf16, #tpu.memory_space<vmem>>, vector<512x3xbf16>,
    %c0_55 = arith.constant 0 : index
    %c0_56 = arith.constant 0 : index
    %40 = vector.load %arg9[%c0_55, %c0_56] : memref<512x27xbf16, #tpu.memory_space<vmem>>, vector<512x27xbf16>
    %c0_57 = arith.constant 0 : index
    %c0_58 = arith.constant 0 : index
    %41 = vector.load %arg1[%c0_57, %c0_58] : memref<27x16xbf16, #tpu.memory_space<vmem>>, vector<27x16xbf16>
    %cst_59 = arith.constant dense<0.000000e+00> : vector<512x16xf32>
    %42 = tpu.matmul %40, %41, %cst_59 {dimension_numbers = #tpu.dot_dimension_numbers<[1], [0], [0], [1], [0, 0, 1, 1], [], []>} : vector<512x27xbf16>, vector<27x16xbf16>, vector<512x16xf32> -> vector<512x16xf32>
    %c0_60 = arith.constant 0 : index
    %c0_61 = arith.constant 0 : index
    %43 = vector.load %arg2[%c0_60, %c0_61] : memref<1x16xf32, #tpu.memory_space<vmem>>, vector<1x16xf32>
    %c0_62 = arith.constant 0 : index
    %c0_63 = arith.constant 0 : index
    %44 = vector.load %arg3[%c0_62, %c0_63] : memref<1x16xf32, #tpu.memory_space<vmem>>, vector<1x16xf32>
    %cst_64 = arith.constant dense<0.000000e+00> : vector<16xf32>
    %45 = vector.multi_reduction <add>, %42, %cst_64 [0] : vector<512x16xf32> to vector<16xf32>
    %46 = vector.shape_cast %45 : vector<16xf32> to vector<1x16xf32>
    %cst_65 = arith.constant 5.120000e+02 : f32
    %47 = vector.broadcast %cst_65 : f32 to vector<1x16xf32>
    %48 = arith.divf %46, %47 : vector<1x16xf32>
    %49 = vector.broadcast %48 : vector<1x16xf32> to vector<512x16xf32>
    %50 = arith.subf %42, %49 : vector<512x16xf32>
    %51 = arith.mulf %50, %50 : vector<512x16xf32>
    %cst_66 = arith.constant dense<0.000000e+00> : vector<16xf32>
    %52 = vector.multi_reduction <add>, %51, %cst_66 [0] : vector<512x16xf32> to vector<16xf32>
    %53 = vector.shape_cast %52 : vector<16xf32> to vector<1x16xf32>
    %cst_67 = arith.constant 5.120000e+02 : f32
    %54 = vector.broadcast %cst_67 : f32 to vector<1x16xf32>
    %55 = arith.divf %53, %54 : vector<1x16xf32>
    %56 = vector.broadcast %48 : vector<1x16xf32> to vector<512x16xf32>
    %57 = arith.subf %42, %56 : vector<512x16xf32>
    %cst_68 = arith.constant 9.99999974E-6 : f32
    %58 = vector.broadcast %cst_68 : f32 to vector<1x16xf32>
    %59 = arith.addf %55, %58 : vector<1x16xf32>
    %60 = math.rsqrt %59 : vector<1x16xf32>
    %61 = vector.broadcast %60 : vector<1x16xf32> to vector<512x16xf32>
    %62 = arith.mulf %57, %61 : vector<512x16xf32>
    %63 = vector.broadcast %43 : vector<1x16xf32> to vector<512x16xf32>
    %64 = arith.mulf %62, %63 : vector<512x16xf32>
    %65 = vector.broadcast %44 : vector<1x16xf32> to vector<512x16xf32>
    %66 = arith.addf %64, %65 : vector<512x16xf32>
    %cst_69 = arith.constant 0.000000e+00 : f32
    %67 = vector.broadcast %cst_69 : f32 to vector<512x16xf32>
    %68 = arith.cmpf oge, %66, %67 : vector<512x16xf32>
    %cst_70 = arith.constant 0.00999999977 : f32
    %69 = vector.broadcast %cst_70 : f32 to vector<512x16xf32>
    %70 = arith.mulf %69, %66 : vector<512x16xf32>
    %71 = arith.select %68, %66, %70 : vector<512x16xi1>, vector<512x16xf32>
    %cst_71 = arith.constant 0.000000e+00 : f32
    %72 = vector.broadcast %cst_71 : f32 to vector<2x18x18x16xf32>
    %c0_72 = arith.constant 0 : index
    %c0_73 = arith.constant 0 : index
    %c0_74 = arith.constant 0 : index
    %c0_75 = arith.constant 0 : index
    %73 = vector.load %arg10[%c0_72, %c0_73, %c0_74, %c0_75] : memref<2x18x18x16xf32, #tpu.memory_space<vmem>>, vector<2x18x18x16xf32>
    tpu.vector_store %arg10[%c0_72, %c0_73, %c0_74, %c0_75], %72 {strides = array<i32>} : memref<2x18x18x16xf32, #tpu.memory_space<vmem>>, vector<2x18x18x16xf32>,
    %74 = vector.shape_cast %71 : vector<512x16xf32> to vector<2x16x16x16xf32>
    %c0_76 = arith.constant 0 : index
    %c1_77 = arith.constant 1 : index
    %c1_78 = arith.constant 1 : index
    %c0_79 = arith.constant 0 : index
    %75 = vector.load %arg10[%c0_76, %c1_77, %c1_78, %c0_79] : memref<2x18x18x16xf32, #tpu.memory_space<vmem>>, vector<2x16x16x16xf32>
    tpu.vector_store %arg10[%c0_76, %c1_77, %c1_78, %c0_79], %74 {strides = array<i32>} : memref<2x18x18x16xf32, #tpu.memory_space<vmem>>, vector<2x16x16x16xf32>,
    %cst_80 = arith.constant 0.000000e+00 : f32
    %76 = vector.broadcast %cst_80 : f32 to vector<2x16x16x16xf32>
    %c0_81 = arith.constant 0 : index
    %c0_82 = arith.constant 0 : index
    %c0_83 = arith.constant 0 : index
    %c0_84 = arith.constant 0 : index
    %77 = vector.load %arg10[%c0_81, %c0_82, %c0_83, %c0_84] : memref<2x18x18x16xf32, #tpu.memory_space<vmem>>, vector<2x16x16x16xf32>
    %c0_85 = arith.constant 0 : index
    %c0_86 = arith.constant 0 : index
    %c0_87 = arith.constant 0 : index
    %c0_88 = arith.constant 0 : index
    %78 = vector.load %arg4[%c0_85, %c0_86, %c0_87, %c0_88] : memref<3x3x1x16xf32, #tpu.memory_space<vmem>>, vector<1x1x1x16xf32>
    %79 = vector.shape_cast %78 : vector<1x1x1x16xf32> to vector<1x16xf32>
    %80 = vector.shape_cast %79 : vector<1x16xf32> to vector<1x1x1x16xf32>
    %81 = vector.broadcast %80 : vector<1x1x1x16xf32> to vector<2x16x16x16xf32>
    %82 = arith.mulf %77, %81 : vector<2x16x16x16xf32>
    %83 = arith.addf %76, %82 : vector<2x16x16x16xf32>
    %c0_89 = arith.constant 0 : index
    %c0_90 = arith.constant 0 : index
    %c1_91 = arith.constant 1 : index
    %c0_92 = arith.constant 0 : index
    %84 = vector.load %arg10[%c0_89, %c0_90, %c1_91, %c0_92] : memref<2x18x18x16xf32, #tpu.memory_space<vmem>>, vector<2x16x16x16xf32>
    %c0_93 = arith.constant 0 : index
    %c1_94 = arith.constant 1 : index
    %c0_95 = arith.constant 0 : index
    %c0_96 = arith.constant 0 : index
    %85 = vector.load %arg4[%c0_93, %c1_94, %c0_95, %c0_96] : memref<3x3x1x16xf32, #tpu.memory_space<vmem>>, vector<1x1x1x16xf32>
    %86 = vector.shape_cast %85 : vector<1x1x1x16xf32> to vector<1x16xf32>
    %87 = vector.shape_cast %86 : vector<1x16xf32> to vector<1x1x1x16xf32>
    %88 = vector.broadcast %87 : vector<1x1x1x16xf32> to vector<2x16x16x16xf32>
    %89 = arith.mulf %84, %88 : vector<2x16x16x16xf32>
    %90 = arith.addf %83, %89 : vector<2x16x16x16xf32>
    %c0_97 = arith.constant 0 : index
    %c0_98 = arith.constant 0 : index
    %c2_99 = arith.constant 2 : index
    %c0_100 = arith.constant 0 : index
    %91 = vector.load %arg10[%c0_97, %c0_98, %c2_99, %c0_100] : memref<2x18x18x16xf32, #tpu.memory_space<vmem>>, vector<2x16x16x16xf32>
    %c0_101 = arith.constant 0 : index
    %c2_102 = arith.constant 2 : index
    %c0_103 = arith.constant 0 : index
    %c0_104 = arith.constant 0 : index
    %92 = vector.load %arg4[%c0_101, %c2_102, %c0_103, %c0_104] : memref<3x3x1x16xf32, #tpu.memory_space<vmem>>, vector<1x1x1x16xf32>
    %93 = vector.shape_cast %92 : vector<1x1x1x16xf32> to vector<1x16xf32>
    %94 = vector.shape_cast %93 : vector<1x16xf32> to vector<1x1x1x16xf32>
    %95 = vector.broadcast %94 : vector<1x1x1x16xf32> to vector<2x16x16x16xf32>
    %96 = arith.mulf %91, %95 : vector<2x16x16x16xf32>
    %97 = arith.addf %90, %96 : vector<2x16x16x16xf32>
    %c0_105 = arith.constant 0 : index
    %c1_106 = arith.constant 1 : index
    %c0_107 = arith.constant 0 : index
    %c0_108 = arith.constant 0 : index
    %98 = vector.load %arg10[%c0_105, %c1_106, %c0_107, %c0_108] : memref<2x18x18x16xf32, #tpu.memory_space<vmem>>, vector<2x16x16x16xf32>
    %c1_109 = arith.constant 1 : index
    %c0_110 = arith.constant 0 : index
    %c0_111 = arith.constant 0 : index
    %c0_112 = arith.constant 0 : index
    %99 = vector.load %arg4[%c1_109, %c0_110, %c0_111, %c0_112] : memref<3x3x1x16xf32, #tpu.memory_space<vmem>>, vector<1x1x1x16xf32>
    %100 = vector.shape_cast %99 : vector<1x1x1x16xf32> to vector<1x16xf32>
    %101 = vector.shape_cast %100 : vector<1x16xf32> to vector<1x1x1x16xf32>
    %102 = vector.broadcast %101 : vector<1x1x1x16xf32> to vector<2x16x16x16xf32>
    %103 = arith.mulf %98, %102 : vector<2x16x16x16xf32>
    %104 = arith.addf %97, %103 : vector<2x16x16x16xf32>
    %c0_113 = arith.constant 0 : index
    %c1_114 = arith.constant 1 : index
    %c1_115 = arith.constant 1 : index
    %c0_116 = arith.constant 0 : index
    %105 = vector.load %arg10[%c0_113, %c1_114, %c1_115, %c0_116] : memref<2x18x18x16xf32, #tpu.memory_space<vmem>>, vector<2x16x16x16xf32>
    %c1_117 = arith.constant 1 : index
    %c1_118 = arith.constant 1 : index
    %c0_119 = arith.constant 0 : index
    %c0_120 = arith.constant 0 : index
    %106 = vector.load %arg4[%c1_117, %c1_118, %c0_119, %c0_120] : memref<3x3x1x16xf32, #tpu.memory_space<vmem>>, vector<1x1x1x16xf32>
    %107 = vector.shape_cast %106 : vector<1x1x1x16xf32> to vector<1x16xf32>
    %108 = vector.shape_cast %107 : vector<1x16xf32> to vector<1x1x1x16xf32>
    %109 = vector.broadcast %108 : vector<1x1x1x16xf32> to vector<2x16x16x16xf32>
    %110 = arith.mulf %105, %109 : vector<2x16x16x16xf32>
    %111 = arith.addf %104, %110 : vector<2x16x16x16xf32>
    %c0_121 = arith.constant 0 : index
    %c1_122 = arith.constant 1 : index
    %c2_123 = arith.constant 2 : index
    %c0_124 = arith.constant 0 : index
    %112 = vector.load %arg10[%c0_121, %c1_122, %c2_123, %c0_124] : memref<2x18x18x16xf32, #tpu.memory_space<vmem>>, vector<2x16x16x16xf32>
    %c1_125 = arith.constant 1 : index
    %c2_126 = arith.constant 2 : index
    %c0_127 = arith.constant 0 : index
    %c0_128 = arith.constant 0 : index
    %113 = vector.load %arg4[%c1_125, %c2_126, %c0_127, %c0_128] : memref<3x3x1x16xf32, #tpu.memory_space<vmem>>, vector<1x1x1x16xf32>
    %114 = vector.shape_cast %113 : vector<1x1x1x16xf32> to vector<1x16xf32>
    %115 = vector.shape_cast %114 : vector<1x16xf32> to vector<1x1x1x16xf32>
    %116 = vector.broadcast %115 : vector<1x1x1x16xf32> to vector<2x16x16x16xf32>
    %117 = arith.mulf %112, %116 : vector<2x16x16x16xf32>
    %118 = arith.addf %111, %117 : vector<2x16x16x16xf32>
    %c0_129 = arith.constant 0 : index
    %c2_130 = arith.constant 2 : index
    %c0_131 = arith.constant 0 : index
    %c0_132 = arith.constant 0 : index
    %119 = vector.load %arg10[%c0_129, %c2_130, %c0_131, %c0_132] : memref<2x18x18x16xf32, #tpu.memory_space<vmem>>, vector<2x16x16x16xf32>
    %c2_133 = arith.constant 2 : index
    %c0_134 = arith.constant 0 : index
    %c0_135 = arith.constant 0 : index
    %c0_136 = arith.constant 0 : index
    %120 = vector.load %arg4[%c2_133, %c0_134, %c0_135, %c0_136] : memref<3x3x1x16xf32, #tpu.memory_space<vmem>>, vector<1x1x1x16xf32>
    %121 = vector.shape_cast %120 : vector<1x1x1x16xf32> to vector<1x16xf32>
    %122 = vector.shape_cast %121 : vector<1x16xf32> to vector<1x1x1x16xf32>
    %123 = vector.broadcast %122 : vector<1x1x1x16xf32> to vector<2x16x16x16xf32>
    %124 = arith.mulf %119, %123 : vector<2x16x16x16xf32>
    %125 = arith.addf %118, %124 : vector<2x16x16x16xf32>
    %c0_137 = arith.constant 0 : index
    %c2_138 = arith.constant 2 : index
    %c1_139 = arith.constant 1 : index
    %c0_140 = arith.constant 0 : index
    %126 = vector.load %arg10[%c0_137, %c2_138, %c1_139, %c0_140] : memref<2x18x18x16xf32, #tpu.memory_space<vmem>>, vector<2x16x16x16xf32>
    %c2_141 = arith.constant 2 : index
    %c1_142 = arith.constant 1 : index
    %c0_143 = arith.constant 0 : index
    %c0_144 = arith.constant 0 : index
    %127 = vector.load %arg4[%c2_141, %c1_142, %c0_143, %c0_144] : memref<3x3x1x16xf32, #tpu.memory_space<vmem>>, vector<1x1x1x16xf32>
    %128 = vector.shape_cast %127 : vector<1x1x1x16xf32> to vector<1x16xf32>
    %129 = vector.shape_cast %128 : vector<1x16xf32> to vector<1x1x1x16xf32>
    %130 = vector.broadcast %129 : vector<1x1x1x16xf32> to vector<2x16x16x16xf32>
    %131 = arith.mulf %126, %130 : vector<2x16x16x16xf32>
    %132 = arith.addf %125, %131 : vector<2x16x16x16xf32>
    %c0_145 = arith.constant 0 : index
    %c2_146 = arith.constant 2 : index
    %c2_147 = arith.constant 2 : index
    %c0_148 = arith.constant 0 : index
    %133 = vector.load %arg10[%c0_145, %c2_146, %c2_147, %c0_148] : memref<2x18x18x16xf32, #tpu.memory_space<vmem>>, vector<2x16x16x16xf32>
    %c2_149 = arith.constant 2 : index
    %c2_150 = arith.constant 2 : index
    %c0_151 = arith.constant 0 : index
    %c0_152 = arith.constant 0 : index
    %134 = vector.load %arg4[%c2_149, %c2_150, %c0_151, %c0_152] : memref<3x3x1x16xf32, #tpu.memory_space<vmem>>, vector<1x1x1x16xf32>
    %135 = vector.shape_cast %134 : vector<1x1x1x16xf32> to vector<1x16xf32>
    %136 = vector.shape_cast %135 : vector<1x16xf32> to vector<1x1x1x16xf32>
    %137 = vector.broadcast %136 : vector<1x1x1x16xf32> to vector<2x16x16x16xf32>
    %138 = arith.mulf %133, %137 : vector<2x16x16x16xf32>
    %139 = arith.addf %132, %138 : vector<2x16x16x16xf32>
    %140 = vector.shape_cast %139 : vector<2x16x16x16xf32> to vector<512x16xf32>
    %c0_153 = arith.constant 0 : index
    %c0_154 = arith.constant 0 : index
    %141 = vector.load %arg5[%c0_153, %c0_154] : memref<1x16xf32, #tpu.memory_space<vmem>>, vector<1x16xf32>
    %c0_155 = arith.constant 0 : index
    %c0_156 = arith.constant 0 : index
    %142 = vector.load %arg6[%c0_155, %c0_156] : memref<1x16xf32, #tpu.memory_space<vmem>>, vector<1x16xf32>
    %cst_157 = arith.constant dense<0.000000e+00> : vector<16xf32>
    %143 = vector.multi_reduction <add>, %140, %cst_157 [0] : vector<512x16xf32> to vector<16xf32>
    %144 = vector.shape_cast %143 : vector<16xf32> to vector<1x16xf32>
    %cst_158 = arith.constant 5.120000e+02 : f32
    %145 = vector.broadcast %cst_158 : f32 to vector<1x16xf32>
    %146 = arith.divf %144, %145 : vector<1x16xf32>
    %147 = vector.broadcast %146 : vector<1x16xf32> to vector<512x16xf32>
    %148 = arith.subf %140, %147 : vector<512x16xf32>
    %149 = arith.mulf %148, %148 : vector<512x16xf32>
    %cst_159 = arith.constant dense<0.000000e+00> : vector<16xf32>
    %150 = vector.multi_reduction <add>, %149, %cst_159 [0] : vector<512x16xf32> to vector<16xf32>
    %151 = vector.shape_cast %150 : vector<16xf32> to vector<1x16xf32>
    %cst_160 = arith.constant 5.120000e+02 : f32
    %152 = vector.broadcast %cst_160 : f32 to vector<1x16xf32>
    %153 = arith.divf %151, %152 : vector<1x16xf32>
    %154 = vector.broadcast %146 : vector<1x16xf32> to vector<512x16xf32>
    %155 = arith.subf %140, %154 : vector<512x16xf32>
    %cst_161 = arith.constant 9.99999974E-6 : f32
    %156 = vector.broadcast %cst_161 : f32 to vector<1x16xf32>
    %157 = arith.addf %153, %156 : vector<1x16xf32>
    %158 = math.rsqrt %157 : vector<1x16xf32>
    %159 = vector.broadcast %158 : vector<1x16xf32> to vector<512x16xf32>
    %160 = arith.mulf %155, %159 : vector<512x16xf32>
    %161 = vector.broadcast %141 : vector<1x16xf32> to vector<512x16xf32>
    %162 = arith.mulf %160, %161 : vector<512x16xf32>
    %163 = vector.broadcast %142 : vector<1x16xf32> to vector<512x16xf32>
    %164 = arith.addf %162, %163 : vector<512x16xf32>
    %cst_162 = arith.constant 0.000000e+00 : f32
    %165 = vector.broadcast %cst_162 : f32 to vector<512x16xf32>
    %166 = arith.cmpf oge, %164, %165 : vector<512x16xf32>
    %cst_163 = arith.constant 0.00999999977 : f32
    %167 = vector.broadcast %cst_163 : f32 to vector<512x16xf32>
    %168 = arith.mulf %167, %164 : vector<512x16xf32>
    %169 = arith.select %166, %164, %168 : vector<512x16xi1>, vector<512x16xf32>
    %170 = vector.shape_cast %71 : vector<512x16xf32> to vector<2x16x16x16xf32>
    %c0_164 = arith.constant 0 : index
    %c0_165 = arith.constant 0 : index
    %c0_166 = arith.constant 0 : index
    %c0_167 = arith.constant 0 : index
    %171 = vector.load %arg7[%c0_164, %c0_165, %c0_166, %c0_167] : memref<2x16x16x32xf32, #tpu.memory_space<vmem>>, vector<2x16x16x16xf32>
    tpu.vector_store %arg7[%c0_164, %c0_165, %c0_166, %c0_167], %170 {strides = array<i32>} : memref<2x16x16x32xf32, #tpu.memory_space<vmem>>, vector<2x16x16x16xf32>,
    %172 = vector.shape_cast %169 : vector<512x16xf32> to vector<2x16x16x16xf32>
    %c0_168 = arith.constant 0 : index
    %c0_169 = arith.constant 0 : index
    %c0_170 = arith.constant 0 : index
    %c16 = arith.constant 16 : index
    %173 = vector.load %arg7[%c0_168, %c0_169, %c0_170, %c16] : memref<2x16x16x32xf32, #tpu.memory_space<vmem>>, vector<2x16x16x16xf32>
    tpu.vector_store %arg7[%c0_168, %c0_169, %c0_170, %c16], %172 {strides = array<i32>} : memref<2x16x16x32xf32, #tpu.memory_space<vmem>>, vector<2x16x16x16xf32>,
    return
  }
}

</mosaic_0001>

<bundles_post_ra>
// kernel: tpu_custom_call.1
= control target key start
LH: loop header
LB: loop body
LE: loop exit
PB: predicated region body
PF: predicated region fallthrough
CT: control target
= control target key end

     0   :  { %vm28_vm0 = vcmask 23552   ;;  %vm31_vm1 = vcmask 17408   ;;  %v7100_v1 = vmov 0.0   ;;  %s7101_s14 = smov 3   ;;  %s7102_s15 = smov 6   ;;  %vm2596_vm2 = vcmask 1044480   ;;  %s14342_s0 = inlined_call_operand.vmem [shape: f32[2,16,16,3], index: 0, kind: input, shape index: {}]   ;;  %s14343_s1 = inlined_call_operand.vmem [shape: bf16[27,16], index: 1, kind: input, shape index: {}]   ;;  %s14344_s2 = inlined_call_operand.vmem [shape: f32[1,16], index: 2, kind: input, shape index: {}]   ;;  %s14345_s3 = inlined_call_operand.vmem [shape: f32[1,16], index: 3, kind: input, shape index: {}]   ;;  %s14346_s4 = inlined_call_operand.vmem [shape: f32[3,3,1,16], index: 4, kind: input, shape index: {}]   ;;  %s14347_s5 = inlined_call_operand.vmem [shape: f32[1,16], index: 5, kind: input, shape index: {}]   ;;  %s14348_s6 = inlined_call_operand.vmem [shape: f32[1,16], index: 6, kind: input, shape index: {}]   ;;  %s14349_s7 = inlined_call_operand.hbm [shape: f32[2,16,16,32], index: 7, kind: output, shape index: {}]  }
   0x1   :  { %v7157_v0 = vld [vmem:[%s14342_s0] sm:$0xff]  ;;  %29 = vst.msk [vmem:[#allocation2] sm:$0xff] %vm28_vm0, %v7100_v1  ;;  %30 = vst.msk [vmem:[#allocation2 + $0x8] sm:$0xff] %vm28_vm0, %v7100_v1  ;;  %v139_v2 = vld [vmem:[%s14342_s0 + $0x8] sm:$0xff]  ;;  %s7103_s16 = smov 9   ;;  %s7104_s17 = smov 12  }
   0x2   :  { %32 = vst.msk [vmem:[#allocation2 + $0x10] sm:$0x3] %vm31_vm1, %v7100_v1  ;;  %35 = vst.msk [vmem:[#allocation2 + $0x28] sm:$0x3] %vm31_vm1, %v7100_v1  ;;  %v140_v3 = vld [vmem:[%s14342_s0 + $0x10] sm:$0xff]  ;;  %v141_v4 = vld [vmem:[%s14342_s0 + $0x18] sm:$0xff] }
   0x3   :  { %33 = vst.msk [vmem:[#allocation2 + $0x18] sm:$0xff] %vm28_vm0, %v7100_v1  ;;  %34 = vst.msk [vmem:[#allocation2 + $0x20] sm:$0xff] %vm28_vm0, %v7100_v1  ;;  %v142_v5 = vld [vmem:[%s14342_s0 + $0x20] sm:$0xff]  ;;  %v143_v6 = vld [vmem:[%s14342_s0 + $0x28] sm:$0xff]  ;;  %s7105_s18 = smov 15  }
   0x4   :  { %36 = vst.msk [vmem:[#allocation2 + $0x30] sm:$0xff] %vm28_vm0, %v7100_v1  ;;  %37 = vst.msk [vmem:[#allocation2 + $0x38] sm:$0xff] %vm28_vm0, %v7100_v1  ;;  %v144_v7 = vld [vmem:[%s14342_s0 + $0x30] sm:$0xff]  ;;  %v145_v8 = vld [vmem:[%s14342_s0 + $0x38] sm:$0xff] }
   0x5   :  { %38 = vst.msk [vmem:[#allocation2 + $0x40] sm:$0x3] %vm31_vm1, %v7100_v1  ;;  %41 = vst.msk [vmem:[#allocation2 + $0x58] sm:$0x3] %vm31_vm1, %v7100_v1  ;;  %v146_v9 = vld [vmem:[%s14342_s0 + $0x40] sm:$0xff]  ;;  %v147_v10 = vld [vmem:[%s14342_s0 + $0x48] sm:$0xff] }
   0x6   :  { %39 = vst.msk [vmem:[#allocation2 + $0x48] sm:$0xff] %vm28_vm0, %v7100_v1  ;;  %40 = vst.msk [vmem:[#allocation2 + $0x50] sm:$0xff] %vm28_vm0, %v7100_v1  ;;  %v148_v11 = vld [vmem:[%s14342_s0 + $0x50] sm:$0xff]  ;;  %v149_v12 = vld [vmem:[%s14342_s0 + $0x58] sm:$0xff] }
   0x7   :  { %42 = vst.msk [vmem:[#allocation2 + $0x60] sm:$0xff] %vm28_vm0, %v7100_v1  ;;  %43 = vst.msk [vmem:[#allocation2 + $0x68] sm:$0xff] %vm28_vm0, %v7100_v1  ;;  %v150_v13 = vld [vmem:[%s14342_s0 + $0x60] sm:$0xff]  ;;  %v151_v14 = vld [vmem:[%s14342_s0 + $0x68] sm:$0xff] }
   0x8   :  { %44 = vst.msk [vmem:[#allocation2 + $0x70] sm:$0x3] %vm31_vm1, %v7100_v1  ;;  %47 = vst.msk [vmem:[#allocation2 + $0x88] sm:$0x3] %vm31_vm1, %v7100_v1  ;;  %v152_v15 = vld [vmem:[%s14342_s0 + $0x70] sm:$0xff]  ;;  %v153_v16 = vld [vmem:[%s14342_s0 + $0x78] sm:$0xff] }
   0x9   :  { %45 = vst.msk [vmem:[#allocation2 + $0x78] sm:$0xff] %vm28_vm0, %v7100_v1  ;;  %46 = vst.msk [vmem:[#allocation2 + $0x80] sm:$0xff] %vm28_vm0, %v7100_v1  ;;  %v154_v17 = vld [vmem:[%s14342_s0 + $0x80] sm:$0xff]  ;;  %v155_v18 = vld [vmem:[%s14342_s0 + $0x88] sm:$0xff] }
   0xa   :  { %48 = vst.msk [vmem:[#allocation2 + $0x90] sm:$0xff] %vm28_vm0, %v7100_v1  ;;  %49 = vst.msk [vmem:[#allocation2 + $0x98] sm:$0xff] %vm28_vm0, %v7100_v1  ;;  %v395_v19 = vld [vmem:[#allocation2 + $0x1] sm:$0xff]  ;;  %v396_v20 = vld [vmem:[#allocation2 + $0x9] sm:$0xff] }
   0xb   :  { %50 = vst.msk [vmem:[#allocation2 + $0xa0] sm:$0x3] %vm31_vm1, %v7100_v1  ;;  %53 = vst.msk [vmem:[#allocation2 + $0xb8] sm:$0x3] %vm31_vm1, %v7100_v1  ;;  %v652_v21 = vld [vmem:[#allocation2 + $0x2] sm:$0xff]  ;;  %v459_v22 = vpack.c.bf16 %v396_v20, %v395_v19  ;;  %v653_v23 = vld [vmem:[#allocation2 + $0xa] sm:$0xff] }
   0xc   :  { %51 = vst.msk [vmem:[#allocation2 + $0xa8] sm:$0xff] %vm28_vm0, %v7100_v1  ;;  %52 = vst.msk [vmem:[#allocation2 + $0xb0] sm:$0xff] %vm28_vm0, %v7100_v1  ;;  %v716_v26 = vpack.c.bf16 %v653_v23, %v652_v21  ;;  %v268_v61 = vld [vmem:[#allocation2 + $0x8] sm:$0xff]  ;;  %v267_v62 = vld [vmem:[#allocation2] sm:$0xff] }
   0xd   :  { %54 = vst.msk [vmem:[#allocation2 + $0xc0] sm:$0xff] %vm28_vm0, %v7100_v1  ;;  %55 = vst.msk [vmem:[#allocation2 + $0xc8] sm:$0xff] %vm28_vm0, %v7100_v1  ;;  %523 = vrot.lane.b32.xlu0 %v459_v22, %s7101_s14  ;;  %v331_v63 = vpack.c.bf16 %v268_v61, %v267_v62 }
   0xe   :  { %56 = vst.msk [vmem:[#allocation2 + $0xd0] sm:$0x3] %vm31_vm1, %v7100_v1  ;;  %59 = vst.msk [vmem:[#allocation2 + $0xe8] sm:$0x3] %vm31_vm1, %v7100_v1  ;;  %780 = vrot.lane.b32.xlu1 %v716_v26, %s7102_s15 }
   0xf   :  { %57 = vst.msk [vmem:[#allocation2 + $0xd8] sm:$0xff] %vm28_vm0, %v7100_v1  ;;  %58 = vst.msk [vmem:[#allocation2 + $0xe0] sm:$0xff] %vm28_vm0, %v7100_v1 }
  0x10   :  { %60 = vst.msk [vmem:[#allocation2 + $0xf0] sm:$0xff] %vm28_vm0, %v7100_v1  ;;  %61 = vst.msk [vmem:[#allocation2 + $0xf8] sm:$0xff] %vm28_vm0, %v7100_v1 }
  0x11   :  { %62 = vst.msk [vmem:[#allocation2 + $0x100] sm:$0x3] %vm31_vm1, %v7100_v1  ;;  %65 = vst.msk [vmem:[#allocation2 + $0x118] sm:$0x3] %vm31_vm1, %v7100_v1 }
  0x12   :  { %63 = vst.msk [vmem:[#allocation2 + $0x108] sm:$0xff] %vm28_vm0, %v7100_v1  ;;  %64 = vst.msk [vmem:[#allocation2 + $0x110] sm:$0xff] %vm28_vm0, %v7100_v1 }
  0x13   :  { %66 = vst.msk [vmem:[#allocation2 + $0x120] sm:$0xff] %vm28_vm0, %v7100_v1  ;;  %67 = vst.msk [vmem:[#allocation2 + $0x128] sm:$0xff] %vm28_vm0, %v7100_v1 }
  0x14   :  { %68 = vst.msk [vmem:[#allocation2 + $0x130] sm:$0x3] %vm31_vm1, %v7100_v1  ;;  %71 = vst.msk [vmem:[#allocation2 + $0x148] sm:$0x3] %vm31_vm1, %v7100_v1 }
  0x15   :  { %69 = vst.msk [vmem:[#allocation2 + $0x138] sm:$0xff] %vm28_vm0, %v7100_v1  ;;  %70 = vst.msk [vmem:[#allocation2 + $0x140] sm:$0xff] %vm28_vm0, %v7100_v1 }
  0x16   :  { %72 = vst.msk [vmem:[#allocation2 + $0x150] sm:$0xff] %vm28_vm0, %v7100_v1  ;;  %73 = vst.msk [vmem:[#allocation2 + $0x158] sm:$0xff] %vm28_vm0, %v7100_v1 }
  0x17   :  { %74 = vst.msk [vmem:[#allocation2 + $0x160] sm:$0x3] %vm31_vm1, %v7100_v1  ;;  %77 = vst.msk [vmem:[#allocation2 + $0x178] sm:$0x3] %vm31_vm1, %v7100_v1 }
  0x18   :  { %75 = vst.msk [vmem:[#allocation2 + $0x168] sm:$0xff] %vm28_vm0, %v7100_v1  ;;  %76 = vst.msk [vmem:[#allocation2 + $0x170] sm:$0xff] %vm28_vm0, %v7100_v1 }
  0x19   :  { %78 = vst.msk [vmem:[#allocation2 + $0x180] sm:$0xff] %vm28_vm0, %v7100_v1  ;;  %79 = vst.msk [vmem:[#allocation2 + $0x188] sm:$0xff] %vm28_vm0, %v7100_v1 }
  0x1a   :  { %80 = vst.msk [vmem:[#allocation2 + $0x190] sm:$0x3] %vm31_vm1, %v7100_v1  ;;  %83 = vst.msk [vmem:[#allocation2 + $0x1a8] sm:$0x3] %vm31_vm1, %v7100_v1 }
  0x1b   :  { %81 = vst.msk [vmem:[#allocation2 + $0x198] sm:$0xff] %vm28_vm0, %v7100_v1  ;;  %82 = vst.msk [vmem:[#allocation2 + $0x1a0] sm:$0xff] %vm28_vm0, %v7100_v1 }
  0x1c   :  { %84 = vst.msk [vmem:[#allocation2 + $0x1b0] sm:$0xff] %vm28_vm0, %v7100_v1  ;;  %85 = vst.msk [vmem:[#allocation2 + $0x1b8] sm:$0xff] %vm28_vm0, %v7100_v1 }
  0x1d   :  { %86 = vst.msk [vmem:[#allocation2 + $0x1c0] sm:$0x3] %vm31_vm1, %v7100_v1  ;;  %89 = vst.msk [vmem:[#allocation2 + $0x1d8] sm:$0x3] %vm31_vm1, %v7100_v1 }
  0x1e   :  { %87 = vst.msk [vmem:[#allocation2 + $0x1c8] sm:$0xff] %vm28_vm0, %v7100_v1  ;;  %88 = vst.msk [vmem:[#allocation2 + $0x1d0] sm:$0xff] %vm28_vm0, %v7100_v1 }
  0x1f   :  { %90 = vst.msk [vmem:[#allocation2 + $0x1e0] sm:$0xff] %vm28_vm0, %v7100_v1  ;;  %91 = vst.msk [vmem:[#allocation2 + $0x1e8] sm:$0xff] %vm28_vm0, %v7100_v1 }
  0x20   :  { %92 = vst.msk [vmem:[#allocation2 + $0x1f0] sm:$0x3] %vm31_vm1, %v7100_v1  ;;  %95 = vst.msk [vmem:[#allocation2 + $0x208] sm:$0x3] %vm31_vm1, %v7100_v1 }
  0x21   :  { %93 = vst.msk [vmem:[#allocation2 + $0x1f8] sm:$0xff] %vm28_vm0, %v7100_v1  ;;  %94 = vst.msk [vmem:[#allocation2 + $0x200] sm:$0xff] %vm28_vm0, %v7100_v1 }
  0x22   :  { %96 = vst.msk [vmem:[#allocation2 + $0x210] sm:$0xff] %vm28_vm0, %v7100_v1  ;;  %97 = vst.msk [vmem:[#allocation2 + $0x218] sm:$0xff] %vm28_vm0, %v7100_v1 }
  0x23   :  { %98 = vst.msk [vmem:[#allocation2 + $0x220] sm:$0x3] %vm31_vm1, %v7100_v1  ;;  %101 = vst.msk [vmem:[#allocation2 + $0x238] sm:$0x3] %vm31_vm1, %v7100_v1 }
  0x24   :  { %99 = vst.msk [vmem:[#allocation2 + $0x228] sm:$0xff] %vm28_vm0, %v7100_v1  ;;  %100 = vst.msk [vmem:[#allocation2 + $0x230] sm:$0xff] %vm28_vm0, %v7100_v1 }
  0x25   :  { %102 = vst.msk [vmem:[#allocation2 + $0x240] sm:$0xff] %vm28_vm0, %v7100_v1  ;;  %103 = vst.msk [vmem:[#allocation2 + $0x248] sm:$0xff] %vm28_vm0, %v7100_v1 }
  0x26   :  { %104 = vst.msk [vmem:[#allocation2 + $0x250] sm:$0x3] %vm31_vm1, %v7100_v1  ;;  %107 = vst.msk [vmem:[#allocation2 + $0x268] sm:$0x3] %vm31_vm1, %v7100_v1 }
  0x27   :  { %105 = vst.msk [vmem:[#allocation2 + $0x258] sm:$0xff] %vm28_vm0, %v7100_v1  ;;  %106 = vst.msk [vmem:[#allocation2 + $0x260] sm:$0xff] %vm28_vm0, %v7100_v1 }
  0x28   :  { %108 = vst.msk [vmem:[#allocation2 + $0x270] sm:$0xff] %vm28_vm0, %v7100_v1  ;;  %109 = vst.msk [vmem:[#allocation2 + $0x278] sm:$0xff] %vm28_vm0, %v7100_v1 }
  0x29   :  { %110 = vst.msk [vmem:[#allocation2 + $0x280] sm:$0x3] %vm31_vm1, %v7100_v1  ;;  %113 = vst.msk [vmem:[#allocation2 + $0x298] sm:$0x3] %vm31_vm1, %v7100_v1 }
  0x2a   :  { %111 = vst.msk [vmem:[#allocation2 + $0x288] sm:$0xff] %vm28_vm0, %v7100_v1  ;;  %112 = vst.msk [vmem:[#allocation2 + $0x290] sm:$0xff] %vm28_vm0, %v7100_v1 }
  0x2b   :  { %114 = vst.msk [vmem:[#allocation2 + $0x2a0] sm:$0xff] %vm28_vm0, %v7100_v1  ;;  %115 = vst.msk [vmem:[#allocation2 + $0x2a8] sm:$0xff] %vm28_vm0, %v7100_v1 }
  0x2c   :  { %116 = vst.msk [vmem:[#allocation2 + $0x2b0] sm:$0x3] %vm31_vm1, %v7100_v1  ;;  %119 = vst.msk [vmem:[#allocation2 + $0x2c8] sm:$0x3] %vm31_vm1, %v7100_v1 }
  0x2d   :  { %117 = vst.msk [vmem:[#allocation2 + $0x2b8] sm:$0xff] %vm28_vm0, %v7100_v1  ;;  %118 = vst.msk [vmem:[#allocation2 + $0x2c0] sm:$0xff] %vm28_vm0, %v7100_v1 }
  0x2e   :  { %120 = vst.msk [vmem:[#allocation2 + $0x2d0] sm:$0xff] %vm28_vm0, %v7100_v1  ;;  %121 = vst.msk [vmem:[#allocation2 + $0x2d8] sm:$0xff] %vm28_vm0, %v7100_v1 }
  0x2f   :  { %122 = vst.msk [vmem:[#allocation2 + $0x2e0] sm:$0x3] %vm31_vm1, %v7100_v1  ;;  %125 = vst.msk [vmem:[#allocation2 + $0x2f8] sm:$0x3] %vm31_vm1, %v7100_v1 }
  0x30   :  { %123 = vst.msk [vmem:[#allocation2 + $0x2e8] sm:$0xff] %vm28_vm0, %v7100_v1  ;;  %124 = vst.msk [vmem:[#allocation2 + $0x2f0] sm:$0xff] %vm28_vm0, %v7100_v1 }
  0x31   :  { %126 = vst.msk [vmem:[#allocation2 + $0x300] sm:$0xff] %vm28_vm0, %v7100_v1  ;;  %127 = vst.msk [vmem:[#allocation2 + $0x308] sm:$0xff] %vm28_vm0, %v7100_v1 }
  0x32   :  { %128 = vst.msk [vmem:[#allocation2 + $0x310] sm:$0x3] %vm31_vm1, %v7100_v1  ;;  %131 = vst.msk [vmem:[#allocation2 + $0x328] sm:$0x3] %vm31_vm1, %v7100_v1 }
  0x33   :  { %129 = vst.msk [vmem:[#allocation2 + $0x318] sm:$0xff] %vm28_vm0, %v7100_v1  ;;  %130 = vst.msk [vmem:[#allocation2 + $0x320] sm:$0xff] %vm28_vm0, %v7100_v1 }
  0x34   :  { %132 = vst.msk [vmem:[#allocation2 + $0x330] sm:$0xff] %vm28_vm0, %v7100_v1  ;;  %133 = vst.msk [vmem:[#allocation2 + $0x338] sm:$0xff] %vm28_vm0, %v7100_v1 }
  0x35   :  { %134 = vst.msk [vmem:[#allocation2 + $0x340] sm:$0x3] %vm31_vm1, %v7100_v1  ;;  %137 = vst.msk [vmem:[#allocation2 + $0x358] sm:$0x3] %vm31_vm1, %v7100_v1 }
  0x36   :  { %135 = vst.msk [vmem:[#allocation2 + $0x348] sm:$0xff] %vm28_vm0, %v7100_v1  ;;  %136 = vst.msk [vmem:[#allocation2 + $0x350] sm:$0xff] %vm28_vm0, %v7100_v1 }
  0x37   :  { %203 = vst.msk [vmem:[#allocation2 + $0x19] sm:$0xff] %vm28_vm0, %v7157_v0  ;;  %204 = vst.msk [vmem:[#allocation2 + $0x21] sm:$0xff] %vm28_vm0, %v139_v2 }
  0x38   :  { %205 = vst.msk [vmem:[#allocation2 + $0x31] sm:$0xff] %vm28_vm0, %v140_v3  ;;  %206 = vst.msk [vmem:[#allocation2 + $0x39] sm:$0xff] %vm28_vm0, %v141_v4 }
  0x39   :  { %207 = vst.msk [vmem:[#allocation2 + $0x49] sm:$0xff] %vm28_vm0, %v142_v5  ;;  %208 = vst.msk [vmem:[#allocation2 + $0x51] sm:$0xff] %vm28_vm0, %v143_v6  ;;  %v156_v6 = vld [vmem:[%s14342_s0 + $0x90] sm:$0xff] }
  0x3a   :  { %209 = vst.msk [vmem:[#allocation2 + $0x61] sm:$0xff] %vm28_vm0, %v144_v7  ;;  %210 = vst.msk [vmem:[#allocation2 + $0x69] sm:$0xff] %vm28_vm0, %v145_v8  ;;  %v157_v7 = vld [vmem:[%s14342_s0 + $0x98] sm:$0xff]  ;;  %v7036_v8 = vld [vmem:[%s14343_s1] sm:$0xff]  }
  0x3b   :  { %211 = vst.msk [vmem:[#allocation2 + $0x79] sm:$0xff] %vm28_vm0, %v146_v9  ;;  %212 = vst.msk [vmem:[#allocation2 + $0x81] sm:$0xff] %vm28_vm0, %v147_v10  ;;  %v158_v9 = vld [vmem:[%s14342_s0 + $0xa0] sm:$0xff]  ;;  %v159_v10 = vld [vmem:[%s14342_s0 + $0xa8] sm:$0xff] }
  0x3c   :  { %213 = vst.msk [vmem:[#allocation2 + $0x91] sm:$0xff] %vm28_vm0, %v148_v11  ;;  %214 = vst.msk [vmem:[#allocation2 + $0x99] sm:$0xff] %vm28_vm0, %v149_v12 }
  0x3d   :  { %215 = vst.msk [vmem:[#allocation2 + $0xa9] sm:$0xff] %vm28_vm0, %v150_v13  ;;  %216 = vst.msk [vmem:[#allocation2 + $0xb1] sm:$0xff] %vm28_vm0, %v151_v14 }
  0x3e   :  { %217 = vst.msk [vmem:[#allocation2 + $0xc1] sm:$0xff] %vm28_vm0, %v152_v15  ;;  %218 = vst.msk [vmem:[#allocation2 + $0xc9] sm:$0xff] %vm28_vm0, %v153_v16  ;;  %v397_v24 = vld [vmem:[#allocation2 + $0x19] sm:$0xff]  ;;  %v398_v25 = vld [vmem:[#allocation2 + $0x21] sm:$0xff] }
  0x3f   :  { %219 = vst.msk [vmem:[#allocation2 + $0xd9] sm:$0xff] %vm28_vm0, %v154_v17  ;;  %220 = vst.msk [vmem:[#allocation2 + $0xe1] sm:$0xff] %vm28_vm0, %v155_v18  ;;  %v654_v27 = vld [vmem:[#allocation2 + $0x1a] sm:$0xff]  ;;  %v655_v28 = vld [vmem:[#allocation2 + $0x22] sm:$0xff]  ;;  %v460_v30 = vpack.c.bf16 %v398_v25, %v397_v24 }
  0x40   :  { %v909_v29 = vld [vmem:[#allocation2 + $0x18] sm:$0xff]  ;;  %v910_v31 = vld [vmem:[#allocation2 + $0x20] sm:$0xff]  ;;  %v911_v32 = vld [vmem:[#allocation2 + $0x30] sm:$0xff]  ;;  %v717_v34 = vpack.c.bf16 %v655_v28, %v654_v27  ;;  %363 = vst.msk [vmem:[#allocation3] sm:$0xff] %vm28_vm0, %v331_v63 }
  0x41   :  { %v912_v33 = vld [vmem:[#allocation2 + $0x38] sm:$0xff]  ;;  %v973_v35 = vpack.c.bf16 %v910_v31, %v909_v29  ;;  %v1683_v37 = vld [vmem:[#allocation2 + $0x48] sm:$0xff]  ;;  %v1684_v38 = vld [vmem:[#allocation2 + $0x50] sm:$0xff]  ;;  %525 = vrot.lane.b32.xlu0 %v460_v30, %s7101_s14  ;;  %221 = vst.msk [vmem:[#allocation2 + $0xf1] sm:$0xff] %vm28_vm0, %v156_v6 }
  0x42   :  { %v7447_v36 = vpack.c.bf16 %v912_v33, %v911_v32  ;;  %v7449_v39 = vpack.c.bf16 %v1684_v38, %v1683_v37  ;;  %v915_v40 = vld [vmem:[#allocation2 + $0x60] sm:$0xff]  ;;  %v916_v41 = vld [vmem:[#allocation2 + $0x68] sm:$0xff]  ;;  %782 = vrot.lane.b32.xlu1 %v717_v34, %s7102_s15  ;;  %v1168_v42 = vld [vmem:[#allocation2 + $0x31] sm:$0xff]  ;;  %222 = vst.msk [vmem:[#allocation2 + $0xf9] sm:$0xff] %vm28_vm0, %v157_v7 }
  0x43   :  { %364 = vst.msk [vmem:[#allocation3 + $0x8] sm:$0xff] %vm28_vm0, %v973_v35  ;;  %v7456_v43 = vpack.c.bf16 %v916_v41, %v915_v40  ;;  %v1169_v44 = vld [vmem:[#allocation2 + $0x39] sm:$0xff]  ;;  %v919_v48 = vld [vmem:[#allocation2 + $0x90] sm:$0xff] }
  0x44   :  { %365 = vst.msk [vmem:[#allocation3 + $0x10] sm:$0xff] %vm28_vm0, %v7447_v36  ;;  %366 = vst.msk [vmem:[#allocation3 + $0x18] sm:$0xff] %vm28_vm0, %v7449_v39  ;;  %v1687_v45 = vld [vmem:[#allocation2 + $0x78] sm:$0xff]  ;;  %v1688_v46 = vld [vmem:[#allocation2 + $0x80] sm:$0xff]  ;;  %v7467_v50 = vpack.c.bf16 %v1169_v44, %v1168_v42 }
  0x45   :  { %v7460_v47 = vpack.c.bf16 %v1688_v46, %v1687_v45  ;;  %367 = vst.msk [vmem:[#allocation3 + $0x20] sm:$0xff] %vm28_vm0, %v7456_v43  ;;  %1037 = vrot.lane.b32.xlu0 %v973_v35, %s7103_s16  ;;  %v920_v49 = vld [vmem:[#allocation2 + $0x98] sm:$0xff]  ;;  %v1691_v54 = vld [vmem:[#allocation2 + $0xa8] sm:$0xff]  ;;  %v1692_v55 = vld [vmem:[#allocation2 + $0xb0] sm:$0xff] }
  0x46   :  { %1039 = vrot.lane.b32.xlu1 %v7447_v36, %s7103_s16  ;;  %v1425_v51 = vld [vmem:[#allocation2 + $0x32] sm:$0xff]  ;;  %v7469_v52 = vpack.c.bf16 %v920_v49, %v919_v48  ;;  %v1426_v53 = vld [vmem:[#allocation2 + $0x3a] sm:$0xff]  ;;  %v7473_v56 = vpack.c.bf16 %v1692_v55, %v1691_v54  ;;  %v924_v58 = vld [vmem:[#allocation2 + $0xc8] sm:$0xff] }
  0x47   :  { %368 = vst.msk [vmem:[#allocation3 + $0x28] sm:$0xff] %vm28_vm0, %v7460_v47  ;;  %v923_v57 = vld [vmem:[#allocation2 + $0xc0] sm:$0xff]  ;;  %v7480_v59 = vpack.c.bf16 %v1426_v53, %v1425_v51  ;;  %v1695_v0 = vld [vmem:[#allocation2 + $0xd8] sm:$0xff]  ;;  %v1940_v3 = vld [vmem:[#allocation2 + $0x49] sm:$0xff] }
  0x48   :  { %369 = vst.msk [vmem:[#allocation3 + $0x30] sm:$0xff] %vm28_vm0, %v7469_v52  ;;  %v7482_v60 = vpack.c.bf16 %v924_v58, %v923_v57  ;;  %370 = vst.msk [vmem:[#allocation3 + $0x38] sm:$0xff] %vm28_vm0, %v7473_v56  ;;  %v1696_v2 = vld [vmem:[#allocation2 + $0xe0] sm:$0xff]  ;;  %v1941_v4 = vld [vmem:[#allocation2 + $0x51] sm:$0xff] }
  0x49   :  { %1294 = vrot.lane.b32.xlu0 %v460_v30, %s7104_s17  ;;  %v7489_v5 = vpack.c.bf16 %v1696_v2, %v1695_v0 }
  0x4a   :  { %1296 = vrot.lane.b32.xlu1 %v7467_v50, %s7104_s17  ;;  %371 = vst.msk [vmem:[#allocation3 + $0x40] sm:$0xff] %vm28_vm0, %v7482_v60 }
  0x4b   :  { %372 = vst.msk [vmem:[#allocation3 + $0x48] sm:$0xff] %vm28_vm0, %v7489_v5 }
  0x4d   :  { %1551 = vrot.lane.b32.xlu0 %v717_v34, %s7105_s18 }
  0x4e   :  { %1553 = vrot.lane.b32.xlu1 %v7480_v59, %s7105_s18 }
  0x4f   :  { %12 = vsyncpa [#allocation6], 0  ;;  %6950 = vmatprep.subr.bf16.mxu0 %v7036_v8  ;;  %223 = vst.msk [vmem:[#allocation2 + $0x109] sm:$0xff] %vm28_vm0, %v158_v9  ;;  %v7037_v11 = vld [vmem:[%s14343_s1 + $0x8] sm:$0x3f]   ;;  %vm2597_vm3 = vcmask 1045504   ;;  %7018 = vmatprep.subr.bf16.mxu1 %v7036_v8  ;;  %v2003_v15 = vpack.c.bf16 %v1941_v4, %v1940_v3 }
  0x50   :  { %224 = vst.msk [vmem:[#allocation2 + $0x111] sm:$0xff] %vm28_vm0, %v159_v10  ;;  %v7106_v12 = vmov 65535   ;;  %s7107_s8 = smov 18   ;;  %6951 = vmatpush3.bf16.msra.mxu0 %v7036_v8  ;;  %7020 = vmatpush3.bf16.msra.mxu1 %v7036_v8  ;;  %s7108_s9 = smov 21   ;;  %v2197_v17 = vld [vmem:[#allocation2 + $0x4a] sm:$0xff]  ;;  %v2198_v18 = vld [vmem:[#allocation2 + $0x52] sm:$0xff] }
  0x51   :  { %v2598_v13 = vsel %vm2596_vm2, 4294967295, %v7106_v12  ;;  %1809 = vrot.lane.b32.xlu0 %v7447_v36, %s7107_s8  ;;  %v927_v19 = vld [vmem:[#allocation2 + $0xf0] sm:$0xff]  ;;  %v928_v20 = vld [vmem:[#allocation2 + $0xf8] sm:$0xff]  ;;  %s7109_s1 = smov 24   ;;  %v2260_v24 = vpack.c.bf16 %v2198_v18, %v2197_v17  ;;  %v1172_v28 = vld [vmem:[#allocation2 + $0x61] sm:$0xff]  ;;  %vm619_vm4 = vcmask 48152  }
  0x52   :  { %v2599_v14 = vsel %vm2597_vm3, %v2598_v13, 0  ;;  %1811 = vrot.lane.b32.xlu1 %v7449_v39, %s7107_s8  ;;  %v7525_v21 = vpack.c.bf16 %v928_v20, %v927_v19  ;;  %v160_v26 = vld [vmem:[%s14342_s0 + $0xb0] sm:$0xff]  ;;  %v161_v27 = vld [vmem:[%s14342_s0 + $0xb8] sm:$0xff]  ;;  %v1429_v34 = vld [vmem:[#allocation2 + $0x62] sm:$0xff]  ;;  %vm876_vm5 = vcmask 72752   ;;  %vm1133_vm6 = vcmask 97352  }
  0x53   :  { %v2601_v16 = vand.u32 %v7037_v11, %v2599_v14  ;;  %225 = vst.msk [vmem:[#allocation2 + $0x121] sm:$0xff] %vm28_vm0, %v160_v26  ;;  %226 = vst.msk [vmem:[#allocation2 + $0x129] sm:$0xff] %vm28_vm0, %v161_v27  ;;  %v1173_v29 = vld [vmem:[#allocation2 + $0x69] sm:$0xff]  ;;  %v162_v36 = vld [vmem:[%s14342_s0 + $0xc0] sm:$0xff]  ;;  %vm1390_vm7 = vcmask 121952   ;;  %vm1647_vm8 = vcmask 146552  }
  0x54   :  { %373 = vst.msk [vmem:[#allocation3 + $0x50] sm:$0xff] %vm28_vm0, %v7525_v21  ;;  %v1233_v33 = vpack.c.bf16 %v1173_v29, %v1172_v28  ;;  %v1430_v35 = vld [vmem:[#allocation2 + $0x6a] sm:$0xff]  ;;  %227 = vst.msk [vmem:[#allocation2 + $0x139] sm:$0xff] %vm28_vm0, %v162_v36  ;;  %v1945_v40 = vld [vmem:[#allocation2 + $0x81] sm:$0xff]  ;;  %vm1905_vm9 = vcmask 171152   ;;  %vm2162_vm10 = vcmask 195752  }
  0x55   :  { %6952 = vmatprep.subr.bf16.mxu0 %v2601_v16  ;;  %7019 = vmatprep.subr.bf16.mxu1 %v2601_v16  ;;  %v163_v37 = vld [vmem:[%s14342_s0 + $0xc8] sm:$0xff]  ;;  %v1490_v38 = vpack.c.bf16 %v1430_v35, %v1429_v34  ;;  %v2201_v46 = vld [vmem:[#allocation2 + $0x7a] sm:$0xff]  ;;  %v1176_v51 = vld [vmem:[#allocation2 + $0x91] sm:$0xff]  ;;  %vm2419_vm11 = vcmask 220352   ;;  %vm2499_vm12 = vcmask 220160   ;;  %vm2894_vm13 = vcmask 130048  }
  0x56   :  { %2066 = vrot.lane.b32.xlu0 %v7467_v50, %s7108_s9  ;;  %6953 = vmatpush3.bf16.msra.mxu0 %v2601_v16  ;;  %v1699_v22 = vld [vmem:[#allocation2 + $0x108] sm:$0xff]  ;;  %228 = vst.msk [vmem:[#allocation2 + $0x141] sm:$0xff] %vm28_vm0, %v163_v37  ;;  %v1177_v53 = vld [vmem:[#allocation2 + $0x99] sm:$0xff]  ;;  %v1949_v2 = vld [vmem:[#allocation2 + $0xb1] sm:$0xff]  ;;  %vm3692_vm14 = vcmask 123904  }
  0x57   :  { %2068 = vrot.lane.b32.xlu1 %v2003_v15, %s7108_s9  ;;  %7021 = vmatpush3.bf16.msra.mxu1 %v2601_v16  ;;  %v1700_v23 = vld [vmem:[#allocation2 + $0x110] sm:$0xff]  ;;  %v2202_v48 = vld [vmem:[#allocation2 + $0x82] sm:$0xff]  ;;  %v1235_v58 = vpack.c.bf16 %v1177_v53, %v1176_v51  ;;  %v1434_v61 = vld [vmem:[#allocation2 + $0x9a] sm:$0xff]  ;;  %3697 = vst.msk [vmem:[#allocation4 + $0x30] sm:$0xff] %vm2894_vm13, %v7100_v1 }
  0x58   :  { %v7529_v25 = vpack.c.bf16 %v1700_v23, %v1699_v22  ;;  %v2262_v49 = vpack.c.bf16 %v2202_v48, %v2201_v46  ;;  %v166_v62 = vld [vmem:[%s14342_s0 + $0xe0] sm:$0xff]  ;;  %v167_v63 = vld [vmem:[%s14342_s0 + $0xe8] sm:$0xff]  ;;  %v2206_v9 = vld [vmem:[#allocation2 + $0xb2] sm:$0xff]  ;;  %3698 = vst.msk [vmem:[#allocation4 + $0x38] sm:$0xff] %vm2894_vm13, %v7100_v1 }
  0x59   :  { %231 = vst.msk [vmem:[#allocation2 + $0x169] sm:$0xff] %vm28_vm0, %v166_v62  ;;  %232 = vst.msk [vmem:[#allocation2 + $0x171] sm:$0xff] %vm28_vm0, %v167_v63  ;;  %v1948_v0 = vld [vmem:[#allocation2 + $0xa9] sm:$0xff]  ;;  %v169_v11 = vld [vmem:[%s14342_s0 + $0xf8] sm:$0xff] }
  0x5a   :  { %2323 = vrot.lane.b32.xlu0 %v7480_v59, %s7109_s1  ;;  %374 = vst.msk [vmem:[#allocation3 + $0x58] sm:$0xff] %vm28_vm0, %v7529_v25  ;;  %v931_v30 = vld [vmem:[#allocation2 + $0x120] sm:$0xff]  ;;  %v932_v31 = vld [vmem:[#allocation2 + $0x128] sm:$0xff]  ;;  %v2007_v7 = vpack.c.bf16 %v1949_v2, %v1948_v0  ;;  %234 = vst.msk [vmem:[#allocation2 + $0x189] sm:$0xff] %vm28_vm0, %v169_v11 }
  0x5b   :  { %527 = vrot.lane.b32.xlu1 %v7467_v50, %s7101_s14  ;;  %v7550_v32 = vpack.c.bf16 %v932_v31, %v931_v30  ;;  %v1703_v41 = vld [vmem:[#allocation2 + $0x138] sm:$0xff]  ;;  %v2205_v8 = vld [vmem:[#allocation2 + $0xaa] sm:$0xff]  ;;  %v1180_v12 = vld [vmem:[#allocation2 + $0xc1] sm:$0xff]  ;;  %3690 = vst.msk [vmem:[#allocation4] sm:$0xff] %vm2894_vm13, %v7100_v1 }
  0x5c   :  { %v165_v50 = vld [vmem:[%s14342_s0 + $0xd8] sm:$0xff]  ;;  %v2264_v10 = vpack.c.bf16 %v2206_v9, %v2205_v8  ;;  %v1181_v13 = vld [vmem:[#allocation2 + $0xc9] sm:$0xff]  ;;  %v174_v53 = vld [vmem:[%s14342_s0 + $0x120] sm:$0xff]  ;;  %3691 = vst.msk [vmem:[#allocation4 + $0x8] sm:$0xff] %vm2894_vm13, %v7100_v1 }
  0x5d   :  { %375 = vst.msk [vmem:[#allocation3 + $0x60] sm:$0xff] %vm28_vm0, %v7550_v32  ;;  %v1704_v42 = vld [vmem:[#allocation2 + $0x140] sm:$0xff]  ;;  %230 = vst.msk [vmem:[#allocation2 + $0x159] sm:$0xff] %vm28_vm0, %v165_v50  ;;  %v1237_v14 = vpack.c.bf16 %v1181_v13, %v1180_v12  ;;  %v1438_v16 = vld [vmem:[#allocation2 + $0xca] sm:$0xff] }
  0x5e   :  { %2325 = vrot.lane.b32.xlu0 %v2260_v24, %s7109_s1  ;;  %v7572_v44 = vpack.c.bf16 %v1704_v42, %v1703_v41  ;;  %v1952_v19 = vld [vmem:[#allocation2 + $0xd9] sm:$0xff]  ;;  %v171_v27 = vld [vmem:[%s14342_s0 + $0x108] sm:$0xff]  ;;  %v172_v34 = vld [vmem:[%s14342_s0 + $0x110] sm:$0xff]  ;;  %239 = vst.msk [vmem:[#allocation2 + $0x1f9] sm:$0xff] %vm28_vm0, %v174_v53 }
  0x5f   :  { %529 = vrot.lane.b32.xlu1 %v2003_v15, %s7101_s14  ;;  %236 = vst.msk [vmem:[#allocation2 + $0x1d1] sm:$0xff] %vm28_vm0, %v171_v27  ;;  %v2210_v28 = vld [vmem:[#allocation2 + $0xe2] sm:$0xff]  ;;  %v173_v35 = vld [vmem:[%s14342_s0 + $0x118] sm:$0xff]  ;;  %237 = vst.msk [vmem:[#allocation2 + $0x1e1] sm:$0xff] %vm28_vm0, %v172_v34 }
  0x60   :  { %376 = vst.msk [vmem:[#allocation3 + $0x68] sm:$0xff] %vm28_vm0, %v7572_v44  ;;  %v1707_v3 = vld [vmem:[#allocation2 + $0x168] sm:$0xff]  ;;  %v1708_v4 = vld [vmem:[#allocation2 + $0x170] sm:$0xff]  ;;  %238 = vst.msk [vmem:[#allocation2 + $0x1e9] sm:$0xff] %vm28_vm0, %v173_v35 }
  0x61   :  { %v7616_v6 = vpack.c.bf16 %v1708_v4, %v1707_v3  ;;  %v1184_v42 = vld [vmem:[#allocation2 + $0xf1] sm:$0xff]  ;;  %v1442_v51 = vld [vmem:[#allocation2 + $0xfa] sm:$0xff]  ;;  %v1956_v62 = vld [vmem:[#allocation2 + $0x109] sm:$0xff]  ;;  %3694 = vst.msk [vmem:[#allocation4 + $0x18] sm:$0xff] %vm2894_vm13, %v7100_v1 }
  0x62   :  { %784 = vrot.lane.b32.xlu0 %v7480_v59, %s7102_s15  ;;  %v1433_v59 = vld [vmem:[#allocation2 + $0x92] sm:$0xff]  ;;  %3695 = vst.msk [vmem:[#allocation4 + $0x20] sm:$0xff] %vm2894_vm13, %v7100_v1  ;;  %3700 = vst.msk [vmem:[#allocation4 + $0x48] sm:$0xff] %vm2894_vm13, %v7100_v1 }
  0x63   :  { %786 = vrot.lane.b32.xlu1 %v2260_v24, %s7102_s15  ;;  %378 = vst.msk [vmem:[#allocation3 + $0x78] sm:$0xff] %vm28_vm0, %v7616_v6  ;;  %v1441_v50 = vld [vmem:[#allocation2 + $0xf2] sm:$0xff] }
  0x64   :  { %v1957_v63 = vld [vmem:[#allocation2 + $0x111] sm:$0xff]  ;;  %3701 = vst.msk [vmem:[#allocation4 + $0x50] sm:$0xff] %vm2894_vm13, %v7100_v1  ;;  %3703 = vst.msk [vmem:[#allocation4 + $0x60] sm:$0xff] %vm2894_vm13, %v7100_v1 }
  0x65   :  { %v2011_v0 = vpack.c.bf16 %v1957_v63, %v1956_v62  ;;  %v176_v12 = vld [vmem:[%s14342_s0 + $0x130] sm:$0xff]  ;;  %v177_v13 = vld [vmem:[%s14342_s0 + $0x138] sm:$0xff]  ;;  %3704 = vst.msk [vmem:[#allocation4 + $0x68] sm:$0xff] %vm2894_vm13, %v7100_v1  ;;  %3706 = vst.msk [vmem:[#allocation4 + $0x78] sm:$0xff] %vm2894_vm13, %v7100_v1 }
  0x66   :  { %1041 = vrot.lane.b32.xlu0 %v7449_v39, %s7103_s16  ;;  %v1944_v39 = vld [vmem:[#allocation2 + $0x79] sm:$0xff]  ;;  %241 = vst.msk [vmem:[#allocation2 + $0x211] sm:$0xff] %vm28_vm0, %v176_v12  ;;  %242 = vst.msk [vmem:[#allocation2 + $0x219] sm:$0xff] %vm28_vm0, %v177_v13  ;;  %v2221_v13 = vld [vmem:[#allocation2 + $0x16a] sm:$0xff] }
  0x67   :  { %1043 = vrot.lane.b32.xlu1 %v7456_v43, %s7103_s16  ;;  %v2005_v45 = vpack.c.bf16 %v1945_v40, %v1944_v39  ;;  %v1450_v63 = vld [vmem:[#allocation2 + $0x15a] sm:$0xff]  ;;  %3707 = vst.msk [vmem:[#allocation4 + $0x80] sm:$0xff] %vm2894_vm13, %v7100_v1  ;;  %3709 = vst.msk [vmem:[#allocation4 + $0x90] sm:$0xff] %vm2894_vm13, %v7100_v1 }
  0x68   :  { %3710 = vst.msk [vmem:[#allocation4 + $0x98] sm:$0xff] %vm2894_vm13, %v7100_v1  ;;  %3712 = vst.msk [vmem:[#allocation4 + $0xa8] sm:$0xff] %vm2894_vm13, %v7100_v1 }
  0x69   :  { %3713 = vst.msk [vmem:[#allocation4 + $0xb0] sm:$0xff] %vm2894_vm13, %v7100_v1  ;;  %3715 = vst.msk [vmem:[#allocation4 + $0xc0] sm:$0xff] %vm2894_vm13, %v7100_v1 }
  0x6a   :  { %1298 = vrot.lane.b32.xlu0 %v2003_v15, %s7104_s17  ;;  %v1437_v15 = vld [vmem:[#allocation2 + $0xc2] sm:$0xff]  ;;  %3716 = vst.msk [vmem:[#allocation4 + $0xc8] sm:$0xff] %vm2894_vm13, %v7100_v1  ;;  %3718 = vst.msk [vmem:[#allocation4 + $0xd8] sm:$0xff] %vm2894_vm13, %v7100_v1 }
  0x6b   :  { %1300 = vrot.lane.b32.xlu1 %v1233_v33, %s7104_s17  ;;  %v1494_v17 = vpack.c.bf16 %v1438_v16, %v1437_v15  ;;  %3719 = vst.msk [vmem:[#allocation4 + $0xe0] sm:$0xff] %vm2894_vm13, %v7100_v1  ;;  %3721 = vst.msk [vmem:[#allocation4 + $0xf0] sm:$0xff] %vm2894_vm13, %v7100_v1 }
  0x6c   :  { %3722 = vst.msk [vmem:[#allocation4 + $0xf8] sm:$0xff] %vm2894_vm13, %v7100_v1  ;;  %3724 = vst.msk [vmem:[#allocation4 + $0x108] sm:$0xff] %vm2894_vm13, %v7100_v1 }
  0x6d   :  { %3725 = vst.msk [vmem:[#allocation4 + $0x110] sm:$0xff] %vm2894_vm13, %v7100_v1  ;;  %3727 = vst.msk [vmem:[#allocation4 + $0x120] sm:$0xff] %vm2894_vm13, %v7100_v1 }
  0x6e   :  { %1555 = vrot.lane.b32.xlu0 %v2260_v24, %s7105_s18  ;;  %v170_v24 = vld [vmem:[%s14342_s0 + $0x100] sm:$0xff]  ;;  %3728 = vst.msk [vmem:[#allocation4 + $0x128] sm:$0xff] %vm2894_vm13, %v7100_v1  ;;  %3730 = vst.msk [vmem:[#allocation4 + $0x138] sm:$0xff] %vm2894_vm13, %v7100_v1 }
  0x6f   :  { %1557 = vrot.lane.b32.xlu1 %v1490_v38, %s7105_s18  ;;  %235 = vst.msk [vmem:[#allocation2 + $0x1c9] sm:$0xff] %vm28_vm0, %v170_v24  ;;  %v1446_v24 = vld [vmem:[#allocation2 + $0x12a] sm:$0xff] }
  0x70   :  { %3731 = vst.msk [vmem:[#allocation4 + $0x140] sm:$0xff] %vm2894_vm13, %v7100_v1  ;;  %3733 = vst.msk [vmem:[#allocation4 + $0x150] sm:$0xff] %vm2894_vm13, %v7100_v1 }
  0x71   :  { %3734 = vst.msk [vmem:[#allocation4 + $0x158] sm:$0xff] %vm2894_vm13, %v7100_v1  ;;  %3736 = vst.msk [vmem:[#allocation4 + $0x168] sm:$0xff] %vm2894_vm13, %v7100_v1 }
  0x72   :  { %1813 = vrot.lane.b32.xlu0 %v7456_v43, %s7107_s8  ;;  %v164_v43 = vld [vmem:[%s14342_s0 + $0xd0] sm:$0xff]  ;;  %3737 = vst.msk [vmem:[#allocation4 + $0x170] sm:$0xff] %vm2894_vm13, %v7100_v1  ;;  %3739 = vst.msk [vmem:[#allocation4 + $0x180] sm:$0xff] %vm2894_vm13, %v7100_v1 }
  0x73   :  { %1815 = vrot.lane.b32.xlu1 %v7460_v47, %s7107_s8  ;;  %229 = vst.msk [vmem:[#allocation2 + $0x151] sm:$0xff] %vm28_vm0, %v164_v43 }
  0x74   :  { %3740 = vst.msk [vmem:[#allocation4 + $0x188] sm:$0xff] %vm2894_vm13, %v7100_v1  ;;  %3742 = vst.msk [vmem:[#allocation4 + $0x198] sm:$0xff] %vm2894_vm13, %v7100_v1 }
  0x75   :  { %3743 = vst.msk [vmem:[#allocation4 + $0x1a0] sm:$0xff] %vm2894_vm13, %v7100_v1  ;;  %3745 = vst.msk [vmem:[#allocation4 + $0x1b0] sm:$0xff] %vm2894_vm13, %v7100_v1 }
  0x76   :  { %2070 = vrot.lane.b32.xlu0 %v1233_v33, %s7108_s9  ;;  %v941_v39 = vld [vmem:[#allocation2 + $0x1c8] sm:$0xff]  ;;  %v942_v40 = vld [vmem:[#allocation2 + $0x1d0] sm:$0xff]  ;;  %3746 = vst.msk [vmem:[#allocation4 + $0x1b8] sm:$0xff] %vm2894_vm13, %v7100_v1  ;;  %3748 = vst.msk [vmem:[#allocation4 + $0x1c8] sm:$0xff] %vm2894_vm13, %v7100_v1 }
  0x77   :  { %2072 = vrot.lane.b32.xlu1 %v2005_v45, %s7108_s9  ;;  %v7688_v46 = vpack.c.bf16 %v942_v40, %v941_v39  ;;  %v2217_v39 = vld [vmem:[#allocation2 + $0x13a] sm:$0xff]  ;;  %v2218_v40 = vld [vmem:[#allocation2 + $0x142] sm:$0xff]  ;;  %3749 = vst.msk [vmem:[#allocation4 + $0x1d0] sm:$0xff] %vm2894_vm13, %v7100_v1  ;;  %3751 = vst.msk [vmem:[#allocation4 + $0x1e0] sm:$0xff] %vm2894_vm13, %v7100_v1 }
  0x78   :  { %3752 = vst.msk [vmem:[#allocation4 + $0x1e8] sm:$0xff] %vm2894_vm13, %v7100_v1  ;;  %3754 = vst.msk [vmem:[#allocation4 + $0x1f8] sm:$0xff] %vm2894_vm13, %v7100_v1 }
  0x79   :  { %380 = vst.msk [vmem:[#allocation3 + $0x88] sm:$0xff] %vm28_vm0, %v7688_v46 }
  0x7a   :  { %2327 = vrot.lane.b32.xlu0 %v1490_v38, %s7109_s1  ;;  %v935_v54 = vld [vmem:[#allocation2 + $0x150] sm:$0xff]  ;;  %v936_v55 = vld [vmem:[#allocation2 + $0x158] sm:$0xff]  ;;  %3755 = vst.msk [vmem:[#allocation4 + $0x200] sm:$0xff] %vm2894_vm13, %v7100_v1  ;;  %3757 = vst.msk [vmem:[#allocation4 + $0x210] sm:$0xff] %vm2894_vm13, %v7100_v1 }
  0x7b   :  { %531 = vrot.lane.b32.xlu1 %v1233_v33, %s7101_s14  ;;  %v7594_v57 = vpack.c.bf16 %v936_v55, %v935_v54  ;;  %v1496_v55 = vpack.c.bf16 %v1442_v51, %v1441_v50  ;;  %v1449_v62 = vld [vmem:[#allocation2 + $0x152] sm:$0xff]  ;;  %3758 = vst.msk [vmem:[#allocation4 + $0x218] sm:$0xff] %vm2894_vm13, %v7100_v1  ;;  %3760 = vst.msk [vmem:[#allocation4 + $0x228] sm:$0xff] %vm2894_vm13, %v7100_v1 }
  0x7c   :  { %3761 = vst.msk [vmem:[#allocation4 + $0x230] sm:$0xff] %vm2894_vm13, %v7100_v1  ;;  %3763 = vst.msk [vmem:[#allocation4 + $0x240] sm:$0xff] %vm2894_vm13, %v7100_v1 }
  0x7d   :  { %377 = vst.msk [vmem:[#allocation3 + $0x70] sm:$0xff] %vm28_vm0, %v7594_v57 }
  0x7e   :  { %2329 = vrot.lane.b32.xlu0 %v2262_v49, %s7109_s1  ;;  %3764 = vst.msk [vmem:[#allocation4 + $0x248] sm:$0xff] %vm2894_vm13, %v7100_v1  ;;  %3766 = vst.msk [vmem:[#allocation4 + $0x258] sm:$0xff] %vm2894_vm13, %v7100_v1 }
  0x7f   :  { %533 = vrot.lane.b32.xlu1 %v2005_v45, %s7101_s14  ;;  %v524_v18 = vpop.permute.xlu0 %523  ;;  %3767 = vst.msk [vmem:[#allocation4 + $0x260] sm:$0xff] %vm2894_vm13, %v7100_v1  ;;  %3769 = vst.msk [vmem:[#allocation4 + $0x270] sm:$0xff] %vm2894_vm13, %v7100_v1 }
  0x80   :  { %620 = vst.msk [vmem:[#allocation3] sm:$0xff] %vm619_vm4, %v524_v18  ;;  %v781_v20 = vpop.permute.xlu1 %780  ;;  %v1188_v18 = vld [vmem:[#allocation2 + $0x121] sm:$0xff] }
  0x81   :  { %877 = vst.msk [vmem:[#allocation3] sm:$0xff] %vm876_vm5, %v781_v20 }
  0x82   :  { %788 = vrot.lane.b32.xlu0 %v1490_v38, %s7102_s15  ;;  %3770 = vst.msk [vmem:[#allocation4 + $0x278] sm:$0xff] %vm2894_vm13, %v7100_v1  ;;  %3772 = vst.msk [vmem:[#allocation4 + $0x288] sm:$0xff] %vm2894_vm13, %v7100_v1 }
  0x83   :  { %790 = vrot.lane.b32.xlu1 %v2262_v49, %s7102_s15  ;;  %3773 = vst.msk [vmem:[#allocation4 + $0x290] sm:$0xff] %vm2894_vm13, %v7100_v1  ;;  %3775 = vst.msk [vmem:[#allocation4 + $0x2a0] sm:$0xff] %vm2894_vm13, %v7100_v1 }
  0x84   :  { %3776 = vst.msk [vmem:[#allocation4 + $0x2a8] sm:$0xff] %vm2894_vm13, %v7100_v1  ;;  %3778 = vst.msk [vmem:[#allocation4 + $0x2b8] sm:$0xff] %vm2894_vm13, %v7100_v1 }
  0x85   :  { %3779 = vst.msk [vmem:[#allocation4 + $0x2c0] sm:$0xff] %vm2894_vm13, %v7100_v1  ;;  %3781 = vst.msk [vmem:[#allocation4 + $0x2d0] sm:$0xff] %vm2894_vm13, %v7100_v1 }
  0x86   :  { %1045 = vrot.lane.b32.xlu0 %v7460_v47, %s7103_s16  ;;  %v1492_v47 = vpack.c.bf16 %v1434_v61, %v1433_v59  ;;  %3782 = vst.msk [vmem:[#allocation4 + $0x2d8] sm:$0xff] %vm2894_vm13, %v7100_v1  ;;  %3784 = vst.msk [vmem:[#allocation4 + $0x2e8] sm:$0xff] %vm2894_vm13, %v7100_v1 }
  0x87   :  { %1047 = vrot.lane.b32.xlu1 %v7469_v52, %s7103_s16  ;;  %3785 = vst.msk [vmem:[#allocation4 + $0x2f0] sm:$0xff] %vm2894_vm13, %v7100_v1  ;;  %3787 = vst.msk [vmem:[#allocation4 + $0x300] sm:$0xff] %vm2894_vm13, %v7100_v1 }
  0x88   :  { %3788 = vst.msk [vmem:[#allocation4 + $0x308] sm:$0xff] %vm2894_vm13, %v7100_v1  ;;  %3790 = vst.msk [vmem:[#allocation4 + $0x318] sm:$0xff] %vm2894_vm13, %v7100_v1 }
  0x89   :  { %3791 = vst.msk [vmem:[#allocation4 + $0x320] sm:$0xff] %vm2894_vm13, %v7100_v1  ;;  %3793 = vst.msk [vmem:[#allocation4 + $0x330] sm:$0xff] %vm2894_vm13, %v7100_v1 }
  0x8a   :  { %1302 = vrot.lane.b32.xlu0 %v2005_v45, %s7104_s17  ;;  %v1185_v45 = vld [vmem:[#allocation2 + $0xf9] sm:$0xff]  ;;  %3794 = vst.msk [vmem:[#allocation4 + $0x338] sm:$0xff] %vm2894_vm13, %v7100_v1  ;;  %3796 = vst.msk [vmem:[#allocation4 + $0x348] sm:$0xff] %vm2894_vm13, %v7100_v1 }
  0x8b   :  { %1304 = vrot.lane.b32.xlu1 %v1235_v58, %s7104_s17  ;;  %3797 = vst.msk [vmem:[#allocation4 + $0x350] sm:$0xff] %vm2894_vm13, %v7100_v1 }
  0x8c   :  { %3699 = vst.msk [vmem:[#allocation4 + $0x40] sm:$0x3] %vm3692_vm14, %v7100_v1  ;;  %3693 = vst.msk [vmem:[#allocation4 + $0x10] sm:$0x3] %vm3692_vm14, %v7100_v1 }
  0x8d   :  { %3696 = vst.msk [vmem:[#allocation4 + $0x28] sm:$0x3] %vm3692_vm14, %v7100_v1  ;;  %3702 = vst.msk [vmem:[#allocation4 + $0x58] sm:$0x3] %vm3692_vm14, %v7100_v1 }
  0x8e   :  { %1559 = vrot.lane.b32.xlu0 %v2262_v49, %s7105_s18  ;;  %v1239_v49 = vpack.c.bf16 %v1185_v45, %v1184_v42  ;;  %v2270_v45 = vpack.c.bf16 %v2218_v40, %v2217_v39  ;;  %3705 = vst.msk [vmem:[#allocation4 + $0x70] sm:$0x3] %vm3692_vm14, %v7100_v1  ;;  %3708 = vst.msk [vmem:[#allocation4 + $0x88] sm:$0x3] %vm3692_vm14, %v7100_v1 }
  0x8f   :  { %1561 = vrot.lane.b32.xlu1 %v1492_v47, %s7105_s18  ;;  %3711 = vst.msk [vmem:[#allocation4 + $0xa0] sm:$0x3] %vm3692_vm14, %v7100_v1  ;;  %3714 = vst.msk [vmem:[#allocation4 + $0xb8] sm:$0x3] %vm3692_vm14, %v7100_v1 }
  0x90   :  { %3717 = vst.msk [vmem:[#allocation4 + $0xd0] sm:$0x3] %vm3692_vm14, %v7100_v1  ;;  %3720 = vst.msk [vmem:[#allocation4 + $0xe8] sm:$0x3] %vm3692_vm14, %v7100_v1 }
  0x91   :  { %3723 = vst.msk [vmem:[#allocation4 + $0x100] sm:$0x3] %vm3692_vm14, %v7100_v1  ;;  %3726 = vst.msk [vmem:[#allocation4 + $0x118] sm:$0x3] %vm3692_vm14, %v7100_v1 }
  0x92   :  { %1817 = vrot.lane.b32.xlu0 %v7469_v52, %s7107_s8  ;;  %v168_v52 = vld [vmem:[%s14342_s0 + $0xf0] sm:$0xff]  ;;  %3729 = vst.msk [vmem:[#allocation4 + $0x130] sm:$0x3] %vm3692_vm14, %v7100_v1  ;;  %3732 = vst.msk [vmem:[#allocation4 + $0x148] sm:$0x3] %vm3692_vm14, %v7100_v1 }
  0x93   :  { %1819 = vrot.lane.b32.xlu1 %v7473_v56, %s7107_s8  ;;  %233 = vst.msk [vmem:[#allocation2 + $0x181] sm:$0xff] %vm28_vm0, %v168_v52 }
  0x94   :  { %3735 = vst.msk [vmem:[#allocation4 + $0x160] sm:$0x3] %vm3692_vm14, %v7100_v1  ;;  %3738 = vst.msk [vmem:[#allocation4 + $0x178] sm:$0x3] %vm3692_vm14, %v7100_v1 }
  0x95   :  { %3741 = vst.msk [vmem:[#allocation4 + $0x190] sm:$0x3] %vm3692_vm14, %v7100_v1  ;;  %3744 = vst.msk [vmem:[#allocation4 + $0x1a8] sm:$0x3] %vm3692_vm14, %v7100_v1 }
  0x96   :  { %2074 = vrot.lane.b32.xlu0 %v1235_v58, %s7108_s9  ;;  %3747 = vst.msk [vmem:[#allocation4 + $0x1c0] sm:$0x3] %vm3692_vm14, %v7100_v1  ;;  %3750 = vst.msk [vmem:[#allocation4 + $0x1d8] sm:$0x3] %vm3692_vm14, %v7100_v1 }
  0x97   :  { %2076 = vrot.lane.b32.xlu1 %v2007_v7, %s7108_s9  ;;  %3753 = vst.msk [vmem:[#allocation4 + $0x1f0] sm:$0x3] %vm3692_vm14, %v7100_v1  ;;  %3756 = vst.msk [vmem:[#allocation4 + $0x208] sm:$0x3] %vm3692_vm14, %v7100_v1 }
  0x98   :  { %3759 = vst.msk [vmem:[#allocation4 + $0x220] sm:$0x3] %vm3692_vm14, %v7100_v1  ;;  %3762 = vst.msk [vmem:[#allocation4 + $0x238] sm:$0x3] %vm3692_vm14, %v7100_v1 }
  0x99   :  { %3765 = vst.msk [vmem:[#allocation4 + $0x250] sm:$0x3] %vm3692_vm14, %v7100_v1  ;;  %3768 = vst.msk [vmem:[#allocation4 + $0x268] sm:$0x3] %vm3692_vm14, %v7100_v1 }
  0x9a   :  { %2331 = vrot.lane.b32.xlu0 %v1492_v47, %s7109_s1  ;;  %3771 = vst.msk [vmem:[#allocation4 + $0x280] sm:$0x3] %vm3692_vm14, %v7100_v1  ;;  %3774 = vst.msk [vmem:[#allocation4 + $0x298] sm:$0x3] %vm3692_vm14, %v7100_v1 }
  0x9b   :  { %535 = vrot.lane.b32.xlu1 %v1235_v58, %s7101_s14  ;;  %3777 = vst.msk [vmem:[#allocation4 + $0x2b0] sm:$0x3] %vm3692_vm14, %v7100_v1  ;;  %3780 = vst.msk [vmem:[#allocation4 + $0x2c8] sm:$0x3] %vm3692_vm14, %v7100_v1 }
  0x9c   :  { %3783 = vst.msk [vmem:[#allocation4 + $0x2e0] sm:$0x3] %vm3692_vm14, %v7100_v1  ;;  %3786 = vst.msk [vmem:[#allocation4 + $0x2f8] sm:$0x3] %vm3692_vm14, %v7100_v1 }
  0x9d   :  { %3789 = vst.msk [vmem:[#allocation4 + $0x310] sm:$0x3] %vm3692_vm14, %v7100_v1  ;;  %3792 = vst.msk [vmem:[#allocation4 + $0x328] sm:$0x3] %vm3692_vm14, %v7100_v1 }
  0x9e   :  { %2333 = vrot.lane.b32.xlu0 %v2264_v10, %s7109_s1  ;;  %3795 = vst.msk [vmem:[#allocation4 + $0x340] sm:$0x3] %vm3692_vm14, %v7100_v1  ;;  %3798 = vst.msk [vmem:[#allocation4 + $0x358] sm:$0x3] %vm3692_vm14, %v7100_v1 }
  0x9f   :  { %537 = vrot.lane.b32.xlu1 %v2007_v7, %s7101_s14 }
  0xa2   :  { %792 = vrot.lane.b32.xlu0 %v1492_v47, %s7102_s15 }
  0xa3   :  { %794 = vrot.lane.b32.xlu1 %v2264_v10, %s7102_s15 }
  0xa6   :  { %1049 = vrot.lane.b32.xlu0 %v7473_v56, %s7103_s16  ;;  %v1953_v56 = vld [vmem:[#allocation2 + $0xe1] sm:$0xff] }
  0xa7   :  { %1051 = vrot.lane.b32.xlu1 %v7482_v60, %s7103_s16  ;;  %v7652_v22 = vpack.c.bf16 %v1953_v56, %v1952_v19  ;;  %v1189_v19 = vld [vmem:[#allocation2 + $0x129] sm:$0xff] }
  0xa8   :  { %v1241_v20 = vpack.c.bf16 %v1189_v19, %v1188_v18  ;;  %v184_v19 = vld [vmem:[%s14342_s0 + $0x170] sm:$0xff] }
  0xa9   :  { %249 = vst.msk [vmem:[#allocation2 + $0x271] sm:$0xff] %vm28_vm0, %v184_v19  ;;  %v944_v19 = vld [vmem:[#allocation2 + $0x1e8] sm:$0xff] }
  0xaa   :  { %1306 = vrot.lane.b32.xlu0 %v2007_v7, %s7104_s17  ;;  %v2213_v7 = vld [vmem:[#allocation2 + $0x10a] sm:$0xff] }
  0xab   :  { %1308 = vrot.lane.b32.xlu1 %v1237_v14, %s7104_s17 }
  0xae   :  { %1563 = vrot.lane.b32.xlu0 %v2264_v10, %s7105_s18 }
  0xaf   :  { %1565 = vrot.lane.b32.xlu1 %v1494_v17, %s7105_s18 }
  0xb2   :  { %1821 = vrot.lane.b32.xlu0 %v7482_v60, %s7107_s8  ;;  %v2209_v60 = vld [vmem:[#allocation2 + $0xda] sm:$0xff] }
  0xb3   :  { %1823 = vrot.lane.b32.xlu1 %v7489_v5, %s7107_s8  ;;  %v526_v23 = vpop.permute.xlu0 %525  ;;  %v2266_v31 = vpack.c.bf16 %v2210_v28, %v2209_v60  ;;  %v179_v60 = vld [vmem:[%s14342_s0 + $0x148] sm:$0xff] }
  0xb4   :  { %621 = vst.msk [vmem:[#allocation3 + $0x8] sm:$0xff] %vm619_vm4, %v526_v23  ;;  %v783_v26 = vpop.permute.xlu1 %782  ;;  %v1445_v23 = vld [vmem:[#allocation2 + $0x122] sm:$0xff] }
  0xb5   :  { %878 = vst.msk [vmem:[#allocation3 + $0x8] sm:$0xff] %vm876_vm5, %v783_v26  ;;  %v178_v26 = vld [vmem:[%s14342_s0 + $0x140] sm:$0xff] }
  0xb6   :  { %2078 = vrot.lane.b32.xlu0 %v1237_v14, %s7108_s9  ;;  %243 = vst.msk [vmem:[#allocation2 + $0x229] sm:$0xff] %vm28_vm0, %v178_v26  ;;  %244 = vst.msk [vmem:[#allocation2 + $0x231] sm:$0xff] %vm28_vm0, %v179_v60 }
  0xb7   :  { %2080 = vrot.lane.b32.xlu1 %v7652_v22, %s7108_s9  ;;  %v1038_v29 = vpop.permute.xlu0 %1037 }
  0xb8   :  { %1134 = vst.msk [vmem:[#allocation3] sm:$0xff] %vm1133_vm6, %v1038_v29  ;;  %v1040_v30 = vpop.permute.xlu1 %1039 }
  0xb9   :  { %1135 = vst.msk [vmem:[#allocation3 + $0x8] sm:$0xff] %vm1133_vm6, %v1040_v30 }
  0xba   :  { %2335 = vrot.lane.b32.xlu0 %v1494_v17, %s7109_s1 }
  0xbb   :  { %539 = vrot.lane.b32.xlu1 %v1237_v14, %s7101_s14  ;;  %v1295_v33 = vpop.permute.xlu0 %1294 }
  0xbc   :  { %1391 = vst.msk [vmem:[#allocation3] sm:$0xff] %vm1390_vm7, %v1295_v33  ;;  %v1297_v36 = vpop.permute.xlu1 %1296  ;;  %v1961_v33 = vld [vmem:[#allocation2 + $0x141] sm:$0xff] }
  0xbd   :  { %1392 = vst.msk [vmem:[#allocation3 + $0x8] sm:$0xff] %vm1390_vm7, %v1297_v36 }
  0xbe   :  { %2337 = vrot.lane.b32.xlu0 %v2266_v31, %s7109_s1 }
  0xbf   :  { %541 = vrot.lane.b32.xlu1 %v7652_v22, %s7101_s14  ;;  %v1552_v37 = vpop.permute.xlu0 %1551 }
  0xc0   :  { %1648 = vst.msk [vmem:[#allocation3] sm:$0xff] %vm1647_vm8, %v1552_v37  ;;  %v1554_v38 = vpop.permute.xlu1 %1553 }
  0xc1   :  { %1649 = vst.msk [vmem:[#allocation3 + $0x8] sm:$0xff] %vm1647_vm8, %v1554_v38 }
  0xc2   :  { %796 = vrot.lane.b32.xlu0 %v1494_v17, %s7102_s15 }
  0xc3   :  { %798 = vrot.lane.b32.xlu1 %v2266_v31, %s7102_s15  ;;  %v1810_v41 = vpop.permute.xlu0 %1809 }
  0xc4   :  { %1906 = vst.msk [vmem:[#allocation3] sm:$0xff] %vm1905_vm9, %v1810_v41  ;;  %v1812_v48 = vpop.permute.xlu1 %1811 }
  0xc5   :  { %1907 = vst.msk [vmem:[#allocation3 + $0x8] sm:$0xff] %vm1905_vm9, %v1812_v48 }
  0xc6   :  { %1053 = vrot.lane.b32.xlu0 %v7489_v5, %s7103_s16  ;;  %v175_v5 = vld [vmem:[%s14342_s0 + $0x128] sm:$0xff] }
  0xc7   :  { %1055 = vrot.lane.b32.xlu1 %v7525_v21, %s7103_s16  ;;  %240 = vst.msk [vmem:[#allocation2 + $0x201] sm:$0xff] %vm28_vm0, %v175_v5  ;;  %v1192_v5 = vld [vmem:[#allocation2 + $0x151] sm:$0xff] }
  0xc8   :  { %v2067_v43 = vpop.permute.xlu0 %2066 }
  0xc9   :  { %2163 = vst.msk [vmem:[#allocation3] sm:$0xff] %vm2162_vm10, %v2067_v43  ;;  %v2069_v54 = vpop.permute.xlu1 %2068  ;;  %v181_v43 = vld [vmem:[%s14342_s0 + $0x158] sm:$0xff] }
  0xca   :  { %2164 = vst.msk [vmem:[#allocation3 + $0x8] sm:$0xff] %vm2162_vm10, %v2069_v54  ;;  %1310 = vrot.lane.b32.xlu0 %v7652_v22, %s7104_s17 }
  0xcb   :  { %1312 = vrot.lane.b32.xlu1 %v1239_v49, %s7104_s17  ;;  %246 = vst.msk [vmem:[#allocation2 + $0x249] sm:$0xff] %vm28_vm0, %v181_v43  ;;  %v1968_v43 = vld [vmem:[#allocation2 + $0x199] sm:$0xff] }
  0xcc   :  { %v2324_v58 = vpop.permute.xlu0 %2323 }
  0xcd   :  { %2420 = vst.msk [vmem:[#allocation3] sm:$0xff] %vm2419_vm11, %v2324_v58  ;;  %v528_v59 = vpop.permute.xlu1 %527 }
  0xce   :  { %622 = vst.msk [vmem:[#allocation3 + $0x10] sm:$0xff] %vm619_vm4, %v528_v59  ;;  %1567 = vrot.lane.b32.xlu0 %v2266_v31, %s7105_s18  ;;  %v1960_v31 = vld [vmem:[#allocation2 + $0x139] sm:$0xff] }
  0xcf   :  { %1569 = vrot.lane.b32.xlu1 %v1496_v55, %s7105_s18  ;;  %v2013_v35 = vpack.c.bf16 %v1961_v33, %v1960_v31  ;;  %v1453_v33 = vld [vmem:[#allocation2 + $0x182] sm:$0xff] }
  0xd0   :  { %v2326_v61 = vpop.permute.xlu0 %2325 }
  0xd1   :  { %2421 = vst.msk [vmem:[#allocation3 + $0x8] sm:$0xff] %vm2419_vm11, %v2326_v61  ;;  %v530_v47 = vpop.permute.xlu1 %529 }
  0xd2   :  { %623 = vst.msk [vmem:[#allocation3 + $0x18] sm:$0xff] %vm619_vm4, %v530_v47  ;;  %1825 = vrot.lane.b32.xlu0 %v7525_v21, %s7107_s8  ;;  %v2214_v21 = vld [vmem:[#allocation2 + $0x112] sm:$0xff]  ;;  %v182_v47 = vld [vmem:[%s14342_s0 + $0x160] sm:$0xff] }
  0xd3   :  { %1827 = vrot.lane.b32.xlu1 %v7529_v25, %s7107_s8  ;;  %v2268_v52 = vpack.c.bf16 %v2214_v21, %v2213_v7  ;;  %247 = vst.msk [vmem:[#allocation2 + $0x259] sm:$0xff] %vm28_vm0, %v182_v47  ;;  %v1964_v21 = vld [vmem:[#allocation2 + $0x169] sm:$0xff]  ;;  %v2225_v47 = vld [vmem:[#allocation2 + $0x19a] sm:$0xff] }
  0xd4   :  { %v785_v2 = vpop.permute.xlu0 %784  ;;  %v2452_v3 = vld [vmem:[#allocation3] sm:$0xff] }
  0xd5   :  { %879 = vst.msk [vmem:[#allocation3 + $0x10] sm:$0xff] %vm876_vm5, %v785_v2  ;;  %v787_v4 = vpop.permute.xlu1 %786  ;;  %6954 = vmatprep.mubr.msk.bf16.mxu0 %vm2499_vm12, %v2452_v3  ;;  %v183_v2 = vld [vmem:[%s14342_s0 + $0x168] sm:$0xff] }
  0xd6   :  { %880 = vst.msk [vmem:[#allocation3 + $0x18] sm:$0xff] %vm876_vm5, %v787_v4  ;;  %2082 = vrot.lane.b32.xlu0 %v1239_v49, %s7108_s9 }
  0xd7   :  { %2084 = vrot.lane.b32.xlu1 %v2011_v0, %s7108_s9  ;;  %248 = vst.msk [vmem:[#allocation2 + $0x261] sm:$0xff] %vm28_vm0, %v183_v2 }
  0xd8   :  { %v1042_v8 = vpop.permute.xlu0 %1041  ;;  %v2453_v9 = vld [vmem:[#allocation3 + $0x8] sm:$0xff] }
  0xd9   :  { %1136 = vst.msk [vmem:[#allocation3 + $0x10] sm:$0xff] %vm1133_vm6, %v1042_v8  ;;  %v1044_v10 = vpop.permute.xlu1 %1043  ;;  %6955 = vmatmul.mubr.msk.bf16.vlgmr.msra.gmra.mrb[0].mxu0 %vm2499_vm12, %v2453_v9  ;;  %v1965_v8 = vld [vmem:[#allocation2 + $0x171] sm:$0xff] }
  0xda   :  { %1137 = vst.msk [vmem:[#allocation3 + $0x18] sm:$0xff] %vm1133_vm6, %v1044_v10  ;;  %2339 = vrot.lane.b32.xlu0 %v1496_v55, %s7109_s1  ;;  %v2015_v10 = vpack.c.bf16 %v1965_v8, %v1964_v21 }
  0xdb   :  { %543 = vrot.lane.b32.xlu1 %v1239_v49, %s7101_s14  ;;  %v180_v49 = vld [vmem:[%s14342_s0 + $0x150] sm:$0xff] }
  0xdc   :  { %v1299_v11 = vpop.permute.xlu0 %1298  ;;  %245 = vst.msk [vmem:[#allocation2 + $0x241] sm:$0xff] %vm28_vm0, %v180_v49 }
  0xdd   :  { %1393 = vst.msk [vmem:[#allocation3 + $0x10] sm:$0xff] %vm1390_vm7, %v1299_v11  ;;  %v1301_v14 = vpop.permute.xlu1 %1300 }
  0xde   :  { %1394 = vst.msk [vmem:[#allocation3 + $0x18] sm:$0xff] %vm1390_vm7, %v1301_v14  ;;  %2341 = vrot.lane.b32.xlu0 %v2268_v52, %s7109_s1  ;;  %v2222_v14 = vld [vmem:[#allocation2 + $0x172] sm:$0xff] }
  0xdf   :  { %545 = vrot.lane.b32.xlu1 %v2011_v0, %s7101_s14 }
  0xe0   :  { %v1556_v15 = vpop.permute.xlu0 %1555 }
  0xe1   :  { %1650 = vst.msk [vmem:[#allocation3 + $0x10] sm:$0xff] %vm1647_vm8, %v1556_v15  ;;  %v1558_v16 = vpop.permute.xlu1 %1557 }
  0xe2   :  { %1651 = vst.msk [vmem:[#allocation3 + $0x18] sm:$0xff] %vm1647_vm8, %v1558_v16  ;;  %800 = vrot.lane.b32.xlu0 %v1496_v55, %s7102_s15  ;;  %v1193_v55 = vld [vmem:[#allocation2 + $0x159] sm:$0xff] }
  0xe3   :  { %802 = vrot.lane.b32.xlu1 %v2268_v52, %s7102_s15  ;;  %v1243_v59 = vpack.c.bf16 %v1193_v55, %v1192_v5 }
  0xe4   :  { %v1814_v17 = vpop.permute.xlu0 %1813 }
  0xe5   :  { %1908 = vst.msk [vmem:[#allocation3 + $0x10] sm:$0xff] %vm1905_vm9, %v1814_v17  ;;  %v1816_v56 = vpop.permute.xlu1 %1815  ;;  %v7838_v17 = vpack.c.bf16 %v2222_v14, %v2221_v13  ;;  %v188_v13 = vld [vmem:[%s14342_s0 + $0x190] sm:$0xff]  ;;  %v189_v14 = vld [vmem:[%s14342_s0 + $0x198] sm:$0xff] }
  0xe6   :  { %1909 = vst.msk [vmem:[#allocation3 + $0x18] sm:$0xff] %vm1905_vm9, %v1816_v56  ;;  %1057 = vrot.lane.b32.xlu0 %v7529_v25, %s7103_s16  ;;  %v1498_v25 = vpack.c.bf16 %v1446_v24, %v1445_v23  ;;  %v185_v56 = vld [vmem:[%s14342_s0 + $0x178] sm:$0xff]  ;;  %v939_v23 = vld [vmem:[#allocation2 + $0x180] sm:$0xff]  ;;  %v940_v24 = vld [vmem:[#allocation2 + $0x188] sm:$0xff] }
  0xe7   :  { %1059 = vrot.lane.b32.xlu1 %v7550_v32, %s7103_s16  ;;  %250 = vst.msk [vmem:[#allocation2 + $0x279] sm:$0xff] %vm28_vm0, %v185_v56  ;;  %253 = vst.msk [vmem:[#allocation2 + $0x2a1] sm:$0xff] %vm28_vm0, %v188_v13 }
  0xe8   :  { %v2071_v22 = vpop.permute.xlu0 %2070  ;;  %254 = vst.msk [vmem:[#allocation2 + $0x2a9] sm:$0xff] %vm28_vm0, %v189_v14  ;;  %v1205_v14 = vld [vmem:[#allocation2 + $0x219] sm:$0xff] }
  0xe9   :  { %2165 = vst.msk [vmem:[#allocation3 + $0x10] sm:$0xff] %vm2162_vm10, %v2071_v22  ;;  %v2073_v27 = vpop.permute.xlu1 %2072 }
  0xea   :  { %2166 = vst.msk [vmem:[#allocation3 + $0x18] sm:$0xff] %vm2162_vm10, %v2073_v27  ;;  %1314 = vrot.lane.b32.xlu0 %v2011_v0, %s7104_s17  ;;  %v7859_v27 = vpack.c.bf16 %v940_v24, %v939_v23  ;;  %v1201_v24 = vld [vmem:[#allocation2 + $0x1e9] sm:$0xff] }
  0xeb   :  { %1316 = vrot.lane.b32.xlu1 %v1241_v20, %s7104_s17 }
  0xec   :  { %v2328_v28 = vpop.permute.xlu0 %2327 }
  0xed   :  { %2422 = vst.msk [vmem:[#allocation3 + $0x10] sm:$0xff] %vm2419_vm11, %v2328_v28  ;;  %v532_v29 = vpop.permute.xlu1 %531  ;;  %v1197_v28 = vld [vmem:[#allocation2 + $0x189] sm:$0xff] }
  0xee   :  { %624 = vst.msk [vmem:[#allocation3 + $0x20] sm:$0xff] %vm619_vm4, %v532_v29  ;;  %1571 = vrot.lane.b32.xlu0 %v2268_v52, %s7105_s18 }
  0xef   :  { %1573 = vrot.lane.b32.xlu1 %v1498_v25, %s7105_s18 }
  0xf0   :  { %v2330_v30 = vpop.permute.xlu0 %2329 }
  0xf1   :  { %2423 = vst.msk [vmem:[#allocation3 + $0x18] sm:$0xff] %vm2419_vm11, %v2330_v30  ;;  %v534_v34 = vpop.permute.xlu1 %533 }
  0xf2   :  { %625 = vst.msk [vmem:[#allocation3 + $0x28] sm:$0xff] %vm619_vm4, %v534_v34  ;;  %1829 = vrot.lane.b32.xlu0 %v7550_v32, %s7107_s8  ;;  %v1454_v34 = vld [vmem:[#allocation2 + $0x18a] sm:$0xff] }
  0xf3   :  { %1831 = vrot.lane.b32.xlu1 %v7572_v44, %s7107_s8  ;;  %v7886_v39 = vpack.c.bf16 %v1454_v34, %v1453_v33  ;;  %v190_v33 = vld [vmem:[%s14342_s0 + $0x1a0] sm:$0xff] }
  0xf4   :  { %v789_v36 = vpop.permute.xlu0 %788  ;;  %v2454_v37 = vld [vmem:[#allocation3 + $0x10] sm:$0xff]  ;;  %255 = vst.msk [vmem:[#allocation2 + $0x2b9] sm:$0xff] %vm28_vm0, %v190_v33 }
  0xf5   :  { %881 = vst.msk [vmem:[#allocation3 + $0x20] sm:$0xff] %vm876_vm5, %v789_v36  ;;  %v791_v38 = vpop.permute.xlu1 %790  ;;  %6958 = vmatprep.mubr.msk.bf16.mxu0 %vm2499_vm12, %v2454_v37  ;;  %v187_v37 = vld [vmem:[%s14342_s0 + $0x188] sm:$0xff] }
  0xf6   :  { %882 = vst.msk [vmem:[#allocation3 + $0x28] sm:$0xff] %vm876_vm5, %v791_v38  ;;  %2086 = vrot.lane.b32.xlu0 %v1241_v20, %s7108_s9  ;;  %v7881_v38 = vld [vmem:[#allocation2 + $0x1b8] sm:$0xff] }
  0xf7   :  { %2088 = vrot.lane.b32.xlu1 %v2013_v35, %s7108_s9  ;;  %252 = vst.msk [vmem:[#allocation2 + $0x291] sm:$0xff] %vm28_vm0, %v187_v37 }
  0xf8   :  { %v1046_v32 = vpop.permute.xlu0 %1045  ;;  %v2455_v41 = vld [vmem:[#allocation3 + $0x18] sm:$0xff] }
  0xf9   :  { %1138 = vst.msk [vmem:[#allocation3 + $0x20] sm:$0xff] %vm1133_vm6, %v1046_v32  ;;  %v1048_v42 = vpop.permute.xlu1 %1047  ;;  %6959 = vmatmul.mubr.msk.bf16.gmra.mrb[4].mxu0 %vm2499_vm12, %v2455_v41  ;;  %v7890_v41 = vld [vmem:[#allocation2 + $0x198] sm:$0xff] }
  0xfa   :  { %1139 = vst.msk [vmem:[#allocation3 + $0x28] sm:$0xff] %vm1133_vm6, %v1048_v42  ;;  %2343 = vrot.lane.b32.xlu0 %v1498_v25, %s7109_s1  ;;  %v7892_v42 = vld [vmem:[#allocation2 + $0x1a0] sm:$0xff] }
  0xfb   :  { %547 = vrot.lane.b32.xlu1 %v1241_v20, %s7101_s14 }
  0xfc   :  { %v1303_v48 = vpop.permute.xlu0 %1302 }
  0xfd   :  { %1395 = vst.msk [vmem:[#allocation3 + $0x20] sm:$0xff] %vm1390_vm7, %v1303_v48  ;;  %v1305_v50 = vpop.permute.xlu1 %1304  ;;  %v1760_v48 = vpack.c.bf16 %v7892_v42, %v7890_v41  ;;  %v305_v41 = vld [vmem:[#allocation2 + $0x1f8] sm:$0xff]  ;;  %v306_v42 = vld [vmem:[#allocation2 + $0x200] sm:$0xff] }
  0xfe   :  { %1396 = vst.msk [vmem:[#allocation3 + $0x28] sm:$0xff] %vm1390_vm7, %v1305_v50  ;;  %2345 = vrot.lane.b32.xlu0 %v2270_v45, %s7109_s1  ;;  %v1969_v50 = vld [vmem:[#allocation2 + $0x1a1] sm:$0xff] }
  0xff   :  { %549 = vrot.lane.b32.xlu1 %v2013_v35, %s7101_s14  ;;  %v2017_v55 = vpack.c.bf16 %v1969_v50, %v1968_v43  ;;  %v1972_v43 = vld [vmem:[#allocation2 + $0x1f9] sm:$0xff]  ;;  %v1973_v50 = vld [vmem:[#allocation2 + $0x201] sm:$0xff] }
 0x100   :  { %v1560_v51 = vpop.permute.xlu0 %1559 }
 0x101   :  { %1652 = vst.msk [vmem:[#allocation3 + $0x20] sm:$0xff] %vm1647_vm8, %v1560_v51  ;;  %v1562_v53 = vpop.permute.xlu1 %1561 }
 0x102   :  { %1653 = vst.msk [vmem:[#allocation3 + $0x28] sm:$0xff] %vm1647_vm8, %v1562_v53  ;;  %804 = vrot.lane.b32.xlu0 %v1498_v25, %s7102_s15  ;;  %v1196_v25 = vld [vmem:[#allocation2 + $0x181] sm:$0xff] }
 0x103   :  { %806 = vrot.lane.b32.xlu1 %v2270_v45, %s7102_s15  ;;  %v7867_v30 = vpack.c.bf16 %v1197_v28, %v1196_v25 }
 0x104   :  { %v1818_v54 = vpop.permute.xlu0 %1817 }
 0x105   :  { %1910 = vst.msk [vmem:[#allocation3 + $0x20] sm:$0xff] %vm1905_vm9, %v1818_v54  ;;  %v1820_v58 = vpop.permute.xlu1 %1819 }
 0x106   :  { %1911 = vst.msk [vmem:[#allocation3 + $0x28] sm:$0xff] %vm1905_vm9, %v1820_v58  ;;  %1061 = vrot.lane.b32.xlu0 %v7572_v44, %s7103_s16  ;;  %v1500_v44 = vpack.c.bf16 %v1450_v63, %v1449_v62  ;;  %v428_v62 = vld [vmem:[#allocation2 + $0x1b9] sm:$0xff] }
 0x107   :  { %1063 = vrot.lane.b32.xlu1 %v7594_v57, %s7103_s16 }
 0x108   :  { %v2075_v61 = vpop.permute.xlu0 %2074 }
 0x109   :  { %2167 = vst.msk [vmem:[#allocation3 + $0x20] sm:$0xff] %vm2162_vm10, %v2075_v61  ;;  %v2077_v0 = vpop.permute.xlu1 %2076  ;;  %v427_v61 = vld [vmem:[#allocation2 + $0x1b1] sm:$0xff] }
 0x10a   :  { %2168 = vst.msk [vmem:[#allocation3 + $0x28] sm:$0xff] %vm2162_vm10, %v2077_v0  ;;  %1318 = vrot.lane.b32.xlu0 %v2013_v35, %s7104_s17  ;;  %v186_v35 = vld [vmem:[%s14342_s0 + $0x180] sm:$0xff]  ;;  %v475_v63 = vpack.c.bf16 %v428_v62, %v427_v61 }
 0x10b   :  { %1320 = vrot.lane.b32.xlu1 %v1243_v59, %s7104_s17  ;;  %251 = vst.msk [vmem:[#allocation2 + $0x289] sm:$0xff] %vm28_vm0, %v186_v35  ;;  %v2226_v0 = vld [vmem:[#allocation2 + $0x1a2] sm:$0xff] }
 0x10c   :  { %v2332_v3 = vpop.permute.xlu0 %2331  ;;  %v2274_v21 = vpack.c.bf16 %v2226_v0, %v2225_v47  ;;  %v303_v35 = vld [vmem:[#allocation2 + $0x1e0] sm:$0xff] }
 0x10d   :  { %2424 = vst.msk [vmem:[#allocation3 + $0x20] sm:$0xff] %vm2419_vm11, %v2332_v3  ;;  %v536_v4 = vpop.permute.xlu1 %535  ;;  %v429_v3 = vld [vmem:[#allocation2 + $0x1c9] sm:$0xff] }
 0x10e   :  { %626 = vst.msk [vmem:[#allocation3 + $0x30] sm:$0xff] %vm619_vm4, %v536_v4  ;;  %1575 = vrot.lane.b32.xlu0 %v2270_v45, %s7105_s18  ;;  %v430_v4 = vld [vmem:[#allocation2 + $0x1d1] sm:$0xff] }
 0x10f   :  { %1577 = vrot.lane.b32.xlu1 %v1500_v44, %s7105_s18  ;;  %v476_v8 = vpack.c.bf16 %v430_v4, %v429_v3  ;;  %v192_v4 = vld [vmem:[%s14342_s0 + $0x1b0] sm:$0xff] }
 0x110   :  { %v2334_v7 = vpop.permute.xlu0 %2333  ;;  %257 = vst.msk [vmem:[#allocation2 + $0x2d1] sm:$0xff] %vm28_vm0, %v192_v4 }
 0x111   :  { %2425 = vst.msk [vmem:[#allocation3 + $0x28] sm:$0xff] %vm2419_vm11, %v2334_v7  ;;  %v538_v9 = vpop.permute.xlu1 %537 }
 0x112   :  { %627 = vst.msk [vmem:[#allocation3 + $0x38] sm:$0xff] %vm619_vm4, %v538_v9  ;;  %1833 = vrot.lane.b32.xlu0 %v7594_v57, %s7107_s8  ;;  %v1727_v51 = vld [vmem:[#allocation2 + $0x288] sm:$0xff]  ;;  %v1728_v54 = vld [vmem:[#allocation2 + $0x290] sm:$0xff] }
 0x113   :  { %1835 = vrot.lane.b32.xlu1 %v7616_v6, %s7107_s8  ;;  %v8129_v5 = vpack.c.bf16 %v1728_v54, %v1727_v51  ;;  %v684_v9 = vld [vmem:[#allocation2 + $0x1b2] sm:$0xff] }
 0x114   :  { %v793_v52 = vpop.permute.xlu0 %792  ;;  %v2456_v11 = vld [vmem:[#allocation3 + $0x20] sm:$0xff]  ;;  %v1731_v51 = vld [vmem:[#allocation2 + $0x2b8] sm:$0xff] }
 0x115   :  { %883 = vst.msk [vmem:[#allocation3 + $0x30] sm:$0xff] %vm876_vm5, %v793_v52  ;;  %v795_v12 = vpop.permute.xlu1 %794  ;;  %6962 = vmatprep.mubr.msk.bf16.mxu0 %vm2499_vm12, %v2456_v11  ;;  %v686_v52 = vld [vmem:[#allocation2 + $0x1ca] sm:$0xff] }
 0x116   :  { %884 = vst.msk [vmem:[#allocation3 + $0x38] sm:$0xff] %vm876_vm5, %v795_v12  ;;  %2090 = vrot.lane.b32.xlu0 %v1243_v59, %s7108_s9  ;;  %v687_v12 = vld [vmem:[#allocation2 + $0x1d2] sm:$0xff] }
 0x117   :  { %2092 = vrot.lane.b32.xlu1 %v2015_v10, %s7108_s9  ;;  %388 = vst.msk [vmem:[#allocation3 + $0xc8] sm:$0xff] %vm28_vm0, %v8129_v5 }
 0x118   :  { %v1050_v57 = vpop.permute.xlu0 %1049  ;;  %v2457_v15 = vld [vmem:[#allocation3 + $0x28] sm:$0xff] }
 0x119   :  { %1140 = vst.msk [vmem:[#allocation3 + $0x30] sm:$0xff] %vm1133_vm6, %v1050_v57  ;;  %v1052_v16 = vpop.permute.xlu1 %1051  ;;  %6963 = vmatmul.mubr.msk.bf16.gmra.mrb[8].mxu0 %vm2499_vm12, %v2457_v15 }
 0x11a   :  { %1141 = vst.msk [vmem:[#allocation3 + $0x38] sm:$0xff] %vm1133_vm6, %v1052_v16  ;;  %2347 = vrot.lane.b32.xlu0 %v1500_v44, %s7109_s1  ;;  %v733_v16 = vpack.c.bf16 %v687_v12, %v686_v52  ;;  %v1204_v12 = vld [vmem:[#allocation2 + $0x211] sm:$0xff] }
 0x11b   :  { %551 = vrot.lane.b32.xlu1 %v1243_v59, %s7101_s14 }
 0x11c   :  { %v1307_v18 = vpop.permute.xlu0 %1306 }
 0x11d   :  { %1397 = vst.msk [vmem:[#allocation3 + $0x30] sm:$0xff] %vm1390_vm7, %v1307_v18  ;;  %v1309_v20 = vpop.permute.xlu1 %1308  ;;  %v943_v18 = vld [vmem:[#allocation2 + $0x1e0] sm:$0xff] }
 0x11e   :  { %1398 = vst.msk [vmem:[#allocation3 + $0x38] sm:$0xff] %vm1390_vm7, %v1309_v20  ;;  %2349 = vrot.lane.b32.xlu0 %v7838_v17, %s7109_s1  ;;  %v990_v20 = vpack.c.bf16 %v944_v19, %v943_v18  ;;  %v8243_v18 = vpack.c.bf16 %v1205_v14, %v1204_v12  ;;  %v1465_v12 = vld [vmem:[#allocation2 + $0x242] sm:$0xff] }
 0x11f   :  { %553 = vrot.lane.b32.xlu1 %v2015_v10, %s7101_s14  ;;  %v198_v14 = vld [vmem:[%s14342_s0 + $0x1e0] sm:$0xff] }
 0x120   :  { %v1564_v22 = vpop.permute.xlu0 %1563  ;;  %263 = vst.msk [vmem:[#allocation2 + $0x319] sm:$0xff] %vm28_vm0, %v198_v14 }
 0x121   :  { %1654 = vst.msk [vmem:[#allocation3 + $0x30] sm:$0xff] %vm1647_vm8, %v1564_v22  ;;  %v1566_v26 = vpop.permute.xlu1 %1565  ;;  %v1200_v22 = vld [vmem:[#allocation2 + $0x1e1] sm:$0xff] }
 0x122   :  { %1655 = vst.msk [vmem:[#allocation3 + $0x38] sm:$0xff] %vm1647_vm8, %v1566_v26  ;;  %808 = vrot.lane.b32.xlu0 %v1500_v44, %s7102_s15  ;;  %v959_v26 = vld [vmem:[#allocation2 + $0x2a0] sm:$0xff]  ;;  %v8169_v28 = vpack.c.bf16 %v1201_v24, %v1200_v22  ;;  %v195_v24 = vld [vmem:[%s14342_s0 + $0x1c8] sm:$0xff] }
 0x123   :  { %810 = vrot.lane.b32.xlu1 %v7838_v17, %s7102_s15  ;;  %v194_v22 = vld [vmem:[%s14342_s0 + $0x1c0] sm:$0xff]  ;;  %260 = vst.msk [vmem:[#allocation2 + $0x2f1] sm:$0xff] %vm28_vm0, %v195_v24 }
 0x124   :  { %v1822_v60 = vpop.permute.xlu0 %1821  ;;  %259 = vst.msk [vmem:[#allocation2 + $0x2e9] sm:$0xff] %vm28_vm0, %v194_v22  ;;  %v1723_v22 = vld [vmem:[#allocation2 + $0x258] sm:$0xff] }
 0x125   :  { %1912 = vst.msk [vmem:[#allocation3 + $0x30] sm:$0xff] %vm1905_vm9, %v1822_v60  ;;  %v1824_v29 = vpop.permute.xlu1 %1823 }
 0x126   :  { %1913 = vst.msk [vmem:[#allocation3 + $0x38] sm:$0xff] %vm1905_vm9, %v1824_v29  ;;  %1065 = vrot.lane.b32.xlu0 %v7616_v6, %s7103_s16  ;;  %v7879_v6 = vld [vmem:[#allocation2 + $0x1b0] sm:$0xff] }
 0x127   :  { %1067 = vrot.lane.b32.xlu1 %v7859_v27, %s7103_s16  ;;  %v347_v40 = vpack.c.bf16 %v7881_v38, %v7879_v6 }
 0x128   :  { %v2079_v31 = vpop.permute.xlu0 %2078 }
 0x129   :  { %2169 = vst.msk [vmem:[#allocation3 + $0x30] sm:$0xff] %vm2162_vm10, %v2079_v31  ;;  %v2081_v36 = vpop.permute.xlu1 %2080  ;;  %v1458_v31 = vld [vmem:[#allocation2 + $0x1ea] sm:$0xff] }
 0x12a   :  { %2170 = vst.msk [vmem:[#allocation3 + $0x38] sm:$0xff] %vm2162_vm10, %v2081_v36  ;;  %1322 = vrot.lane.b32.xlu0 %v2015_v10, %s7104_s17  ;;  %v685_v10 = vld [vmem:[#allocation2 + $0x1ba] sm:$0xff]  ;;  %v304_v36 = vld [vmem:[#allocation2 + $0x1e8] sm:$0xff] }
 0x12b   :  { %1324 = vrot.lane.b32.xlu1 %v7867_v30, %s7104_s17  ;;  %379 = vst.msk [vmem:[#allocation3 + $0x80] sm:$0xff] %vm28_vm0, %v347_v40  ;;  %v732_v15 = vpack.c.bf16 %v685_v10, %v684_v9  ;;  %v349_v6 = vpack.c.bf16 %v304_v36, %v303_v35  ;;  %v1716_v40 = vld [vmem:[#allocation2 + $0x200] sm:$0xff]  ;;  %v947_v9 = vld [vmem:[#allocation2 + $0x210] sm:$0xff]  ;;  %v948_v10 = vld [vmem:[#allocation2 + $0x218] sm:$0xff] }
 0x12c   :  { %v2336_v32 = vpop.permute.xlu0 %2335 }
 0x12d   :  { %2426 = vst.msk [vmem:[#allocation3 + $0x30] sm:$0xff] %vm2419_vm11, %v2336_v32  ;;  %v7895_v45 = vpop.permute.xlu1 %539 }
 0x12e   :  { %628 = vst.msk [vmem:[#allocation3 + $0x40] sm:$0xff] %vm619_vm4, %v7895_v45  ;;  %1579 = vrot.lane.b32.xlu0 %v7838_v17, %s7105_s18 }
 0x12f   :  { %1581 = vrot.lane.b32.xlu1 %v7886_v39, %s7105_s18  ;;  %381 = vst.msk [vmem:[#allocation3 + $0x90] sm:$0xff] %vm28_vm0, %v349_v6  ;;  %v1976_v6 = vld [vmem:[#allocation2 + $0x229] sm:$0xff] }
 0x130   :  { %v2338_v49 = vpop.permute.xlu0 %2337 }
 0x131   :  { %2427 = vst.msk [vmem:[#allocation3 + $0x38] sm:$0xff] %vm2419_vm11, %v2338_v49  ;;  %v542_v53 = vpop.permute.xlu1 %541 }
 0x132   :  { %629 = vst.msk [vmem:[#allocation3 + $0x48] sm:$0xff] %vm619_vm4, %v542_v53  ;;  %1837 = vrot.lane.b32.xlu0 %v7859_v27, %s7107_s8  ;;  %v960_v27 = vld [vmem:[#allocation2 + $0x2a8] sm:$0xff] }
 0x133   :  { %1839 = vrot.lane.b32.xlu1 %v1760_v48, %s7107_s8  ;;  %v8163_v25 = vpack.c.bf16 %v960_v27, %v959_v26  ;;  %v350_v48 = vpack.c.bf16 %v306_v42, %v305_v41  ;;  %v307_v26 = vld [vmem:[#allocation2 + $0x210] sm:$0xff]  ;;  %v308_v27 = vld [vmem:[#allocation2 + $0x218] sm:$0xff] }
 0x134   :  { %v797_v58 = vpop.permute.xlu0 %796  ;;  %v2458_v59 = vld [vmem:[#allocation3 + $0x30] sm:$0xff] }
 0x135   :  { %885 = vst.msk [vmem:[#allocation3 + $0x40] sm:$0xff] %vm876_vm5, %v797_v58  ;;  %v799_v1 = vpop.permute.xlu1 %798  ;;  %6966 = vmatprep.mubr.msk.bf16.mxu0 %vm2499_vm12, %v2458_v59  ;;  %v2019_v58 = vpack.c.bf16 %v1973_v50, %v1972_v43  ;;  %v2233_v43 = vld [vmem:[#allocation2 + $0x22a] sm:$0xff]  ;;  %v2234_v50 = vld [vmem:[#allocation2 + $0x232] sm:$0xff] }
 0x136   :  { %886 = vst.msk [vmem:[#allocation3 + $0x48] sm:$0xff] %vm876_vm5, %v799_v1  ;;  %2094 = vrot.lane.b32.xlu0 %v7867_v30, %s7108_s9  ;;  %v1457_v30 = vld [vmem:[#allocation2 + $0x1e2] sm:$0xff]  ;;  %v2229_v1 = vld [vmem:[#allocation2 + $0x1fa] sm:$0xff] }
 0x137   :  { %2096 = vrot.lane.b32.xlu1 %v2017_v55, %s7108_s9  ;;  %389 = vst.msk [vmem:[#allocation3 + $0xd0] sm:$0xff] %vm28_vm0, %v8163_v25  ;;  %v8186_v37 = vpack.c.bf16 %v1458_v31, %v1457_v30  ;;  %382 = vst.msk [vmem:[#allocation3 + $0x98] sm:$0xff] %vm28_vm0, %v350_v48  ;;  %v1719_v30 = vld [vmem:[#allocation2 + $0x228] sm:$0xff]  ;;  %v1720_v31 = vld [vmem:[#allocation2 + $0x230] sm:$0xff] }
 0x138   :  { %v1054_v2 = vpop.permute.xlu0 %1053  ;;  %v2459_v44 = vld [vmem:[#allocation3 + $0x38] sm:$0xff]  ;;  %v8268_v35 = vpack.c.bf16 %v1720_v31, %v1719_v30  ;;  %v1981_v31 = vld [vmem:[#allocation2 + $0x261] sm:$0xff] }
 0x139   :  { %1142 = vst.msk [vmem:[#allocation3 + $0x40] sm:$0xff] %vm1133_vm6, %v1054_v2  ;;  %v1056_v7 = vpop.permute.xlu1 %1055  ;;  %6967 = vmatmul.mubr.msk.bf16.gmra.mrb[12].mxu0 %vm2499_vm12, %v2459_v44  ;;  %v1980_v30 = vld [vmem:[#allocation2 + $0x259] sm:$0xff] }
 0x13a   :  { %1143 = vst.msk [vmem:[#allocation3 + $0x48] sm:$0xff] %vm1133_vm6, %v1056_v7  ;;  %2351 = vrot.lane.b32.xlu0 %v7886_v39, %s7109_s1  ;;  %v1715_v39 = vld [vmem:[#allocation2 + $0x1f8] sm:$0xff] }
 0x13b   :  { %555 = vrot.lane.b32.xlu1 %v475_v63, %s7101_s14  ;;  %v8194_v45 = vpack.c.bf16 %v1716_v40, %v1715_v39  ;;  %v2230_v63 = vld [vmem:[#allocation2 + $0x202] sm:$0xff]  ;;  %v193_v7 = vld [vmem:[%s14342_s0 + $0x1b8] sm:$0xff] }
 0x13c   :  { %v1311_v11 = vpop.permute.xlu0 %1310  ;;  %v2276_v44 = vpack.c.bf16 %v2230_v63, %v2229_v1  ;;  %258 = vst.msk [vmem:[#allocation2 + $0x2d9] sm:$0xff] %vm28_vm0, %v193_v7  ;;  %v1735_v39 = vld [vmem:[#allocation2 + $0x2e8] sm:$0xff] }
 0x13d   :  { %1399 = vst.msk [vmem:[#allocation3 + $0x40] sm:$0xff] %vm1390_vm7, %v1311_v11  ;;  %v1313_v57 = vpop.permute.xlu1 %1312  ;;  %v992_v11 = vpack.c.bf16 %v948_v10, %v947_v9  ;;  %v1209_v7 = vld [vmem:[#allocation2 + $0x249] sm:$0xff] }
 0x13e   :  { %1400 = vst.msk [vmem:[#allocation3 + $0x48] sm:$0xff] %vm1390_vm7, %v1313_v57  ;;  %2353 = vrot.lane.b32.xlu0 %v2274_v21, %s7109_s1  ;;  %v963_v57 = vld [vmem:[#allocation2 + $0x2d0] sm:$0xff] }
 0x13f   :  { %557 = vrot.lane.b32.xlu1 %v476_v8, %s7101_s14 }
 0x140   :  { %v1568_v17 = vpop.permute.xlu0 %1567 }
 0x141   :  { %1656 = vst.msk [vmem:[#allocation3 + $0x40] sm:$0xff] %vm1647_vm8, %v1568_v17  ;;  %v1570_v56 = vpop.permute.xlu1 %1569 }
 0x142   :  { %1657 = vst.msk [vmem:[#allocation3 + $0x48] sm:$0xff] %vm1647_vm8, %v1570_v56  ;;  %812 = vrot.lane.b32.xlu0 %v732_v15, %s7102_s15  ;;  %v1461_v56 = vld [vmem:[#allocation2 + $0x212] sm:$0xff] }
 0x143   :  { %814 = vrot.lane.b32.xlu1 %v733_v16, %s7102_s15  ;;  %v964_v15 = vld [vmem:[#allocation2 + $0x2d8] sm:$0xff] }
 0x144   :  { %v1826_v23 = vpop.permute.xlu0 %1825  ;;  %v8237_v17 = vpack.c.bf16 %v964_v15, %v963_v57  ;;  %v199_v15 = vld [vmem:[%s14342_s0 + $0x1e8] sm:$0xff] }
 0x145   :  { %1914 = vst.msk [vmem:[#allocation3 + $0x40] sm:$0xff] %vm1905_vm9, %v1826_v23  ;;  %v1828_v60 = vpop.permute.xlu1 %1827 }
 0x146   :  { %1915 = vst.msk [vmem:[#allocation3 + $0x48] sm:$0xff] %vm1905_vm9, %v1828_v60  ;;  %1069 = vrot.lane.b32.xlu0 %v7688_v46, %s7103_s16  ;;  %v191_v46 = vld [vmem:[%s14342_s0 + $0x1a8] sm:$0xff] }
 0x147   :  { %1071 = vrot.lane.b32.xlu1 %v990_v20, %s7103_s16  ;;  %256 = vst.msk [vmem:[#allocation2 + $0x2c1] sm:$0xff] %vm28_vm0, %v191_v46  ;;  %391 = vst.msk [vmem:[#allocation3 + $0xe0] sm:$0xff] %vm28_vm0, %v8237_v17  ;;  %v310_v46 = vld [vmem:[#allocation2 + $0x230] sm:$0xff] }
 0x148   :  { %v2083_v29 = vpop.permute.xlu0 %2082  ;;  %264 = vst.msk [vmem:[#allocation2 + $0x321] sm:$0xff] %vm28_vm0, %v199_v15 }
 0x149   :  { %2171 = vst.msk [vmem:[#allocation3 + $0x40] sm:$0xff] %vm2162_vm10, %v2083_v29  ;;  %v2085_v34 = vpop.permute.xlu1 %2084 }
 0x14a   :  { %2172 = vst.msk [vmem:[#allocation3 + $0x48] sm:$0xff] %vm2162_vm10, %v2085_v34  ;;  %1326 = vrot.lane.b32.xlu0 %v476_v8, %s7104_s17  ;;  %v309_v34 = vld [vmem:[#allocation2 + $0x228] sm:$0xff] }
 0x14b   :  { %1328 = vrot.lane.b32.xlu1 %v8169_v28, %s7104_s17  ;;  %v352_v36 = vpack.c.bf16 %v310_v46, %v309_v34 }
 0x14c   :  { %v2340_v38 = vpop.permute.xlu0 %2339 }
 0x14d   :  { %2428 = vst.msk [vmem:[#allocation3 + $0x40] sm:$0xff] %vm2419_vm11, %v2340_v38  ;;  %v544_v32 = vpop.permute.xlu1 %543  ;;  %v1977_v38 = vld [vmem:[#allocation2 + $0x231] sm:$0xff] }
 0x14e   :  { %630 = vst.msk [vmem:[#allocation3 + $0x50] sm:$0xff] %vm619_vm4, %v544_v32  ;;  %1583 = vrot.lane.b32.xlu0 %v733_v16, %s7105_s18  ;;  %v1732_v54 = vld [vmem:[#allocation2 + $0x2c0] sm:$0xff]  ;;  %v1736_v32 = vld [vmem:[#allocation2 + $0x2f0] sm:$0xff]  ;;  %v2021_v42 = vpack.c.bf16 %v1977_v38, %v1976_v6 }
 0x14f   :  { %1585 = vrot.lane.b32.xlu1 %v8186_v37, %s7105_s18  ;;  %v8200_v55 = vpack.c.bf16 %v1732_v54, %v1731_v51  ;;  %384 = vst.msk [vmem:[#allocation3 + $0xa8] sm:$0xff] %vm28_vm0, %v352_v36  ;;  %v8274_v41 = vpack.c.bf16 %v1736_v32, %v1735_v39  ;;  %v1740_v46 = vld [vmem:[#allocation2 + $0x320] sm:$0xff]  ;;  %v2023_v36 = vpack.c.bf16 %v1981_v31, %v1980_v30  ;;  %v2241_v31 = vld [vmem:[#allocation2 + $0x28a] sm:$0xff] }
 0x150   :  { %v2342_v49 = vpop.permute.xlu0 %2341  ;;  %v2237_v39 = vld [vmem:[#allocation2 + $0x25a] sm:$0xff] }
 0x151   :  { %2429 = vst.msk [vmem:[#allocation3 + $0x48] sm:$0xff] %vm2419_vm11, %v2342_v49  ;;  %v546_v53 = vpop.permute.xlu1 %545 }
 0x152   :  { %631 = vst.msk [vmem:[#allocation3 + $0x58] sm:$0xff] %vm619_vm4, %v546_v53  ;;  %1841 = vrot.lane.b32.xlu0 %v990_v20, %s7107_s8  ;;  %v1462_v20 = vld [vmem:[#allocation2 + $0x21a] sm:$0xff] }
 0x153   :  { %1843 = vrot.lane.b32.xlu1 %v8194_v45, %s7107_s8  ;;  %390 = vst.msk [vmem:[#allocation3 + $0xd8] sm:$0xff] %vm28_vm0, %v8200_v55  ;;  %v8260_v60 = vpack.c.bf16 %v1462_v20, %v1461_v56  ;;  %392 = vst.msk [vmem:[#allocation3 + $0xe8] sm:$0xff] %vm28_vm0, %v8274_v41 }
 0x154   :  { %v801_v59 = vpop.permute.xlu0 %800  ;;  %v2460_v61 = vld [vmem:[#allocation3 + $0x40] sm:$0xff] }
 0x155   :  { %887 = vst.msk [vmem:[#allocation3 + $0x50] sm:$0xff] %vm876_vm5, %v801_v59  ;;  %v803_v62 = vpop.permute.xlu1 %802  ;;  %6970 = vmatprep.mubr.msk.bf16.mxu0 %vm2499_vm12, %v2460_v61  ;;  %v196_v61 = vld [vmem:[%s14342_s0 + $0x1d0] sm:$0xff] }
 0x156   :  { %888 = vst.msk [vmem:[#allocation3 + $0x58] sm:$0xff] %vm876_vm5, %v803_v62  ;;  %2098 = vrot.lane.b32.xlu0 %v8169_v28, %s7108_s9  ;;  %v197_v62 = vld [vmem:[%s14342_s0 + $0x1d8] sm:$0xff] }
 0x157   :  { %2100 = vrot.lane.b32.xlu1 %v2019_v58, %s7108_s9  ;;  %261 = vst.msk [vmem:[#allocation2 + $0x301] sm:$0xff] %vm28_vm0, %v196_v61  ;;  %262 = vst.msk [vmem:[#allocation2 + $0x309] sm:$0xff] %vm28_vm0, %v197_v62 }
 0x158   :  { %v1058_v47 = vpop.permute.xlu0 %1057  ;;  %v2461_v0 = vld [vmem:[#allocation3 + $0x48] sm:$0xff] }
 0x159   :  { %1144 = vst.msk [vmem:[#allocation3 + $0x50] sm:$0xff] %vm1133_vm6, %v1058_v47  ;;  %v1060_v2 = vpop.permute.xlu1 %1059  ;;  %6971 = vmatmul.mubr.msk.bf16.gmra.mrb[16].mxu0 %vm2499_vm12, %v2461_v0  ;;  %v951_v47 = vld [vmem:[#allocation2 + $0x240] sm:$0xff]  ;;  %v952_v0 = vld [vmem:[#allocation2 + $0x248] sm:$0xff] }
 0x15a   :  { %1145 = vst.msk [vmem:[#allocation3 + $0x58] sm:$0xff] %vm1133_vm6, %v1060_v2  ;;  %2355 = vrot.lane.b32.xlu0 %v8186_v37, %s7109_s1 }
 0x15b   :  { %559 = vrot.lane.b32.xlu1 %v8169_v28, %s7101_s14  ;;  %v351_v28 = vpack.c.bf16 %v308_v27, %v307_v26  ;;  %v313_v26 = vld [vmem:[#allocation2 + $0x258] sm:$0xff]  ;;  %v314_v27 = vld [vmem:[#allocation2 + $0x260] sm:$0xff] }
 0x15c   :  { %v1315_v3 = vpop.permute.xlu0 %1314 }
 0x15d   :  { %1401 = vst.msk [vmem:[#allocation3 + $0x50] sm:$0xff] %vm1390_vm7, %v1315_v3  ;;  %v1317_v21 = vpop.permute.xlu1 %1316  ;;  %v1208_v3 = vld [vmem:[#allocation2 + $0x241] sm:$0xff] }
 0x15e   :  { %1402 = vst.msk [vmem:[#allocation3 + $0x58] sm:$0xff] %vm1390_vm7, %v1317_v21  ;;  %2357 = vrot.lane.b32.xlu0 %v2276_v44, %s7109_s1  ;;  %v967_v21 = vld [vmem:[#allocation2 + $0x300] sm:$0xff] }
 0x15f   :  { %561 = vrot.lane.b32.xlu1 %v2019_v58, %s7101_s14  ;;  %383 = vst.msk [vmem:[#allocation3 + $0xa0] sm:$0xff] %vm28_vm0, %v351_v28  ;;  %v354_v28 = vpack.c.bf16 %v314_v27, %v313_v26 }
 0x160   :  { %v1572_v8 = vpop.permute.xlu0 %1571 }
 0x161   :  { %1658 = vst.msk [vmem:[#allocation3 + $0x50] sm:$0xff] %vm1647_vm8, %v1572_v8  ;;  %v1574_v52 = vpop.permute.xlu1 %1573  ;;  %v968_v8 = vld [vmem:[#allocation2 + $0x308] sm:$0xff] }
 0x162   :  { %1659 = vst.msk [vmem:[#allocation3 + $0x58] sm:$0xff] %vm1647_vm8, %v1574_v52  ;;  %816 = vrot.lane.b32.xlu0 %v8186_v37, %s7102_s15  ;;  %v8311_v10 = vpack.c.bf16 %v968_v8, %v967_v21  ;;  %v8317_v52 = vpack.c.bf16 %v1209_v7, %v1208_v3  ;;  %v1470_v3 = vld [vmem:[#allocation2 + $0x27a] sm:$0xff]  ;;  %v315_v7 = vld [vmem:[#allocation2 + $0x270] sm:$0xff] }
 0x163   :  { %818 = vrot.lane.b32.xlu1 %v2276_v44, %s7102_s15  ;;  %386 = vst.msk [vmem:[#allocation3 + $0xb8] sm:$0xff] %vm28_vm0, %v354_v28  ;;  %v316_v21 = vld [vmem:[#allocation2 + $0x278] sm:$0xff] }
 0x164   :  { %v1830_v13 = vpop.permute.xlu0 %1829  ;;  %393 = vst.msk [vmem:[#allocation3 + $0xf0] sm:$0xff] %vm28_vm0, %v8311_v10 }
 0x165   :  { %1916 = vst.msk [vmem:[#allocation3 + $0x50] sm:$0xff] %vm1905_vm9, %v1830_v13  ;;  %v1832_v16 = vpop.permute.xlu1 %1831  ;;  %v1466_v13 = vld [vmem:[#allocation2 + $0x24a] sm:$0xff] }
 0x166   :  { %1917 = vst.msk [vmem:[#allocation3 + $0x58] sm:$0xff] %vm1905_vm9, %v1832_v16  ;;  %1073 = vrot.lane.b32.xlu0 %v8194_v45, %s7103_s16  ;;  %v311_v16 = vld [vmem:[#allocation2 + $0x240] sm:$0xff] }
 0x167   :  { %1075 = vrot.lane.b32.xlu1 %v992_v11, %s7103_s16 }
 0x168   :  { %v2087_v19 = vpop.permute.xlu0 %2086 }
 0x169   :  { %2173 = vst.msk [vmem:[#allocation3 + $0x50] sm:$0xff] %vm2162_vm10, %v2087_v19  ;;  %v2089_v23 = vpop.permute.xlu1 %2088  ;;  %v8334_v19 = vpack.c.bf16 %v1466_v13, %v1465_v12 }
 0x16a   :  { %2174 = vst.msk [vmem:[#allocation3 + $0x58] sm:$0xff] %vm2162_vm10, %v2089_v23  ;;  %1330 = vrot.lane.b32.xlu0 %v2019_v58, %s7104_s17  ;;  %v2278_v58 = vpack.c.bf16 %v2234_v50, %v2233_v43  ;;  %v1724_v23 = vld [vmem:[#allocation2 + $0x260] sm:$0xff]  ;;  %v200_v43 = vld [vmem:[%s14342_s0 + $0x1f0] sm:$0xff]  ;;  %v201_v50 = vld [vmem:[%s14342_s0 + $0x1f8] sm:$0xff] }
 0x16b   :  { %1332 = vrot.lane.b32.xlu1 %v8243_v18, %s7104_s17  ;;  %265 = vst.msk [vmem:[#allocation2 + $0x331] sm:$0xff] %vm28_vm0, %v200_v43  ;;  %266 = vst.msk [vmem:[#allocation2 + $0x339] sm:$0xff] %vm28_vm0, %v201_v50  ;;  %v1473_v50 = vld [vmem:[#allocation2 + $0x2a2] sm:$0xff] }
 0x16c   :  { %v2344_v29 = vpop.permute.xlu0 %2343 }
 0x16d   :  { %2430 = vst.msk [vmem:[#allocation3 + $0x50] sm:$0xff] %vm2419_vm11, %v2344_v29  ;;  %v548_v33 = vpop.permute.xlu1 %547 }
 0x16e   :  { %632 = vst.msk [vmem:[#allocation3 + $0x60] sm:$0xff] %vm619_vm4, %v548_v33  ;;  %1587 = vrot.lane.b32.xlu0 %v2276_v44, %s7105_s18  ;;  %v994_v44 = vpack.c.bf16 %v952_v0, %v951_v47  ;;  %v1739_v33 = vld [vmem:[#allocation2 + $0x318] sm:$0xff] }
 0x16f   :  { %1589 = vrot.lane.b32.xlu1 %v8260_v60, %s7105_s18 }
 0x170   :  { %v2346_v37 = vpop.permute.xlu0 %2345 }
 0x171   :  { %2431 = vst.msk [vmem:[#allocation3 + $0x58] sm:$0xff] %vm2419_vm11, %v2346_v37  ;;  %v550_v40 = vpop.permute.xlu1 %549 }
 0x172   :  { %633 = vst.msk [vmem:[#allocation3 + $0x68] sm:$0xff] %vm619_vm4, %v550_v40  ;;  %1845 = vrot.lane.b32.xlu0 %v992_v11, %s7107_s8  ;;  %v2238_v40 = vld [vmem:[#allocation2 + $0x262] sm:$0xff] }
 0x173   :  { %1847 = vrot.lane.b32.xlu1 %v8268_v35, %s7107_s8 }
 0x174   :  { %v805_v45 = vpop.permute.xlu0 %804  ;;  %v2462_v48 = vld [vmem:[#allocation3 + $0x50] sm:$0xff] }
 0x175   :  { %889 = vst.msk [vmem:[#allocation3 + $0x60] sm:$0xff] %vm876_vm5, %v805_v45  ;;  %v807_v49 = vpop.permute.xlu1 %806  ;;  %6974 = vmatprep.mubr.msk.bf16.mxu0 %vm2499_vm12, %v2462_v48  ;;  %v2280_v48 = vpack.c.bf16 %v2238_v40, %v2237_v39 }
 0x176   :  { %890 = vst.msk [vmem:[#allocation3 + $0x68] sm:$0xff] %vm876_vm5, %v807_v49  ;;  %2102 = vrot.lane.b32.xlu0 %v8243_v18, %s7108_s9 }
 0x177   :  { %2104 = vrot.lane.b32.xlu1 %v2021_v42, %s7108_s9 }
 0x178   :  { %v1062_v51 = vpop.permute.xlu0 %1061  ;;  %v2463_v53 = vld [vmem:[#allocation3 + $0x58] sm:$0xff] }
 0x179   :  { %1146 = vst.msk [vmem:[#allocation3 + $0x60] sm:$0xff] %vm1133_vm6, %v1062_v51  ;;  %v1064_v54 = vpop.permute.xlu1 %1063  ;;  %6975 = vmatmul.mubr.msk.bf16.gmra.mrb[20].mxu0 %vm2499_vm12, %v2463_v53 }
 0x17a   :  { %1147 = vst.msk [vmem:[#allocation3 + $0x68] sm:$0xff] %vm1133_vm6, %v1064_v54  ;;  %2359 = vrot.lane.b32.xlu0 %v8260_v60, %s7109_s1  ;;  %v955_v54 = vld [vmem:[#allocation2 + $0x270] sm:$0xff] }
 0x17b   :  { %563 = vrot.lane.b32.xlu1 %v8243_v18, %s7101_s14  ;;  %v312_v18 = vld [vmem:[#allocation2 + $0x248] sm:$0xff] }
 0x17c   :  { %v1319_v59 = vpop.permute.xlu0 %1318  ;;  %v353_v56 = vpack.c.bf16 %v312_v18, %v311_v16 }
 0x17d   :  { %1403 = vst.msk [vmem:[#allocation3 + $0x60] sm:$0xff] %vm1390_vm7, %v1319_v59  ;;  %v1321_v1 = vpop.permute.xlu1 %1320 }
 0x17e   :  { %1404 = vst.msk [vmem:[#allocation3 + $0x68] sm:$0xff] %vm1390_vm7, %v1321_v1  ;;  %2361 = vrot.lane.b32.xlu0 %v2278_v58, %s7109_s1  ;;  %v1212_v1 = vld [vmem:[#allocation2 + $0x271] sm:$0xff] }
 0x17f   :  { %565 = vrot.lane.b32.xlu1 %v2021_v42, %s7101_s14  ;;  %385 = vst.msk [vmem:[#allocation3 + $0xb0] sm:$0xff] %vm28_vm0, %v353_v56  ;;  %v1985_v56 = vld [vmem:[#allocation2 + $0x291] sm:$0xff] }
 0x180   :  { %v1576_v63 = vpop.permute.xlu0 %1575 }
 0x181   :  { %1660 = vst.msk [vmem:[#allocation3 + $0x60] sm:$0xff] %vm1647_vm8, %v1576_v63  ;;  %v1578_v2 = vpop.permute.xlu1 %1577  ;;  %v1213_v63 = vld [vmem:[#allocation2 + $0x279] sm:$0xff] }
 0x182   :  { %1661 = vst.msk [vmem:[#allocation3 + $0x68] sm:$0xff] %vm1647_vm8, %v1578_v2  ;;  %820 = vrot.lane.b32.xlu0 %v8260_v60, %s7102_s15  ;;  %v1766_v60 = vpack.c.bf16 %v1724_v23, %v1723_v22  ;;  %v1253_v0 = vpack.c.bf16 %v1213_v63, %v1212_v1 }
 0x183   :  { %822 = vrot.lane.b32.xlu1 %v2278_v58, %s7102_s15 }
 0x184   :  { %v1834_v4 = vpop.permute.xlu0 %1833 }
 0x185   :  { %1918 = vst.msk [vmem:[#allocation3 + $0x60] sm:$0xff] %vm1905_vm9, %v1834_v4  ;;  %v1836_v9 = vpop.permute.xlu1 %1835 }
 0x186   :  { %1919 = vst.msk [vmem:[#allocation3 + $0x68] sm:$0xff] %vm1905_vm9, %v1836_v9  ;;  %1077 = vrot.lane.b32.xlu0 %v8268_v35, %s7103_s16  ;;  %v8346_v35 = vpack.c.bf16 %v1740_v46, %v1739_v33  ;;  %v355_v9 = vpack.c.bf16 %v316_v21, %v315_v7  ;;  %v2242_v33 = vld [vmem:[#allocation2 + $0x292] sm:$0xff] }
 0x187   :  { %1079 = vrot.lane.b32.xlu1 %v994_v44, %s7103_s16 }
 0x188   :  { %v2091_v11 = vpop.permute.xlu0 %2090  ;;  %394 = vst.msk [vmem:[#allocation3 + $0xf8] sm:$0xff] %vm28_vm0, %v8346_v35  ;;  %387 = vst.msk [vmem:[#allocation3 + $0xc0] sm:$0xff] %vm28_vm0, %v355_v9 }
 0x189   :  { %2175 = vst.msk [vmem:[#allocation3 + $0x60] sm:$0xff] %vm2162_vm10, %v2091_v11  ;;  %v2093_v57 = vpop.permute.xlu1 %2092 }
 0x18a   :  { %2176 = vst.msk [vmem:[#allocation3 + $0x68] sm:$0xff] %vm2162_vm10, %v2093_v57  ;;  %1334 = vrot.lane.b32.xlu0 %v2021_v42, %s7104_s17 }
 0x18b   :  { %1336 = vrot.lane.b32.xlu1 %v8317_v52, %s7104_s17 }
 0x18c   :  { %v2348_v20 = vpop.permute.xlu0 %2347 }
 0x18d   :  { %2432 = vst.msk [vmem:[#allocation3 + $0x60] sm:$0xff] %vm2419_vm11, %v2348_v20  ;;  %v552_v24 = vpop.permute.xlu1 %551 }
 0x18e   :  { %634 = vst.msk [vmem:[#allocation3 + $0x70] sm:$0xff] %vm619_vm4, %v552_v24  ;;  %1591 = vrot.lane.b32.xlu0 %v2278_v58, %s7105_s18  ;;  %v956_v58 = vld [vmem:[#allocation2 + $0x278] sm:$0xff] }
 0x18f   :  { %1593 = vrot.lane.b32.xlu1 %v8334_v19, %s7105_s18  ;;  %v996_v61 = vpack.c.bf16 %v956_v58, %v955_v54 }
 0x190   :  { %v2350_v29 = vpop.permute.xlu0 %2349 }
 0x191   :  { %2433 = vst.msk [vmem:[#allocation3 + $0x68] sm:$0xff] %vm2419_vm11, %v2350_v29  ;;  %v554_v34 = vpop.permute.xlu1 %553 }
 0x192   :  { %635 = vst.msk [vmem:[#allocation3 + $0x78] sm:$0xff] %vm619_vm4, %v554_v34  ;;  %1849 = vrot.lane.b32.xlu0 %v994_v44, %s7107_s8  ;;  %v1469_v44 = vld [vmem:[#allocation2 + $0x272] sm:$0xff] }
 0x193   :  { %1851 = vrot.lane.b32.xlu1 %v1766_v60, %s7107_s8  ;;  %v1510_v8 = vpack.c.bf16 %v1470_v3, %v1469_v44  ;;  %v1988_v44 = vld [vmem:[#allocation2 + $0x2b9] sm:$0xff]  ;;  %v1989_v3 = vld [vmem:[#allocation2 + $0x2c1] sm:$0xff] }
 0x194   :  { %v809_v37 = vpop.permute.xlu0 %808  ;;  %v2464_v6 = vld [vmem:[#allocation3 + $0x60] sm:$0xff]  ;;  %v2027_v9 = vpack.c.bf16 %v1989_v3, %v1988_v44 }
 0x195   :  { %891 = vst.msk [vmem:[#allocation3 + $0x70] sm:$0xff] %vm876_vm5, %v809_v37  ;;  %v811_v38 = vpop.permute.xlu1 %810  ;;  %6978 = vmatprep.mubr.msk.bf16.mxu0 %vm2499_vm12, %v2464_v6  ;;  %v2282_v37 = vpack.c.bf16 %v2242_v33, %v2241_v31 }
 0x196   :  { %892 = vst.msk [vmem:[#allocation3 + $0x78] sm:$0xff] %vm876_vm5, %v811_v38  ;;  %2106 = vrot.lane.b32.xlu0 %v8317_v52, %s7108_s9 }
 0x197   :  { %2108 = vrot.lane.b32.xlu1 %v2023_v36, %s7108_s9 }
 0x198   :  { %v1066_v32 = vpop.permute.xlu0 %1065  ;;  %v2465_v42 = vld [vmem:[#allocation3 + $0x68] sm:$0xff] }
 0x199   :  { %1148 = vst.msk [vmem:[#allocation3 + $0x70] sm:$0xff] %vm1133_vm6, %v1066_v32  ;;  %v1068_v45 = vpop.permute.xlu1 %1067  ;;  %6979 = vmatmul.mubr.msk.bf16.gmra.mrb[24].mxu0 %vm2499_vm12, %v2465_v42  ;;  %v1216_v42 = vld [vmem:[#allocation2 + $0x2a1] sm:$0xff] }
 0x19a   :  { %1149 = vst.msk [vmem:[#allocation3 + $0x78] sm:$0xff] %vm1133_vm6, %v1068_v45  ;;  %2363 = vrot.lane.b32.xlu0 %v8334_v19, %s7109_s1  ;;  %v1217_v45 = vld [vmem:[#allocation2 + $0x2a9] sm:$0xff] }
 0x19b   :  { %567 = vrot.lane.b32.xlu1 %v8317_v52, %s7101_s14 }
 0x19c   :  { %v1323_v49 = vpop.permute.xlu0 %1322 }
 0x19d   :  { %1405 = vst.msk [vmem:[#allocation3 + $0x70] sm:$0xff] %vm1390_vm7, %v1323_v49  ;;  %v1325_v51 = vpop.permute.xlu1 %1324  ;;  %v1255_v49 = vpack.c.bf16 %v1217_v45, %v1216_v42 }
 0x19e   :  { %1406 = vst.msk [vmem:[#allocation3 + $0x78] sm:$0xff] %vm1390_vm7, %v1325_v51  ;;  %2365 = vrot.lane.b32.xlu0 %v2280_v48, %s7109_s1  ;;  %v1474_v51 = vld [vmem:[#allocation2 + $0x2aa] sm:$0xff] }
 0x19f   :  { %569 = vrot.lane.b32.xlu1 %v2023_v36, %s7101_s14  ;;  %v1512_v54 = vpack.c.bf16 %v1474_v51, %v1473_v50  ;;  %v1992_v50 = vld [vmem:[#allocation2 + $0x2e9] sm:$0xff]  ;;  %v1993_v51 = vld [vmem:[#allocation2 + $0x2f1] sm:$0xff] }
 0x1a0   :  { %v1580_v53 = vpop.permute.xlu0 %1579 }
 0x1a1   :  { %1662 = vst.msk [vmem:[#allocation3 + $0x70] sm:$0xff] %vm1647_vm8, %v1580_v53  ;;  %v1582_v59 = vpop.permute.xlu1 %1581 }
 0x1a2   :  { %1663 = vst.msk [vmem:[#allocation3 + $0x78] sm:$0xff] %vm1647_vm8, %v1582_v59  ;;  %824 = vrot.lane.b32.xlu0 %v8334_v19, %s7102_s15  ;;  %v1984_v19 = vld [vmem:[#allocation2 + $0x289] sm:$0xff] }
 0x1a3   :  { %826 = vrot.lane.b32.xlu1 %v2280_v48, %s7102_s15  ;;  %v2025_v26 = vpack.c.bf16 %v1985_v56, %v1984_v19  ;;  %v2246_v19 = vld [vmem:[#allocation2 + $0x2c2] sm:$0xff] }
 0x1a4   :  { %v1838_v62 = vpop.permute.xlu0 %1837 }
 0x1a5   :  { %1920 = vst.msk [vmem:[#allocation3 + $0x70] sm:$0xff] %vm1905_vm9, %v1838_v62  ;;  %v1840_v47 = vpop.permute.xlu1 %1839 }
 0x1a6   :  { %1921 = vst.msk [vmem:[#allocation3 + $0x78] sm:$0xff] %vm1905_vm9, %v1840_v47  ;;  %1081 = vrot.lane.b32.xlu0 %v1766_v60, %s7103_s16 }
 0x1a7   :  { %1083 = vrot.lane.b32.xlu1 %v996_v61, %s7103_s16 }
 0x1a8   :  { %v2095_v2 = vpop.permute.xlu0 %2094 }
 0x1a9   :  { %2177 = vst.msk [vmem:[#allocation3 + $0x70] sm:$0xff] %vm2162_vm10, %v2095_v2  ;;  %v2097_v4 = vpop.permute.xlu1 %2096 }
 0x1aa   :  { %2178 = vst.msk [vmem:[#allocation3 + $0x78] sm:$0xff] %vm2162_vm10, %v2097_v4  ;;  %1338 = vrot.lane.b32.xlu0 %v2023_v36, %s7104_s17 }
 0x1ab   :  { %1340 = vrot.lane.b32.xlu1 %v1253_v0, %s7104_s17 }
 0x1ac   :  { %v2352_v52 = vpop.permute.xlu0 %2351  ;;  %v8389_v11 = vpop.f32.mrb[0].mxu0 }
 0x1ad   :  { %2434 = vst.msk [vmem:[#allocation3 + $0x70] sm:$0xff] %vm2419_vm11, %v2352_v52  ;;  %v556_v12 = vpop.permute.xlu1 %555  ;;  %v8392_v13 = vpop.f32.mrb[1].mxu0  ;;  %v2898_v23 = vsel %vm2894_vm13, %v8389_v11, 0.0 }
 0x1ae   :  { %636 = vst.msk [vmem:[#allocation3 + $0x80] sm:$0xff] %vm619_vm4, %v556_v12  ;;  %1595 = vrot.lane.b32.xlu0 %v2280_v48, %s7105_s18  ;;  %v8397_v14 = vpop.f32.mrb[2].mxu0  ;;  %v2895_v15 = vsel %vm2894_vm13, %v8392_v13, 0.0 }
 0x1af   :  { %1597 = vrot.lane.b32.xlu1 %v1510_v8, %s7105_s18  ;;  %v8400_v57 = vpop.f32.mrb[3].mxu0  ;;  %v2900_v27 = vsel %vm2894_vm13, %v8397_v14, 0.0 }
 0x1b0   :  { %v2896_v16 = vsel %vm2894_vm13, %v8400_v57, 0.0  ;;  %v2354_v18 = vpop.permute.xlu0 %2353 }
 0x1b1   :  { %v2897_v20 = vadd.f32 %v2896_v16, %v2895_v15  ;;  %2435 = vst.msk [vmem:[#allocation3 + $0x78] sm:$0xff] %vm2419_vm11, %v2354_v18  ;;  %v558_v22 = vpop.permute.xlu1 %557 }
 0x1b2   :  { %637 = vst.msk [vmem:[#allocation3 + $0x88] sm:$0xff] %vm619_vm4, %v558_v22  ;;  %1853 = vrot.lane.b32.xlu0 %v996_v61, %s7107_s8 }
 0x1b3   :  { %v2899_v24 = vadd.f32 %v2898_v23, %v2897_v20  ;;  %1855 = vrot.lane.b32.xlu1 %v8129_v5, %s7107_s8 }
 0x1b4   :  { %v813_v60 = vpop.permute.xlu0 %812  ;;  %v2466_v28 = vld [vmem:[#allocation3 + $0x70] sm:$0xff] }
 0x1b5   :  { %893 = vst.msk [vmem:[#allocation3 + $0x80] sm:$0xff] %vm876_vm5, %v813_v60  ;;  %v815_v29 = vpop.permute.xlu1 %814  ;;  %6982 = vmatprep.mubr.msk.bf16.mxu0 %vm2499_vm12, %v2466_v28  ;;  %v2901_v30 = vadd.f32 %v2900_v27, %v2899_v24 }
 0x1b6   :  { %894 = vst.msk [vmem:[#allocation3 + $0x88] sm:$0xff] %vm876_vm5, %v815_v29  ;;  %2110 = vrot.lane.b32.xlu0 %v1253_v0, %s7108_s9  ;;  %v1220_v29 = vld [vmem:[#allocation2 + $0x2d1] sm:$0xff] }
 0x1b7   :  { %2112 = vrot.lane.b32.xlu1 %v2025_v26, %s7108_s9 }
 0x1b8   :  { %v1070_v34 = vpop.permute.xlu0 %1069  ;;  %v2467_v46 = vld [vmem:[#allocation3 + $0x78] sm:$0xff] }
 0x1b9   :  { %1150 = vst.msk [vmem:[#allocation3 + $0x80] sm:$0xff] %vm1133_vm6, %v1070_v34  ;;  %v1072_v36 = vpop.permute.xlu1 %1071  ;;  %6983 = vmatmul.mubr.msk.bf16.gmra.mrb[28].mxu0 %vm2499_vm12, %v2467_v46  ;;  %v1477_v46 = vld [vmem:[#allocation2 + $0x2d2] sm:$0xff] }
 0x1ba   :  { %1151 = vst.msk [vmem:[#allocation3 + $0x88] sm:$0xff] %vm1133_vm6, %v1072_v36  ;;  %2367 = vrot.lane.b32.xlu0 %v1510_v8, %s7109_s1  ;;  %v1478_v36 = vld [vmem:[#allocation2 + $0x2da] sm:$0xff] }
 0x1bb   :  { %571 = vrot.lane.b32.xlu1 %v1253_v0, %s7101_s14 }
 0x1bc   :  { %v1327_v6 = vpop.permute.xlu0 %1326 }
 0x1bd   :  { %1407 = vst.msk [vmem:[#allocation3 + $0x80] sm:$0xff] %vm1390_vm7, %v1327_v6  ;;  %v1329_v38 = vpop.permute.xlu1 %1328  ;;  %v1514_v6 = vpack.c.bf16 %v1478_v36, %v1477_v46 }
 0x1be   :  { %1408 = vst.msk [vmem:[#allocation3 + $0x88] sm:$0xff] %vm1390_vm7, %v1329_v38  ;;  %2369 = vrot.lane.b32.xlu0 %v2282_v37, %s7109_s1 }
 0x1bf   :  { %573 = vrot.lane.b32.xlu1 %v2025_v26, %s7101_s14 }
 0x1c0   :  { %v1584_v39 = vpop.permute.xlu0 %1583 }
 0x1c1   :  { %1664 = vst.msk [vmem:[#allocation3 + $0x80] sm:$0xff] %vm1647_vm8, %v1584_v39  ;;  %v1586_v40 = vpop.permute.xlu1 %1585 }
 0x1c2   :  { %1665 = vst.msk [vmem:[#allocation3 + $0x88] sm:$0xff] %vm1647_vm8, %v1586_v40  ;;  %828 = vrot.lane.b32.xlu0 %v1510_v8, %s7102_s15 }
 0x1c3   :  { %830 = vrot.lane.b32.xlu1 %v2282_v37, %s7102_s15 }
 0x1c4   :  { %v1842_v32 = vpop.permute.xlu0 %1841 }
 0x1c5   :  { %1922 = vst.msk [vmem:[#allocation3 + $0x80] sm:$0xff] %vm1905_vm9, %v1842_v32  ;;  %v1844_v48 = vpop.permute.xlu1 %1843 }
 0x1c6   :  { %1923 = vst.msk [vmem:[#allocation3 + $0x88] sm:$0xff] %vm1905_vm9, %v1844_v48  ;;  %1085 = vrot.lane.b32.xlu0 %v8129_v5, %s7103_s16 }
 0x1c7   :  { %1087 = vrot.lane.b32.xlu1 %v8163_v25, %s7103_s16 }
 0x1c8   :  { %v2099_v43 = vpop.permute.xlu0 %2098 }
 0x1c9   :  { %2179 = vst.msk [vmem:[#allocation3 + $0x80] sm:$0xff] %vm2162_vm10, %v2099_v43  ;;  %v2101_v53 = vpop.permute.xlu1 %2100 }
 0x1ca   :  { %2180 = vst.msk [vmem:[#allocation3 + $0x88] sm:$0xff] %vm2162_vm10, %v2101_v53  ;;  %1342 = vrot.lane.b32.xlu0 %v2025_v26, %s7104_s17 }
 0x1cb   :  { %1344 = vrot.lane.b32.xlu1 %v1255_v49, %s7104_s17 }
 0x1cc   :  { %v2356_v58 = vpop.permute.xlu0 %2355  ;;  %v8443_v59 = vpop.f32.mrb[4].mxu0 }
 0x1cd   :  { %2436 = vst.msk [vmem:[#allocation3 + $0x80] sm:$0xff] %vm2419_vm11, %v2356_v58  ;;  %v560_v5 = vpop.permute.xlu1 %559  ;;  %v8446_v61 = vpop.f32.mrb[5].mxu0  ;;  %v2906_v21 = vsel %vm2894_vm13, %v8443_v59, 0.0 }
 0x1ce   :  { %638 = vst.msk [vmem:[#allocation3 + $0x90] sm:$0xff] %vm619_vm4, %v560_v5  ;;  %v2902_v62 = vsel %vm2894_vm13, %v8446_v61, 0.0  ;;  %1599 = vrot.lane.b32.xlu0 %v2282_v37, %s7105_s18  ;;  %v8452_v1 = vpop.f32.mrb[6].mxu0 }
 0x1cf   :  { %v2903_v63 = vadd.f32 %v2902_v62, %v2901_v30  ;;  %1601 = vrot.lane.b32.xlu1 %v1512_v54, %s7105_s18  ;;  %v8455_v47 = vpop.f32.mrb[7].mxu0  ;;  %v2908_v52 = vsel %vm2894_vm13, %v8452_v1, 0.0  ;;  %v1221_v30 = vld [vmem:[#allocation2 + $0x2d9] sm:$0xff]  ;;  %v2029_v62 = vpack.c.bf16 %v1993_v51, %v1992_v50 }
 0x1d0   :  { %v2904_v0 = vsel %vm2894_vm13, %v8455_v47, 0.0  ;;  %v2358_v2 = vpop.permute.xlu0 %2357  ;;  %v1257_v33 = vpack.c.bf16 %v1221_v30, %v1220_v29 }
 0x1d1   :  { %v2905_v4 = vadd.f32 %v2904_v0, %v2903_v63  ;;  %2437 = vst.msk [vmem:[#allocation3 + $0x88] sm:$0xff] %vm2419_vm11, %v2358_v2  ;;  %v562_v7 = vpop.permute.xlu1 %561 }
 0x1d2   :  { %639 = vst.msk [vmem:[#allocation3 + $0x98] sm:$0xff] %vm619_vm4, %v562_v7  ;;  %1857 = vrot.lane.b32.xlu0 %v8163_v25, %s7107_s8  ;;  %v2245_v25 = vld [vmem:[#allocation2 + $0x2ba] sm:$0xff] }
 0x1d3   :  { %v2907_v8 = vadd.f32 %v2906_v21, %v2905_v4  ;;  %1859 = vrot.lane.b32.xlu1 %v8200_v55, %s7107_s8  ;;  %v2284_v23 = vpack.c.bf16 %v2246_v19, %v2245_v25  ;;  %v2250_v4 = vld [vmem:[#allocation2 + $0x2f2] sm:$0xff]  ;;  %v1224_v25 = vld [vmem:[#allocation2 + $0x301] sm:$0xff]  ;;  %v1225_v19 = vld [vmem:[#allocation2 + $0x309] sm:$0xff] }
 0x1d4   :  { %v817_v12 = vpop.permute.xlu0 %816  ;;  %v2468_v15 = vld [vmem:[#allocation3 + $0x80] sm:$0xff] }
 0x1d5   :  { %895 = vst.msk [vmem:[#allocation3 + $0x90] sm:$0xff] %vm876_vm5, %v817_v12  ;;  %v819_v16 = vpop.permute.xlu1 %818  ;;  %6986 = vmatprep.mubr.msk.bf16.mxu1 %vm2499_vm12, %v2468_v15  ;;  %v2909_v18 = vadd.f32 %v2908_v52, %v2907_v8 }
 0x1d6   :  { %896 = vst.msk [vmem:[#allocation3 + $0x98] sm:$0xff] %vm876_vm5, %v819_v16  ;;  %2114 = vrot.lane.b32.xlu0 %v1255_v49, %s7108_s9 }
 0x1d7   :  { %2116 = vrot.lane.b32.xlu1 %v2027_v9, %s7108_s9 }
 0x1d8   :  { %v1074_v56 = vpop.permute.xlu0 %1073  ;;  %v2469_v20 = vld [vmem:[#allocation3 + $0x88] sm:$0xff] }
 0x1d9   :  { %1152 = vst.msk [vmem:[#allocation3 + $0x90] sm:$0xff] %vm1133_vm6, %v1074_v56  ;;  %v1076_v22 = vpop.permute.xlu1 %1075  ;;  %6987 = vmatmul.mubr.msk.bf16.vlgmr.msra.gmra.mrb[0].mxu1 %vm2499_vm12, %v2469_v20  ;;  %v1259_v20 = vpack.c.bf16 %v1225_v19, %v1224_v25  ;;  %v1486_v25 = vld [vmem:[#allocation2 + $0x33a] sm:$0xff] }
 0x1da   :  { %1153 = vst.msk [vmem:[#allocation3 + $0x98] sm:$0xff] %vm1133_vm6, %v1076_v22  ;;  %2371 = vrot.lane.b32.xlu0 %v1512_v54, %s7109_s1 }
 0x1db   :  { %575 = vrot.lane.b32.xlu1 %v1255_v49, %s7101_s14 }
 0x1dc   :  { %v1331_v24 = vpop.permute.xlu0 %1330 }
 0x1dd   :  { %1409 = vst.msk [vmem:[#allocation3 + $0x90] sm:$0xff] %vm1390_vm7, %v1331_v24  ;;  %v1333_v26 = vpop.permute.xlu1 %1332  ;;  %v1482_v24 = vld [vmem:[#allocation2 + $0x30a] sm:$0xff] }
 0x1de   :  { %1410 = vst.msk [vmem:[#allocation3 + $0x98] sm:$0xff] %vm1390_vm7, %v1333_v26  ;;  %2373 = vrot.lane.b32.xlu0 %v2284_v23, %s7109_s1 }
 0x1df   :  { %577 = vrot.lane.b32.xlu1 %v2027_v9, %s7101_s14 }
 0x1e0   :  { %v1588_v27 = vpop.permute.xlu0 %1587 }
 0x1e1   :  { %1666 = vst.msk [vmem:[#allocation3 + $0x90] sm:$0xff] %vm1647_vm8, %v1588_v27  ;;  %v1590_v60 = vpop.permute.xlu1 %1589 }
 0x1e2   :  { %1667 = vst.msk [vmem:[#allocation3 + $0x98] sm:$0xff] %vm1647_vm8, %v1590_v60  ;;  %832 = vrot.lane.b32.xlu0 %v1512_v54, %s7102_s15 }
 0x1e3   :  { %834 = vrot.lane.b32.xlu1 %v2284_v23, %s7102_s15 }
 0x1e4   :  { %v1846_v28 = vpop.permute.xlu0 %1845 }
 0x1e5   :  { %1924 = vst.msk [vmem:[#allocation3 + $0x90] sm:$0xff] %vm1905_vm9, %v1846_v28  ;;  %v1848_v31 = vpop.permute.xlu1 %1847 }
 0x1e6   :  { %1925 = vst.msk [vmem:[#allocation3 + $0x98] sm:$0xff] %vm1905_vm9, %v1848_v31  ;;  %1089 = vrot.lane.b32.xlu0 %v8200_v55, %s7103_s16 }
 0x1e7   :  { %1091 = vrot.lane.b32.xlu1 %v8237_v17, %s7103_s16 }
 0x1e8   :  { %v2103_v34 = vpop.permute.xlu0 %2102 }
 0x1e9   :  { %2181 = vst.msk [vmem:[#allocation3 + $0x90] sm:$0xff] %vm2162_vm10, %v2103_v34  ;;  %v2105_v37 = vpop.permute.xlu1 %2104 }
 0x1ea   :  { %2182 = vst.msk [vmem:[#allocation3 + $0x98] sm:$0xff] %vm2162_vm10, %v2105_v37  ;;  %1346 = vrot.lane.b32.xlu0 %v2027_v9, %s7104_s17  ;;  %v1996_v37 = vld [vmem:[#allocation2 + $0x319] sm:$0xff] }
 0x1eb   :  { %1348 = vrot.lane.b32.xlu1 %v1257_v33, %s7104_s17 }
 0x1ec   :  { %v2360_v38 = vpop.permute.xlu0 %2359  ;;  %v8497_v39 = vpop.f32.mrb[8].mxu0 }
 0x1ed   :  { %2438 = vst.msk [vmem:[#allocation3 + $0x90] sm:$0xff] %vm2419_vm11, %v2360_v38  ;;  %v564_v55 = vpop.permute.xlu1 %563  ;;  %v8500_v40 = vpop.f32.mrb[9].mxu0  ;;  %v2914_v58 = vsel %vm2894_vm13, %v8497_v39, 0.0 }
 0x1ee   :  { %640 = vst.msk [vmem:[#allocation3 + $0xa0] sm:$0xff] %vm619_vm4, %v564_v55  ;;  %v2910_v32 = vsel %vm2894_vm13, %v8500_v40, 0.0  ;;  %1603 = vrot.lane.b32.xlu0 %v2284_v23, %s7105_s18  ;;  %v8506_v42 = vpop.f32.mrb[10].mxu0  ;;  %v1481_v23 = vld [vmem:[#allocation2 + $0x302] sm:$0xff] }
 0x1ef   :  { %v2911_v45 = vadd.f32 %v2910_v32, %v2909_v18  ;;  %1605 = vrot.lane.b32.xlu1 %v1514_v6, %s7105_s18  ;;  %v8509_v48 = vpop.f32.mrb[11].mxu0  ;;  %v2916_v63 = vsel %vm2894_vm13, %v8506_v42, 0.0  ;;  %v1516_v27 = vpack.c.bf16 %v1482_v24, %v1481_v23  ;;  %v1744_v23 = vld [vmem:[#allocation2 + $0x350] sm:$0xff] }
 0x1f0   :  { %v2912_v49 = vsel %vm2894_vm13, %v8509_v48, 0.0  ;;  %v2362_v43 = vpop.permute.xlu0 %2361 }
 0x1f1   :  { %v2913_v53 = vadd.f32 %v2912_v49, %v2911_v45  ;;  %2439 = vst.msk [vmem:[#allocation3 + $0x98] sm:$0xff] %vm2419_vm11, %v2362_v43  ;;  %v566_v54 = vpop.permute.xlu1 %565 }
 0x1f2   :  { %641 = vst.msk [vmem:[#allocation3 + $0xa8] sm:$0xff] %vm619_vm4, %v566_v54  ;;  %1861 = vrot.lane.b32.xlu0 %v8237_v17, %s7107_s8  ;;  %v2249_v17 = vld [vmem:[#allocation2 + $0x2ea] sm:$0xff] }
 0x1f3   :  { %v2915_v5 = vadd.f32 %v2914_v58, %v2913_v53  ;;  %1863 = vrot.lane.b32.xlu1 %v8274_v41, %s7107_s8  ;;  %v2286_v9 = vpack.c.bf16 %v2250_v4, %v2249_v17  ;;  %v2254_v58 = vld [vmem:[#allocation2 + $0x322] sm:$0xff]  ;;  %v971_v17 = vld [vmem:[#allocation2 + $0x330] sm:$0xff]  ;;  %v972_v4 = vld [vmem:[#allocation2 + $0x338] sm:$0xff] }
 0x1f4   :  { %v821_v0 = vpop.permute.xlu0 %820  ;;  %v2470_v2 = vld [vmem:[#allocation3 + $0x90] sm:$0xff] }
 0x1f5   :  { %897 = vst.msk [vmem:[#allocation3 + $0xa0] sm:$0xff] %vm876_vm5, %v821_v0  ;;  %v823_v44 = vpop.permute.xlu1 %822  ;;  %6990 = vmatprep.mubr.msk.bf16.mxu1 %vm2499_vm12, %v2470_v2  ;;  %v2917_v3 = vadd.f32 %v2916_v63, %v2915_v5 }
 0x1f6   :  { %898 = vst.msk [vmem:[#allocation3 + $0xa8] sm:$0xff] %vm876_vm5, %v823_v44  ;;  %2118 = vrot.lane.b32.xlu0 %v1257_v33, %s7108_s9 }
 0x1f7   :  { %2120 = vrot.lane.b32.xlu1 %v2029_v62, %s7108_s9 }
 0x1f8   :  { %v1078_v7 = vpop.permute.xlu0 %1077  ;;  %v2471_v21 = vld [vmem:[#allocation3 + $0x98] sm:$0xff] }
 0x1f9   :  { %1154 = vst.msk [vmem:[#allocation3 + $0xa0] sm:$0xff] %vm1133_vm6, %v1078_v7  ;;  %v1080_v8 = vpop.permute.xlu1 %1079  ;;  %6991 = vmatmul.mubr.msk.bf16.gmra.mrb[4].mxu1 %vm2499_vm12, %v2471_v21  ;;  %v1004_v21 = vpack.c.bf16 %v972_v4, %v971_v17 }
 0x1fa   :  { %1155 = vst.msk [vmem:[#allocation3 + $0xa8] sm:$0xff] %vm1133_vm6, %v1080_v8  ;;  %2375 = vrot.lane.b32.xlu0 %v1514_v6, %s7109_s1 }
 0x1fb   :  { %579 = vrot.lane.b32.xlu1 %v1257_v33, %s7101_s14 }
 0x1fc   :  { %v1335_v52 = vpop.permute.xlu0 %1334 }
 0x1fd   :  { %1411 = vst.msk [vmem:[#allocation3 + $0xa0] sm:$0xff] %vm1390_vm7, %v1335_v52  ;;  %v1337_v12 = vpop.permute.xlu1 %1336  ;;  %v1229_v52 = vld [vmem:[#allocation2 + $0x339] sm:$0xff] }
 0x1fe   :  { %1412 = vst.msk [vmem:[#allocation3 + $0xa8] sm:$0xff] %vm1390_vm7, %v1337_v12  ;;  %2377 = vrot.lane.b32.xlu0 %v2286_v9, %s7109_s1 }
 0x1ff   :  { %581 = vrot.lane.b32.xlu1 %v2029_v62, %s7101_s14 }
 0x200   :  { %v1592_v15 = vpop.permute.xlu0 %1591 }
 0x201   :  { %1668 = vst.msk [vmem:[#allocation3 + $0xa0] sm:$0xff] %vm1647_vm8, %v1592_v15  ;;  %v1594_v16 = vpop.permute.xlu1 %1593 }
 0x202   :  { %1669 = vst.msk [vmem:[#allocation3 + $0xa8] sm:$0xff] %vm1647_vm8, %v1594_v16  ;;  %836 = vrot.lane.b32.xlu0 %v1514_v6, %s7102_s15  ;;  %v1997_v6 = vld [vmem:[#allocation2 + $0x321] sm:$0xff] }
 0x203   :  { %838 = vrot.lane.b32.xlu1 %v2286_v9, %s7102_s15  ;;  %v2031_v49 = vpack.c.bf16 %v1997_v6, %v1996_v37  ;;  %v2000_v37 = vld [vmem:[#allocation2 + $0x349] sm:$0xff]  ;;  %v2001_v6 = vld [vmem:[#allocation2 + $0x351] sm:$0xff] }
 0x204   :  { %v1850_v18 = vpop.permute.xlu0 %1849 }
 0x205   :  { %1926 = vst.msk [vmem:[#allocation3 + $0xa0] sm:$0xff] %vm1905_vm9, %v1850_v18  ;;  %v1852_v56 = vpop.permute.xlu1 %1851  ;;  %v1485_v18 = vld [vmem:[#allocation2 + $0x332] sm:$0xff] }
 0x206   :  { %1927 = vst.msk [vmem:[#allocation3 + $0xa8] sm:$0xff] %vm1905_vm9, %v1852_v56  ;;  %1093 = vrot.lane.b32.xlu0 %v8274_v41, %s7103_s16  ;;  %v1518_v56 = vpack.c.bf16 %v1486_v25, %v1485_v18 }
 0x207   :  { %1095 = vrot.lane.b32.xlu1 %v8311_v10, %s7103_s16 }
 0x208   :  { %v2107_v22 = vpop.permute.xlu0 %2106 }
 0x209   :  { %2183 = vst.msk [vmem:[#allocation3 + $0xa0] sm:$0xff] %vm2162_vm10, %v2107_v22  ;;  %v2109_v26 = vpop.permute.xlu1 %2108 }
 0x20a   :  { %2184 = vst.msk [vmem:[#allocation3 + $0xa8] sm:$0xff] %vm2162_vm10, %v2109_v26  ;;  %1350 = vrot.lane.b32.xlu0 %v2029_v62, %s7104_s17 }
 0x20b   :  { %1352 = vrot.lane.b32.xlu1 %v1259_v20, %s7104_s17 }
 0x20c   :  { %v2364_v60 = vpop.permute.xlu0 %2363  ;;  %v8551_v28 = vpop.f32.mrb[12].mxu0 }
 0x20d   :  { %2440 = vst.msk [vmem:[#allocation3 + $0xa0] sm:$0xff] %vm2419_vm11, %v2364_v60  ;;  %v568_v41 = vpop.permute.xlu1 %567  ;;  %v8554_v29 = vpop.f32.mrb[13].mxu0  ;;  %v2922_v32 = vsel %vm2894_vm13, %v8551_v28, 0.0 }
 0x20e   :  { %642 = vst.msk [vmem:[#allocation3 + $0xb0] sm:$0xff] %vm619_vm4, %v568_v41  ;;  %v2918_v30 = vsel %vm2894_vm13, %v8554_v29, 0.0  ;;  %1607 = vrot.lane.b32.xlu0 %v2286_v9, %s7105_s18  ;;  %v8560_v31 = vpop.f32.mrb[14].mxu0  ;;  %v1228_v9 = vld [vmem:[#allocation2 + $0x331] sm:$0xff] }
 0x20f   :  { %v2919_v33 = vadd.f32 %v2918_v30, %v2917_v3  ;;  %1609 = vrot.lane.b32.xlu1 %v1516_v27, %s7105_s18  ;;  %v8563_v34 = vpop.f32.mrb[15].mxu0  ;;  %v2924_v43 = vsel %vm2894_vm13, %v8560_v31, 0.0  ;;  %v1261_v15 = vpack.c.bf16 %v1229_v52, %v1228_v9 }
 0x210   :  { %v2920_v46 = vsel %vm2894_vm13, %v8563_v34, 0.0  ;;  %v2366_v36 = vpop.permute.xlu0 %2365 }
 0x211   :  { %v2921_v38 = vadd.f32 %v2920_v46, %v2919_v33  ;;  %2441 = vst.msk [vmem:[#allocation3 + $0xa8] sm:$0xff] %vm2419_vm11, %v2366_v36  ;;  %v570_v55 = vpop.permute.xlu1 %569 }
 0x212   :  { %643 = vst.msk [vmem:[#allocation3 + $0xb8] sm:$0xff] %vm619_vm4, %v570_v55  ;;  %1865 = vrot.lane.b32.xlu0 %v8311_v10, %s7107_s8  ;;  %v2253_v10 = vld [vmem:[#allocation2 + $0x31a] sm:$0xff] }
 0x213   :  { %v2923_v45 = vadd.f32 %v2922_v32, %v2921_v38  ;;  %1867 = vrot.lane.b32.xlu1 %v8346_v35, %s7107_s8  ;;  %v2288_v0 = vpack.c.bf16 %v2254_v58, %v2253_v10 }
 0x214   :  { %v825_v50 = vpop.permute.xlu0 %824  ;;  %v2472_v51 = vld [vmem:[#allocation3 + $0xa0] sm:$0xff] }
 0x215   :  { %899 = vst.msk [vmem:[#allocation3 + $0xb0] sm:$0xff] %vm876_vm5, %v825_v50  ;;  %v827_v53 = vpop.permute.xlu1 %826  ;;  %6994 = vmatprep.mubr.msk.bf16.mxu1 %vm2499_vm12, %v2472_v51  ;;  %v2925_v54 = vadd.f32 %v2924_v43, %v2923_v45 }
 0x216   :  { %900 = vst.msk [vmem:[#allocation3 + $0xb8] sm:$0xff] %vm876_vm5, %v827_v53  ;;  %2122 = vrot.lane.b32.xlu0 %v1259_v20, %s7108_s9  ;;  %v2257_v53 = vld [vmem:[#allocation2 + $0x34a] sm:$0xff] }
 0x217   :  { %2124 = vrot.lane.b32.xlu1 %v2031_v49, %s7108_s9 }
 0x218   :  { %v1082_v5 = vpop.permute.xlu0 %1081  ;;  %v2473_v62 = vld [vmem:[#allocation3 + $0xa8] sm:$0xff] }
 0x219   :  { %1156 = vst.msk [vmem:[#allocation3 + $0xb0] sm:$0xff] %vm1133_vm6, %v1082_v5  ;;  %v1084_v63 = vpop.permute.xlu1 %1083  ;;  %6995 = vmatmul.mubr.msk.bf16.gmra.mrb[8].mxu1 %vm2499_vm12, %v2473_v62 }
 0x21a   :  { %1157 = vst.msk [vmem:[#allocation3 + $0xb8] sm:$0xff] %vm1133_vm6, %v1084_v63  ;;  %2379 = vrot.lane.b32.xlu0 %v1516_v27, %s7109_s1 }
 0x21b   :  { %583 = vrot.lane.b32.xlu1 %v1259_v20, %s7101_s14 }
 0x21c   :  { %v1339_v2 = vpop.permute.xlu0 %1338 }
 0x21d   :  { %1413 = vst.msk [vmem:[#allocation3 + $0xb0] sm:$0xff] %vm1390_vm7, %v1339_v2  ;;  %v1341_v44 = vpop.permute.xlu1 %1340 }
 0x21e   :  { %1414 = vst.msk [vmem:[#allocation3 + $0xb8] sm:$0xff] %vm1390_vm7, %v1341_v44  ;;  %2381 = vrot.lane.b32.xlu0 %v2288_v0, %s7109_s1 }
 0x21f   :  { %585 = vrot.lane.b32.xlu1 %v2031_v49, %s7101_s14 }
 0x220   :  { %v1596_v3 = vpop.permute.xlu0 %1595 }
 0x221   :  { %1670 = vst.msk [vmem:[#allocation3 + $0xb0] sm:$0xff] %vm1647_vm8, %v1596_v3  ;;  %v1598_v7 = vpop.permute.xlu1 %1597 }
 0x222   :  { %1671 = vst.msk [vmem:[#allocation3 + $0xb8] sm:$0xff] %vm1647_vm8, %v1598_v7  ;;  %840 = vrot.lane.b32.xlu0 %v1516_v27, %s7102_s15 }
 0x223   :  { %842 = vrot.lane.b32.xlu1 %v2288_v0, %s7102_s15 }
 0x224   :  { %v1854_v8 = vpop.permute.xlu0 %1853 }
 0x225   :  { %1928 = vst.msk [vmem:[#allocation3 + $0xb0] sm:$0xff] %vm1905_vm9, %v1854_v8  ;;  %v1856_v12 = vpop.permute.xlu1 %1855 }
 0x226   :  { %1929 = vst.msk [vmem:[#allocation3 + $0xb8] sm:$0xff] %vm1905_vm9, %v1856_v12  ;;  %1097 = vrot.lane.b32.xlu0 %v8346_v35, %s7103_s16  ;;  %v1743_v35 = vld [vmem:[#allocation2 + $0x348] sm:$0xff] }
 0x227   :  { %1099 = vrot.lane.b32.xlu1 %v1004_v21, %s7103_s16  ;;  %v1776_v33 = vpack.c.bf16 %v1744_v23, %v1743_v35 }
 0x228   :  { %v2111_v16 = vpop.permute.xlu0 %2110 }
 0x229   :  { %2185 = vst.msk [vmem:[#allocation3 + $0xb0] sm:$0xff] %vm2162_vm10, %v2111_v16  ;;  %v2113_v19 = vpop.permute.xlu1 %2112 }
 0x22a   :  { %2186 = vst.msk [vmem:[#allocation3 + $0xb8] sm:$0xff] %vm2162_vm10, %v2113_v19  ;;  %1354 = vrot.lane.b32.xlu0 %v2031_v49, %s7104_s17  ;;  %v2033_v49 = vpack.c.bf16 %v2001_v6, %v2000_v37 }
 0x22b   :  { %1356 = vrot.lane.b32.xlu1 %v1261_v15, %s7104_s17 }
 0x22c   :  { %v2368_v20 = vpop.permute.xlu0 %2367  ;;  %v8604_v22 = vpop.f32.mrb[16].mxu0 }
 0x22d   :  { %2442 = vst.msk [vmem:[#allocation3 + $0xb0] sm:$0xff] %vm2419_vm11, %v2368_v20  ;;  %v572_v24 = vpop.permute.xlu1 %571  ;;  %v8607_v26 = vpop.f32.mrb[17].mxu0  ;;  %v2930_v32 = vsel %vm2894_vm13, %v8604_v22, 0.0 }
 0x22e   :  { %644 = vst.msk [vmem:[#allocation3 + $0xc0] sm:$0xff] %vm619_vm4, %v572_v24  ;;  %v2926_v27 = vsel %vm2894_vm13, %v8607_v26, 0.0  ;;  %1611 = vrot.lane.b32.xlu0 %v2288_v0, %s7105_s18  ;;  %v8613_v60 = vpop.f32.mrb[18].mxu0 }
 0x22f   :  { %v2927_v41 = vadd.f32 %v2926_v27, %v2925_v54  ;;  %1613 = vrot.lane.b32.xlu1 %v1518_v56, %s7105_s18  ;;  %v8616_v30 = vpop.f32.mrb[19].mxu0  ;;  %v2932_v43 = vsel %vm2894_vm13, %v8613_v60, 0.0  ;;  %v2258_v54 = vld [vmem:[#allocation2 + $0x352] sm:$0xff] }
 0x230   :  { %v2928_v46 = vsel %vm2894_vm13, %v8616_v30, 0.0  ;;  %v2370_v36 = vpop.permute.xlu0 %2369  ;;  %v2290_v5 = vpack.c.bf16 %v2258_v54, %v2257_v53 }
 0x231   :  { %v2929_v38 = vadd.f32 %v2928_v46, %v2927_v41  ;;  %2443 = vst.msk [vmem:[#allocation3 + $0xb8] sm:$0xff] %vm2419_vm11, %v2370_v36  ;;  %v574_v55 = vpop.permute.xlu1 %573 }
 0x232   :  { %645 = vst.msk [vmem:[#allocation3 + $0xc8] sm:$0xff] %vm619_vm4, %v574_v55  ;;  %1869 = vrot.lane.b32.xlu0 %v1004_v21, %s7107_s8 }
 0x233   :  { %v2931_v45 = vadd.f32 %v2930_v32, %v2929_v38  ;;  %1871 = vrot.lane.b32.xlu1 %v1776_v33, %s7107_s8 }
 0x234   :  { %v829_v50 = vpop.permute.xlu0 %828  ;;  %v2474_v51 = vld [vmem:[#allocation3 + $0xb0] sm:$0xff] }
 0x235   :  { %901 = vst.msk [vmem:[#allocation3 + $0xc0] sm:$0xff] %vm876_vm5, %v829_v50  ;;  %v831_v10 = vpop.permute.xlu1 %830  ;;  %6998 = vmatprep.mubr.msk.bf16.mxu1 %vm2499_vm12, %v2474_v51  ;;  %v2933_v58 = vadd.f32 %v2932_v43, %v2931_v45 }
 0x236   :  { %902 = vst.msk [vmem:[#allocation3 + $0xc8] sm:$0xff] %vm876_vm5, %v831_v10  ;;  %2126 = vrot.lane.b32.xlu0 %v1261_v15, %s7108_s9 }
 0x237   :  { %2128 = vrot.lane.b32.xlu1 %v2033_v49, %s7108_s9 }
 0x238   :  { %v1086_v62 = vpop.permute.xlu0 %1085  ;;  %v2475_v63 = vld [vmem:[#allocation3 + $0xb8] sm:$0xff] }
 0x239   :  { %1158 = vst.msk [vmem:[#allocation3 + $0xc0] sm:$0xff] %vm1133_vm6, %v1086_v62  ;;  %v1088_v0 = vpop.permute.xlu1 %1087  ;;  %6999 = vmatmul.mubr.msk.bf16.gmra.mrb[12].mxu1 %vm2499_vm12, %v2475_v63 }
 0x23a   :  { %1159 = vst.msk [vmem:[#allocation3 + $0xc8] sm:$0xff] %vm1133_vm6, %v1088_v0  ;;  %2383 = vrot.lane.b32.xlu0 %v1518_v56, %s7109_s1 }
 0x23b   :  { %2385 = vrot.lane.b32.xlu1 %v2290_v5, %s7109_s1 }
 0x23c   :  { %v1343_v2 = vpop.permute.xlu0 %1342 }
 0x23d   :  { %1415 = vst.msk [vmem:[#allocation3 + $0xc0] sm:$0xff] %vm1390_vm7, %v1343_v2  ;;  %v1345_v44 = vpop.permute.xlu1 %1344 }
 0x23e   :  { %1416 = vst.msk [vmem:[#allocation3 + $0xc8] sm:$0xff] %vm1390_vm7, %v1345_v44 }
 0x240   :  { %v1600_v3 = vpop.permute.xlu0 %1599 }
 0x241   :  { %1672 = vst.msk [vmem:[#allocation3 + $0xc0] sm:$0xff] %vm1647_vm8, %v1600_v3  ;;  %v1602_v17 = vpop.permute.xlu1 %1601 }
 0x242   :  { %1673 = vst.msk [vmem:[#allocation3 + $0xc8] sm:$0xff] %vm1647_vm8, %v1602_v17 }
 0x244   :  { %v1858_v4 = vpop.permute.xlu0 %1857 }
 0x245   :  { %1930 = vst.msk [vmem:[#allocation3 + $0xc0] sm:$0xff] %vm1905_vm9, %v1858_v4  ;;  %v1860_v7 = vpop.permute.xlu1 %1859 }
 0x246   :  { %1931 = vst.msk [vmem:[#allocation3 + $0xc8] sm:$0xff] %vm1905_vm9, %v1860_v7 }
 0x248   :  { %v2115_v21 = vpop.permute.xlu0 %2114 }
 0x249   :  { %2187 = vst.msk [vmem:[#allocation3 + $0xc0] sm:$0xff] %vm2162_vm10, %v2115_v21  ;;  %v2117_v8 = vpop.permute.xlu1 %2116 }
 0x24a   :  { %2188 = vst.msk [vmem:[#allocation3 + $0xc8] sm:$0xff] %vm2162_vm10, %v2117_v8 }
 0x24c   :  { %v2372_v9 = vpop.permute.xlu0 %2371  ;;  %v8646_v52 = vpop.f32.mrb[20].mxu0 }
 0x24d   :  { %2444 = vst.msk [vmem:[#allocation3 + $0xc0] sm:$0xff] %vm2419_vm11, %v2372_v9  ;;  %v576_v12 = vpop.permute.xlu1 %575  ;;  %v8649_v15 = vpop.f32.mrb[21].mxu0  ;;  %v2938_v24 = vsel %vm2894_vm13, %v8646_v52, 0.0 }
 0x24e   :  { %646 = vst.msk [vmem:[#allocation3 + $0xd0] sm:$0xff] %vm619_vm4, %v576_v12  ;;  %v2934_v16 = vsel %vm2894_vm13, %v8649_v15, 0.0  ;;  %v8654_v18 = vpop.f32.mrb[22].mxu0 }
 0x24f   :  { %v2935_v25 = vadd.f32 %v2934_v16, %v2933_v58  ;;  %v8656_v19 = vpop.f32.mrb[23].mxu0  ;;  %v2940_v41 = vsel %vm2894_vm13, %v8654_v18, 0.0 }
 0x250   :  { %v2936_v56 = vsel %vm2894_vm13, %v8656_v19, 0.0  ;;  %v2374_v20 = vpop.permute.xlu0 %2373 }
 0x251   :  { %v2937_v35 = vadd.f32 %v2936_v56, %v2935_v25  ;;  %2445 = vst.msk [vmem:[#allocation3 + $0xc8] sm:$0xff] %vm2419_vm11, %v2374_v20  ;;  %v578_v23 = vpop.permute.xlu1 %577 }
 0x252   :  { %647 = vst.msk [vmem:[#allocation3 + $0xd8] sm:$0xff] %vm619_vm4, %v578_v23 }
 0x253   :  { %v2939_v27 = vadd.f32 %v2938_v24, %v2937_v35 }
 0x254   :  { %v833_v33 = vpop.permute.xlu0 %832  ;;  %v2476_v46 = vld [vmem:[#allocation3 + $0xc0] sm:$0xff] }
 0x255   :  { %903 = vst.msk [vmem:[#allocation3 + $0xd0] sm:$0xff] %vm876_vm5, %v833_v33  ;;  %v835_v36 = vpop.permute.xlu1 %834  ;;  %7002 = vmatprep.mubr.msk.bf16.mxu1 %vm2499_vm12, %v2476_v46  ;;  %v2941_v37 = vadd.f32 %v2940_v41, %v2939_v27 }
 0x256   :  { %904 = vst.msk [vmem:[#allocation3 + $0xd8] sm:$0xff] %vm876_vm5, %v835_v36 }
 0x258   :  { %v1090_v6 = vpop.permute.xlu0 %1089  ;;  %v2477_v38 = vld [vmem:[#allocation3 + $0xc8] sm:$0xff] }
 0x259   :  { %1160 = vst.msk [vmem:[#allocation3 + $0xd0] sm:$0xff] %vm1133_vm6, %v1090_v6  ;;  %v1092_v55 = vpop.permute.xlu1 %1091  ;;  %7003 = vmatmul.mubr.msk.bf16.gmra.mrb[16].mxu1 %vm2499_vm12, %v2477_v38 }
 0x25a   :  { %1161 = vst.msk [vmem:[#allocation3 + $0xd8] sm:$0xff] %vm1133_vm6, %v1092_v55 }
 0x25c   :  { %v1347_v32 = vpop.permute.xlu0 %1346 }
 0x25d   :  { %1417 = vst.msk [vmem:[#allocation3 + $0xd0] sm:$0xff] %vm1390_vm7, %v1347_v32  ;;  %v1349_v45 = vpop.permute.xlu1 %1348 }
 0x25e   :  { %1418 = vst.msk [vmem:[#allocation3 + $0xd8] sm:$0xff] %vm1390_vm7, %v1349_v45 }
 0x260   :  { %v1604_v49 = vpop.permute.xlu0 %1603 }
 0x261   :  { %1674 = vst.msk [vmem:[#allocation3 + $0xd0] sm:$0xff] %vm1647_vm8, %v1604_v49  ;;  %v1606_v43 = vpop.permute.xlu1 %1605 }
 0x262   :  { %1675 = vst.msk [vmem:[#allocation3 + $0xd8] sm:$0xff] %vm1647_vm8, %v1606_v43 }
 0x264   :  { %v1862_v50 = vpop.permute.xlu0 %1861 }
 0x265   :  { %1932 = vst.msk [vmem:[#allocation3 + $0xd0] sm:$0xff] %vm1905_vm9, %v1862_v50  ;;  %v1864_v51 = vpop.permute.xlu1 %1863 }
 0x266   :  { %1933 = vst.msk [vmem:[#allocation3 + $0xd8] sm:$0xff] %vm1905_vm9, %v1864_v51 }
 0x268   :  { %v2119_v53 = vpop.permute.xlu0 %2118 }
 0x269   :  { %2189 = vst.msk [vmem:[#allocation3 + $0xd0] sm:$0xff] %vm2162_vm10, %v2119_v53  ;;  %v2121_v54 = vpop.permute.xlu1 %2120 }
 0x26a   :  { %2190 = vst.msk [vmem:[#allocation3 + $0xd8] sm:$0xff] %vm2162_vm10, %v2121_v54 }
 0x26c   :  { %v2376_v10 = vpop.permute.xlu0 %2375  ;;  %v8680_v58 = vpop.f32.mrb[24].mxu0 }
 0x26d   :  { %2446 = vst.msk [vmem:[#allocation3 + $0xd0] sm:$0xff] %vm2419_vm11, %v2376_v10  ;;  %v580_v5 = vpop.permute.xlu1 %579  ;;  %v8683_v62 = vpop.f32.mrb[25].mxu0  ;;  %v2946_v21 = vsel %vm2894_vm13, %v8680_v58, 0.0 }
 0x26e   :  { %648 = vst.msk [vmem:[#allocation3 + $0xe0] sm:$0xff] %vm619_vm4, %v580_v5  ;;  %v2942_v63 = vsel %vm2894_vm13, %v8683_v62, 0.0  ;;  %v8688_v0 = vpop.f32.mrb[26].mxu0 }
 0x26f   :  { %v2943_v2 = vadd.f32 %v2942_v63, %v2941_v37  ;;  %v8690_v44 = vpop.f32.mrb[27].mxu0  ;;  %v2948_v9 = vsel %vm2894_vm13, %v8688_v0, 0.0 }
 0x270   :  { %v2944_v3 = vsel %vm2894_vm13, %v8690_v44, 0.0  ;;  %v2378_v17 = vpop.permute.xlu0 %2377 }
 0x271   :  { %v2945_v4 = vadd.f32 %v2944_v3, %v2943_v2  ;;  %2447 = vst.msk [vmem:[#allocation3 + $0xd8] sm:$0xff] %vm2419_vm11, %v2378_v17  ;;  %v582_v7 = vpop.permute.xlu1 %581 }
 0x272   :  { %649 = vst.msk [vmem:[#allocation3 + $0xe8] sm:$0xff] %vm619_vm4, %v582_v7 }
 0x273   :  { %v2947_v8 = vadd.f32 %v2946_v21, %v2945_v4 }
 0x274   :  { %v837_v12 = vpop.permute.xlu0 %836  ;;  %v2478_v16 = vld [vmem:[#allocation3 + $0xd0] sm:$0xff] }
 0x275   :  { %905 = vst.msk [vmem:[#allocation3 + $0xe0] sm:$0xff] %vm876_vm5, %v837_v12  ;;  %v839_v25 = vpop.permute.xlu1 %838  ;;  %7006 = vmatprep.mubr.msk.bf16.mxu1 %vm2499_vm12, %v2478_v16  ;;  %v2949_v56 = vadd.f32 %v2948_v9, %v2947_v8 }
 0x276   :  { %906 = vst.msk [vmem:[#allocation3 + $0xe8] sm:$0xff] %vm876_vm5, %v839_v25 }
 0x278   :  { %v1094_v20 = vpop.permute.xlu0 %1093  ;;  %v2479_v35 = vld [vmem:[#allocation3 + $0xd8] sm:$0xff] }
 0x279   :  { %1162 = vst.msk [vmem:[#allocation3 + $0xe0] sm:$0xff] %vm1133_vm6, %v1094_v20  ;;  %v1096_v23 = vpop.permute.xlu1 %1095  ;;  %7007 = vmatmul.mubr.msk.bf16.gmra.mrb[20].mxu1 %vm2499_vm12, %v2479_v35 }
 0x27a   :  { %1163 = vst.msk [vmem:[#allocation3 + $0xe8] sm:$0xff] %vm1133_vm6, %v1096_v23 }
 0x27c   :  { %v1351_v24 = vpop.permute.xlu0 %1350 }
 0x27d   :  { %1419 = vst.msk [vmem:[#allocation3 + $0xe0] sm:$0xff] %vm1390_vm7, %v1351_v24  ;;  %v1353_v27 = vpop.permute.xlu1 %1352 }
 0x27e   :  { %1420 = vst.msk [vmem:[#allocation3 + $0xe8] sm:$0xff] %vm1390_vm7, %v1353_v27 }
 0x280   :  { %v1608_v41 = vpop.permute.xlu0 %1607 }
 0x281   :  { %1676 = vst.msk [vmem:[#allocation3 + $0xe0] sm:$0xff] %vm1647_vm8, %v1608_v41  ;;  %v1610_v33 = vpop.permute.xlu1 %1609 }
 0x282   :  { %1677 = vst.msk [vmem:[#allocation3 + $0xe8] sm:$0xff] %vm1647_vm8, %v1610_v33 }
 0x284   :  { %v1866_v46 = vpop.permute.xlu0 %1865 }
 0x285   :  { %1934 = vst.msk [vmem:[#allocation3 + $0xe0] sm:$0xff] %vm1905_vm9, %v1866_v46  ;;  %v1868_v36 = vpop.permute.xlu1 %1867 }
 0x286   :  { %1935 = vst.msk [vmem:[#allocation3 + $0xe8] sm:$0xff] %vm1905_vm9, %v1868_v36 }
 0x288   :  { %v2123_v37 = vpop.permute.xlu0 %2122 }
 0x289   :  { %2191 = vst.msk [vmem:[#allocation3 + $0xe0] sm:$0xff] %vm2162_vm10, %v2123_v37  ;;  %v2125_v6 = vpop.permute.xlu1 %2124 }
 0x28a   :  { %2192 = vst.msk [vmem:[#allocation3 + $0xe8] sm:$0xff] %vm2162_vm10, %v2125_v6 }
 0x28c   :  { %v2380_v38 = vpop.permute.xlu0 %2379  ;;  %v8714_v55 = vpop.f32.mrb[28].mxu0 }
 0x28d   :  { %2448 = vst.msk [vmem:[#allocation3 + $0xe0] sm:$0xff] %vm2419_vm11, %v2380_v38  ;;  %v584_v32 = vpop.permute.xlu1 %583  ;;  %v8717_v45 = vpop.f32.mrb[29].mxu0  ;;  %v2954_v63 = vsel %vm2894_vm13, %v8714_v55, 0.0 }
 0x28e   :  { %650 = vst.msk [vmem:[#allocation3 + $0xf0] sm:$0xff] %vm619_vm4, %v584_v32  ;;  %v2950_v49 = vsel %vm2894_vm13, %v8717_v45, 0.0  ;;  %v8722_v43 = vpop.f32.mrb[30].mxu0 }
 0x28f   :  { %v2951_v50 = vadd.f32 %v2950_v49, %v2949_v56  ;;  %v8724_v51 = vpop.f32.mrb[31].mxu0  ;;  %v2956_v3 = vsel %vm2894_vm13, %v8722_v43, 0.0 }
 0x290   :  { %v2952_v53 = vsel %vm2894_vm13, %v8724_v51, 0.0  ;;  %v2382_v54 = vpop.permute.xlu0 %2381 }
 0x291   :  { %v2953_v10 = vadd.f32 %v2952_v53, %v2951_v50  ;;  %2449 = vst.msk [vmem:[#allocation3 + $0xe8] sm:$0xff] %vm2419_vm11, %v2382_v54  ;;  %v586_v5 = vpop.permute.xlu1 %585 }
 0x292   :  { %651 = vst.msk [vmem:[#allocation3 + $0xf8] sm:$0xff] %vm619_vm4, %v586_v5 }
 0x293   :  { %v2955_v2 = vadd.f32 %v2954_v63, %v2953_v10 }
 0x294   :  { %v841_v17 = vpop.permute.xlu0 %840  ;;  %v2480_v4 = vld [vmem:[#allocation3 + $0xe0] sm:$0xff] }
 0x295   :  { %907 = vst.msk [vmem:[#allocation3 + $0xf0] sm:$0xff] %vm876_vm5, %v841_v17  ;;  %v843_v7 = vpop.permute.xlu1 %842  ;;  %7010 = vmatprep.mubr.msk.bf16.mxu1 %vm2499_vm12, %v2480_v4  ;;  %v2957_v21 = vadd.f32 %v2956_v3, %v2955_v2 }
 0x296   :  { %908 = vst.msk [vmem:[#allocation3 + $0xf8] sm:$0xff] %vm876_vm5, %v843_v7 }
 0x298   :  { %v1098_v8 = vpop.permute.xlu0 %1097  ;;  %v2481_v9 = vld [vmem:[#allocation3 + $0xe8] sm:$0xff] }
 0x299   :  { %1164 = vst.msk [vmem:[#allocation3 + $0xf0] sm:$0xff] %vm1133_vm6, %v1098_v8  ;;  %v1100_v12 = vpop.permute.xlu1 %1099  ;;  %7011 = vmatmul.mubr.msk.bf16.gmra.mrb[24].mxu1 %vm2499_vm12, %v2481_v9 }
 0x29a   :  { %1165 = vst.msk [vmem:[#allocation3 + $0xf8] sm:$0xff] %vm1133_vm6, %v1100_v12 }
 0x29c   :  { %v1355_v16 = vpop.permute.xlu0 %1354 }
 0x29d   :  { %1421 = vst.msk [vmem:[#allocation3 + $0xf0] sm:$0xff] %vm1390_vm7, %v1355_v16  ;;  %v1357_v25 = vpop.permute.xlu1 %1356 }
 0x29e   :  { %1422 = vst.msk [vmem:[#allocation3 + $0xf8] sm:$0xff] %vm1390_vm7, %v1357_v25 }
 0x2a0   :  { %v1612_v56 = vpop.permute.xlu0 %1611 }
 0x2a1   :  { %1678 = vst.msk [vmem:[#allocation3 + $0xf0] sm:$0xff] %vm1647_vm8, %v1612_v56  ;;  %v1614_v20 = vpop.permute.xlu1 %1613 }
 0x2a2   :  { %1679 = vst.msk [vmem:[#allocation3 + $0xf8] sm:$0xff] %vm1647_vm8, %v1614_v20 }
 0x2a4   :  { %v1870_v35 = vpop.permute.xlu0 %1869 }
 0x2a5   :  { %1936 = vst.msk [vmem:[#allocation3 + $0xf0] sm:$0xff] %vm1905_vm9, %v1870_v35  ;;  %v1872_v23 = vpop.permute.xlu1 %1871 }
 0x2a6   :  { %1937 = vst.msk [vmem:[#allocation3 + $0xf8] sm:$0xff] %vm1905_vm9, %v1872_v23 }
 0x2a8   :  { %v2127_v24 = vpop.permute.xlu0 %2126 }
 0x2a9   :  { %2193 = vst.msk [vmem:[#allocation3 + $0xf0] sm:$0xff] %vm2162_vm10, %v2127_v24  ;;  %v2129_v27 = vpop.permute.xlu1 %2128 }
 0x2aa   :  { %2194 = vst.msk [vmem:[#allocation3 + $0xf8] sm:$0xff] %vm2162_vm10, %v2129_v27 }
 0x2ac   :  { %v8748_v41 = vpop.f32.mrb[0].mxu1  ;;  %v2384_v33 = vpop.permute.xlu0 %2383 }
 0x2ad   :  { %2450 = vst.msk [vmem:[#allocation3 + $0xf0] sm:$0xff] %vm2419_vm11, %v2384_v33  ;;  %v2386_v46 = vpop.permute.xlu1 %2385  ;;  %v8751_v36 = vpop.f32.mrb[1].mxu1  ;;  %v2962_v53 = vsel %vm2894_vm13, %v8748_v41, 0.0 }
 0x2ae   :  { %2451 = vst.msk [vmem:[#allocation3 + $0xf8] sm:$0xff] %vm2419_vm11, %v2386_v46  ;;  %v2958_v37 = vsel %vm2894_vm13, %v8751_v36, 0.0  ;;  %v8756_v6 = vpop.f32.mrb[2].mxu1 }
 0x2af   :  { %v2959_v38 = vadd.f32 %v2958_v37, %v2957_v21  ;;  %v8758_v32 = vpop.f32.mrb[3].mxu1  ;;  %v2964_v10 = vsel %vm2894_vm13, %v8756_v6, 0.0 }
 0x2b0   :  { %v2960_v49 = vsel %vm2894_vm13, %v8758_v32, 0.0 }
 0x2b1   :  { %v2961_v50 = vadd.f32 %v2960_v49, %v2959_v38 }
 0x2b3   :  { %v2963_v54 = vadd.f32 %v2962_v53, %v2961_v50 }
 0x2b4   :  { %v2482_v5 = vld [vmem:[#allocation3 + $0xf0] sm:$0xff] }
 0x2b5   :  { %7014 = vmatprep.mubr.msk.bf16.mxu1 %vm2499_vm12, %v2482_v5  ;;  %v2483_v63 = vld [vmem:[#allocation3 + $0xf8] sm:$0xff]  ;;  %v2965_v2 = vadd.f32 %v2964_v10, %v2963_v54 }
 0x2b6   :  { %7015 = vmatmul.mubr.msk.bf16.gmra.mrb[28].mxu1 %vm2499_vm12, %v2483_v63 }
 0x2cc   :  { %v8768_v3 = vpop.f32.mrb[4].mxu1 }
 0x2cd   :  { %v8770_v17 = vpop.f32.mrb[5].mxu1  ;;  %v2970_v16 = vsel %vm2894_vm13, %v8768_v3, 0.0 }
 0x2ce   :  { %v2966_v4 = vsel %vm2894_vm13, %v8770_v17, 0.0  ;;  %v8774_v7 = vpop.f32.mrb[6].mxu1 }
 0x2cf   :  { %v2967_v21 = vadd.f32 %v2966_v4, %v2965_v2  ;;  %v8776_v8 = vpop.f32.mrb[7].mxu1  ;;  %v2972_v56 = vsel %vm2894_vm13, %v8774_v7, 0.0 }
 0x2d0   :  { %v2968_v9 = vsel %vm2894_vm13, %v8776_v8, 0.0 }
 0x2d1   :  { %v2969_v12 = vadd.f32 %v2968_v9, %v2967_v21 }
 0x2d3   :  { %v2971_v25 = vadd.f32 %v2970_v16, %v2969_v12 }
 0x2d5   :  { %v2973_v20 = vadd.f32 %v2972_v56, %v2971_v25 }
 0x2ec   :  { %v8784_v35 = vpop.f32.mrb[8].mxu1 }
 0x2ed   :  { %v8786_v23 = vpop.f32.mrb[9].mxu1  ;;  %v2978_v49 = vsel %vm2894_vm13, %v8784_v35, 0.0 }
 0x2ee   :  { %v2974_v24 = vsel %vm2894_vm13, %v8786_v23, 0.0  ;;  %v8790_v27 = vpop.f32.mrb[10].mxu1 }
 0x2ef   :  { %v2975_v33 = vadd.f32 %v2974_v24, %v2973_v20  ;;  %v8792_v46 = vpop.f32.mrb[11].mxu1  ;;  %v2980_v53 = vsel %vm2894_vm13, %v8790_v27, 0.0 }
 0x2f0   :  { %v2976_v37 = vsel %vm2894_vm13, %v8792_v46, 0.0 }
 0x2f1   :  { %v2977_v38 = vadd.f32 %v2976_v37, %v2975_v33 }
 0x2f3   :  { %v2979_v50 = vadd.f32 %v2978_v49, %v2977_v38 }
 0x2f5   :  { %v2981_v54 = vadd.f32 %v2980_v53, %v2979_v50 }
 0x30c   :  { %v8800_v10 = vpop.f32.mrb[12].mxu1 }
 0x30d   :  { %v8802_v5 = vpop.f32.mrb[13].mxu1  ;;  %v2986_v16 = vsel %vm2894_vm13, %v8800_v10, 0.0 }
 0x30e   :  { %v2982_v63 = vsel %vm2894_vm13, %v8802_v5, 0.0  ;;  %v8806_v2 = vpop.f32.mrb[14].mxu1 }
 0x30f   :  { %14497 = vst [vmem:[#allocation8_spill] sm:$0xff] %v8806_v2  ;;  %v2983_v4 = vadd.f32 %v2982_v63, %v2981_v54  ;;  %v8808_v21 = vpop.f32.mrb[15].mxu1  ;;  %v2988_v56 = vsel %vm2894_vm13, %v8806_v2, 0.0 }
 0x310   :  { %v2984_v9 = vsel %vm2894_vm13, %v8808_v21, 0.0 }
 0x311   :  { %v2985_v12 = vadd.f32 %v2984_v9, %v2983_v4 }
 0x313   :  { %v2987_v25 = vadd.f32 %v2986_v16, %v2985_v12 }
 0x315   :  { %v2989_v20 = vadd.f32 %v2988_v56, %v2987_v25 }
 0x32c   :  { %v8816_v24 = vpop.f32.mrb[16].mxu1 }
 0x32d   :  { %14498 = vst [vmem:[#allocation9_spill] sm:$0xff] %v8816_v24  ;;  %v8818_v33 = vpop.f32.mrb[17].mxu1  ;;  %v2994_v63 = vsel %vm2894_vm13, %v8816_v24, 0.0 }
 0x32e   :  { %14499 = vst [vmem:[#allocation10_spill] sm:$0xff] %v8818_v33  ;;  %v2990_v37 = vsel %vm2894_vm13, %v8818_v33, 0.0  ;;  %v8822_v38 = vpop.f32.mrb[18].mxu1 }
 0x32f   :  { %14500 = vst [vmem:[#allocation11_spill] sm:$0xff] %v8822_v38  ;;  %v2991_v49 = vadd.f32 %v2990_v37, %v2989_v20  ;;  %v8824_v50 = vpop.f32.mrb[19].mxu1  ;;  %v2996_v9 = vsel %vm2894_vm13, %v8822_v38, 0.0 }
 0x330   :  { %14501 = vst [vmem:[#allocation12_spill] sm:$0xff] %v8824_v50  ;;  %v2992_v53 = vsel %vm2894_vm13, %v8824_v50, 0.0 }
 0x331   :  { %v2993_v54 = vadd.f32 %v2992_v53, %v2991_v49 }
 0x333   :  { %v2995_v4 = vadd.f32 %v2994_v63, %v2993_v54 }
 0x335   :  { %v2997_v12 = vadd.f32 %v2996_v9, %v2995_v4 }
 0x34c   :  { %v8832_v16 = vpop.f32.mrb[20].mxu1 }
 0x34d   :  { %14502 = vst [vmem:[#allocation13_spill] sm:$0xff] %v8832_v16  ;;  %v8834_v25 = vpop.f32.mrb[21].mxu1  ;;  %v3002_v54 = vsel %vm2894_vm13, %v8832_v16, 0.0 }
 0x34e   :  { %14503 = vst [vmem:[#allocation14_spill] sm:$0xff] %v8834_v25  ;;  %v2998_v56 = vsel %vm2894_vm13, %v8834_v25, 0.0  ;;  %v8838_v20 = vpop.f32.mrb[22].mxu1 }
 0x34f   :  { %14504 = vst [vmem:[#allocation15_spill] sm:$0xff] %v8838_v20  ;;  %v2999_v37 = vadd.f32 %v2998_v56, %v2997_v12  ;;  %v8840_v50 = vpop.f32.mrb[23].mxu1  ;;  %v3004_v4 = vsel %vm2894_vm13, %v8838_v20, 0.0 }
 0x350   :  { %14505 = vst [vmem:[#allocation16_spill] sm:$0xff] %v8840_v50  ;;  %v3000_v49 = vsel %vm2894_vm13, %v8840_v50, 0.0 }
 0x351   :  { %v3001_v53 = vadd.f32 %v3000_v49, %v2999_v37 }
 0x353   :  { %v3003_v63 = vadd.f32 %v3002_v54, %v3001_v53 }
 0x355   :  { %v3005_v9 = vadd.f32 %v3004_v4, %v3003_v63 }
 0x36c   :  { %v8848_v38 = vpop.f32.mrb[24].mxu1 }
 0x36d   :  { %14506 = vst [vmem:[#allocation17_spill] sm:$0xff] %v8848_v38  ;;  %v8850_v25 = vpop.f32.mrb[25].mxu1  ;;  %v3010_v53 = vsel %vm2894_vm13, %v8848_v38, 0.0 }
 0x36e   :  { %14507 = vst [vmem:[#allocation18_spill] sm:$0xff] %v8850_v25  ;;  %v3006_v12 = vsel %vm2894_vm13, %v8850_v25, 0.0  ;;  %v8854_v56 = vpop.f32.mrb[26].mxu1 }
 0x36f   :  { %14508 = vst [vmem:[#allocation19_spill] sm:$0xff] %v8854_v56  ;;  %v3007_v24 = vadd.f32 %v3006_v12, %v3005_v9  ;;  %v8856_v50 = vpop.f32.mrb[27].mxu1  ;;  %v3012_v63 = vsel %vm2894_vm13, %v8854_v56, 0.0 }
 0x370   :  { %14509 = vst [vmem:[#allocation20_spill] sm:$0xff] %v8856_v50  ;;  %v3008_v37 = vsel %vm2894_vm13, %v8856_v50, 0.0 }
 0x371   :  { %v3009_v49 = vadd.f32 %v3008_v37, %v3007_v24 }
 0x373   :  { %v3011_v54 = vadd.f32 %v3010_v53, %v3009_v49 }
 0x375   :  { %v3013_v4 = vadd.f32 %v3012_v63, %v3011_v54 }
 0x389   :  { %v8864_v20 = vpop.f32.mrb[28].mxu1 }
 0x38a   :  { %v8866_v25 = vpop.f32.mrb[29].mxu1  ;;  %v3018_v49 = vsel %vm2894_vm13, %v8864_v20, 0.0 }
 0x38b   :  { %14510 = vst [vmem:[#allocation21_spill] sm:$0xff] %v8866_v25  ;;  %v3014_v9 = vsel %vm2894_vm13, %v8866_v25, 0.0  ;;  %v8870_v12 = vpop.f32.mrb[30].mxu1 }
 0x38c   :  { %v3015_v16 = vadd.f32 %v3014_v9, %v3013_v4  ;;  %v8872_v50 = vpop.f32.mrb[31].mxu1  ;;  %v3020_v54 = vsel %vm2894_vm13, %v8870_v12, 0.0 }
 0x38d   :  { %14511 = vst [vmem:[#allocation22_spill] sm:$0xff] %v8872_v50  ;;  %v3016_v24 = vsel %vm2894_vm13, %v8872_v50, 0.0 }
 0x38e   :  { %v3017_v37 = vadd.f32 %v3016_v24, %v3015_v16 }
 0x390   :  { %v3019_v53 = vadd.f32 %v3018_v49, %v3017_v37  ;;  %v14523_v37 = vld [vmem:[#allocation9_spill] sm:$0xff]  ;;  %v14525_v49 = vld [vmem:[#allocation11_spill] sm:$0xff] }
 0x392   :  { %v3021_v63 = vadd.f32 %v3020_v54, %v3019_v53  ;;  %v14527_v53 = vld [vmem:[#allocation14_spill] sm:$0xff] }
 0x394   :  { %v3022_v56 = vrot.slane %v3021_v63, 4 }
 0x396   :  { %v3023_v38 = vadd.f32 %v3022_v56, %v3021_v63  ;;  %v14529_v63 = vld [vmem:[#allocation16_spill] sm:$0xff] }
 0x398   :  { %v3024_v25 = vrot.slane %v3023_v38, 2 }
 0x39a   :  { %v3025_v33 = vadd.f32 %v3024_v25, %v3023_v38  ;;  %v14519_v38 = vld [vmem:[#allocation10_spill] sm:$0xff]  ;;  %v14521_v25 = vld [vmem:[#allocation12_spill] sm:$0xff] }
 0x39c   :  { %v3026_v2 = vrot.slane %v3025_v33, 1 }
 0x39e   :  { %v3027_v4 = vadd.f32 %v3026_v2, %v3025_v33  ;;  %v14517_v33 = vld [vmem:[#allocation8_spill] sm:$0xff] }
 0x3a0   :  { %v8880_v9 = vmul.f32 0.001953125, %v3027_v4 }
 0x3a2   :  { %v8884_v50 = vsub.f32 %v8392_v13, %v8880_v9  ;;  %v8888_v16 = vsub.f32 %v8400_v57, %v8880_v9  ;;  %v8892_v24 = vsub.f32 %v8389_v11, %v8880_v9  ;;  %v8896_v56 = vsub.f32 %v8397_v14, %v8880_v9 }
 0x3a3   :  { %v8900_v2 = vsub.f32 %v8446_v61, %v8880_v9  ;;  %v8904_v13 = vsub.f32 %v8455_v47, %v8880_v9  ;;  %v8908_v57 = vsub.f32 %v8443_v59, %v8880_v9  ;;  %v8912_v11 = vsub.f32 %v8452_v1, %v8880_v9 }
 0x3a4   :  { %14512 = vst [vmem:[#allocation23_spill] sm:$0xff] %v8884_v50  ;;  %14513 = vst [vmem:[#allocation24_spill] sm:$0xff] %v8888_v16  ;;  %v8916_v14 = vsub.f32 %v8500_v40, %v8880_v9  ;;  %v8920_v61 = vsub.f32 %v8509_v48, %v8880_v9  ;;  %v8924_v47 = vsub.f32 %v8497_v39, %v8880_v9 }
 0x3a5   :  { %14514 = vst [vmem:[#allocation25_spill] sm:$0xff] %v8892_v24  ;;  %14515 = vst [vmem:[#allocation26_spill] sm:$0xff] %v8896_v56  ;;  %v8928_v59 = vsub.f32 %v8506_v42, %v8880_v9  ;;  %v8932_v1 = vsub.f32 %v8554_v29, %v8880_v9  ;;  %v8936_v40 = vsub.f32 %v8563_v34, %v8880_v9 }
 0x3a6   :  { %v8940_v48 = vsub.f32 %v8551_v28, %v8880_v9  ;;  %v8944_v39 = vsub.f32 %v8560_v31, %v8880_v9  ;;  %v8948_v42 = vsub.f32 %v8607_v26, %v8880_v9  ;;  %v8952_v29 = vsub.f32 %v8616_v30, %v8880_v9 }
 0x3a7   :  { %v8956_v34 = vsub.f32 %v8604_v22, %v8880_v9  ;;  %v8960_v28 = vsub.f32 %v8613_v60, %v8880_v9  ;;  %v8964_v31 = vsub.f32 %v8649_v15, %v8880_v9  ;;  %v8968_v26 = vsub.f32 %v8656_v19, %v8880_v9 }
 0x3a8   :  { %v8972_v30 = vsub.f32 %v8646_v52, %v8880_v9  ;;  %v8976_v22 = vsub.f32 %v8654_v18, %v8880_v9  ;;  %v8980_v60 = vsub.f32 %v8683_v62, %v8880_v9  ;;  %v8984_v15 = vsub.f32 %v8690_v44, %v8880_v9 }
 0x3a9   :  { %v8988_v19 = vsub.f32 %v8680_v58, %v8880_v9  ;;  %v8992_v52 = vsub.f32 %v8688_v0, %v8880_v9  ;;  %v8996_v18 = vsub.f32 %v8717_v45, %v8880_v9  ;;  %v9000_v62 = vsub.f32 %v8724_v51, %v8880_v9 }
 0x3aa   :  { %v9004_v44 = vsub.f32 %v8714_v55, %v8880_v9  ;;  %v9008_v58 = vsub.f32 %v8722_v43, %v8880_v9  ;;  %v9012_v0 = vsub.f32 %v8751_v36, %v8880_v9  ;;  %v9016_v45 = vsub.f32 %v8758_v32, %v8880_v9 }
 0x3ab   :  { %v9020_v51 = vsub.f32 %v8748_v41, %v8880_v9  ;;  %v9024_v55 = vsub.f32 %v8756_v6, %v8880_v9  ;;  %v9028_v43 = vsub.f32 %v8770_v17, %v8880_v9  ;;  %v9032_v36 = vsub.f32 %v8776_v8, %v8880_v9 }
 0x3ac   :  { %v9036_v32 = vsub.f32 %v8768_v3, %v8880_v9  ;;  %v9040_v41 = vsub.f32 %v8774_v7, %v8880_v9  ;;  %v9044_v6 = vsub.f32 %v8786_v23, %v8880_v9  ;;  %v9048_v17 = vsub.f32 %v8792_v46, %v8880_v9 }
 0x3ad   :  { %v9052_v8 = vsub.f32 %v8784_v35, %v8880_v9  ;;  %v9056_v3 = vsub.f32 %v8790_v27, %v8880_v9  ;;  %v9060_v7 = vsub.f32 %v8802_v5, %v8880_v9  ;;  %v9064_v23 = vsub.f32 %v8808_v21, %v8880_v9 }
 0x3ae   :  { %v9068_v46 = vsub.f32 %v8800_v10, %v8880_v9  ;;  %v9072_v35 = vsub.f32 %v14517_v33, %v8880_v9  ;;  %v9076_v27 = vsub.f32 %v14519_v38, %v8880_v9  ;;  %v9080_v5 = vsub.f32 %v14521_v25, %v8880_v9  ;;  %v14531_v33 = vld [vmem:[#allocation13_spill] sm:$0xff]  ;;  %v14533_v25 = vld [vmem:[#allocation15_spill] sm:$0xff] }
 0x3af   :  { %v9084_v21 = vsub.f32 %v14523_v37, %v8880_v9  ;;  %v9088_v10 = vsub.f32 %v14525_v49, %v8880_v9  ;;  %v9092_v54 = vsub.f32 %v14527_v53, %v8880_v9  ;;  %v9096_v4 = vsub.f32 %v14529_v63, %v8880_v9 }
 0x3b0   :  { %14516 = vst [vmem:[#allocation27_spill] sm:$0xff] %v9068_v46  ;;  %14518 = vst [vmem:[#allocation8_spill] sm:$0xff] %v9072_v35  ;;  %v9100_v38 = vsub.f32 %v14531_v33, %v8880_v9  ;;  %v9104_v37 = vsub.f32 %v14533_v25, %v8880_v9 }
 0x3b1   :  { %14520 = vst [vmem:[#allocation10_spill] sm:$0xff] %v9076_v27  ;;  %14522 = vst [vmem:[#allocation12_spill] sm:$0xff] %v9080_v5 }
 0x3b2   :  { %14524 = vst [vmem:[#allocation9_spill] sm:$0xff] %v9084_v21  ;;  %14526 = vst [vmem:[#allocation11_spill] sm:$0xff] %v9088_v10  ;;  %v14535_v21 = vld [vmem:[#allocation18_spill] sm:$0xff]  ;;  %v14537_v10 = vld [vmem:[#allocation20_spill] sm:$0xff] }
 0x3b3   :  { %14528 = vst [vmem:[#allocation14_spill] sm:$0xff] %v9092_v54  ;;  %14530 = vst [vmem:[#allocation16_spill] sm:$0xff] %v9096_v4  ;;  %v9108_v49 = vsub.f32 %v14535_v21, %v8880_v9  ;;  %v9112_v53 = vsub.f32 %v14537_v10, %v8880_v9  ;;  %v14539_v54 = vld [vmem:[#allocation17_spill] sm:$0xff]  ;;  %v14541_v4 = vld [vmem:[#allocation19_spill] sm:$0xff]  ;;  %v9132_v10 = vsub.f32 %v8864_v20, %v8880_v9 }
 0x3b4   :  { %14532 = vst [vmem:[#allocation13_spill] sm:$0xff] %v9100_v38  ;;  %14534 = vst [vmem:[#allocation15_spill] sm:$0xff] %v9104_v37  ;;  %v9116_v63 = vsub.f32 %v14539_v54, %v8880_v9  ;;  %v9120_v33 = vsub.f32 %v14541_v4, %v8880_v9  ;;  %v14543_v38 = vld [vmem:[#allocation21_spill] sm:$0xff]  ;;  %v14545_v37 = vld [vmem:[#allocation22_spill] sm:$0xff]  ;;  %v9136_v54 = vsub.f32 %v8870_v12, %v8880_v9 }
 0x3b5   :  { %14536 = vst [vmem:[#allocation18_spill] sm:$0xff] %v9108_v49  ;;  %14538 = vst [vmem:[#allocation20_spill] sm:$0xff] %v9112_v53  ;;  %v9124_v25 = vsub.f32 %v14543_v38, %v8880_v9  ;;  %v9128_v21 = vsub.f32 %v14545_v37, %v8880_v9  ;;  %v3094_v4 = vmul.f32 %v8884_v50, %v8884_v50 }
 0x3b6   :  { %14540 = vst [vmem:[#allocation17_spill] sm:$0xff] %v9116_v63  ;;  %14542 = vst [vmem:[#allocation19_spill] sm:$0xff] %v9120_v33  ;;  %v3095_v33 = vmul.f32 %v8888_v16, %v8888_v16  ;;  %v3096_v38 = vmul.f32 %v8892_v24, %v8892_v24  ;;  %v3097_v37 = vmul.f32 %v8896_v56, %v8896_v56 }
 0x3b7   :  { %14544 = vst [vmem:[#allocation21_spill] sm:$0xff] %v9124_v25  ;;  %14546 = vst [vmem:[#allocation22_spill] sm:$0xff] %v9128_v21  ;;  %v3158_v21 = vsel %vm2894_vm13, %v3094_v4, 0.0  ;;  %v3098_v12 = vmul.f32 %v8900_v2, %v8900_v2  ;;  %v3099_v16 = vmul.f32 %v8904_v13, %v8904_v13  ;;  %v3100_v56 = vmul.f32 %v8908_v57, %v8908_v57 }
 0x3b8   :  { %14547 = vst [vmem:[#allocation28_spill] sm:$0xff] %v9132_v10  ;;  %14548 = vst [vmem:[#allocation29_spill] sm:$0xff] %v9136_v54  ;;  %v3159_v20 = vsel %vm2894_vm13, %v3095_v33, 0.0  ;;  %v3161_v9 = vsel %vm2894_vm13, %v3096_v38, 0.0  ;;  %v3163_v54 = vsel %vm2894_vm13, %v3097_v37, 0.0  ;;  %v3101_v33 = vmul.f32 %v8912_v11, %v8912_v11 }
 0x3b9   :  { %v3160_v10 = vadd.f32 %v3159_v20, %v3158_v21  ;;  %v3165_v4 = vsel %vm2894_vm13, %v3098_v12, 0.0  ;;  %v3167_v21 = vsel %vm2894_vm13, %v3099_v16, 0.0  ;;  %v3169_v38 = vsel %vm2894_vm13, %v3100_v56, 0.0 }
 0x3ba   :  { %v3105_v16 = vmul.f32 %v8928_v59, %v8928_v59  ;;  %v3106_v56 = vmul.f32 %v8932_v1, %v8932_v1 }
 0x3bb   :  { %v3162_v50 = vadd.f32 %v3161_v9, %v3160_v10  ;;  %v3102_v10 = vmul.f32 %v8916_v14, %v8916_v14 }
 0x3bd   :  { %v3164_v24 = vadd.f32 %v3163_v54, %v3162_v50  ;;  %v3103_v50 = vmul.f32 %v8920_v61, %v8920_v61  ;;  %v3171_v54 = vsel %vm2894_vm13, %v3101_v33, 0.0  ;;  %v3173_v12 = vsel %vm2894_vm13, %v3102_v10, 0.0 }
 0x3be   :  { %v3107_v33 = vmul.f32 %v8936_v40, %v8936_v40  ;;  %v3108_v10 = vmul.f32 %v8940_v48, %v8940_v48 }
 0x3bf   :  { %v3166_v25 = vadd.f32 %v3165_v4, %v3164_v24  ;;  %v3104_v24 = vmul.f32 %v8924_v47, %v8924_v47 }
 0x3c1   :  { %v3168_v20 = vadd.f32 %v3167_v21, %v3166_v25  ;;  %v3175_v25 = vsel %vm2894_vm13, %v3103_v50, 0.0  ;;  %v3109_v50 = vmul.f32 %v8944_v39, %v8944_v39 }
 0x3c3   :  { %v3170_v9 = vadd.f32 %v3169_v38, %v3168_v20  ;;  %v3177_v20 = vsel %vm2894_vm13, %v3104_v24, 0.0  ;;  %v3110_v24 = vmul.f32 %v8948_v42, %v8948_v42 }
 0x3c5   :  { %v3172_v37 = vadd.f32 %v3171_v54, %v3170_v9  ;;  %v3179_v9 = vsel %vm2894_vm13, %v3105_v16, 0.0  ;;  %v3111_v16 = vmul.f32 %v8952_v29, %v8952_v29 }
 0x3c7   :  { %v3174_v4 = vadd.f32 %v3173_v12, %v3172_v37  ;;  %v3181_v37 = vsel %vm2894_vm13, %v3106_v56, 0.0  ;;  %v3112_v56 = vmul.f32 %v8956_v34, %v8956_v34 }
 0x3c9   :  { %v3176_v21 = vadd.f32 %v3175_v25, %v3174_v4  ;;  %v3183_v4 = vsel %vm2894_vm13, %v3107_v33, 0.0  ;;  %v3113_v33 = vmul.f32 %v8960_v28, %v8960_v28 }
 0x3cb   :  { %v3178_v38 = vadd.f32 %v3177_v20, %v3176_v21  ;;  %v3185_v21 = vsel %vm2894_vm13, %v3108_v10, 0.0  ;;  %v3114_v10 = vmul.f32 %v8964_v31, %v8964_v31 }
 0x3cd   :  { %v3180_v54 = vadd.f32 %v3179_v9, %v3178_v38  ;;  %v3187_v38 = vsel %vm2894_vm13, %v3109_v50, 0.0  ;;  %v3115_v50 = vmul.f32 %v8968_v26, %v8968_v26 }
 0x3cf   :  { %v3182_v12 = vadd.f32 %v3181_v37, %v3180_v54  ;;  %v3189_v54 = vsel %vm2894_vm13, %v3110_v24, 0.0  ;;  %v3116_v24 = vmul.f32 %v8972_v30, %v8972_v30 }
 0x3d1   :  { %v3184_v25 = vadd.f32 %v3183_v4, %v3182_v12  ;;  %v3191_v12 = vsel %vm2894_vm13, %v3111_v16, 0.0  ;;  %v3117_v16 = vmul.f32 %v8976_v22, %v8976_v22 }
 0x3d3   :  { %v3186_v20 = vadd.f32 %v3185_v21, %v3184_v25  ;;  %v3193_v25 = vsel %vm2894_vm13, %v3112_v56, 0.0  ;;  %v3118_v56 = vmul.f32 %v8980_v60, %v8980_v60 }
 0x3d5   :  { %v3188_v9 = vadd.f32 %v3187_v38, %v3186_v20  ;;  %v3195_v20 = vsel %vm2894_vm13, %v3113_v33, 0.0  ;;  %v3119_v33 = vmul.f32 %v8984_v15, %v8984_v15 }
 0x3d7   :  { %v3190_v37 = vadd.f32 %v3189_v54, %v3188_v9  ;;  %v3197_v9 = vsel %vm2894_vm13, %v3114_v10, 0.0  ;;  %v3120_v10 = vmul.f32 %v8988_v19, %v8988_v19 }
 0x3d9   :  { %v3192_v4 = vadd.f32 %v3191_v12, %v3190_v37  ;;  %v3199_v37 = vsel %vm2894_vm13, %v3115_v50, 0.0  ;;  %v3121_v50 = vmul.f32 %v8992_v52, %v8992_v52 }
 0x3db   :  { %v3194_v21 = vadd.f32 %v3193_v25, %v3192_v4  ;;  %v3201_v4 = vsel %vm2894_vm13, %v3116_v24, 0.0  ;;  %v3122_v24 = vmul.f32 %v8996_v18, %v8996_v18 }
 0x3dd   :  { %v3196_v38 = vadd.f32 %v3195_v20, %v3194_v21  ;;  %v3203_v21 = vsel %vm2894_vm13, %v3117_v16, 0.0  ;;  %v3123_v16 = vmul.f32 %v9000_v62, %v9000_v62 }
 0x3df   :  { %v3198_v54 = vadd.f32 %v3197_v9, %v3196_v38  ;;  %v3205_v38 = vsel %vm2894_vm13, %v3118_v56, 0.0  ;;  %v3124_v56 = vmul.f32 %v9004_v44, %v9004_v44 }
 0x3e1   :  { %v3200_v12 = vadd.f32 %v3199_v37, %v3198_v54  ;;  %v3207_v54 = vsel %vm2894_vm13, %v3119_v33, 0.0  ;;  %v3125_v33 = vmul.f32 %v9008_v58, %v9008_v58 }
 0x3e3   :  { %v3202_v25 = vadd.f32 %v3201_v4, %v3200_v12  ;;  %v3209_v12 = vsel %vm2894_vm13, %v3120_v10, 0.0  ;;  %v3126_v10 = vmul.f32 %v9012_v0, %v9012_v0 }
 0x3e5   :  { %v3204_v20 = vadd.f32 %v3203_v21, %v3202_v25  ;;  %v3211_v25 = vsel %vm2894_vm13, %v3121_v50, 0.0  ;;  %v3127_v50 = vmul.f32 %v9016_v45, %v9016_v45 }
 0x3e7   :  { %v3206_v9 = vadd.f32 %v3205_v38, %v3204_v20  ;;  %v3213_v20 = vsel %vm2894_vm13, %v3122_v24, 0.0  ;;  %v3128_v24 = vmul.f32 %v9020_v51, %v9020_v51 }
 0x3e9   :  { %v3208_v37 = vadd.f32 %v3207_v54, %v3206_v9  ;;  %v3215_v9 = vsel %vm2894_vm13, %v3123_v16, 0.0  ;;  %v3129_v16 = vmul.f32 %v9024_v55, %v9024_v55 }
 0x3eb   :  { %v3210_v4 = vadd.f32 %v3209_v12, %v3208_v37  ;;  %v3217_v37 = vsel %vm2894_vm13, %v3124_v56, 0.0  ;;  %v3130_v56 = vmul.f32 %v9028_v43, %v9028_v43 }
 0x3ed   :  { %v3212_v21 = vadd.f32 %v3211_v25, %v3210_v4  ;;  %v3219_v4 = vsel %vm2894_vm13, %v3125_v33, 0.0  ;;  %v3131_v33 = vmul.f32 %v9032_v36, %v9032_v36 }
 0x3ef   :  { %v3214_v38 = vadd.f32 %v3213_v20, %v3212_v21  ;;  %v3221_v21 = vsel %vm2894_vm13, %v3126_v10, 0.0  ;;  %v3132_v10 = vmul.f32 %v9036_v32, %v9036_v32 }
 0x3f1   :  { %v3216_v54 = vadd.f32 %v3215_v9, %v3214_v38  ;;  %v3223_v38 = vsel %vm2894_vm13, %v3127_v50, 0.0  ;;  %v3133_v50 = vmul.f32 %v9040_v41, %v9040_v41 }
 0x3f3   :  { %v3218_v12 = vadd.f32 %v3217_v37, %v3216_v54  ;;  %v3225_v54 = vsel %vm2894_vm13, %v3128_v24, 0.0  ;;  %v3134_v24 = vmul.f32 %v9044_v6, %v9044_v6 }
 0x3f5   :  { %v3220_v25 = vadd.f32 %v3219_v4, %v3218_v12  ;;  %v3227_v12 = vsel %vm2894_vm13, %v3129_v16, 0.0  ;;  %v3135_v16 = vmul.f32 %v9048_v17, %v9048_v17 }
 0x3f7   :  { %v3222_v20 = vadd.f32 %v3221_v21, %v3220_v25  ;;  %v3229_v25 = vsel %vm2894_vm13, %v3130_v56, 0.0  ;;  %v3136_v56 = vmul.f32 %v9052_v8, %v9052_v8 }
 0x3f9   :  { %v3224_v9 = vadd.f32 %v3223_v38, %v3222_v20  ;;  %v3231_v20 = vsel %vm2894_vm13, %v3131_v33, 0.0  ;;  %v3137_v33 = vmul.f32 %v9056_v3, %v9056_v3 }
 0x3fb   :  { %v3226_v37 = vadd.f32 %v3225_v54, %v3224_v9  ;;  %v3233_v9 = vsel %vm2894_vm13, %v3132_v10, 0.0  ;;  %v3138_v10 = vmul.f32 %v9060_v7, %v9060_v7 }
 0x3fd   :  { %v3228_v4 = vadd.f32 %v3227_v12, %v3226_v37  ;;  %v3235_v37 = vsel %vm2894_vm13, %v3133_v50, 0.0  ;;  %v3139_v50 = vmul.f32 %v9064_v23, %v9064_v23 }
 0x3ff   :  { %v3230_v21 = vadd.f32 %v3229_v25, %v3228_v4  ;;  %v3237_v4 = vsel %vm2894_vm13, %v3134_v24, 0.0  ;;  %v3140_v24 = vmul.f32 %v9068_v46, %v9068_v46  ;;  %v14560_v46 = vld [vmem:[#allocation23_spill] sm:$0xff] }
 0x401   :  { %v3232_v38 = vadd.f32 %v3231_v20, %v3230_v21  ;;  %v3239_v21 = vsel %vm2894_vm13, %v3135_v16, 0.0  ;;  %v3141_v16 = vmul.f32 %v9072_v35, %v9072_v35 }
 0x403   :  { %v3234_v54 = vadd.f32 %v3233_v9, %v3232_v38  ;;  %v3241_v38 = vsel %vm2894_vm13, %v3136_v56, 0.0  ;;  %v3142_v56 = vmul.f32 %v9076_v27, %v9076_v27 }
 0x405   :  { %v3236_v12 = vadd.f32 %v3235_v37, %v3234_v54  ;;  %v3243_v54 = vsel %vm2894_vm13, %v3137_v33, 0.0  ;;  %v3143_v33 = vmul.f32 %v9080_v5, %v9080_v5 }
 0x407   :  { %v3238_v25 = vadd.f32 %v3237_v4, %v3236_v12  ;;  %v3245_v12 = vsel %vm2894_vm13, %v3138_v10, 0.0  ;;  %v14549_v10 = vld [vmem:[#allocation9_spill] sm:$0xff] }
 0x409   :  { %v3240_v20 = vadd.f32 %v3239_v21, %v3238_v25  ;;  %v3247_v25 = vsel %vm2894_vm13, %v3139_v50, 0.0  ;;  %v14550_v50 = vld [vmem:[#allocation11_spill] sm:$0xff] }
 0x40b   :  { %v3242_v9 = vadd.f32 %v3241_v38, %v3240_v20  ;;  %v3249_v20 = vsel %vm2894_vm13, %v3140_v24, 0.0  ;;  %v14551_v24 = vld [vmem:[#allocation14_spill] sm:$0xff] }
 0x40d   :  { %v3244_v37 = vadd.f32 %v3243_v54, %v3242_v9  ;;  %v3251_v9 = vsel %vm2894_vm13, %v3141_v16, 0.0  ;;  %v14552_v16 = vld [vmem:[#allocation16_spill] sm:$0xff] }
 0x40f   :  { %v3246_v4 = vadd.f32 %v3245_v12, %v3244_v37  ;;  %v3144_v37 = vmul.f32 %v14549_v10, %v14549_v10  ;;  %v3253_v12 = vsel %vm2894_vm13, %v3142_v56, 0.0  ;;  %v14553_v56 = vld [vmem:[#allocation13_spill] sm:$0xff] }
 0x411   :  { %v3248_v21 = vadd.f32 %v3247_v25, %v3246_v4  ;;  %v3145_v4 = vmul.f32 %v14550_v50, %v14550_v50  ;;  %v3255_v25 = vsel %vm2894_vm13, %v3143_v33, 0.0  ;;  %v14554_v33 = vld [vmem:[#allocation15_spill] sm:$0xff] }
 0x413   :  { %v3250_v38 = vadd.f32 %v3249_v20, %v3248_v21  ;;  %v3146_v21 = vmul.f32 %v14551_v24, %v14551_v24  ;;  %v3257_v20 = vsel %vm2894_vm13, %v3144_v37, 0.0 }
 0x415   :  { %v3252_v54 = vadd.f32 %v3251_v9, %v3250_v38  ;;  %v3147_v38 = vmul.f32 %v14552_v16, %v14552_v16  ;;  %v3259_v9 = vsel %vm2894_vm13, %v3145_v4, 0.0 }
 0x417   :  { %v3254_v35 = vadd.f32 %v3253_v12, %v3252_v54  ;;  %v3148_v54 = vmul.f32 %v14553_v56, %v14553_v56  ;;  %v3261_v12 = vsel %vm2894_vm13, %v3146_v21, 0.0 }
 0x419   :  { %v3256_v27 = vadd.f32 %v3255_v25, %v3254_v35  ;;  %v3149_v35 = vmul.f32 %v14554_v33, %v14554_v33  ;;  %v3263_v25 = vsel %vm2894_vm13, %v3147_v38, 0.0  ;;  %v3265_v37 = vsel %vm2894_vm13, %v3148_v54, 0.0  ;;  %v14555_v38 = vld [vmem:[#allocation19_spill] sm:$0xff]  ;;  %v14556_v54 = vld [vmem:[#allocation21_spill] sm:$0xff] }
 0x41b   :  { %v3258_v5 = vadd.f32 %v3257_v20, %v3256_v27  ;;  %v3150_v27 = vmul.f32 %v9108_v49, %v9108_v49  ;;  %v3267_v4 = vsel %vm2894_vm13, %v3149_v35, 0.0  ;;  %v14557_v35 = vld [vmem:[#allocation22_spill] sm:$0xff] }
 0x41d   :  { %v3260_v10 = vadd.f32 %v3259_v9, %v3258_v5  ;;  %v3151_v5 = vmul.f32 %v9112_v53, %v9112_v53  ;;  %v3269_v21 = vsel %vm2894_vm13, %v3150_v27, 0.0  ;;  %v14558_v27 = vld [vmem:[#allocation28_spill] sm:$0xff] }
 0x41f   :  { %v3262_v50 = vadd.f32 %v3261_v12, %v3260_v10  ;;  %v3152_v10 = vmul.f32 %v9116_v63, %v9116_v63 }
 0x421   :  { %v3264_v24 = vadd.f32 %v3263_v25, %v3262_v50  ;;  %v3153_v50 = vmul.f32 %v14555_v38, %v14555_v38  ;;  %v3271_v25 = vsel %vm2894_vm13, %v3151_v5, 0.0  ;;  %v14559_v5 = vld [vmem:[#allocation29_spill] sm:$0xff] }
 0x423   :  { %v3266_v20 = vadd.f32 %v3265_v37, %v3264_v24  ;;  %v3154_v24 = vmul.f32 %v14556_v54, %v14556_v54  ;;  %v3273_v37 = vsel %vm2894_vm13, %v3152_v10, 0.0 }
 0x425   :  { %v3268_v9 = vadd.f32 %v3267_v4, %v3266_v20  ;;  %v3155_v20 = vmul.f32 %v14557_v35, %v14557_v35  ;;  %v3275_v4 = vsel %vm2894_vm13, %v3153_v50, 0.0 }
 0x427   :  { %v3270_v12 = vadd.f32 %v3269_v21, %v3268_v9  ;;  %v3156_v9 = vmul.f32 %v14558_v27, %v14558_v27  ;;  %v3277_v21 = vsel %vm2894_vm13, %v3154_v24, 0.0 }
 0x429   :  { %v3272_v49 = vadd.f32 %v3271_v25, %v3270_v12  ;;  %v3157_v12 = vmul.f32 %v14559_v5, %v14559_v5  ;;  %v3279_v25 = vsel %vm2894_vm13, %v3155_v20, 0.0  ;;  %v14561_v20 = vld [vmem:[#allocation24_spill] sm:$0xff] }
 0x42b   :  { %v3274_v53 = vadd.f32 %v3273_v37, %v3272_v49  ;;  %v3281_v49 = vsel %vm2894_vm13, %v3156_v9, 0.0  ;;  %v3283_v37 = vsel %vm2894_vm13, %v3157_v12, 0.0  ;;  %v14562_v9 = vld [vmem:[#allocation25_spill] sm:$0xff]  ;;  %v14563_v12 = vld [vmem:[#allocation26_spill] sm:$0xff] }
 0x42d   :  { %v3276_v63 = vadd.f32 %v3275_v4, %v3274_v53 }
 0x42f   :  { %v3278_v38 = vadd.f32 %v3277_v21, %v3276_v63 }
 0x431   :  { %v3280_v54 = vadd.f32 %v3279_v25, %v3278_v38 }
 0x433   :  { %v3282_v10 = vadd.f32 %v3281_v49, %v3280_v54 }
 0x435   :  { %v3284_v35 = vadd.f32 %v3283_v37, %v3282_v10  ;;  %v14566_v10 = vld [vmem:[#allocation27_spill] sm:$0xff]  ;;  %v14567_v37 = vld [vmem:[#allocation8_spill] sm:$0xff] }
 0x437   :  { %v3285_v50 = vrot.slane %v3284_v35, 4 }
 0x439   :  { %v3286_v53 = vadd.f32 %v3285_v50, %v3284_v35  ;;  %v14568_v50 = vld [vmem:[#allocation10_spill] sm:$0xff] }
 0x43b   :  { %v3287_v4 = vrot.slane %v3286_v53, 2 }
 0x43d   :  { %v3288_v33 = vadd.f32 %v3287_v4, %v3286_v53  ;;  %v14569_v53 = vld [vmem:[#allocation12_spill] sm:$0xff]  ;;  %v14570_v4 = vld [vmem:[#allocation9_spill] sm:$0xff] }
 0x43f   :  { %v3289_v56 = vrot.slane %v3288_v33, 1 }
 0x441   :  { %v3290_v16 = vadd.f32 %v3289_v56, %v3288_v33 }
 0x443   :  { %v3291_v24 = vmul.f32 0.001953125, %v3290_v16 }
 0x445   :  { %v3292_v63 = vadd.f32 1e-05, %v3291_v24 }
 0x447   :  { %7038 = vrsqrt.f32 %v3292_v63  ;;  %v14571_v63 = vld [vmem:[#allocation11_spill] sm:$0xff] }
 0x451   :  { %v9330_v21 = vpop.eup %7038 }
 0x452   :  { %v9334_v38 = vmul.f32 %v9330_v21, %v14560_v46  ;;  %v9338_v54 = vmul.f32 %v9330_v21, %v14561_v20  ;;  %v9342_v35 = vmul.f32 %v9330_v21, %v14562_v9  ;;  %v9346_v56 = vmul.f32 %v9330_v21, %v14563_v12  ;;  %v14573_v9 = vld [vmem:[#allocation14_spill] sm:$0xff] }
 0x453   :  { %v9350_v16 = vmul.f32 %v9330_v21, %v8900_v2  ;;  %v9354_v46 = vmul.f32 %v9330_v21, %v14558_v27  ;;  %v9358_v33 = vmul.f32 %v9330_v21, %v14559_v5  ;;  %v9362_v25 = vmul.f32 %v9330_v21, %v8904_v13 }
 0x454   :  { %v9366_v49 = vmul.f32 %v9330_v21, %v8908_v57  ;;  %v9370_v2 = vmul.f32 %v9330_v21, %v8912_v11  ;;  %v9374_v27 = vmul.f32 %v9330_v21, %v8916_v14  ;;  %v9378_v5 = vmul.f32 %v9330_v21, %v8920_v61 }
 0x455   :  { %14564 = vst [vmem:[#allocation28_spill] sm:$0xff] %v9354_v46  ;;  %14565 = vst [vmem:[#allocation29_spill] sm:$0xff] %v9358_v33  ;;  %v9382_v13 = vmul.f32 %v9330_v21, %v8924_v47  ;;  %v9386_v57 = vmul.f32 %v9330_v21, %v8928_v59  ;;  %v9390_v11 = vmul.f32 %v9330_v21, %v8932_v1 }
 0x456   :  { %v9394_v14 = vmul.f32 %v9330_v21, %v8936_v40  ;;  %v9398_v61 = vmul.f32 %v9330_v21, %v8940_v48  ;;  %v9402_v47 = vmul.f32 %v9330_v21, %v8944_v39  ;;  %v9406_v59 = vmul.f32 %v9330_v21, %v8948_v42 }
 0x457   :  { %v9410_v1 = vmul.f32 %v9330_v21, %v8952_v29  ;;  %v9414_v40 = vmul.f32 %v9330_v21, %v8956_v34  ;;  %v9418_v48 = vmul.f32 %v9330_v21, %v8960_v28  ;;  %v9422_v39 = vmul.f32 %v9330_v21, %v8964_v31 }
 0x458   :  { %v9426_v42 = vmul.f32 %v9330_v21, %v8968_v26  ;;  %v9430_v29 = vmul.f32 %v9330_v21, %v8972_v30  ;;  %v9434_v34 = vmul.f32 %v9330_v21, %v8976_v22  ;;  %v9438_v28 = vmul.f32 %v9330_v21, %v8980_v60 }
 0x459   :  { %v9442_v31 = vmul.f32 %v9330_v21, %v8984_v15  ;;  %v9446_v26 = vmul.f32 %v9330_v21, %v8988_v19  ;;  %v9450_v30 = vmul.f32 %v9330_v21, %v8992_v52  ;;  %v9454_v22 = vmul.f32 %v9330_v21, %v8996_v18 }
 0x45a   :  { %v9458_v60 = vmul.f32 %v9330_v21, %v9000_v62  ;;  %v9462_v15 = vmul.f32 %v9330_v21, %v9004_v44  ;;  %v9466_v19 = vmul.f32 %v9330_v21, %v9008_v58  ;;  %v9470_v52 = vmul.f32 %v9330_v21, %v9012_v0 }
 0x45b   :  { %v9474_v18 = vmul.f32 %v9330_v21, %v9016_v45  ;;  %v9478_v62 = vmul.f32 %v9330_v21, %v9020_v51  ;;  %v9482_v44 = vmul.f32 %v9330_v21, %v9024_v55  ;;  %v9486_v58 = vmul.f32 %v9330_v21, %v9028_v43 }
 0x45c   :  { %v9490_v0 = vmul.f32 %v9330_v21, %v9032_v36  ;;  %v9494_v45 = vmul.f32 %v9330_v21, %v9036_v32  ;;  %v9498_v51 = vmul.f32 %v9330_v21, %v9040_v41  ;;  %v9502_v55 = vmul.f32 %v9330_v21, %v9044_v6 }
 0x45d   :  { %v9506_v43 = vmul.f32 %v9330_v21, %v9048_v17  ;;  %v9510_v36 = vmul.f32 %v9330_v21, %v9052_v8  ;;  %v9514_v32 = vmul.f32 %v9330_v21, %v9056_v3  ;;  %v9518_v41 = vmul.f32 %v9330_v21, %v9060_v7  ;;  %v9539_v7 = vld [vmem:[%s14344_s2] ss:$0 sm:$0xff] }
 0x45e   :  { %v9522_v6 = vmul.f32 %v9330_v21, %v9064_v23  ;;  %v9526_v17 = vmul.f32 %v9330_v21, %v14566_v10  ;;  %v9530_v8 = vmul.f32 %v9330_v21, %v14567_v37  ;;  %v9534_v3 = vmul.f32 %v9330_v21, %v14568_v50  ;;  %v14575_v10 = vld [vmem:[#allocation16_spill] sm:$0xff]  ;;  %v14577_v50 = vld [vmem:[#allocation13_spill] sm:$0xff] }
 0x45f   :  { %v3343_v23 = vmul.f32 %v9330_v21, %v14569_v53  ;;  %v3344_v24 = vmul.f32 %v9330_v21, %v14570_v4  ;;  %v9547_v20 = vmul.f32 %v9330_v21, %v14571_v63  ;;  %v9551_v12 = vmul.f32 %v9330_v21, %v14573_v9  ;;  %v14579_v53 = vld [vmem:[#allocation15_spill] sm:$0xff]  ;;  %v14581_v4 = vld [vmem:[#allocation18_spill] sm:$0xff] }
 0x460   :  { %v9555_v37 = vmul.f32 %v9330_v21, %v14575_v10  ;;  %v9559_v33 = vmul.f32 %v9330_v21, %v14577_v50  ;;  %v9563_v46 = vmul.f32 %v9330_v21, %v14579_v53  ;;  %v9567_v63 = vmul.f32 %v9330_v21, %v14581_v4 }
 0x461   :  { %14572 = vst [vmem:[#allocation23_spill] sm:$0xff] %v9547_v20  ;;  %14574 = vst [vmem:[#allocation24_spill] sm:$0xff] %v9551_v12  ;;  %v14582_v20 = vld [vmem:[#allocation20_spill] sm:$0xff]  ;;  %v14583_v12 = vld [vmem:[#allocation17_spill] sm:$0xff] }
 0x462   :  { %14576 = vst [vmem:[#allocation25_spill] sm:$0xff] %v9555_v37  ;;  %14578 = vst [vmem:[#allocation26_spill] sm:$0xff] %v9559_v33  ;;  %v9571_v9 = vmul.f32 %v9330_v21, %v14582_v20  ;;  %v9575_v10 = vmul.f32 %v9330_v21, %v14583_v12  ;;  %v14584_v37 = vld [vmem:[#allocation19_spill] sm:$0xff]  ;;  %v14585_v33 = vld [vmem:[#allocation21_spill] sm:$0xff]  ;;  %v9591_v20 = vmul.f32 %v9539_v7, %v9334_v38 }
 0x463   :  { %14580 = vst [vmem:[#allocation27_spill] sm:$0xff] %v9563_v46  ;;  %v9579_v50 = vmul.f32 %v9330_v21, %v14584_v37  ;;  %v9583_v53 = vmul.f32 %v9330_v21, %v14585_v33  ;;  %v14586_v46 = vld [vmem:[#allocation22_spill] sm:$0xff]  ;;  %v9595_v12 = vmul.f32 %v9539_v7, %v9338_v54  ;;  %v9599_v37 = vmul.f32 %v9539_v7, %v9342_v35 }
 0x464   :  { %v9587_v4 = vmul.f32 %v9330_v21, %v14586_v46  ;;  %v9603_v33 = vmul.f32 %v9539_v7, %v9346_v56  ;;  %v9607_v21 = vmul.f32 %v9539_v7, %v9350_v16  ;;  %v9611_v38 = vmul.f32 %v9539_v7, %v9362_v25 }
 0x465   :  { %v9615_v54 = vmul.f32 %v9539_v7, %v9366_v49  ;;  %v9619_v35 = vmul.f32 %v9539_v7, %v9370_v2  ;;  %v9623_v56 = vmul.f32 %v9539_v7, %v9374_v27  ;;  %v9627_v16 = vmul.f32 %v9539_v7, %v9378_v5 }
 0x466   :  { %v9631_v46 = vmul.f32 %v9539_v7, %v9382_v13  ;;  %v9635_v25 = vmul.f32 %v9539_v7, %v9386_v57  ;;  %v9639_v49 = vmul.f32 %v9539_v7, %v9390_v11  ;;  %v9643_v2 = vmul.f32 %v9539_v7, %v9394_v14 }
 0x467   :  { %v9647_v27 = vmul.f32 %v9539_v7, %v9398_v61  ;;  %v9651_v5 = vmul.f32 %v9539_v7, %v9402_v47  ;;  %v9655_v13 = vmul.f32 %v9539_v7, %v9406_v59  ;;  %v9659_v57 = vmul.f32 %v9539_v7, %v9410_v1 }
 0x468   :  { %v9663_v11 = vmul.f32 %v9539_v7, %v9414_v40  ;;  %v9667_v14 = vmul.f32 %v9539_v7, %v9418_v48  ;;  %v9671_v61 = vmul.f32 %v9539_v7, %v9422_v39  ;;  %v9675_v47 = vmul.f32 %v9539_v7, %v9426_v42 }
 0x469   :  { %v9679_v59 = vmul.f32 %v9539_v7, %v9430_v29  ;;  %v9683_v1 = vmul.f32 %v9539_v7, %v9434_v34  ;;  %v9687_v40 = vmul.f32 %v9539_v7, %v9438_v28  ;;  %v9691_v48 = vmul.f32 %v9539_v7, %v9442_v31 }
 0x46a   :  { %v9695_v39 = vmul.f32 %v9539_v7, %v9446_v26  ;;  %v9699_v42 = vmul.f32 %v9539_v7, %v9450_v30  ;;  %v9703_v29 = vmul.f32 %v9539_v7, %v9454_v22  ;;  %v9707_v34 = vmul.f32 %v9539_v7, %v9458_v60 }
 0x46b   :  { %v9711_v28 = vmul.f32 %v9539_v7, %v9462_v15  ;;  %v9715_v31 = vmul.f32 %v9539_v7, %v9466_v19  ;;  %v9719_v26 = vmul.f32 %v9539_v7, %v9470_v52  ;;  %v9723_v30 = vmul.f32 %v9539_v7, %v9474_v18 }
 0x46c   :  { %v9727_v22 = vmul.f32 %v9539_v7, %v9478_v62  ;;  %v9731_v60 = vmul.f32 %v9539_v7, %v9482_v44  ;;  %v9735_v15 = vmul.f32 %v9539_v7, %v9486_v58  ;;  %v9739_v19 = vmul.f32 %v9539_v7, %v9490_v0 }
 0x46d   :  { %v9743_v52 = vmul.f32 %v9539_v7, %v9494_v45  ;;  %v9747_v18 = vmul.f32 %v9539_v7, %v9498_v51  ;;  %v9751_v62 = vmul.f32 %v9539_v7, %v9502_v55  ;;  %v9755_v44 = vmul.f32 %v9539_v7, %v9506_v43 }
 0x46e   :  { %v9759_v58 = vmul.f32 %v9539_v7, %v9510_v36  ;;  %v9763_v0 = vmul.f32 %v9539_v7, %v9514_v32  ;;  %v9767_v45 = vmul.f32 %v9539_v7, %v9518_v41  ;;  %v9771_v51 = vmul.f32 %v9539_v7, %v9522_v6  ;;  %v9794_v6 = vld [vmem:[%s14345_s3] ss:$0 sm:$0xff] }
 0x46f   :  { %v9775_v55 = vmul.f32 %v9539_v7, %v9526_v17  ;;  %v9779_v43 = vmul.f32 %v9539_v7, %v9530_v8  ;;  %v9783_v36 = vmul.f32 %v9539_v7, %v9534_v3  ;;  %v9786_v32 = vmul.f32 %v9539_v7, %v3343_v23  ;;  %v14592_v17 = vld [vmem:[#allocation23_spill] sm:$0xff]  ;;  %v14593_v8 = vld [vmem:[#allocation24_spill] sm:$0xff]  ;;  %v14594_v3 = vld [vmem:[#allocation25_spill] sm:$0xff] }
 0x470   :  { %v9789_v41 = vmul.f32 %v9539_v7, %v3344_v24  ;;  %v9806_v23 = vmul.f32 %v9539_v7, %v14594_v3  ;;  %v9826_v3 = vmul.f32 %v9539_v7, %v9575_v10 }
 0x471   :  { %14587 = vst [vmem:[#allocation8_spill] sm:$0xff] %v9775_v55  ;;  %14588 = vst [vmem:[#allocation10_spill] sm:$0xff] %v9779_v43  ;;  %v9798_v55 = vmul.f32 %v9539_v7, %v14592_v17  ;;  %v9802_v43 = vmul.f32 %v9539_v7, %v14593_v8  ;;  %v9818_v17 = vmul.f32 %v9539_v7, %v9567_v63 }
 0x472   :  { %14589 = vst [vmem:[#allocation12_spill] sm:$0xff] %v9783_v36  ;;  %14590 = vst [vmem:[#allocation9_spill] sm:$0xff] %v9786_v32  ;;  %v14595_v32 = vld [vmem:[#allocation26_spill] sm:$0xff]  ;;  %v9822_v8 = vmul.f32 %v9539_v7, %v9571_v9  ;;  %v9838_v63 = vmul.f32 %v9539_v7, %v9587_v4  ;;  %v9858_v4 = vadd.f32 %v9794_v6, %v9599_v37 }
 0x473   :  { %14591 = vst [vmem:[#allocation11_spill] sm:$0xff] %v9789_v41  ;;  %v9810_v24 = vmul.f32 %v9539_v7, %v14595_v32  ;;  %v14596_v41 = vld [vmem:[#allocation27_spill] sm:$0xff]  ;;  %14597 = vst [vmem:[#allocation14_spill] sm:$0xff] %v9818_v17  ;;  %v9830_v32 = vmul.f32 %v9539_v7, %v9579_v50  ;;  %v14599_v17 = vld [vmem:[#allocation28_spill] sm:$0xff]  ;;  %v9850_v50 = vadd.f32 %v9794_v6, %v9591_v20 }
 0x474   :  { %v9814_v36 = vmul.f32 %v9539_v7, %v14596_v41  ;;  %14598 = vst [vmem:[#allocation16_spill] sm:$0xff] %v9822_v8  ;;  %v9834_v41 = vmul.f32 %v9539_v7, %v9583_v53  ;;  %v9842_v9 = vmul.f32 %v9539_v7, %v14599_v17  ;;  %v14600_v8 = vld [vmem:[#allocation29_spill] sm:$0xff]  ;;  %v9854_v53 = vadd.f32 %v9794_v6, %v9595_v12 }
 0x475   :  { %v9846_v10 = vmul.f32 %v9539_v7, %v14600_v8  ;;  %v9862_v17 = vadd.f32 %v9794_v6, %v9603_v33  ;;  %v9866_v7 = vadd.f32 %v9794_v6, %v9607_v21  ;;  %v9870_v20 = vadd.f32 %v9794_v6, %v9611_v38 }
 0x476   :  { %v9874_v12 = vadd.f32 %v9794_v6, %v9615_v54  ;;  %v9878_v37 = vadd.f32 %v9794_v6, %v9619_v35  ;;  %v9882_v33 = vadd.f32 %v9794_v6, %v9623_v56  ;;  %v9886_v21 = vadd.f32 %v9794_v6, %v9627_v16 }
 0x477   :  { %v9890_v38 = vadd.f32 %v9794_v6, %v9631_v46  ;;  %v9894_v54 = vadd.f32 %v9794_v6, %v9635_v25  ;;  %v9898_v35 = vadd.f32 %v9794_v6, %v9639_v49  ;;  %v9902_v56 = vadd.f32 %v9794_v6, %v9643_v2 }
 0x478   :  { %v9906_v16 = vadd.f32 %v9794_v6, %v9647_v27  ;;  %v9910_v46 = vadd.f32 %v9794_v6, %v9651_v5  ;;  %v9914_v25 = vadd.f32 %v9794_v6, %v9655_v13  ;;  %v9918_v49 = vadd.f32 %v9794_v6, %v9659_v57  ;;  %v14605_v8 = vld [vmem:[#allocation8_spill] sm:$0xff] }
 0x479   :  { %v9922_v2 = vadd.f32 %v9794_v6, %v9663_v11  ;;  %v9926_v27 = vadd.f32 %v9794_v6, %v9667_v14  ;;  %v9930_v5 = vadd.f32 %v9794_v6, %v9671_v61  ;;  %v9934_v13 = vadd.f32 %v9794_v6, %v9675_v47 }
 0x47a   :  { %v9938_v57 = vadd.f32 %v9794_v6, %v9679_v59  ;;  %v9942_v11 = vadd.f32 %v9794_v6, %v9683_v1  ;;  %v9946_v14 = vadd.f32 %v9794_v6, %v9687_v40  ;;  %v9950_v61 = vadd.f32 %v9794_v6, %v9691_v48 }
 0x47b   :  { %v9954_v47 = vadd.f32 %v9794_v6, %v9695_v39  ;;  %v9958_v59 = vadd.f32 %v9794_v6, %v9699_v42  ;;  %v9962_v1 = vadd.f32 %v9794_v6, %v9703_v29  ;;  %v9966_v40 = vadd.f32 %v9794_v6, %v9707_v34 }
 0x47c   :  { %v9970_v48 = vadd.f32 %v9794_v6, %v9711_v28  ;;  %v9974_v39 = vadd.f32 %v9794_v6, %v9715_v31  ;;  %v9978_v42 = vadd.f32 %v9794_v6, %v9719_v26  ;;  %v9982_v29 = vadd.f32 %v9794_v6, %v9723_v30 }
 0x47d   :  { %v9986_v34 = vadd.f32 %v9794_v6, %v9727_v22  ;;  %v9990_v28 = vadd.f32 %v9794_v6, %v9731_v60  ;;  %v9994_v31 = vadd.f32 %v9794_v6, %v9735_v15  ;;  %v9998_v26 = vadd.f32 %v9794_v6, %v9739_v19 }
 0x47e   :  { %v10002_v30 = vadd.f32 %v9794_v6, %v9743_v52  ;;  %v10006_v22 = vadd.f32 %v9794_v6, %v9747_v18  ;;  %v10010_v60 = vadd.f32 %v9794_v6, %v9751_v62  ;;  %v10014_v15 = vadd.f32 %v9794_v6, %v9755_v44 }
 0x47f   :  { %v10018_v19 = vadd.f32 %v9794_v6, %v9759_v58  ;;  %v10022_v52 = vadd.f32 %v9794_v6, %v9763_v0  ;;  %v10026_v18 = vadd.f32 %v9794_v6, %v9767_v45  ;;  %v10030_v62 = vadd.f32 %v9794_v6, %v9771_v51 }
 0x480   :  { %14601 = vst [vmem:[#allocation13_spill] sm:$0xff] %v10014_v15  ;;  %v10034_v44 = vadd.f32 %v9794_v6, %v14605_v8  ;;  %v14606_v15 = vld [vmem:[#allocation10_spill] sm:$0xff]  ;;  %v10054_v8 = vadd.f32 %v9794_v6, %v9798_v55  ;;  %vm3498_vm15 = vcmp.ge.f32.partialorder %v9850_v50, 0.0  ;;  %vm3499_vm0 = vcmp.ge.f32.partialorder %v9854_v53, 0.0 }
 0x481   :  { %14602 = vst [vmem:[#allocation15_spill] sm:$0xff] %v10018_v19  ;;  %14603 = vst [vmem:[#allocation18_spill] sm:$0xff] %v10022_v52  ;;  %v10038_v58 = vadd.f32 %v9794_v6, %v14606_v15  ;;  %v14607_v19 = vld [vmem:[#allocation12_spill] sm:$0xff]  ;;  %v14608_v52 = vld [vmem:[#allocation9_spill] sm:$0xff]  ;;  %v10058_v15 = vadd.f32 %v9794_v6, %v9802_v43  ;;  %vm3500_vm1 = vcmp.ge.f32.partialorder %v9858_v4, 0.0  ;;  %vm3501_vm2 = vcmp.ge.f32.partialorder %v9862_v17, 0.0 }
 0x482   :  { %14604 = vst [vmem:[#allocation20_spill] sm:$0xff] %v10026_v18  ;;  %v10042_v0 = vadd.f32 %v9794_v6, %v14607_v19  ;;  %v10046_v45 = vadd.f32 %v9794_v6, %v14608_v52  ;;  %v14610_v18 = vld [vmem:[#allocation11_spill] sm:$0xff]  ;;  %14612 = vst [vmem:[#allocation21_spill] sm:$0xff] %v10054_v8  ;;  %v10062_v19 = vadd.f32 %v9794_v6, %v9806_v23  ;;  %v14618_v8 = vld [vmem:[#allocation16_spill] sm:$0xff]  ;;  %vm3502_vm3 = vcmp.ge.f32.partialorder %v9866_v7, 0.0 }
 0x483   :  { %v10050_v51 = vadd.f32 %v9794_v6, %v14610_v18  ;;  %v10066_v52 = vadd.f32 %v9794_v6, %v9810_v24  ;;  %v10070_v18 = vadd.f32 %v9794_v6, %v9814_v36  ;;  %v10078_v43 = vadd.f32 %v9794_v6, %v14618_v8 }
 0x484   :  { %14609 = vst [vmem:[#allocation17_spill] sm:$0xff] %v10046_v45  ;;  %14613 = vst [vmem:[#allocation22_spill] sm:$0xff] %v10062_v19  ;;  %v10082_v23 = vadd.f32 %v9794_v6, %v9826_v3  ;;  %v10086_v24 = vadd.f32 %v9794_v6, %v9830_v32  ;;  %v10090_v36 = vadd.f32 %v9794_v6, %v9834_v41  ;;  %vm3503_vm4 = vcmp.ge.f32.partialorder %v9870_v20, 0.0 }
 0x485   :  { %14611 = vst [vmem:[#allocation19_spill] sm:$0xff] %v10050_v51  ;;  %14614 = vst [vmem:[#allocation23_spill] sm:$0xff] %v10066_v52  ;;  %v14616_v51 = vld [vmem:[#allocation14_spill] sm:$0xff]  ;;  %vm3504_vm5 = vcmp.ge.f32.partialorder %v9874_v12, 0.0  ;;  %vm3505_vm6 = vcmp.ge.f32.partialorder %v9878_v37, 0.0  ;;  %vm3506_vm7 = vcmp.ge.f32.partialorder %v9882_v33, 0.0  ;;  %v10107_v3 = vadd.f32 %v9794_v6, %v9842_v9 }
 0x486   :  { %14615 = vst [vmem:[#allocation24_spill] sm:$0xff] %v10070_v18  ;;  %v10074_v55 = vadd.f32 %v9794_v6, %v14616_v51  ;;  %14619 = vst [vmem:[#allocation26_spill] sm:$0xff] %v10078_v43  ;;  %v10094_v51 = vadd.f32 %v9794_v6, %v9838_v63  ;;  %vm3507_vm8 = vcmp.ge.f32.partialorder %v9886_v21, 0.0  ;;  %v3562_v32 = vmul.f32 0.01, %v9850_v50 }
 0x487   :  { %14620 = vst [vmem:[#allocation27_spill] sm:$0xff] %v10082_v23  ;;  %14621 = vst [vmem:[#allocation28_spill] sm:$0xff] %v10086_v24  ;;  %v3563_v41 = vmul.f32 0.01, %v9854_v53  ;;  %v3564_v63 = vmul.f32 0.01, %v9858_v4  ;;  %v10115_v8 = vadd.f32 %v9794_v6, %v9846_v10 }
 0x488   :  { %14617 = vst [vmem:[#allocation25_spill] sm:$0xff] %v10074_v55  ;;  %14622 = vst [vmem:[#allocation29_spill] sm:$0xff] %v10090_v36  ;;  %vm3508_vm9 = vcmp.ge.f32.partialorder %v9890_v38, 0.0  ;;  %v3566_v36 = vmul.f32 0.01, %v9866_v7  ;;  %vm3509_vm10 = vcmp.ge.f32.partialorder %v9894_v54, 0.0  ;;  %v3626_v6 = vsel %vm3498_vm15, %v9850_v50, %v3562_v32 }
 0x489   :  { %14623 = vst [vmem:[#allocation8_spill] sm:$0xff] %v10094_v51  ;;  %14624 = vst [vmem:[#allocation10_spill] sm:$0xff] %v10107_v3  ;;  %v3565_v51 = vmul.f32 0.01, %v9862_v17  ;;  %v3567_v9 = vmul.f32 0.01, %v9870_v20  ;;  %v3627_v55 = vsel %vm3499_vm0, %v9854_v53, %v3563_v41  ;;  %v3628_v52 = vsel %vm3500_vm1, %v9858_v4, %v3564_v63 }
 0x48a   :  { %14625 = vst [vmem:[#allocation12_spill] sm:$0xff] %v10115_v8  ;;  %v3568_v3 = vmul.f32 0.01, %v9874_v12  ;;  %v3569_v24 = vmul.f32 0.01, %v9878_v37  ;;  %vm3510_vm11 = vcmp.ge.f32.partialorder %v9898_v35, 0.0 }
 0x48b   :  { %v3570_v23 = vmul.f32 0.01, %v9882_v33  ;;  %v10130_v10 = vmul.f32 0.01, %v9886_v21  ;;  %v10133_v8 = vmul.f32 0.01, %v9890_v38  ;;  %v3629_v19 = vsel %vm3501_vm2, %v9862_v17, %v3565_v51 }
 0x48c   :  { %v10136_v43 = vmul.f32 0.01, %v9894_v54  ;;  %3800 = vst.msk [vmem:[#allocation4 + $0x19] sm:$0xff] %vm2894_vm13, %v3626_v6  ;;  %6460 = vst.msk [vmem:[#allocation5] sm:$0xff] %vm2894_vm13, %v3626_v6  ;;  %vm3511_vm12 = vcmp.ge.f32.partialorder %v9902_v56, 0.0  ;;  %vm3512_vm14 = vcmp.ge.f32.partialorder %v9906_v16, 0.0 }
 0x48d   :  { %v10145_v50 = vmul.f32 0.01, %v9898_v35  ;;  %v10148_v32 = vmul.f32 0.01, %v9902_v56  ;;  %v10151_v18 = vmul.f32 0.01, %v9906_v16 }
 0x48e   :  { %3801 = vst.msk [vmem:[#allocation4 + $0x21] sm:$0xff] %vm2894_vm13, %v3627_v55  ;;  %6461 = vst.msk [vmem:[#allocation5 + $0x8] sm:$0xff] %vm2894_vm13, %v3627_v55  ;;  %v10160_v53 = vmul.f32 0.01, %v9910_v46  ;;  %v10163_v41 = vmul.f32 0.01, %v9914_v25 }
 0x48f   :  { %v10166_v6 = vmul.f32 0.01, %v9918_v49  ;;  %3802 = vst.msk [vmem:[#allocation4 + $0x31] sm:$0xff] %vm2894_vm13, %v3628_v52  ;;  %6462 = vst.msk [vmem:[#allocation5 + $0x10] sm:$0xff] %vm2894_vm13, %v3628_v52  ;;  %vm3513_vm15 = vcmp.ge.f32.partialorder %v9910_v46, 0.0  ;;  %vm3514_vm0 = vcmp.ge.f32.partialorder %v9914_v25, 0.0 }
 0x490   :  { %v10175_v4 = vmul.f32 0.01, %v9922_v2  ;;  %v10178_v55 = vmul.f32 0.01, %v9926_v27  ;;  %v10181_v63 = vmul.f32 0.01, %v9930_v5 }
 0x491   :  { %14626 = vst [vmem:[#allocation9_spill] sm:$0xff] %v10166_v6  ;;  %v3630_v6 = vsel %vm3502_vm3, %v9866_v7, %v3566_v36  ;;  %3803 = vst.msk [vmem:[#allocation4 + $0x39] sm:$0xff] %vm2894_vm13, %v3629_v19  ;;  %v10190_v17 = vmul.f32 0.01, %v9934_v13  ;;  %v10193_v52 = vmul.f32 0.01, %v9938_v57 }
 0x492   :  { %14627 = vst [vmem:[#allocation11_spill] sm:$0xff] %v10181_v63  ;;  %6463 = vst.msk [vmem:[#allocation5 + $0x18] sm:$0xff] %vm2894_vm13, %v3629_v19  ;;  %v10196_v51 = vmul.f32 0.01, %v9942_v11  ;;  %v3631_v63 = vsel %vm3503_vm4, %v9870_v20, %v3567_v9  ;;  %vm3515_vm1 = vcmp.ge.f32.partialorder %v9918_v49, 0.0  ;;  %vm3516_vm2 = vcmp.ge.f32.partialorder %v9922_v2, 0.0 }
 0x493   :  { %3804 = vst.msk [vmem:[#allocation4 + $0x49] sm:$0xff] %vm2894_vm13, %v3630_v6  ;;  %6464 = vst.msk [vmem:[#allocation5 + $0x20] sm:$0xff] %vm2894_vm13, %v3630_v6  ;;  %v10205_v7 = vmul.f32 0.01, %v9946_v14  ;;  %v10208_v19 = vmul.f32 0.01, %v9950_v61 }
 0x494   :  { %14628 = vst [vmem:[#allocation14_spill] sm:$0xff] %v10196_v51  ;;  %v10211_v36 = vmul.f32 0.01, %v9954_v47  ;;  %v3632_v51 = vsel %vm3504_vm5, %v9874_v12, %v3568_v3  ;;  %3805 = vst.msk [vmem:[#allocation4 + $0x51] sm:$0xff] %vm2894_vm13, %v3631_v63  ;;  %v10220_v20 = vmul.f32 0.01, %v9958_v59 }
 0x495   :  { %6465 = vst.msk [vmem:[#allocation5 + $0x28] sm:$0xff] %vm2894_vm13, %v3631_v63  ;;  %v10223_v9 = vmul.f32 0.01, %v9962_v1  ;;  %v10226_v6 = vmul.f32 0.01, %v9966_v40  ;;  %3806 = vst.msk [vmem:[#allocation4 + $0x61] sm:$0xff] %vm2894_vm13, %v3632_v51 }
 0x496   :  { %14629 = vst [vmem:[#allocation16_spill] sm:$0xff] %v10211_v36  ;;  %v3633_v36 = vsel %vm3505_vm6, %v9878_v37, %v3569_v24  ;;  %6466 = vst.msk [vmem:[#allocation5 + $0x30] sm:$0xff] %vm2894_vm13, %v3632_v51  ;;  %v10237_v12 = vmul.f32 0.01, %v9970_v48  ;;  %v10240_v3 = vmul.f32 0.01, %v9974_v39  ;;  %v3634_v37 = vsel %vm3506_vm7, %v9882_v33, %v3570_v23 }
 0x497   :  { %v10243_v63 = vmul.f32 0.01, %v9978_v42  ;;  %3807 = vst.msk [vmem:[#allocation4 + $0x69] sm:$0xff] %vm2894_vm13, %v3633_v36  ;;  %6467 = vst.msk [vmem:[#allocation5 + $0x38] sm:$0xff] %vm2894_vm13, %v3633_v36  ;;  %vm3520_vm6 = vcmp.ge.f32.partialorder %v9938_v57, 0.0  ;;  %v3635_v23 = vsel %vm3507_vm8, %v9886_v21, %v10130_v10  ;;  %vm3524_vm7 = vcmp.ge.f32.partialorder %v9954_v47, 0.0 }
 0x498   :  { %v10255_v24 = vmul.f32 0.01, %v9982_v29  ;;  %v10258_v51 = vmul.f32 0.01, %v9986_v34  ;;  %v10261_v33 = vmul.f32 0.01, %v9990_v28  ;;  %v3636_v10 = vsel %vm3508_vm9, %v9890_v38, %v10133_v8 }
 0x499   :  { %3808 = vst.msk [vmem:[#allocation4 + $0x79] sm:$0xff] %vm2894_vm13, %v3634_v37  ;;  %6468 = vst.msk [vmem:[#allocation5 + $0x40] sm:$0xff] %vm2894_vm13, %v3634_v37  ;;  %v10274_v36 = vmul.f32 0.01, %v9994_v31  ;;  %v10280_v21 = vmul.f32 0.01, %v10002_v30  ;;  %v3637_v8 = vsel %vm3509_vm10, %v9894_v54, %v10136_v43  ;;  %v3638_v43 = vsel %vm3510_vm11, %v9898_v35, %v10145_v50 }
 0x49a   :  { %14630 = vst [vmem:[#allocation30_spill] sm:$0xff] %v10261_v33  ;;  %v10277_v33 = vmul.f32 0.01, %v9998_v26  ;;  %3809 = vst.msk [vmem:[#allocation4 + $0x81] sm:$0xff] %vm2894_vm13, %v3635_v23  ;;  %vm3528_vm8 = vcmp.ge.f32.partialorder %v9970_v48, 0.0  ;;  %vm3532_vm9 = vcmp.ge.f32.partialorder %v9986_v34, 0.0  ;;  %v3639_v50 = vsel %vm3511_vm12, %v9902_v56, %v10148_v32 }
 0x49b   :  { %14631 = vst [vmem:[#allocation31_spill] sm:$0xff] %v10274_v36  ;;  %14633 = vst [vmem:[#allocation33_spill] sm:$0xff] %v10280_v21  ;;  %v10293_v37 = vmul.f32 0.01, %v10006_v22  ;;  %v10296_v21 = vmul.f32 0.01, %v10010_v60  ;;  %v3640_v32 = vsel %vm3512_vm14, %v9906_v16, %v10151_v18  ;;  %v3641_v18 = vsel %vm3513_vm15, %v9910_v46, %v10160_v53 }
 0x49c   :  { %14632 = vst [vmem:[#allocation32_spill] sm:$0xff] %v10277_v33  ;;  %6469 = vst.msk [vmem:[#allocation5 + $0x48] sm:$0xff] %vm2894_vm13, %v3635_v23  ;;  %v14636_v33 = vld [vmem:[#allocation13_spill] sm:$0xff]  ;;  %v14638_v23 = vld [vmem:[#allocation15_spill] sm:$0xff]  ;;  %vm3536_vm10 = vcmp.ge.f32.partialorder %v10002_v30, 0.0  ;;  %vm3544_vm12 = vcmp.ge.f32.partialorder %v10034_v44, 0.0  ;;  %v3642_v53 = vsel %vm3514_vm0, %v9914_v25, %v10163_v41 }
 0x49d   :  { %14634 = vst [vmem:[#allocation34_spill] sm:$0xff] %v10293_v37  ;;  %14635 = vst [vmem:[#allocation35_spill] sm:$0xff] %v10296_v21  ;;  %v10299_v38 = vmul.f32 0.01, %v14636_v33  ;;  %v10312_v21 = vmul.f32 0.01, %v14638_v23 }
 0x49e   :  { %3810 = vst.msk [vmem:[#allocation4 + $0x91] sm:$0xff] %vm2894_vm13, %v3636_v10  ;;  %6470 = vst.msk [vmem:[#allocation5 + $0x50] sm:$0xff] %vm2894_vm13, %v3636_v10  ;;  %v14640_v36 = vld [vmem:[#allocation20_spill] sm:$0xff]  ;;  %v10331_v10 = vmul.f32 0.01, %v10030_v62  ;;  %vm3540_vm11 = vcmp.ge.f32.partialorder %v14638_v23, 0.0 }
 0x49f   :  { %14637 = vst [vmem:[#allocation13_spill] sm:$0xff] %v10299_v38  ;;  %v14639_v38 = vld [vmem:[#allocation18_spill] sm:$0xff]  ;;  %v10318_v54 = vmul.f32 0.01, %v14640_v36  ;;  %3811 = vst.msk [vmem:[#allocation4 + $0x99] sm:$0xff] %vm2894_vm13, %v3637_v8  ;;  %v14665_v41 = vld [vmem:[#allocation9_spill] sm:$0xff] }
 0x4a0   :  { %v10315_v37 = vmul.f32 0.01, %v14639_v38  ;;  %6471 = vst.msk [vmem:[#allocation5 + $0x58] sm:$0xff] %vm2894_vm13, %v3637_v8  ;;  %v10337_v35 = vmul.f32 0.01, %v10038_v58  ;;  %3812 = vst.msk [vmem:[#allocation4 + $0xa9] sm:$0xff] %vm2894_vm13, %v3638_v43 }
 0x4a1   :  { %14641 = vst [vmem:[#allocation15_spill] sm:$0xff] %v10318_v54  ;;  %v10334_v54 = vmul.f32 0.01, %v10034_v44  ;;  %6472 = vst.msk [vmem:[#allocation5 + $0x60] sm:$0xff] %vm2894_vm13, %v3638_v43  ;;  %v10350_v8 = vmul.f32 0.01, %v10042_v0 }
 0x4a2   :  { %14643 = vst [vmem:[#allocation20_spill] sm:$0xff] %v10337_v35  ;;  %v10353_v35 = vmul.f32 0.01, %v10046_v45  ;;  %3813 = vst.msk [vmem:[#allocation4 + $0xb1] sm:$0xff] %vm2894_vm13, %v3639_v50  ;;  %v14648_v43 = vld [vmem:[#allocation21_spill] sm:$0xff]  ;;  %vm14671_vm4 = vcmp.ge.f32.partialorder %v9926_v27, 0.0 }
 0x4a3   :  { %14642 = vst [vmem:[#allocation18_spill] sm:$0xff] %v10334_v54  ;;  %14644 = vst [vmem:[#allocation36_spill] sm:$0xff] %v10350_v8  ;;  %v14646_v54 = vld [vmem:[#allocation19_spill] sm:$0xff]  ;;  %v14651_v8 = vld [vmem:[#allocation22_spill] sm:$0xff]  ;;  %vm14674_vm3 = vcmp.ge.f32.partialorder %v9934_v13, 0.0 }
 0x4a4   :  { %14645 = vst [vmem:[#allocation37_spill] sm:$0xff] %v10353_v35  ;;  %v10356_v56 = vmul.f32 0.01, %v14646_v54  ;;  %6473 = vst.msk [vmem:[#allocation5 + $0x68] sm:$0xff] %vm2894_vm13, %v3639_v50  ;;  %v10369_v35 = vmul.f32 0.01, %v14648_v43 }
 0x4a5   :  { %v10375_v16 = vmul.f32 0.01, %v14651_v8  ;;  %3814 = vst.msk [vmem:[#allocation4 + $0xc1] sm:$0xff] %vm2894_vm13, %v3640_v32  ;;  %6474 = vst.msk [vmem:[#allocation5 + $0x70] sm:$0xff] %vm2894_vm13, %v3640_v32  ;;  %vm3548_vm14 = vcmp.ge.f32.partialorder %v14646_v54, 0.0  ;;  %v14653_v50 = vld [vmem:[#allocation23_spill] sm:$0xff] }
 0x4a6   :  { %14647 = vst [vmem:[#allocation19_spill] sm:$0xff] %v10356_v56  ;;  %14649 = vst [vmem:[#allocation21_spill] sm:$0xff] %v10369_v35  ;;  %v10372_v56 = vmul.f32 0.01, %v10058_v15  ;;  %v14657_v45 = vld [vmem:[#allocation25_spill] sm:$0xff]  ;;  %vm3552_vm15 = vcmp.ge.f32.partialorder %v14653_v50, 0.0 }
 0x4a7   :  { %14652 = vst [vmem:[#allocation39_spill] sm:$0xff] %v10375_v16  ;;  %v14655_v16 = vld [vmem:[#allocation24_spill] sm:$0xff]  ;;  %v10394_v46 = vmul.f32 0.01, %v14657_v45  ;;  %3815 = vst.msk [vmem:[#allocation4 + $0xc9] sm:$0xff] %vm2894_vm13, %v3641_v18  ;;  %v14659_v32 = vld [vmem:[#allocation26_spill] sm:$0xff] }
 0x4a8   :  { %14650 = vst [vmem:[#allocation38_spill] sm:$0xff] %v10372_v56  ;;  %v10388_v56 = vmul.f32 0.01, %v14653_v50  ;;  %v10391_v35 = vmul.f32 0.01, %v14655_v16  ;;  %6475 = vst.msk [vmem:[#allocation5 + $0x78] sm:$0xff] %vm2894_vm13, %v3641_v18  ;;  %v3643_v18 = vsel %vm3515_vm1, %v9918_v49, %v14665_v41 }
 0x4a9   :  { %14658 = vst [vmem:[#allocation40_spill] sm:$0xff] %v10394_v46  ;;  %v14661_v46 = vld [vmem:[#allocation27_spill] sm:$0xff]  ;;  %v14663_v8 = vld [vmem:[#allocation28_spill] sm:$0xff]  ;;  %3816 = vst.msk [vmem:[#allocation4 + $0xd9] sm:$0xff] %vm2894_vm13, %v3642_v53 }
 0x4aa   :  { %14654 = vst [vmem:[#allocation23_spill] sm:$0xff] %v10388_v56  ;;  %14656 = vst [vmem:[#allocation24_spill] sm:$0xff] %v10391_v35  ;;  %v10407_v35 = vmul.f32 0.01, %v14659_v32  ;;  %v10410_v56 = vmul.f32 0.01, %v14661_v46 }
 0x4ab   :  { %v10413_v25 = vmul.f32 0.01, %v14663_v8  ;;  %6476 = vst.msk [vmem:[#allocation5 + $0x80] sm:$0xff] %vm2894_vm13, %v3642_v53  ;;  %vm3556_vm0 = vcmp.ge.f32.partialorder %v14661_v46, 0.0  ;;  %v14666_v32 = vld [vmem:[#allocation29_spill] sm:$0xff]  ;;  %v14668_v45 = vld [vmem:[#allocation10_spill] sm:$0xff]  ;;  %v3644_v53 = vsel %vm3516_vm2, %v9922_v2, %v10175_v4  ;;  %v3647_v4 = vsel %vm14674_vm3, %v9934_v13, %v10190_v17 }
 0x4ac   :  { %14660 = vst [vmem:[#allocation41_spill] sm:$0xff] %v10407_v35  ;;  %14662 = vst [vmem:[#allocation27_spill] sm:$0xff] %v10410_v56  ;;  %v14667_v35 = vld [vmem:[#allocation8_spill] sm:$0xff]  ;;  %v10426_v56 = vmul.f32 0.01, %v14666_v32  ;;  %vm3560_vm1 = vcmp.ge.f32.partialorder %v14668_v45, 0.0 }
 0x4ad   :  { %14664 = vst [vmem:[#allocation28_spill] sm:$0xff] %v10413_v25  ;;  %v10429_v25 = vmul.f32 0.01, %v14667_v35  ;;  %v10432_v49 = vmul.f32 0.01, %v14668_v45  ;;  %3817 = vst.msk [vmem:[#allocation4 + $0xe1] sm:$0xff] %vm2894_vm13, %v3643_v18 }
 0x4ae   :  { %6477 = vst.msk [vmem:[#allocation5 + $0x88] sm:$0xff] %vm2894_vm13, %v3643_v18  ;;  %v14670_v41 = vld [vmem:[#allocation12_spill] sm:$0xff]  ;;  %v14672_v35 = vld [vmem:[#allocation11_spill] sm:$0xff]  ;;  %vm14673_vm2 = vcmp.ge.f32.partialorder %v9930_v5, 0.0  ;;  %3818 = vst.msk [vmem:[#allocation4 + $0xf1] sm:$0xff] %vm2894_vm13, %v3644_v53  ;;  %v3648_v18 = vsel %vm3520_vm6, %v9938_v57, %v10193_v52  ;;  %vm14678_vm3 = vcmp.ge.f32.partialorder %v9950_v61, 0.0 }
 0x4af   :  { %14669 = vst [vmem:[#allocation9_spill] sm:$0xff] %v10432_v49  ;;  %vm3561_vm5 = vcmp.ge.f32.partialorder %v14670_v41, 0.0  ;;  %v10443_v32 = vmul.f32 0.01, %v14670_v41  ;;  %v3645_v49 = vsel %vm14671_vm4, %v9926_v27, %v10178_v55  ;;  %v3646_v2 = vsel %vm14673_vm2, %v9930_v5, %v14672_v35  ;;  %6478 = vst.msk [vmem:[#allocation5 + $0x90] sm:$0xff] %vm2894_vm13, %v3644_v53  ;;  %v14675_v27 = vld [vmem:[#allocation14_spill] sm:$0xff] }
 0x4b0   :  { %vm14676_vm4 = vcmp.ge.f32.partialorder %v9942_v11, 0.0  ;;  %vm14677_vm2 = vcmp.ge.f32.partialorder %v9946_v14, 0.0  ;;  %v3651_v13 = vsel %vm14678_vm3, %v9950_v61, %v10208_v19  ;;  %3819 = vst.msk [vmem:[#allocation4 + $0xf9] sm:$0xff] %vm2894_vm13, %v3645_v49  ;;  %3820 = vst.msk [vmem:[#allocation4 + $0x109] sm:$0xff] %vm2894_vm13, %v3646_v2  ;;  %v14679_v57 = vld [vmem:[#allocation16_spill] sm:$0xff]  ;;  %vm14680_vm6 = vcmp.ge.f32.partialorder %v9958_v59, 0.0 }
 0x4b1   :  { %v3649_v55 = vsel %vm14676_vm4, %v9942_v11, %v14675_v27  ;;  %v3650_v5 = vsel %vm14677_vm2, %v9946_v14, %v10205_v7  ;;  %3821 = vst.msk [vmem:[#allocation4 + $0x111] sm:$0xff] %vm2894_vm13, %v3647_v4  ;;  %6479 = vst.msk [vmem:[#allocation5 + $0x98] sm:$0xff] %vm2894_vm13, %v3645_v49  ;;  %v3652_v11 = vsel %vm3524_vm7, %v9954_v47, %v14679_v57  ;;  %vm14681_vm4 = vcmp.ge.f32.partialorder %v9962_v1, 0.0  ;;  %v14690_v7 = vld [vmem:[#allocation32_spill] sm:$0xff]  ;;  %v14714_v35 = vld [vmem:[#allocation38_spill] sm:$0xff] }
 0x4b2   :  { %6480 = vst.msk [vmem:[#allocation5 + $0xa0] sm:$0xff] %vm2894_vm13, %v3646_v2  ;;  %6481 = vst.msk [vmem:[#allocation5 + $0xa8] sm:$0xff] %vm2894_vm13, %v3647_v4  ;;  %v3653_v14 = vsel %vm14680_vm6, %v9958_v59, %v10220_v20  ;;  %v3654_v61 = vsel %vm14681_vm4, %v9962_v1, %v10223_v9  ;;  %vm14682_vm2 = vcmp.ge.f32.partialorder %v9966_v40, 0.0  ;;  %v3656_v47 = vsel %vm3528_vm8, %v9970_v48, %v10237_v12  ;;  %v14695_v20 = vld [vmem:[#allocation35_spill] sm:$0xff]  ;;  %v14717_v2 = vld [vmem:[#allocation22_spill] sm:$0xff] }
 0x4b3   :  { %v3655_v17 = vsel %vm14682_vm2, %v9966_v40, %v10226_v6  ;;  %3822 = vst.msk [vmem:[#allocation4 + $0x121] sm:$0xff] %vm2894_vm13, %v3648_v18  ;;  %3823 = vst.msk [vmem:[#allocation4 + $0x129] sm:$0xff] %vm2894_vm13, %v3649_v55  ;;  %vm14683_vm7 = vcmp.ge.f32.partialorder %v9974_v39, 0.0  ;;  %vm14684_vm3 = vcmp.ge.f32.partialorder %v9978_v42, 0.0  ;;  %vm14685_vm6 = vcmp.ge.f32.partialorder %v9982_v29, 0.0  ;;  %v14697_v6 = vld [vmem:[#allocation13_spill] sm:$0xff] }
 0x4b4   :  { %3824 = vst.msk [vmem:[#allocation4 + $0x139] sm:$0xff] %vm2894_vm13, %v3650_v5  ;;  %3825 = vst.msk [vmem:[#allocation4 + $0x141] sm:$0xff] %vm2894_vm13, %v3651_v13  ;;  %v3657_v59 = vsel %vm14683_vm7, %v9974_v39, %v10240_v3  ;;  %v3658_v1 = vsel %vm14684_vm3, %v9978_v42, %v10243_v63  ;;  %v3659_v40 = vsel %vm14685_vm6, %v9982_v29, %v10255_v24  ;;  %v14686_v39 = vld [vmem:[#allocation30_spill] sm:$0xff]  ;;  %vm14687_vm8 = vcmp.ge.f32.partialorder %v9990_v28, 0.0  ;;  %v14688_v29 = vld [vmem:[#allocation31_spill] sm:$0xff] }
 0x4b5   :  { %6482 = vst.msk [vmem:[#allocation5 + $0xb0] sm:$0xff] %vm2894_vm13, %v3648_v18  ;;  %6483 = vst.msk [vmem:[#allocation5 + $0xb8] sm:$0xff] %vm2894_vm13, %v3649_v55  ;;  %v3660_v48 = vsel %vm3532_vm9, %v9986_v34, %v10258_v51  ;;  %v3661_v42 = vsel %vm14687_vm8, %v9990_v28, %v14686_v39  ;;  %vm14689_vm4 = vcmp.ge.f32.partialorder %v9994_v31, 0.0  ;;  %vm14691_vm2 = vcmp.ge.f32.partialorder %v9998_v26, 0.0  ;;  %v14692_v34 = vld [vmem:[#allocation33_spill] sm:$0xff]  ;;  %v14703_v24 = vld [vmem:[#allocation18_spill] sm:$0xff] }
 0x4b6   :  { %6484 = vst.msk [vmem:[#allocation5 + $0xc0] sm:$0xff] %vm2894_vm13, %v3650_v5  ;;  %6485 = vst.msk [vmem:[#allocation5 + $0xc8] sm:$0xff] %vm2894_vm13, %v3651_v13  ;;  %v3662_v52 = vsel %vm14689_vm4, %v9994_v31, %v14688_v29  ;;  %v3663_v19 = vsel %vm14691_vm2, %v9998_v26, %v14690_v7  ;;  %v3664_v28 = vsel %vm3536_vm10, %v10002_v30, %v14692_v34  ;;  %v14693_v31 = vld [vmem:[#allocation34_spill] sm:$0xff]  ;;  %vm14694_vm9 = vcmp.ge.f32.partialorder %v10006_v22, 0.0  ;;  %v14704_v51 = vld [vmem:[#allocation20_spill] sm:$0xff] }
 0x4b7   :  { %3826 = vst.msk [vmem:[#allocation4 + $0x151] sm:$0xff] %vm2894_vm13, %v3652_v11  ;;  %3827 = vst.msk [vmem:[#allocation4 + $0x159] sm:$0xff] %vm2894_vm13, %v3653_v14  ;;  %v3665_v26 = vsel %vm14694_vm9, %v10006_v22, %v14693_v31  ;;  %vm14696_vm7 = vcmp.ge.f32.partialorder %v10010_v60, 0.0  ;;  %vm14698_vm3 = vcmp.ge.f32.partialorder %v14636_v33, 0.0  ;;  %v3668_v30 = vsel %vm3540_vm11, %v14638_v23, %v10312_v21  ;;  %v14716_v53 = vld [vmem:[#allocation39_spill] sm:$0xff]  ;;  %v14722_v27 = vld [vmem:[#allocation40_spill] sm:$0xff] }
 0x4b8   :  { %3828 = vst.msk [vmem:[#allocation4 + $0x169] sm:$0xff] %vm2894_vm13, %v3654_v61  ;;  %3829 = vst.msk [vmem:[#allocation4 + $0x171] sm:$0xff] %vm2894_vm13, %v3655_v17  ;;  %v3666_v9 = vsel %vm14696_vm7, %v10010_v60, %v14695_v20  ;;  %v3667_v12 = vsel %vm14698_vm3, %v14636_v33, %v14697_v6  ;;  %vm14699_vm10 = vcmp.ge.f32.partialorder %v14639_v38, 0.0  ;;  %v14700_v60 = vld [vmem:[#allocation15_spill] sm:$0xff]  ;;  %vm14701_vm6 = vcmp.ge.f32.partialorder %v14640_v36, 0.0  ;;  %v14723_v55 = vld [vmem:[#allocation25_spill] sm:$0xff] }
 0x4b9   :  { %6486 = vst.msk [vmem:[#allocation5 + $0xd0] sm:$0xff] %vm2894_vm13, %v3652_v11  ;;  %6487 = vst.msk [vmem:[#allocation5 + $0xd8] sm:$0xff] %vm2894_vm13, %v3653_v14  ;;  %v3669_v22 = vsel %vm14699_vm10, %v14639_v38, %v10315_v37  ;;  %v3670_v3 = vsel %vm14701_vm6, %v14640_v36, %v14700_v60  ;;  %vm14702_vm8 = vcmp.ge.f32.partialorder %v10030_v62, 0.0  ;;  %vm14705_vm11 = vcmp.ge.f32.partialorder %v10038_v58, 0.0  ;;  %v14706_v36 = vld [vmem:[#allocation36_spill] sm:$0xff]  ;;  %v14708_v37 = vld [vmem:[#allocation37_spill] sm:$0xff] }
 0x4ba   :  { %6488 = vst.msk [vmem:[#allocation5 + $0xe0] sm:$0xff] %vm2894_vm13, %v3654_v61  ;;  %6489 = vst.msk [vmem:[#allocation5 + $0xe8] sm:$0xff] %vm2894_vm13, %v3655_v17  ;;  %v3671_v63 = vsel %vm14702_vm8, %v10030_v62, %v10331_v10  ;;  %v3672_v62 = vsel %vm3544_vm12, %v10034_v44, %v14703_v24  ;;  %v3673_v33 = vsel %vm14705_vm11, %v10038_v58, %v14704_v51  ;;  %vm14707_vm4 = vcmp.ge.f32.partialorder %v10042_v0, 0.0  ;;  %v14709_v38 = vld [vmem:[#allocation17_spill] sm:$0xff]  ;;  %v14711_v44 = vld [vmem:[#allocation19_spill] sm:$0xff] }
 0x4bb   :  { %3830 = vst.msk [vmem:[#allocation4 + $0x181] sm:$0xff] %vm2894_vm13, %v3656_v47  ;;  %3831 = vst.msk [vmem:[#allocation4 + $0x189] sm:$0xff] %vm2894_vm13, %v3657_v59  ;;  %v3674_v21 = vsel %vm14707_vm4, %v10042_v0, %v14706_v36  ;;  %vm14710_vm2 = vcmp.ge.f32.partialorder %v14709_v38, 0.0  ;;  %v3676_v58 = vsel %vm3548_vm14, %v14646_v54, %v14711_v44  ;;  %v14712_v0 = vld [vmem:[#allocation21_spill] sm:$0xff]  ;;  %vm14713_vm12 = vcmp.ge.f32.partialorder %v14648_v43, 0.0  ;;  %v14726_v57 = vld [vmem:[#allocation26_spill] sm:$0xff] }
 0x4bc   :  { %3832 = vst.msk [vmem:[#allocation4 + $0x1c9] sm:$0xff] %vm2894_vm13, %v3658_v1  ;;  %3833 = vst.msk [vmem:[#allocation4 + $0x1d1] sm:$0xff] %vm2894_vm13, %v3659_v40  ;;  %v3675_v23 = vsel %vm14710_vm2, %v14709_v38, %v14708_v37  ;;  %v3677_v10 = vsel %vm14713_vm12, %v14648_v43, %v14712_v0  ;;  %vm14715_vm9 = vcmp.ge.f32.partialorder %v10058_v15, 0.0  ;;  %vm14718_vm7 = vcmp.ge.f32.partialorder %v14717_v2, 0.0  ;;  %v14720_v43 = vld [vmem:[#allocation24_spill] sm:$0xff]  ;;  %v14725_v13 = vld [vmem:[#allocation41_spill] sm:$0xff] }
 0x4bd   :  { %6490 = vst.msk [vmem:[#allocation5 + $0xf0] sm:$0xff] %vm2894_vm13, %v3656_v47  ;;  %6491 = vst.msk [vmem:[#allocation5 + $0xf8] sm:$0xff] %vm2894_vm13, %v3657_v59  ;;  %v3678_v49 = vsel %vm14715_vm9, %v10058_v15, %v14714_v35  ;;  %v3679_v4 = vsel %vm14718_vm7, %v14717_v2, %v14716_v53  ;;  %v14719_v15 = vld [vmem:[#allocation23_spill] sm:$0xff]  ;;  %vm14721_vm14 = vcmp.ge.f32.partialorder %v14655_v16, 0.0  ;;  %vm14724_vm3 = vcmp.ge.f32.partialorder %v14723_v55, 0.0  ;;  %v14729_v14 = vld [vmem:[#allocation28_spill] sm:$0xff] }
 0x4be   :  { %6492 = vst.msk [vmem:[#allocation5 + $0x100] sm:$0xff] %vm2894_vm13, %v3658_v1  ;;  %6493 = vst.msk [vmem:[#allocation5 + $0x108] sm:$0xff] %vm2894_vm13, %v3659_v40  ;;  %v3680_v54 = vsel %vm3552_vm15, %v14653_v50, %v14719_v15  ;;  %v3681_v18 = vsel %vm14721_vm14, %v14655_v16, %v14720_v43  ;;  %v3682_v5 = vsel %vm14724_vm3, %v14723_v55, %v14722_v27  ;;  %vm14727_vm10 = vcmp.ge.f32.partialorder %v14726_v57, 0.0  ;;  %v14728_v16 = vld [vmem:[#allocation27_spill] sm:$0xff]  ;;  %v14731_v17 = vld [vmem:[#allocation29_spill] sm:$0xff] }
 0x4bf   :  { %3834 = vst.msk [vmem:[#allocation4 + $0x1e1] sm:$0xff] %vm2894_vm13, %v3660_v48  ;;  %3835 = vst.msk [vmem:[#allocation4 + $0x1e9] sm:$0xff] %vm2894_vm13, %v3661_v42  ;;  %v3683_v11 = vsel %vm14727_vm10, %v14726_v57, %v14725_v13  ;;  %v3684_v50 = vsel %vm3556_vm0, %v14661_v46, %v14728_v16  ;;  %vm14730_vm15 = vcmp.ge.f32.partialorder %v14663_v8, 0.0  ;;  %vm14732_vm6 = vcmp.ge.f32.partialorder %v14731_v17, 0.0  ;;  %v14733_v59 = vld [vmem:[#allocation8_spill] sm:$0xff]  ;;  %v3897_v40 = vld [vmem:[#allocation4 + $0x1b8] sm:$0xff] }
 0x4c0   :  { %3836 = vst.msk [vmem:[#allocation4 + $0x1f9] sm:$0xff] %vm2894_vm13, %v3662_v52  ;;  %3837 = vst.msk [vmem:[#allocation4 + $0x201] sm:$0xff] %vm2894_vm13, %v3663_v19  ;;  %v3685_v61 = vsel %vm14730_vm15, %v14663_v8, %v14729_v14  ;;  %v3686_v47 = vsel %vm14732_vm6, %v14731_v17, %v10426_v56  ;;  %vm14734_vm8 = vcmp.ge.f32.partialorder %v14733_v59, 0.0  ;;  %v14735_v8 = vld [vmem:[#allocation9_spill] sm:$0xff]  ;;  %v3689_v46 = vsel %vm3561_vm5, %v14670_v41, %v10443_v32  ;;  %v10725_v32 = vld [vmem:[%s14346_s4 + $0x1] ss:$0 sm:$0xff] }
 0x4c1   :  { %6494 = vst.msk [vmem:[#allocation5 + $0x110] sm:$0xff] %vm2894_vm13, %v3660_v48  ;;  %6495 = vst.msk [vmem:[#allocation5 + $0x118] sm:$0xff] %vm2894_vm13, %v3661_v42  ;;  %v3687_v1 = vsel %vm14734_vm8, %v14733_v59, %v10429_v25  ;;  %v3688_v56 = vsel %vm3560_vm1, %v14668_v45, %v14735_v8  ;;  %v10720_v45 = vld [vmem:[%s14346_s4] ss:$0 sm:$0xff]  ;;  %v3896_v25 = vld [vmem:[#allocation4 + $0x1b0] sm:$0xff] }
 0x4c2   :  { %6496 = vst.msk [vmem:[#allocation5 + $0x120] sm:$0xff] %vm2894_vm13, %v3662_v52  ;;  %6497 = vst.msk [vmem:[#allocation5 + $0x128] sm:$0xff] %vm2894_vm13, %v3663_v19  ;;  %v4095_v41 = vld [vmem:[#allocation4 + $0x1b1] sm:$0xff]  ;;  %v4096_v48 = vld [vmem:[#allocation4 + $0x1b9] sm:$0xff]  ;;  %v3967_v42 = vmul.f32 %v10720_v45, %v3896_v25  ;;  %v3968_v52 = vmul.f32 %v10720_v45, %v3897_v40 }
 0x4c3   :  { %3838 = vst.msk [vmem:[#allocation4 + $0x211] sm:$0xff] %vm2894_vm13, %v3664_v28  ;;  %3839 = vst.msk [vmem:[#allocation4 + $0x219] sm:$0xff] %vm2894_vm13, %v3665_v26  ;;  %v10730_v39 = vld [vmem:[%s14346_s4 + $0x2] ss:$0 sm:$0xff]  ;;  %v4167_v29 = vmul.f32 %v10725_v32, %v4095_v41  ;;  %v4168_v7 = vmul.f32 %v10725_v32, %v4096_v48  ;;  %v4295_v19 = vld [vmem:[#allocation4 + $0x1b2] sm:$0xff] }
 0x4c4   :  { %3840 = vst.msk [vmem:[#allocation4 + $0x229] sm:$0xff] %vm2894_vm13, %v3666_v9  ;;  %3841 = vst.msk [vmem:[#allocation4 + $0x231] sm:$0xff] %vm2894_vm13, %v3667_v12  ;;  %v4296_v34 = vld [vmem:[#allocation4 + $0x1ba] sm:$0xff]  ;;  %v3865_v31 = vld [vmem:[#allocation4 + $0x8] sm:$0xff] }
 0x4c5   :  { %6498 = vst.msk [vmem:[#allocation5 + $0x130] sm:$0xff] %vm2894_vm13, %v3664_v28  ;;  %6499 = vst.msk [vmem:[#allocation5 + $0x138] sm:$0xff] %vm2894_vm13, %v3665_v26  ;;  %v3864_v28 = vld [vmem:[#allocation4] sm:$0xff]  ;;  %v4064_v20 = vld [vmem:[#allocation4 + $0x9] sm:$0xff]  ;;  %v4232_v60 = vadd.f32 %v4168_v7, %v3968_v52  ;;  %v3936_v37 = vmul.f32 %v10720_v45, %v3865_v31 }
 0x4c6   :  { %6500 = vst.msk [vmem:[#allocation5 + $0x140] sm:$0xff] %vm2894_vm13, %v3666_v9  ;;  %6501 = vst.msk [vmem:[#allocation5 + $0x148] sm:$0xff] %vm2894_vm13, %v3667_v12  ;;  %v4063_v26 = vld [vmem:[#allocation4 + $0x1] sm:$0xff]  ;;  %v5094_v9 = vld [vmem:[#allocation4 + $0x198] sm:$0xff] }
 0x4c7   :  { %3842 = vst.msk [vmem:[#allocation4 + $0x241] sm:$0xff] %vm2894_vm13, %v3668_v30  ;;  %3843 = vst.msk [vmem:[#allocation4 + $0x249] sm:$0xff] %vm2894_vm13, %v3669_v22  ;;  %v5095_v6 = vld [vmem:[#allocation4 + $0x1a0] sm:$0xff]  ;;  %v3866_v51 = vld [vmem:[#allocation4 + $0x18] sm:$0xff]  ;;  %v4135_v38 = vmul.f32 %v10725_v32, %v4063_v26 }
 0x4c8   :  { %3844 = vst.msk [vmem:[#allocation4 + $0x259] sm:$0xff] %vm2894_vm13, %v3670_v3  ;;  %3845 = vst.msk [vmem:[#allocation4 + $0x261] sm:$0xff] %vm2894_vm13, %v3671_v63  ;;  %v5294_v12 = vld [vmem:[#allocation4 + $0x199] sm:$0xff]  ;;  %v6909_v24 = vld [vmem:[%s14346_s4 + $0x6] ss:$0 sm:$0xff] }
 0x4c9   :  { %6502 = vst.msk [vmem:[#allocation5 + $0x150] sm:$0xff] %vm2894_vm13, %v3668_v30  ;;  %6503 = vst.msk [vmem:[#allocation5 + $0x158] sm:$0xff] %vm2894_vm13, %v3669_v22  ;;  %v4231_v30 = vadd.f32 %v4167_v29, %v3967_v42  ;;  %v4367_v22 = vmul.f32 %v10730_v39, %v4295_v19  ;;  %v3868_v36 = vld [vmem:[#allocation4 + $0x30] sm:$0xff]  ;;  %v3870_v0 = vld [vmem:[#allocation4 + $0x48] sm:$0xff]  ;;  %v10748_v15 = vmul.f32 %v6909_v24, %v5094_v9 }
 0x4ca   :  { %6504 = vst.msk [vmem:[#allocation5 + $0x160] sm:$0xff] %vm2894_vm13, %v3670_v3  ;;  %6505 = vst.msk [vmem:[#allocation5 + $0x168] sm:$0xff] %vm2894_vm13, %v3671_v63  ;;  %v4368_v3 = vmul.f32 %v10730_v39, %v4296_v34  ;;  %v4263_v63 = vld [vmem:[#allocation4 + $0x2] sm:$0xff]  ;;  %v4264_v44 = vld [vmem:[#allocation4 + $0xa] sm:$0xff]  ;;  %v10772_v41 = vmul.f32 %v10720_v45, %v3868_v36  ;;  %v10781_v19 = vmul.f32 %v10720_v45, %v3870_v0 }
 0x4cb   :  { %3846 = vst.msk [vmem:[#allocation4 + $0x271] sm:$0xff] %vm2894_vm13, %v3672_v62  ;;  %3847 = vst.msk [vmem:[#allocation4 + $0x279] sm:$0xff] %vm2894_vm13, %v3673_v33  ;;  %v3872_v35 = vld [vmem:[#allocation4 + $0x60] sm:$0xff]  ;;  %v3874_v53 = vld [vmem:[#allocation4 + $0x78] sm:$0xff]  ;;  %v10775_v40 = vmul.f32 %v10730_v39, %v4264_v44 }
 0x4cc   :  { %3848 = vst.msk [vmem:[#allocation4 + $0x289] sm:$0xff] %vm2894_vm13, %v3674_v21  ;;  %3849 = vst.msk [vmem:[#allocation4 + $0x291] sm:$0xff] %vm2894_vm13, %v3675_v23  ;;  %v3875_v2 = vld [vmem:[#allocation4 + $0x80] sm:$0xff]  ;;  %v3877_v27 = vld [vmem:[#allocation4 + $0x98] sm:$0xff]  ;;  %v10756_v57 = vadd.f32 %v4368_v3, %v4232_v60 }
 0x4cd   :  { %6506 = vst.msk [vmem:[#allocation5 + $0x170] sm:$0xff] %vm2894_vm13, %v3672_v62  ;;  %6507 = vst.msk [vmem:[#allocation5 + $0x178] sm:$0xff] %vm2894_vm13, %v3673_v33  ;;  %v6911_v62 = vld [vmem:[%s14346_s4 + $0x7] ss:$0 sm:$0xff]  ;;  %v3878_v55 = vld [vmem:[#allocation4 + $0xa8] sm:$0xff] }
 0x4ce   :  { %6508 = vst.msk [vmem:[#allocation5 + $0x180] sm:$0xff] %vm2894_vm13, %v3674_v21  ;;  %6509 = vst.msk [vmem:[#allocation5 + $0x188] sm:$0xff] %vm2894_vm13, %v3675_v23  ;;  %v3867_v33 = vld [vmem:[#allocation4 + $0x20] sm:$0xff]  ;;  %v3935_v21 = vmul.f32 %v10720_v45, %v3864_v28  ;;  %v4136_v23 = vmul.f32 %v10725_v32, %v4064_v20  ;;  %v10752_v43 = vmul.f32 %v6911_v62, %v5294_v12  ;;  %v3882_v16 = vld [vmem:[#allocation4 + $0xd8] sm:$0xff] }
 0x4cf   :  { %3850 = vst.msk [vmem:[#allocation4 + $0x2a1] sm:$0xff] %vm2894_vm13, %v3676_v58  ;;  %3851 = vst.msk [vmem:[#allocation4 + $0x2a9] sm:$0xff] %vm2894_vm13, %v3677_v10  ;;  %v3880_v13 = vld [vmem:[#allocation4 + $0xc0] sm:$0xff]  ;;  %v3884_v14 = vld [vmem:[#allocation4 + $0xf0] sm:$0xff]  ;;  %v10769_v25 = vmul.f32 %v10720_v45, %v3867_v33  ;;  %v10787_v28 = vmul.f32 %v10720_v45, %v3872_v35  ;;  %v10793_v12 = vmul.f32 %v10720_v45, %v3874_v53 }
 0x4d0   :  { %3852 = vst.msk [vmem:[#allocation4 + $0x2b9] sm:$0xff] %vm2894_vm13, %v3678_v49  ;;  %3853 = vst.msk [vmem:[#allocation4 + $0x2c1] sm:$0xff] %vm2894_vm13, %v3679_v4  ;;  %v10760_v17 = vadd.f32 %v4136_v23, %v3936_v37  ;;  %v3885_v59 = vld [vmem:[#allocation4 + $0xf8] sm:$0xff]  ;;  %v3887_v8 = vld [vmem:[#allocation4 + $0x110] sm:$0xff]  ;;  %v10810_v62 = vmul.f32 %v10720_v45, %v3877_v27  ;;  %v10819_v36 = vmul.f32 %v10720_v45, %v3880_v13 }
 0x4d1   :  { %6510 = vst.msk [vmem:[#allocation5 + $0x190] sm:$0xff] %vm2894_vm13, %v3676_v58  ;;  %6511 = vst.msk [vmem:[#allocation5 + $0x198] sm:$0xff] %vm2894_vm13, %v3677_v10  ;;  %v3869_v58 = vld [vmem:[#allocation4 + $0x38] sm:$0xff]  ;;  %v3871_v10 = vld [vmem:[#allocation4 + $0x50] sm:$0xff] }
 0x4d2   :  { %6512 = vst.msk [vmem:[#allocation5 + $0x1a0] sm:$0xff] %vm2894_vm13, %v3678_v49  ;;  %6513 = vst.msk [vmem:[#allocation5 + $0x1a8] sm:$0xff] %vm2894_vm13, %v3679_v4  ;;  %v3873_v49 = vld [vmem:[#allocation4 + $0x68] sm:$0xff]  ;;  %v3876_v4 = vld [vmem:[#allocation4 + $0x90] sm:$0xff]  ;;  %v10778_v7 = vmul.f32 %v10720_v45, %v3869_v58  ;;  %v10784_v34 = vmul.f32 %v10720_v45, %v3871_v10  ;;  %v10833_v58 = vmul.f32 %v10720_v45, %v3882_v16 }
 0x4d3   :  { %3854 = vst.msk [vmem:[#allocation4 + $0x2d1] sm:$0xff] %vm2894_vm13, %v3680_v54  ;;  %3855 = vst.msk [vmem:[#allocation4 + $0x2d9] sm:$0xff] %vm2894_vm13, %v3681_v18  ;;  %v3889_v48 = vld [vmem:[#allocation4 + $0x128] sm:$0xff]  ;;  %v3890_v42 = vld [vmem:[#allocation4 + $0x138] sm:$0xff]  ;;  %v10839_v10 = vmul.f32 %v10720_v45, %v3884_v14 }
 0x4d4   :  { %3856 = vst.msk [vmem:[#allocation4 + $0x2e9] sm:$0xff] %vm2894_vm13, %v3682_v5  ;;  %3857 = vst.msk [vmem:[#allocation4 + $0x2f1] sm:$0xff] %vm2894_vm13, %v3683_v11  ;;  %v3891_v29 = vld [vmem:[#allocation4 + $0x140] sm:$0xff]  ;;  %v3892_v52 = vld [vmem:[#allocation4 + $0x150] sm:$0xff]  ;;  %v10870_v14 = vmul.f32 %v10720_v45, %v3889_v48 }
 0x4d5   :  { %6514 = vst.msk [vmem:[#allocation5 + $0x1b0] sm:$0xff] %vm2894_vm13, %v3680_v54  ;;  %6515 = vst.msk [vmem:[#allocation5 + $0x1b8] sm:$0xff] %vm2894_vm13, %v3681_v18  ;;  %v10750_v54 = vmul.f32 %v6909_v24, %v5095_v6  ;;  %v10754_v18 = vadd.f32 %v4367_v22, %v4231_v30  ;;  %v3893_v31 = vld [vmem:[#allocation4 + $0x158] sm:$0xff]  ;;  %v3894_v26 = vld [vmem:[#allocation4 + $0x168] sm:$0xff]  ;;  %v10790_v6 = vmul.f32 %v10720_v45, %v3873_v49 }
 0x4d6   :  { %6516 = vst.msk [vmem:[#allocation5 + $0x1c0] sm:$0xff] %vm2894_vm13, %v3682_v5  ;;  %6517 = vst.msk [vmem:[#allocation5 + $0x1c8] sm:$0xff] %vm2894_vm13, %v3683_v11  ;;  %v3879_v5 = vld [vmem:[#allocation4 + $0xb0] sm:$0xff]  ;;  %v3881_v11 = vld [vmem:[#allocation4 + $0xc8] sm:$0xff]  ;;  %v10796_v30 = vmul.f32 %v10720_v45, %v3875_v2  ;;  %v10799_v22 = vmul.f32 %v10720_v45, %v3876_v4  ;;  %v10850_v4 = vmul.f32 %v10720_v45, %v3885_v59 }
 0x4d7   :  { %3858 = vst.msk [vmem:[#allocation4 + $0x301] sm:$0xff] %vm2894_vm13, %v3684_v50  ;;  %3859 = vst.msk [vmem:[#allocation4 + $0x309] sm:$0xff] %vm2894_vm13, %v3685_v61  ;;  %v3895_v20 = vld [vmem:[#allocation4 + $0x170] sm:$0xff]  ;;  %v3898_v9 = vld [vmem:[#allocation4 + $0x1c8] sm:$0xff]  ;;  %v10816_v33 = vmul.f32 %v10720_v45, %v3879_v5  ;;  %v10830_v44 = vmul.f32 %v10720_v45, %v3881_v11  ;;  %v10873_v59 = vmul.f32 %v10720_v45, %v3890_v42 }
 0x4d8   :  { %3860 = vst.msk [vmem:[#allocation4 + $0x319] sm:$0xff] %vm2894_vm13, %v3686_v47  ;;  %3861 = vst.msk [vmem:[#allocation4 + $0x321] sm:$0xff] %vm2894_vm13, %v3687_v1  ;;  %v10801_v60 = vld [vmem:[#allocation4 + $0x1d0] sm:$0xff]  ;;  %v10803_v3 = vld [vmem:[#allocation4 + $0x1e0] sm:$0xff]  ;;  %v10891_v48 = vmul.f32 %v10720_v45, %v3894_v26  ;;  %v10894_v42 = vmul.f32 %v10720_v45, %v3895_v20 }
 0x4d9   :  { %6518 = vst.msk [vmem:[#allocation5 + $0x1d0] sm:$0xff] %vm2894_vm13, %v3684_v50  ;;  %6519 = vst.msk [vmem:[#allocation5 + $0x1d8] sm:$0xff] %vm2894_vm13, %v3685_v61  ;;  %v3883_v50 = vld [vmem:[#allocation4 + $0xe0] sm:$0xff]  ;;  %v10758_v61 = vadd.f32 %v4135_v38, %v3935_v21  ;;  %v10807_v24 = vld [vmem:[#allocation4 + $0x1f8] sm:$0xff] }
 0x4da   :  { %6520 = vst.msk [vmem:[#allocation5 + $0x1e0] sm:$0xff] %vm2894_vm13, %v3686_v47  ;;  %6521 = vst.msk [vmem:[#allocation5 + $0x1e8] sm:$0xff] %vm2894_vm13, %v3687_v1  ;;  %v10763_v47 = vmul.f32 %v10730_v39, %v4263_v63  ;;  %v3886_v1 = vld [vmem:[#allocation4 + $0x108] sm:$0xff]  ;;  %v10821_v21 = vld [vmem:[#allocation4 + $0x200] sm:$0xff]  ;;  %v10836_v0 = vmul.f32 %v10720_v45, %v3883_v50  ;;  %v10919_v20 = vmul.f32 %v10720_v45, %v10807_v24 }
 0x4db   :  { %3862 = vst.msk [vmem:[#allocation4 + $0x331] sm:$0xff] %vm2894_vm13, %v3688_v56  ;;  %3863 = vst.msk [vmem:[#allocation4 + $0x339] sm:$0xff] %vm2894_vm13, %v3689_v46  ;;  %v10805_v63 = vld [vmem:[#allocation4 + $0x1e8] sm:$0xff]  ;;  %v10823_v37 = vld [vmem:[#allocation4 + $0x210] sm:$0xff]  ;;  %v10853_v27 = vmul.f32 %v10720_v45, %v3886_v1  ;;  %v10876_v1 = vmul.f32 %v10720_v45, %v3891_v29  ;;  %v10897_v29 = vmul.f32 %v10720_v45, %v3898_v9 }
 0x4dc   :  { %6522 = vst.msk [vmem:[#allocation5 + $0x1f0] sm:$0xff] %vm2894_vm13, %v3688_v56  ;;  %6523 = vst.msk [vmem:[#allocation5 + $0x1f8] sm:$0xff] %vm2894_vm13, %v3689_v46  ;;  %v3888_v56 = vld [vmem:[#allocation4 + $0x120] sm:$0xff]  ;;  %v10766_v46 = vmul.f32 %v10720_v45, %v3866_v51  ;;  %v10813_v51 = vmul.f32 %v10720_v45, %v3878_v55  ;;  %v10825_v38 = vld [vmem:[#allocation4 + $0x218] sm:$0xff]  ;;  %v10856_v55 = vmul.f32 %v10720_v45, %v3887_v8 }
 0x4dd   :  { %14736 = vst [vmem:[#allocation10_spill] sm:$0xff] %v10730_v39  ;;  %14737 = vst [vmem:[#allocation12_spill] sm:$0xff] %v10748_v15  ;;  %v10827_v23 = vld [vmem:[#allocation4 + $0x228] sm:$0xff]  ;;  %v10841_v35 = vld [vmem:[#allocation4 + $0x230] sm:$0xff]  ;;  %v10859_v5 = vmul.f32 %v10720_v45, %v3888_v56  ;;  %v10879_v8 = vmul.f32 %v10720_v45, %v3892_v52  ;;  %v10888_v15 = vmul.f32 %v10720_v45, %v3893_v31 }
 0x4de   :  { %14738 = vst [vmem:[#allocation11_spill] sm:$0xff] %v10750_v54  ;;  %14739 = vst [vmem:[#allocation14_spill] sm:$0xff] %v10752_v43  ;;  %v10843_v49 = vld [vmem:[#allocation4 + $0x240] sm:$0xff]  ;;  %v10845_v53 = vld [vmem:[#allocation4 + $0x248] sm:$0xff]  ;;  %v10911_v31 = vmul.f32 %v10720_v45, %v10803_v3  ;;  %v10915_v26 = vmul.f32 %v10720_v45, %v10805_v63 }
 0x4df   :  { %14740 = vst [vmem:[#allocation16_spill] sm:$0xff] %v10754_v18  ;;  %14741 = vst [vmem:[#allocation30_spill] sm:$0xff] %v10756_v57  ;;  %v10847_v2 = vld [vmem:[#allocation4 + $0x258] sm:$0xff]  ;;  %v10861_v13 = vld [vmem:[#allocation4 + $0x260] sm:$0xff] }
 0x4e0   :  { %14742 = vst [vmem:[#allocation31_spill] sm:$0xff] %v10758_v61  ;;  %14743 = vst [vmem:[#allocation32_spill] sm:$0xff] %v10760_v17  ;;  %v10863_v11 = vld [vmem:[#allocation4 + $0x270] sm:$0xff]  ;;  %v10865_v16 = vld [vmem:[#allocation4 + $0x278] sm:$0xff] }
 0x4e1   :  { %14744 = vst [vmem:[#allocation33_spill] sm:$0xff] %v10763_v47  ;;  %14745 = vst [vmem:[#allocation34_spill] sm:$0xff] %v10775_v40  ;;  %v10867_v50 = vld [vmem:[#allocation4 + $0x288] sm:$0xff]  ;;  %v10881_v56 = vld [vmem:[#allocation4 + $0x290] sm:$0xff]  ;;  %v10907_v40 = vmul.f32 %v10720_v45, %v10801_v60 }
 0x4e2   :  { %14746 = vst [vmem:[#allocation35_spill] sm:$0xff] %v10801_v60  ;;  %14747 = vst [vmem:[#allocation13_spill] sm:$0xff] %v10803_v3  ;;  %v10883_v43 = vld [vmem:[#allocation4 + $0x2a0] sm:$0xff]  ;;  %v10885_v54 = vld [vmem:[#allocation4 + $0x2a8] sm:$0xff]  ;;  %v10929_v60 = vmul.f32 %v10720_v45, %v10821_v21  ;;  %v10933_v3 = vmul.f32 %v10720_v45, %v10823_v37 }
 0x4e3   :  { %14748 = vst [vmem:[#allocation15_spill] sm:$0xff] %v10805_v63  ;;  %14749 = vst [vmem:[#allocation18_spill] sm:$0xff] %v10807_v24  ;;  %v10899_v52 = vld [vmem:[#allocation4 + $0x2b8] sm:$0xff]  ;;  %v10901_v18 = vld [vmem:[#allocation4 + $0x2c0] sm:$0xff]  ;;  %v10937_v63 = vmul.f32 %v10720_v45, %v10825_v38  ;;  %v10941_v24 = vmul.f32 %v10720_v45, %v10827_v23 }
 0x4e4   :  { %14750 = vst [vmem:[#allocation20_spill] sm:$0xff] %v10821_v21  ;;  %14751 = vst [vmem:[#allocation36_spill] sm:$0xff] %v10823_v37  ;;  %v10903_v57 = vld [vmem:[#allocation4 + $0x2d0] sm:$0xff]  ;;  %v10921_v9 = vld [vmem:[#allocation4 + $0x2d8] sm:$0xff]  ;;  %v10951_v21 = vmul.f32 %v10720_v45, %v10841_v35  ;;  %v10955_v37 = vmul.f32 %v10720_v45, %v10843_v49 }
 0x4e5   :  { %14752 = vst [vmem:[#allocation37_spill] sm:$0xff] %v10825_v38  ;;  %14753 = vst [vmem:[#allocation17_spill] sm:$0xff] %v10827_v23  ;;  %v10923_v17 = vld [vmem:[#allocation4 + $0x2e8] sm:$0xff]  ;;  %v10925_v47 = vld [vmem:[#allocation4 + $0x2f0] sm:$0xff]  ;;  %v10959_v38 = vmul.f32 %v10720_v45, %v10845_v53  ;;  %v10963_v23 = vmul.f32 %v10720_v45, %v10847_v2 }
 0x4e6   :  { %14754 = vst [vmem:[#allocation19_spill] sm:$0xff] %v10833_v58  ;;  %14755 = vst [vmem:[#allocation21_spill] sm:$0xff] %v10836_v0  ;;  %v10943_v61 = vld [vmem:[#allocation4 + $0x300] sm:$0xff]  ;;  %v10945_v39 = vld [vmem:[#allocation4 + $0x308] sm:$0xff] }
 0x4e7   :  { %14756 = vst [vmem:[#allocation38_spill] sm:$0xff] %v10839_v10  ;;  %14757 = vst [vmem:[#allocation39_spill] sm:$0xff] %v10841_v35  ;;  %v10969_v35 = vmul.f32 %v10720_v45, %v10861_v13  ;;  %v4106_v10 = vld [vmem:[#allocation4 + $0x231] sm:$0xff]  ;;  %v4107_v0 = vld [vmem:[#allocation4 + $0x241] sm:$0xff] }
 0x4e8   :  { %14758 = vst [vmem:[#allocation22_spill] sm:$0xff] %v10843_v49  ;;  %14759 = vst [vmem:[#allocation23_spill] sm:$0xff] %v10845_v53  ;;  %v10973_v49 = vmul.f32 %v10720_v45, %v10863_v11  ;;  %v10977_v53 = vmul.f32 %v10720_v45, %v10865_v16 }
 0x4e9   :  { %14760 = vst [vmem:[#allocation24_spill] sm:$0xff] %v10847_v2  ;;  %14761 = vst [vmem:[#allocation40_spill] sm:$0xff] %v10850_v4  ;;  %v10981_v2 = vmul.f32 %v10720_v45, %v10867_v50 }
 0x4ea   :  { %14762 = vst [vmem:[#allocation25_spill] sm:$0xff] %v10853_v27  ;;  %14763 = vst [vmem:[#allocation41_spill] sm:$0xff] %v10856_v55  ;;  %v4103_v55 = vld [vmem:[#allocation4 + $0x211] sm:$0xff] }
 0x4eb   :  { %14764 = vst [vmem:[#allocation26_spill] sm:$0xff] %v10859_v5  ;;  %14765 = vst [vmem:[#allocation27_spill] sm:$0xff] %v10861_v13  ;;  %v10985_v13 = vmul.f32 %v10720_v45, %v10881_v56 }
 0x4ec   :  { %14766 = vst [vmem:[#allocation28_spill] sm:$0xff] %v10863_v11  ;;  %14767 = vst [vmem:[#allocation29_spill] sm:$0xff] %v10865_v16  ;;  %v10989_v11 = vmul.f32 %v10720_v45, %v10883_v43  ;;  %v10993_v16 = vmul.f32 %v10720_v45, %v10885_v54 }
 0x4ed   :  { %14768 = vst [vmem:[#allocation8_spill] sm:$0xff] %v10867_v50  ;;  %14769 = vst [vmem:[#allocation9_spill] sm:$0xff] %v10870_v14  ;;  %v10997_v50 = vmul.f32 %v10720_v45, %v10899_v52 }
 0x4ee   :  { %14770 = vst [vmem:[#allocation42_spill] sm:$0xff] %v10873_v59  ;;  %14771 = vst [vmem:[#allocation43_spill] sm:$0xff] %v10876_v1  ;;  %v4099_v1 = vld [vmem:[#allocation4 + $0x1e1] sm:$0xff]  ;;  %v4101_v59 = vld [vmem:[#allocation4 + $0x1f9] sm:$0xff] }
 0x4ef   :  { %14772 = vst [vmem:[#allocation44_spill] sm:$0xff] %v10879_v8  ;;  %14773 = vst [vmem:[#allocation45_spill] sm:$0xff] %v10881_v56  ;;  %v11001_v56 = vmul.f32 %v10720_v45, %v10901_v18 }
 0x4f0   :  { %14774 = vst [vmem:[#allocation46_spill] sm:$0xff] %v10883_v43  ;;  %14775 = vst [vmem:[#allocation47_spill] sm:$0xff] %v10885_v54  ;;  %v11005_v43 = vmul.f32 %v10720_v45, %v10903_v57  ;;  %v11009_v54 = vmul.f32 %v10720_v45, %v10921_v9 }
 0x4f1   :  { %14776 = vst [vmem:[#allocation48_spill] sm:$0xff] %v10888_v15  ;;  %14777 = vst [vmem:[#allocation49_spill] sm:$0xff] %v10891_v48  ;;  %v4097_v48 = vld [vmem:[#allocation4 + $0x1c9] sm:$0xff] }
 0x4f2   :  { %14778 = vst [vmem:[#allocation50_spill] sm:$0xff] %v10894_v42  ;;  %14779 = vst [vmem:[#allocation51_spill] sm:$0xff] %v10897_v29  ;;  %v4091_v29 = vld [vmem:[#allocation4 + $0x151] sm:$0xff]  ;;  %v4093_v42 = vld [vmem:[#allocation4 + $0x169] sm:$0xff] }
 0x4f3   :  { %14780 = vst [vmem:[#allocation52_spill] sm:$0xff] %v10899_v52  ;;  %14781 = vst [vmem:[#allocation53_spill] sm:$0xff] %v10901_v18  ;;  %v11013_v52 = vmul.f32 %v10720_v45, %v10923_v17  ;;  %v11017_v18 = vmul.f32 %v10720_v45, %v10925_v47 }
 0x4f4   :  { %14782 = vst [vmem:[#allocation54_spill] sm:$0xff] %v10903_v57  ;;  %14783 = vst [vmem:[#allocation55_spill] sm:$0xff] %v10907_v40  ;;  %v11021_v57 = vmul.f32 %v10720_v45, %v10943_v61  ;;  %v4090_v40 = vld [vmem:[#allocation4 + $0x141] sm:$0xff] }
 0x4f5   :  { %14784 = vst [vmem:[#allocation56_spill] sm:$0xff] %v10911_v31  ;;  %14785 = vst [vmem:[#allocation57_spill] sm:$0xff] %v10915_v26  ;;  %v4085_v26 = vld [vmem:[#allocation4 + $0x109] sm:$0xff] }
 0x4f6   :  { %14786 = vst [vmem:[#allocation58_spill] sm:$0xff] %v10919_v20  ;;  %14787 = vst [vmem:[#allocation59_spill] sm:$0xff] %v10921_v9  ;;  %v10947_v20 = vld [vmem:[#allocation4 + $0x318] sm:$0xff]  ;;  %v11025_v9 = vmul.f32 %v10720_v45, %v10945_v39  ;;  %v11096_v58 = vmul.f32 %v10725_v32, %v4085_v26  ;;  %v11114_v26 = vmul.f32 %v10725_v32, %v4091_v29 }
 0x4f7   :  { %14788 = vst [vmem:[#allocation60_spill] sm:$0xff] %v10923_v17  ;;  %14789 = vst [vmem:[#allocation61_spill] sm:$0xff] %v10925_v47  ;;  %v11029_v17 = vmul.f32 %v10720_v45, %v10947_v20 }
 0x4f8   :  { %14790 = vst [vmem:[#allocation62_spill] sm:$0xff] %v10929_v60  ;;  %14791 = vst [vmem:[#allocation63_spill] sm:$0xff] %v10933_v3  ;;  %v4067_v3 = vld [vmem:[#allocation4 + $0x31] sm:$0xff]  ;;  %v10965_v60 = vld [vmem:[#allocation4 + $0x320] sm:$0xff] }
 0x4f9   :  { %14792 = vst [vmem:[#allocation64_spill] sm:$0xff] %v10937_v63  ;;  %14793 = vst [vmem:[#allocation65_spill] sm:$0xff] %v10941_v24  ;;  %v4065_v24 = vld [vmem:[#allocation4 + $0x19] sm:$0xff]  ;;  %v4066_v63 = vld [vmem:[#allocation4 + $0x21] sm:$0xff]  ;;  %v11033_v47 = vmul.f32 %v10720_v45, %v10965_v60 }
 0x4fa   :  { %14794 = vst [vmem:[#allocation66_spill] sm:$0xff] %v10943_v61  ;;  %14795 = vst [vmem:[#allocation67_spill] sm:$0xff] %v10945_v39  ;;  %v4086_v61 = vld [vmem:[#allocation4 + $0x111] sm:$0xff]  ;;  %v11036_v31 = vmul.f32 %v10725_v32, %v4065_v24  ;;  %v11039_v39 = vmul.f32 %v10725_v32, %v4066_v63  ;;  %v4092_v63 = vld [vmem:[#allocation4 + $0x159] sm:$0xff] }
 0x4fb   :  { %14796 = vst [vmem:[#allocation68_spill] sm:$0xff] %v10947_v20  ;;  %14797 = vst [vmem:[#allocation69_spill] sm:$0xff] %v10951_v21  ;;  %v4071_v21 = vld [vmem:[#allocation4 + $0x61] sm:$0xff]  ;;  %v11042_v20 = vmul.f32 %v10725_v32, %v4067_v3  ;;  %v4094_v3 = vld [vmem:[#allocation4 + $0x171] sm:$0xff] }
 0x4fc   :  { %14798 = vst [vmem:[#allocation70_spill] sm:$0xff] %v10955_v37  ;;  %14799 = vst [vmem:[#allocation71_spill] sm:$0xff] %v10959_v38  ;;  %v4069_v38 = vld [vmem:[#allocation4 + $0x49] sm:$0xff]  ;;  %v4070_v37 = vld [vmem:[#allocation4 + $0x51] sm:$0xff]  ;;  %v11054_v24 = vmul.f32 %v10725_v32, %v4071_v21 }
 0x4fd   :  { %14800 = vst [vmem:[#allocation72_spill] sm:$0xff] %v10963_v23  ;;  %14801 = vst [vmem:[#allocation73_spill] sm:$0xff] %v10965_v60  ;;  %v4068_v23 = vld [vmem:[#allocation4 + $0x39] sm:$0xff]  ;;  %v11048_v60 = vmul.f32 %v10725_v32, %v4069_v38  ;;  %v4100_v21 = vld [vmem:[#allocation4 + $0x1e9] sm:$0xff] }
 0x4fe   :  { %14802 = vst [vmem:[#allocation74_spill] sm:$0xff] %v10969_v35  ;;  %14803 = vst [vmem:[#allocation75_spill] sm:$0xff] %v10973_v49  ;;  %v4074_v49 = vld [vmem:[#allocation4 + $0x81] sm:$0xff]  ;;  %v4075_v35 = vld [vmem:[#allocation4 + $0x91] sm:$0xff]  ;;  %v11045_v45 = vmul.f32 %v10725_v32, %v4068_v23 }
 0x4ff   :  { %14804 = vst [vmem:[#allocation76_spill] sm:$0xff] %v10977_v53  ;;  %14805 = vst [vmem:[#allocation77_spill] sm:$0xff] %v10981_v2  ;;  %v4072_v2 = vld [vmem:[#allocation4 + $0x69] sm:$0xff]  ;;  %v4073_v53 = vld [vmem:[#allocation4 + $0x79] sm:$0xff]  ;;  %v11063_v23 = vmul.f32 %v10725_v32, %v4074_v49  ;;  %v11066_v38 = vmul.f32 %v10725_v32, %v4075_v35 }
 0x500   :  { %14806 = vst [vmem:[#allocation78_spill] sm:$0xff] %v10985_v13  ;;  %14807 = vst [vmem:[#allocation79_spill] sm:$0xff] %v10989_v11  ;;  %v4078_v11 = vld [vmem:[#allocation4 + $0xb1] sm:$0xff]  ;;  %v4079_v13 = vld [vmem:[#allocation4 + $0xc1] sm:$0xff]  ;;  %v11057_v15 = vmul.f32 %v10725_v32, %v4072_v2  ;;  %v11060_v8 = vmul.f32 %v10725_v32, %v4073_v53 }
 0x501   :  { %14808 = vst [vmem:[#allocation80_spill] sm:$0xff] %v10993_v16  ;;  %14809 = vst [vmem:[#allocation81_spill] sm:$0xff] %v10997_v50  ;;  %v4076_v50 = vld [vmem:[#allocation4 + $0x99] sm:$0xff]  ;;  %v4077_v16 = vld [vmem:[#allocation4 + $0xa9] sm:$0xff]  ;;  %v11075_v2 = vmul.f32 %v10725_v32, %v4078_v11  ;;  %v11078_v53 = vmul.f32 %v10725_v32, %v4079_v13 }
 0x502   :  { %14810 = vst [vmem:[#allocation82_spill] sm:$0xff] %v11001_v56  ;;  %14811 = vst [vmem:[#allocation83_spill] sm:$0xff] %v11005_v43  ;;  %v4082_v43 = vld [vmem:[#allocation4 + $0xe1] sm:$0xff]  ;;  %v4083_v56 = vld [vmem:[#allocation4 + $0xf1] sm:$0xff]  ;;  %v11069_v14 = vmul.f32 %v10725_v32, %v4076_v50  ;;  %v11072_v5 = vmul.f32 %v10725_v32, %v4077_v16 }
 0x503   :  { %14812 = vst [vmem:[#allocation84_spill] sm:$0xff] %v11009_v54  ;;  %14813 = vst [vmem:[#allocation85_spill] sm:$0xff] %v11013_v52  ;;  %v4080_v52 = vld [vmem:[#allocation4 + $0xc9] sm:$0xff]  ;;  %v4081_v54 = vld [vmem:[#allocation4 + $0xd9] sm:$0xff]  ;;  %v11087_v50 = vmul.f32 %v10725_v32, %v4082_v43  ;;  %v11090_v16 = vmul.f32 %v10725_v32, %v4083_v56 }
 0x504   :  { %14814 = vst [vmem:[#allocation86_spill] sm:$0xff] %v11017_v18  ;;  %14815 = vst [vmem:[#allocation87_spill] sm:$0xff] %v11021_v57  ;;  %v4084_v18 = vld [vmem:[#allocation4 + $0xf9] sm:$0xff]  ;;  %v4087_v57 = vld [vmem:[#allocation4 + $0x121] sm:$0xff]  ;;  %v11081_v27 = vmul.f32 %v10725_v32, %v4080_v52  ;;  %v11084_v4 = vmul.f32 %v10725_v32, %v4081_v54  ;;  %v11099_v52 = vmul.f32 %v10725_v32, %v4086_v61 }
 0x505   :  { %14816 = vst [vmem:[#allocation88_spill] sm:$0xff] %v11025_v9  ;;  %14817 = vst [vmem:[#allocation89_spill] sm:$0xff] %v11029_v17  ;;  %v4088_v17 = vld [vmem:[#allocation4 + $0x129] sm:$0xff]  ;;  %v4089_v9 = vld [vmem:[#allocation4 + $0x139] sm:$0xff]  ;;  %v11093_v13 = vmul.f32 %v10725_v32, %v4084_v18  ;;  %v11102_v54 = vmul.f32 %v10725_v32, %v4087_v57  ;;  %v11111_v18 = vmul.f32 %v10725_v32, %v4090_v40 }
 0x506   :  { %14818 = vst [vmem:[#allocation90_spill] sm:$0xff] %v11033_v47  ;;  %v11051_v47 = vmul.f32 %v10725_v32, %v4070_v37  ;;  %v4098_v37 = vld [vmem:[#allocation4 + $0x1d1] sm:$0xff]  ;;  %v4102_v49 = vld [vmem:[#allocation4 + $0x201] sm:$0xff]  ;;  %v4104_v35 = vld [vmem:[#allocation4 + $0x219] sm:$0xff]  ;;  %v11105_v56 = vmul.f32 %v10725_v32, %v4088_v17  ;;  %v11117_v57 = vmul.f32 %v10725_v32, %v4092_v63  ;;  %v11123_v17 = vmul.f32 %v10725_v32, %v4094_v3 }
 0x507   :  { %14819 = vst [vmem:[#allocation91_spill] sm:$0xff] %v11084_v4  ;;  %14820 = vst [vmem:[#allocation92_spill] sm:$0xff] %v11087_v50  ;;  %v4105_v11 = vld [vmem:[#allocation4 + $0x229] sm:$0xff]  ;;  %v4109_v50 = vld [vmem:[#allocation4 + $0x259] sm:$0xff]  ;;  %v11129_v29 = vmul.f32 %v10725_v32, %v4098_v37  ;;  %v11135_v63 = vmul.f32 %v10725_v32, %v4100_v21  ;;  %v11147_v37 = vmul.f32 %v10725_v32, %v4104_v35 }
 0x508   :  { %14821 = vst [vmem:[#allocation93_spill] sm:$0xff] %v11090_v16  ;;  %14822 = vst [vmem:[#allocation94_spill] sm:$0xff] %v11096_v58  ;;  %v4108_v43 = vld [vmem:[#allocation4 + $0x249] sm:$0xff]  ;;  %v4110_v4 = vld [vmem:[#allocation4 + $0x261] sm:$0xff]  ;;  %v11108_v16 = vmul.f32 %v10725_v32, %v4089_v9  ;;  %v11126_v9 = vmul.f32 %v10725_v32, %v4097_v48  ;;  %v11141_v48 = vmul.f32 %v10725_v32, %v4102_v49 }
 0x509   :  { %14823 = vst [vmem:[#allocation95_spill] sm:$0xff] %v11099_v52  ;;  %14824 = vst [vmem:[#allocation96_spill] sm:$0xff] %v11102_v54  ;;  %v4111_v61 = vld [vmem:[#allocation4 + $0x271] sm:$0xff]  ;;  %v4112_v52 = vld [vmem:[#allocation4 + $0x279] sm:$0xff]  ;;  %v11120_v54 = vmul.f32 %v10725_v32, %v4093_v42  ;;  %v11138_v42 = vmul.f32 %v10725_v32, %v4101_v59  ;;  %v11153_v59 = vmul.f32 %v10725_v32, %v4106_v10 }
 0x50a   :  { %14825 = vst [vmem:[#allocation97_spill] sm:$0xff] %v11108_v16  ;;  %14826 = vst [vmem:[#allocation98_spill] sm:$0xff] %v11111_v18  ;;  %v4113_v58 = vld [vmem:[#allocation4 + $0x289] sm:$0xff]  ;;  %v4114_v40 = vld [vmem:[#allocation4 + $0x291] sm:$0xff]  ;;  %v11159_v49 = vmul.f32 %v10725_v32, %v4108_v43  ;;  %v11171_v10 = vmul.f32 %v10725_v32, %v4112_v52 }
 0x50b   :  { %14827 = vst [vmem:[#allocation99_spill] sm:$0xff] %v11114_v26  ;;  %14828 = vst [vmem:[#allocation100_spill] sm:$0xff] %v11120_v54  ;;  %v4115_v18 = vld [vmem:[#allocation4 + $0x2a1] sm:$0xff]  ;;  %v4116_v16 = vld [vmem:[#allocation4 + $0x2a9] sm:$0xff]  ;;  %v11132_v26 = vmul.f32 %v10725_v32, %v4099_v1  ;;  %v11150_v1 = vmul.f32 %v10725_v32, %v4105_v11  ;;  %v11165_v11 = vmul.f32 %v10725_v32, %v4110_v4 }
 0x50c   :  { %14829 = vst [vmem:[#allocation101_spill] sm:$0xff] %v11123_v17  ;;  %14830 = vst [vmem:[#allocation102_spill] sm:$0xff] %v11126_v9  ;;  %v4117_v3 = vld [vmem:[#allocation4 + $0x2b9] sm:$0xff]  ;;  %v4118_v17 = vld [vmem:[#allocation4 + $0x2c1] sm:$0xff]  ;;  %v11144_v9 = vmul.f32 %v10725_v32, %v4103_v55  ;;  %v11162_v55 = vmul.f32 %v10725_v32, %v4109_v50  ;;  %v11180_v50 = vmul.f32 %v10725_v32, %v4115_v18 }
 0x50d   :  { %14831 = vst [vmem:[#allocation103_spill] sm:$0xff] %v11132_v26  ;;  %14832 = vst [vmem:[#allocation104_spill] sm:$0xff] %v11135_v63  ;;  %v4119_v54 = vld [vmem:[#allocation4 + $0x2d1] sm:$0xff]  ;;  %v4120_v21 = vld [vmem:[#allocation4 + $0x2d9] sm:$0xff]  ;;  %v11186_v4 = vmul.f32 %v10725_v32, %v4117_v3 }
 0x50e   :  { %14833 = vst [vmem:[#allocation105_spill] sm:$0xff] %v11138_v42  ;;  %14834 = vst [vmem:[#allocation106_spill] sm:$0xff] %v11144_v9  ;;  %v4121_v63 = vld [vmem:[#allocation4 + $0x2e9] sm:$0xff]  ;;  %v4122_v26 = vld [vmem:[#allocation4 + $0x2f1] sm:$0xff]  ;;  %v11156_v42 = vmul.f32 %v10725_v32, %v4107_v0  ;;  %v11174_v0 = vmul.f32 %v10725_v32, %v4113_v58  ;;  %v11192_v52 = vmul.f32 %v10725_v32, %v4119_v54 }
 0x50f   :  { %14835 = vst [vmem:[#allocation107_spill] sm:$0xff] %v11147_v37  ;;  %14836 = vst [vmem:[#allocation108_spill] sm:$0xff] %v11150_v1  ;;  %v4123_v35 = vld [vmem:[#allocation4 + $0x301] sm:$0xff]  ;;  %v4124_v37 = vld [vmem:[#allocation4 + $0x309] sm:$0xff]  ;;  %v11168_v1 = vmul.f32 %v10725_v32, %v4111_v61  ;;  %v11189_v61 = vmul.f32 %v10725_v32, %v4118_v17  ;;  %v11195_v58 = vmul.f32 %v10725_v32, %v4120_v21 }
 0x510   :  { %14837 = vst [vmem:[#allocation109_spill] sm:$0xff] %v11159_v49  ;;  %14838 = vst [vmem:[#allocation110_spill] sm:$0xff] %v11162_v55  ;;  %v4125_v9 = vld [vmem:[#allocation4 + $0x319] sm:$0xff]  ;;  %v4126_v43 = vld [vmem:[#allocation4 + $0x321] sm:$0xff]  ;;  %v11177_v49 = vmul.f32 %v10725_v32, %v4114_v40  ;;  %v11183_v55 = vmul.f32 %v10725_v32, %v4116_v16  ;;  %v11198_v40 = vmul.f32 %v10725_v32, %v4121_v63 }
 0x511   :  { %v11201_v18 = vmul.f32 %v10725_v32, %v4122_v26  ;;  %v11204_v16 = vmul.f32 %v10725_v32, %v4123_v35  ;;  %v11207_v3 = vmul.f32 %v10725_v32, %v4124_v37  ;;  %v11210_v17 = vmul.f32 %v10725_v32, %v4125_v9  ;;  %v14874_v35 = vld [vmem:[#allocation42_spill] sm:$0xff] }
 0x512   :  { %v11213_v54 = vmul.f32 %v10725_v32, %v4126_v43  ;;  %v11217_v21 = vadd.f32 %v11036_v31, %v10766_v46  ;;  %v11221_v26 = vadd.f32 %v11039_v39, %v10769_v25  ;;  %v11225_v63 = vadd.f32 %v11042_v20, %v10772_v41  ;;  %v14863_v31 = vld [vmem:[#allocation25_spill] sm:$0xff]  ;;  %v14864_v20 = vld [vmem:[#allocation94_spill] sm:$0xff] }
 0x513   :  { %v11229_v37 = vadd.f32 %v11045_v45, %v10778_v7  ;;  %v11233_v32 = vadd.f32 %v11048_v60, %v10781_v19  ;;  %v11237_v46 = vadd.f32 %v11051_v47, %v10784_v34  ;;  %v11241_v39 = vadd.f32 %v11054_v24, %v10787_v28  ;;  %v14855_v60 = vld [vmem:[#allocation21_spill] sm:$0xff]  ;;  %v14867_v45 = vld [vmem:[#allocation95_spill] sm:$0xff] }
 0x514   :  { %v11245_v25 = vadd.f32 %v11057_v15, %v10790_v6  ;;  %v11249_v41 = vadd.f32 %v11060_v8, %v10793_v12  ;;  %v11253_v7 = vadd.f32 %v11063_v23, %v10796_v30  ;;  %v11257_v47 = vadd.f32 %v11066_v38, %v10799_v22  ;;  %v14852_v12 = vld [vmem:[#allocation19_spill] sm:$0xff]  ;;  %v14861_v8 = vld [vmem:[#allocation40_spill] sm:$0xff]  ;;  %v14869_v23 = vld [vmem:[#allocation26_spill] sm:$0xff] }
 0x515   :  { %14839 = vst [vmem:[#allocation111_spill] sm:$0xff] %v11229_v37  ;;  %14840 = vst [vmem:[#allocation112_spill] sm:$0xff] %v11233_v32  ;;  %v11261_v19 = vadd.f32 %v11069_v14, %v10810_v62  ;;  %v11265_v15 = vadd.f32 %v11072_v5, %v10813_v51  ;;  %v11269_v34 = vadd.f32 %v11075_v2, %v10816_v33  ;;  %v14853_v30 = vld [vmem:[#allocation91_spill] sm:$0xff]  ;;  %v14856_v62 = vld [vmem:[#allocation92_spill] sm:$0xff] }
 0x516   :  { %14841 = vst [vmem:[#allocation113_spill] sm:$0xff] %v11237_v46  ;;  %14842 = vst [vmem:[#allocation114_spill] sm:$0xff] %v11241_v39  ;;  %v11273_v28 = vadd.f32 %v11078_v53, %v10819_v36  ;;  %v11277_v6 = vadd.f32 %v11081_v27, %v10830_v44  ;;  %v11281_v22 = vadd.f32 %v14853_v30, %v14852_v12  ;;  %v14858_v5 = vld [vmem:[#allocation38_spill] sm:$0xff]  ;;  %v14859_v14 = vld [vmem:[#allocation93_spill] sm:$0xff] }
 0x517   :  { %14843 = vst [vmem:[#allocation115_spill] sm:$0xff] %v11245_v25  ;;  %14844 = vst [vmem:[#allocation116_spill] sm:$0xff] %v11249_v41  ;;  %v11285_v51 = vadd.f32 %v14856_v62, %v14855_v60  ;;  %v11289_v33 = vadd.f32 %v14859_v14, %v14858_v5  ;;  %v11293_v36 = vadd.f32 %v11093_v13, %v14861_v8  ;;  %v14866_v27 = vld [vmem:[#allocation41_spill] sm:$0xff]  ;;  %v14870_v38 = vld [vmem:[#allocation96_spill] sm:$0xff] }
 0x518   :  { %14845 = vst [vmem:[#allocation117_spill] sm:$0xff] %v11253_v7  ;;  %14846 = vst [vmem:[#allocation118_spill] sm:$0xff] %v11257_v47  ;;  %v11297_v44 = vadd.f32 %v14864_v20, %v14863_v31  ;;  %v11301_v24 = vadd.f32 %v14867_v45, %v14866_v27  ;;  %v11305_v2 = vadd.f32 %v14870_v38, %v14869_v23  ;;  %v14872_v53 = vld [vmem:[#allocation9_spill] sm:$0xff]  ;;  %v14877_v12 = vld [vmem:[#allocation43_spill] sm:$0xff] }
 0x519   :  { %14847 = vst [vmem:[#allocation119_spill] sm:$0xff] %v11261_v19  ;;  %14848 = vst [vmem:[#allocation120_spill] sm:$0xff] %v11265_v15  ;;  %v11309_v9 = vadd.f32 %v11105_v56, %v14872_v53  ;;  %v14875_v43 = vld [vmem:[#allocation97_spill] sm:$0xff]  ;;  %v14878_v30 = vld [vmem:[#allocation98_spill] sm:$0xff] }
 0x51a   :  { %14849 = vst [vmem:[#allocation121_spill] sm:$0xff] %v11269_v34  ;;  %14850 = vst [vmem:[#allocation122_spill] sm:$0xff] %v11273_v28  ;;  %v11313_v13 = vadd.f32 %v14875_v43, %v14874_v35  ;;  %v11317_v60 = vadd.f32 %v14878_v30, %v14877_v12  ;;  %v14880_v62 = vld [vmem:[#allocation44_spill] sm:$0xff]  ;;  %v14881_v5 = vld [vmem:[#allocation99_spill] sm:$0xff] }
 0x51b   :  { %14851 = vst [vmem:[#allocation123_spill] sm:$0xff] %v11277_v6  ;;  %14854 = vst [vmem:[#allocation19_spill] sm:$0xff] %v11281_v22  ;;  %v11321_v14 = vadd.f32 %v14881_v5, %v14880_v62  ;;  %v14883_v8 = vld [vmem:[#allocation48_spill] sm:$0xff]  ;;  %v14885_v20 = vld [vmem:[#allocation49_spill] sm:$0xff] }
 0x51c   :  { %14857 = vst [vmem:[#allocation91_spill] sm:$0xff] %v11285_v51  ;;  %14860 = vst [vmem:[#allocation21_spill] sm:$0xff] %v11289_v33  ;;  %v11325_v31 = vadd.f32 %v11117_v57, %v14883_v8  ;;  %v14886_v27 = vld [vmem:[#allocation100_spill] sm:$0xff]  ;;  %v14888_v45 = vld [vmem:[#allocation50_spill] sm:$0xff] }
 0x51d   :  { %14862 = vst [vmem:[#allocation92_spill] sm:$0xff] %v11293_v36  ;;  %14865 = vst [vmem:[#allocation38_spill] sm:$0xff] %v11297_v44  ;;  %v11329_v56 = vadd.f32 %v14886_v27, %v14885_v20  ;;  %v14889_v23 = vld [vmem:[#allocation101_spill] sm:$0xff]  ;;  %v14891_v53 = vld [vmem:[#allocation51_spill] sm:$0xff] }
 0x51e   :  { %14868 = vst [vmem:[#allocation93_spill] sm:$0xff] %v11301_v24  ;;  %14871 = vst [vmem:[#allocation40_spill] sm:$0xff] %v11305_v2  ;;  %v11333_v38 = vadd.f32 %v14889_v23, %v14888_v45  ;;  %v14892_v35 = vld [vmem:[#allocation102_spill] sm:$0xff]  ;;  %v14893_v12 = vld [vmem:[#allocation55_spill] sm:$0xff] }
 0x51f   :  { %14873 = vst [vmem:[#allocation25_spill] sm:$0xff] %v11309_v9  ;;  %14876 = vst [vmem:[#allocation94_spill] sm:$0xff] %v11313_v13  ;;  %v11337_v43 = vadd.f32 %v14892_v35, %v14891_v53  ;;  %v11341_v30 = vadd.f32 %v11129_v29, %v14893_v12  ;;  %v14894_v62 = vld [vmem:[#allocation56_spill] sm:$0xff]  ;;  %v14895_v5 = vld [vmem:[#allocation103_spill] sm:$0xff] }
 0x520   :  { %14879 = vst [vmem:[#allocation41_spill] sm:$0xff] %v11317_v60  ;;  %14882 = vst [vmem:[#allocation95_spill] sm:$0xff] %v11321_v14  ;;  %v11345_v57 = vadd.f32 %v14895_v5, %v14894_v62  ;;  %v14896_v8 = vld [vmem:[#allocation57_spill] sm:$0xff]  ;;  %v14898_v27 = vld [vmem:[#allocation58_spill] sm:$0xff] }
 0x521   :  { %14884 = vst [vmem:[#allocation26_spill] sm:$0xff] %v11325_v31  ;;  %14887 = vst [vmem:[#allocation96_spill] sm:$0xff] %v11329_v56  ;;  %v14897_v31 = vld [vmem:[#allocation104_spill] sm:$0xff]  ;;  %v14899_v56 = vld [vmem:[#allocation105_spill] sm:$0xff] }
 0x522   :  { %14890 = vst [vmem:[#allocation9_spill] sm:$0xff] %v11333_v38  ;;  %v11349_v20 = vadd.f32 %v14897_v31, %v14896_v8  ;;  %v11353_v45 = vadd.f32 %v14899_v56, %v14898_v27  ;;  %v14900_v23 = vld [vmem:[#allocation62_spill] sm:$0xff]  ;;  %v14901_v35 = vld [vmem:[#allocation63_spill] sm:$0xff]  ;;  %v14903_v12 = vld [vmem:[#allocation64_spill] sm:$0xff] }
 0x523   :  { %v11357_v53 = vadd.f32 %v11141_v48, %v14900_v23  ;;  %v14902_v38 = vld [vmem:[#allocation106_spill] sm:$0xff]  ;;  %v14904_v14 = vld [vmem:[#allocation107_spill] sm:$0xff]  ;;  %v14905_v5 = vld [vmem:[#allocation65_spill] sm:$0xff] }
 0x524   :  { %v11361_v29 = vadd.f32 %v14902_v38, %v14901_v35  ;;  %v11365_v62 = vadd.f32 %v14904_v14, %v14903_v12  ;;  %v14906_v60 = vld [vmem:[#allocation108_spill] sm:$0xff]  ;;  %v14907_v8 = vld [vmem:[#allocation69_spill] sm:$0xff]  ;;  %v14908_v27 = vld [vmem:[#allocation70_spill] sm:$0xff] }
 0x525   :  { %v11369_v31 = vadd.f32 %v14906_v60, %v14905_v5  ;;  %v11373_v56 = vadd.f32 %v11153_v59, %v14907_v8  ;;  %v11377_v48 = vadd.f32 %v11156_v42, %v14908_v27  ;;  %v14909_v23 = vld [vmem:[#allocation71_spill] sm:$0xff]  ;;  %v14910_v13 = vld [vmem:[#allocation109_spill] sm:$0xff]  ;;  %v14911_v35 = vld [vmem:[#allocation72_spill] sm:$0xff] }
 0x526   :  { %v11381_v38 = vadd.f32 %v14910_v13, %v14909_v23  ;;  %v14912_v9 = vld [vmem:[#allocation110_spill] sm:$0xff]  ;;  %v4265_v12 = vld [vmem:[#allocation4 + $0x1a] sm:$0xff]  ;;  %v4266_v2 = vld [vmem:[#allocation4 + $0x22] sm:$0xff] }
 0x527   :  { %v11385_v14 = vadd.f32 %v14912_v9, %v14911_v35  ;;  %v4267_v60 = vld [vmem:[#allocation4 + $0x32] sm:$0xff]  ;;  %v14916_v42 = vld [vmem:[#allocation76_spill] sm:$0xff]  ;;  %v14918_v13 = vld [vmem:[#allocation77_spill] sm:$0xff] }
 0x528   :  { %v14913_v5 = vld [vmem:[#allocation74_spill] sm:$0xff]  ;;  %v14914_v59 = vld [vmem:[#allocation75_spill] sm:$0xff]  ;;  %v11397_v27 = vadd.f32 %v11171_v10, %v14916_v42  ;;  %v11401_v23 = vadd.f32 %v11174_v0, %v14918_v13  ;;  %v4271_v36 = vld [vmem:[#allocation4 + $0x62] sm:$0xff] }
 0x529   :  { %v11389_v24 = vadd.f32 %v11165_v11, %v14913_v5  ;;  %v11393_v8 = vadd.f32 %v11168_v1, %v14914_v59  ;;  %v4268_v9 = vld [vmem:[#allocation4 + $0x3a] sm:$0xff]  ;;  %v4269_v35 = vld [vmem:[#allocation4 + $0x4a] sm:$0xff]  ;;  %v4270_v44 = vld [vmem:[#allocation4 + $0x52] sm:$0xff] }
 0x52a   :  { %14917 = vst [vmem:[#allocation97_spill] sm:$0xff] %v11397_v27  ;;  %14919 = vst [vmem:[#allocation43_spill] sm:$0xff] %v11401_v23  ;;  %v14920_v33 = vld [vmem:[#allocation78_spill] sm:$0xff]  ;;  %v14922_v5 = vld [vmem:[#allocation79_spill] sm:$0xff] }
 0x52b   :  { %14915 = vst [vmem:[#allocation42_spill] sm:$0xff] %v11393_v8  ;;  %v11405_v11 = vadd.f32 %v11177_v49, %v14920_v33  ;;  %v11409_v1 = vadd.f32 %v11180_v50, %v14922_v5  ;;  %v14924_v59 = vld [vmem:[#allocation80_spill] sm:$0xff]  ;;  %v14926_v42 = vld [vmem:[#allocation81_spill] sm:$0xff]  ;;  %v4275_v6 = vld [vmem:[#allocation4 + $0x92] sm:$0xff] }
 0x52c   :  { %v11413_v10 = vadd.f32 %v11183_v55, %v14924_v59  ;;  %v11417_v0 = vadd.f32 %v11186_v4, %v14926_v42  ;;  %v4272_v13 = vld [vmem:[#allocation4 + $0x6a] sm:$0xff]  ;;  %v4273_v51 = vld [vmem:[#allocation4 + $0x7a] sm:$0xff]  ;;  %v4274_v22 = vld [vmem:[#allocation4 + $0x82] sm:$0xff] }
 0x52d   :  { %14921 = vst [vmem:[#allocation98_spill] sm:$0xff] %v11405_v11  ;;  %14923 = vst [vmem:[#allocation44_spill] sm:$0xff] %v11409_v1  ;;  %v14928_v28 = vld [vmem:[#allocation82_spill] sm:$0xff]  ;;  %v14930_v33 = vld [vmem:[#allocation83_spill] sm:$0xff] }
 0x52e   :  { %14925 = vst [vmem:[#allocation99_spill] sm:$0xff] %v11413_v10  ;;  %14927 = vst [vmem:[#allocation48_spill] sm:$0xff] %v11417_v0  ;;  %v11421_v49 = vadd.f32 %v11189_v61, %v14928_v28  ;;  %v11425_v50 = vadd.f32 %v11192_v52, %v14930_v33  ;;  %v14932_v5 = vld [vmem:[#allocation84_spill] sm:$0xff]  ;;  %v14934_v59 = vld [vmem:[#allocation85_spill] sm:$0xff] }
 0x52f   :  { %v11429_v55 = vadd.f32 %v11195_v58, %v14932_v5  ;;  %v11433_v4 = vadd.f32 %v11198_v40, %v14934_v59  ;;  %v4276_v42 = vld [vmem:[#allocation4 + $0x9a] sm:$0xff]  ;;  %v4277_v34 = vld [vmem:[#allocation4 + $0xaa] sm:$0xff]  ;;  %v4278_v15 = vld [vmem:[#allocation4 + $0xb2] sm:$0xff] }
 0x530   :  { %14929 = vst [vmem:[#allocation49_spill] sm:$0xff] %v11421_v49  ;;  %14931 = vst [vmem:[#allocation100_spill] sm:$0xff] %v11425_v50  ;;  %v4279_v19 = vld [vmem:[#allocation4 + $0xc2] sm:$0xff]  ;;  %v14936_v47 = vld [vmem:[#allocation86_spill] sm:$0xff] }
 0x531   :  { %14933 = vst [vmem:[#allocation50_spill] sm:$0xff] %v11429_v55  ;;  %14935 = vst [vmem:[#allocation101_spill] sm:$0xff] %v11433_v4  ;;  %v11437_v61 = vadd.f32 %v11201_v18, %v14936_v47  ;;  %v14938_v28 = vld [vmem:[#allocation87_spill] sm:$0xff]  ;;  %v14940_v33 = vld [vmem:[#allocation88_spill] sm:$0xff] }
 0x532   :  { %v11441_v52 = vadd.f32 %v11204_v16, %v14938_v28  ;;  %v11445_v58 = vadd.f32 %v11207_v3, %v14940_v33  ;;  %v14942_v5 = vld [vmem:[#allocation89_spill] sm:$0xff]  ;;  %v4281_v7 = vld [vmem:[#allocation4 + $0xda] sm:$0xff]  ;;  %v4283_v25 = vld [vmem:[#allocation4 + $0xf2] sm:$0xff] }
 0x533   :  { %14937 = vst [vmem:[#allocation51_spill] sm:$0xff] %v11437_v61  ;;  %v11449_v40 = vadd.f32 %v11210_v17, %v14942_v5  ;;  %v4280_v59 = vld [vmem:[#allocation4 + $0xca] sm:$0xff]  ;;  %v4282_v41 = vld [vmem:[#allocation4 + $0xe2] sm:$0xff]  ;;  %v4284_v47 = vld [vmem:[#allocation4 + $0xfa] sm:$0xff] }
 0x534   :  { %14939 = vst [vmem:[#allocation102_spill] sm:$0xff] %v11441_v52  ;;  %14941 = vst [vmem:[#allocation55_spill] sm:$0xff] %v11445_v58  ;;  %v14944_v39 = vld [vmem:[#allocation90_spill] sm:$0xff]  ;;  %v4287_v28 = vld [vmem:[#allocation4 + $0x122] sm:$0xff] }
 0x535   :  { %14943 = vst [vmem:[#allocation56_spill] sm:$0xff] %v11449_v40  ;;  %v11453_v18 = vadd.f32 %v11213_v54, %v14944_v39  ;;  %v4285_v46 = vld [vmem:[#allocation4 + $0x10a] sm:$0xff]  ;;  %v4286_v16 = vld [vmem:[#allocation4 + $0x112] sm:$0xff]  ;;  %v4289_v5 = vld [vmem:[#allocation4 + $0x13a] sm:$0xff] }
 0x536   :  { %v14946_v32 = vld [vmem:[#allocation10_spill] sm:$0xff]  ;;  %v4290_v40 = vld [vmem:[#allocation4 + $0x142] sm:$0xff]  ;;  %v14974_v23 = vld [vmem:[#allocation31_spill] sm:$0xff] }
 0x537   :  { %14945 = vst [vmem:[#allocation103_spill] sm:$0xff] %v11453_v18  ;;  %v11456_v37 = vmul.f32 %v14946_v32, %v4265_v12  ;;  %v11459_v3 = vmul.f32 %v14946_v32, %v4266_v2  ;;  %v11462_v17 = vmul.f32 %v14946_v32, %v4267_v60  ;;  %v4288_v33 = vld [vmem:[#allocation4 + $0x12a] sm:$0xff]  ;;  %v4291_v58 = vld [vmem:[#allocation4 + $0x152] sm:$0xff]  ;;  %v11465_v54 = vmul.f32 %v14946_v32, %v4268_v9  ;;  %v4292_v2 = vld [vmem:[#allocation4 + $0x15a] sm:$0xff] }
 0x538   :  { %v11468_v39 = vmul.f32 %v14946_v32, %v4269_v35  ;;  %v11471_v18 = vmul.f32 %v14946_v32, %v4270_v44  ;;  %v11474_v12 = vmul.f32 %v14946_v32, %v4271_v36  ;;  %v4293_v52 = vld [vmem:[#allocation4 + $0x16a] sm:$0xff]  ;;  %v4294_v60 = vld [vmem:[#allocation4 + $0x172] sm:$0xff]  ;;  %v11477_v4 = vmul.f32 %v14946_v32, %v4272_v13  ;;  %v4323_v50 = vld [vmem:[#allocation4 + $0x302] sm:$0xff] }
 0x539   :  { %14947 = vst [vmem:[#allocation57_spill] sm:$0xff] %v11465_v54  ;;  %v4297_v61 = vld [vmem:[#allocation4 + $0x1ca] sm:$0xff]  ;;  %v11480_v55 = vmul.f32 %v14946_v32, %v4273_v51  ;;  %v11483_v9 = vmul.f32 %v14946_v32, %v4274_v22  ;;  %v11486_v35 = vmul.f32 %v14946_v32, %v4275_v6  ;;  %v4298_v44 = vld [vmem:[#allocation4 + $0x1d2] sm:$0xff]  ;;  %v11492_v54 = vmul.f32 %v14946_v32, %v4277_v34  ;;  %v4302_v22 = vld [vmem:[#allocation4 + $0x202] sm:$0xff] }
 0x53a   :  { %14948 = vst [vmem:[#allocation104_spill] sm:$0xff] %v11468_v39  ;;  %14949 = vst [vmem:[#allocation58_spill] sm:$0xff] %v11471_v18  ;;  %v4299_v18 = vld [vmem:[#allocation4 + $0x1e2] sm:$0xff]  ;;  %v4300_v36 = vld [vmem:[#allocation4 + $0x1ea] sm:$0xff]  ;;  %v11489_v39 = vmul.f32 %v14946_v32, %v4276_v42  ;;  %v11495_v13 = vmul.f32 %v14946_v32, %v4278_v15  ;;  %v11498_v51 = vmul.f32 %v14946_v32, %v4279_v19 }
 0x53b   :  { %14950 = vst [vmem:[#allocation105_spill] sm:$0xff] %v11474_v12  ;;  %14951 = vst [vmem:[#allocation62_spill] sm:$0xff] %v11477_v4  ;;  %v4301_v12 = vld [vmem:[#allocation4 + $0x1fa] sm:$0xff]  ;;  %v11507_v42 = vmul.f32 %v14946_v32, %v4282_v41  ;;  %v11510_v34 = vmul.f32 %v14946_v32, %v4283_v25  ;;  %v4305_v15 = vld [vmem:[#allocation4 + $0x22a] sm:$0xff]  ;;  %v11513_v19 = vmul.f32 %v14946_v32, %v4284_v47 }
 0x53c   :  { %14952 = vst [vmem:[#allocation63_spill] sm:$0xff] %v11480_v55  ;;  %14953 = vst [vmem:[#allocation106_spill] sm:$0xff] %v11483_v9  ;;  %v4303_v9 = vld [vmem:[#allocation4 + $0x212] sm:$0xff]  ;;  %v4304_v6 = vld [vmem:[#allocation4 + $0x21a] sm:$0xff]  ;;  %v11504_v55 = vmul.f32 %v14946_v32, %v4281_v7  ;;  %v11522_v7 = vmul.f32 %v14946_v32, %v4287_v28  ;;  %v11525_v25 = vmul.f32 %v14946_v32, %v4288_v33 }
 0x53d   :  { %14954 = vst [vmem:[#allocation64_spill] sm:$0xff] %v11486_v35  ;;  %14955 = vst [vmem:[#allocation107_spill] sm:$0xff] %v11489_v39  ;;  %v11501_v35 = vmul.f32 %v14946_v32, %v4280_v59  ;;  %v11519_v59 = vmul.f32 %v14946_v32, %v4286_v16  ;;  %v4308_v41 = vld [vmem:[#allocation4 + $0x24a] sm:$0xff]  ;;  %v11531_v47 = vmul.f32 %v14946_v32, %v4290_v40  ;;  %v4311_v16 = vld [vmem:[#allocation4 + $0x272] sm:$0xff] }
 0x53e   :  { %14956 = vst [vmem:[#allocation65_spill] sm:$0xff] %v11492_v54  ;;  %14957 = vst [vmem:[#allocation108_spill] sm:$0xff] %v11495_v13  ;;  %v4306_v13 = vld [vmem:[#allocation4 + $0x232] sm:$0xff]  ;;  %v4307_v54 = vld [vmem:[#allocation4 + $0x242] sm:$0xff]  ;;  %v11537_v28 = vmul.f32 %v14946_v32, %v4292_v2  ;;  %v11543_v33 = vmul.f32 %v14946_v32, %v4294_v60  ;;  %v4373_v2 = vmul.f32 %v14946_v32, %v4301_v12 }
 0x53f   :  { %14958 = vst [vmem:[#allocation69_spill] sm:$0xff] %v11498_v51  ;;  %14959 = vst [vmem:[#allocation70_spill] sm:$0xff] %v11501_v35  ;;  %v11516_v51 = vmul.f32 %v14946_v32, %v4285_v46  ;;  %v11534_v46 = vmul.f32 %v14946_v32, %v4291_v58  ;;  %v4315_v40 = vld [vmem:[#allocation4 + $0x2a2] sm:$0xff]  ;;  %v4370_v58 = vmul.f32 %v14946_v32, %v4298_v44  ;;  %v4320_v35 = vld [vmem:[#allocation4 + $0x2da] sm:$0xff] }
 0x540   :  { %14960 = vst [vmem:[#allocation71_spill] sm:$0xff] %v11504_v55  ;;  %14961 = vst [vmem:[#allocation109_spill] sm:$0xff] %v11507_v42  ;;  %v4309_v42 = vld [vmem:[#allocation4 + $0x25a] sm:$0xff]  ;;  %v4310_v55 = vld [vmem:[#allocation4 + $0x262] sm:$0xff]  ;;  %v4375_v60 = vmul.f32 %v14946_v32, %v4303_v9  ;;  %v4380_v12 = vmul.f32 %v14946_v32, %v4308_v41 }
 0x541   :  { %14962 = vst [vmem:[#allocation72_spill] sm:$0xff] %v11510_v34  ;;  %14963 = vst [vmem:[#allocation110_spill] sm:$0xff] %v11513_v19  ;;  %v11528_v34 = vmul.f32 %v14946_v32, %v4289_v5  ;;  %v4369_v5 = vmul.f32 %v14946_v32, %v4297_v61  ;;  %v4318_v19 = vld [vmem:[#allocation4 + $0x2c2] sm:$0xff]  ;;  %v4376_v61 = vmul.f32 %v14946_v32, %v4304_v6  ;;  %v4321_v39 = vld [vmem:[#allocation4 + $0x2ea] sm:$0xff] }
 0x542   :  { %14964 = vst [vmem:[#allocation74_spill] sm:$0xff] %v11516_v51  ;;  %14965 = vst [vmem:[#allocation75_spill] sm:$0xff] %v11519_v59  ;;  %v4312_v59 = vld [vmem:[#allocation4 + $0x27a] sm:$0xff]  ;;  %v4313_v51 = vld [vmem:[#allocation4 + $0x28a] sm:$0xff]  ;;  %v4381_v4 = vmul.f32 %v14946_v32, %v4309_v42  ;;  %v4382_v9 = vmul.f32 %v14946_v32, %v4310_v55  ;;  %v4383_v6 = vmul.f32 %v14946_v32, %v4311_v16 }
 0x543   :  { %14966 = vst [vmem:[#allocation76_spill] sm:$0xff] %v11522_v7  ;;  %14967 = vst [vmem:[#allocation77_spill] sm:$0xff] %v11525_v25  ;;  %v11540_v7 = vmul.f32 %v14946_v32, %v4293_v52  ;;  %v4372_v25 = vmul.f32 %v14946_v32, %v4300_v36  ;;  %v4319_v52 = vld [vmem:[#allocation4 + $0x2d2] sm:$0xff]  ;;  %v4379_v36 = vmul.f32 %v14946_v32, %v4307_v54  ;;  %v4324_v49 = vld [vmem:[#allocation4 + $0x30a] sm:$0xff] }
 0x544   :  { %14968 = vst [vmem:[#allocation78_spill] sm:$0xff] %v11528_v34  ;;  %14969 = vst [vmem:[#allocation79_spill] sm:$0xff] %v11531_v47  ;;  %v4314_v34 = vld [vmem:[#allocation4 + $0x292] sm:$0xff]  ;;  %v4316_v47 = vld [vmem:[#allocation4 + $0x2aa] sm:$0xff]  ;;  %v4385_v0 = vmul.f32 %v14946_v32, %v4313_v51  ;;  %v4387_v54 = vmul.f32 %v14946_v32, %v4315_v40  ;;  %v4390_v1 = vmul.f32 %v14946_v32, %v4318_v19 }
 0x545   :  { %14970 = vst [vmem:[#allocation80_spill] sm:$0xff] %v11534_v46  ;;  %14971 = vst [vmem:[#allocation81_spill] sm:$0xff] %v11537_v28  ;;  %v4371_v46 = vmul.f32 %v14946_v32, %v4299_v18  ;;  %v4317_v28 = vld [vmem:[#allocation4 + $0x2ba] sm:$0xff]  ;;  %v4322_v44 = vld [vmem:[#allocation4 + $0x2f2] sm:$0xff]  ;;  %v4378_v18 = vmul.f32 %v14946_v32, %v4306_v13  ;;  %v4386_v13 = vmul.f32 %v14946_v32, %v4314_v34 }
 0x546   :  { %14972 = vst [vmem:[#allocation82_spill] sm:$0xff] %v11540_v7  ;;  %14973 = vst [vmem:[#allocation83_spill] sm:$0xff] %v11543_v33  ;;  %v4374_v7 = vmul.f32 %v14946_v32, %v4302_v22  ;;  %v4377_v33 = vmul.f32 %v14946_v32, %v4305_v15  ;;  %v4325_v22 = vld [vmem:[#allocation4 + $0x31a] sm:$0xff]  ;;  %v4384_v15 = vmul.f32 %v14946_v32, %v4312_v59  ;;  %v4326_v10 = vld [vmem:[#allocation4 + $0x322] sm:$0xff] }
 0x547   :  { %v4388_v41 = vmul.f32 %v14946_v32, %v4316_v47  ;;  %v4389_v42 = vmul.f32 %v14946_v32, %v4317_v28  ;;  %v4391_v11 = vmul.f32 %v14946_v32, %v4319_v52  ;;  %v4392_v55 = vmul.f32 %v14946_v32, %v4320_v35  ;;  %v14975_v28 = vld [vmem:[#allocation33_spill] sm:$0xff]  ;;  %v14977_v19 = vld [vmem:[#allocation32_spill] sm:$0xff]  ;;  %v14978_v52 = vld [vmem:[#allocation34_spill] sm:$0xff] }
 0x548   :  { %v4393_v16 = vmul.f32 %v14946_v32, %v4321_v39  ;;  %v4394_v59 = vmul.f32 %v14946_v32, %v4322_v44  ;;  %v4395_v51 = vmul.f32 %v14946_v32, %v4323_v50  ;;  %v4396_v34 = vmul.f32 %v14946_v32, %v4324_v49  ;;  %v14995_v44 = vld [vmem:[#allocation101_spill] sm:$0xff] }
 0x549   :  { %v4397_v40 = vmul.f32 %v14946_v32, %v4325_v22  ;;  %v4398_v47 = vmul.f32 %v14946_v32, %v4326_v10  ;;  %v11577_v27 = vadd.f32 %v14975_v28, %v14974_v23  ;;  %v11581_v8 = vadd.f32 %v14978_v52, %v14977_v19  ;;  %v14999_v22 = vld [vmem:[#allocation102_spill] sm:$0xff] }
 0x54a   :  { %v11585_v39 = vadd.f32 %v11456_v37, %v11217_v21  ;;  %v11589_v50 = vadd.f32 %v11459_v3, %v11221_v26  ;;  %v11593_v49 = vadd.f32 %v11462_v17, %v11225_v63  ;;  %v11596_v32 = vadd.f32 %v4369_v5, %v11337_v43  ;;  %v14991_v5 = vld [vmem:[#allocation49_spill] sm:$0xff] }
 0x54b   :  { %14976 = vst [vmem:[#allocation84_spill] sm:$0xff] %v11577_v27  ;;  %14979 = vst [vmem:[#allocation85_spill] sm:$0xff] %v11581_v8  ;;  %v11599_v23 = vadd.f32 %v4370_v58, %v11341_v30  ;;  %v11602_v10 = vadd.f32 %v4371_v46, %v11345_v57  ;;  %v11605_v21 = vadd.f32 %v4372_v25, %v11349_v20  ;;  %v14990_v46 = vld [vmem:[#allocation48_spill] sm:$0xff] }
 0x54c   :  { %14980 = vst [vmem:[#allocation86_spill] sm:$0xff] %v11585_v39  ;;  %14981 = vst [vmem:[#allocation87_spill] sm:$0xff] %v11589_v50  ;;  %v11608_v37 = vadd.f32 %v4373_v2, %v11353_v45  ;;  %v11611_v26 = vadd.f32 %v4374_v7, %v11357_v53  ;;  %v11614_v63 = vadd.f32 %v4375_v60, %v11361_v29  ;;  %v14992_v58 = vld [vmem:[#allocation100_spill] sm:$0xff]  ;;  %v14993_v60 = vld [vmem:[#allocation50_spill] sm:$0xff] }
 0x54d   :  { %14982 = vst [vmem:[#allocation88_spill] sm:$0xff] %v11593_v49  ;;  %v11617_v43 = vadd.f32 %v4376_v61, %v11365_v62  ;;  %v11620_v30 = vadd.f32 %v4377_v33, %v11369_v31  ;;  %v11623_v57 = vadd.f32 %v4378_v18, %v11373_v56  ;;  %v11626_v20 = vadd.f32 %v4379_v36, %v11377_v48  ;;  %v14983_v62 = vld [vmem:[#allocation42_spill] sm:$0xff]  ;;  %v14984_v31 = vld [vmem:[#allocation97_spill] sm:$0xff]  ;;  %v14985_v56 = vld [vmem:[#allocation43_spill] sm:$0xff] }
 0x54e   :  { %v11629_v45 = vadd.f32 %v4380_v12, %v11381_v38  ;;  %v11632_v53 = vadd.f32 %v4381_v4, %v11385_v14  ;;  %v11635_v29 = vadd.f32 %v4382_v9, %v11389_v24  ;;  %v11638_v3 = vadd.f32 %v4383_v6, %v14983_v62  ;;  %v14986_v48 = vld [vmem:[#allocation98_spill] sm:$0xff]  ;;  %v11652_v38 = vld [vmem:[%s14346_s4 + $0x3] ss:$0 sm:$0xff]  ;;  %v14989_v4 = vld [vmem:[#allocation99_spill] sm:$0xff] }
 0x54f   :  { %v11641_v17 = vadd.f32 %v4384_v15, %v14984_v31  ;;  %v11644_v35 = vadd.f32 %v4385_v0, %v14985_v56  ;;  %v11647_v7 = vadd.f32 %v4386_v13, %v14986_v48  ;;  %14987 = vst [vmem:[#allocation89_spill] sm:$0xff] %v11652_v38  ;;  %v14988_v14 = vld [vmem:[#allocation44_spill] sm:$0xff]  ;;  %v11658_v25 = vadd.f32 %v4388_v41, %v14989_v4  ;;  %v14997_v36 = vld [vmem:[#allocation51_spill] sm:$0xff]  ;;  %v15014_v56 = vld [vmem:[#allocation17_spill] sm:$0xff] }
 0x550   :  { %v11655_v24 = vadd.f32 %v4387_v54, %v14988_v14  ;;  %v11661_v33 = vadd.f32 %v4389_v42, %v14990_v46  ;;  %v11664_v0 = vadd.f32 %v4390_v1, %v14991_v5  ;;  %v11667_v2 = vadd.f32 %v4391_v11, %v14992_v58  ;;  %v15001_v6 = vld [vmem:[#allocation55_spill] sm:$0xff]  ;;  %v15003_v1 = vld [vmem:[#allocation56_spill] sm:$0xff]  ;;  %v15016_v46 = vld [vmem:[#allocation22_spill] sm:$0xff] }
 0x551   :  { %v11670_v61 = vadd.f32 %v4392_v55, %v14993_v60  ;;  %v11673_v18 = vadd.f32 %v4393_v16, %v14995_v44  ;;  %v11676_v12 = vadd.f32 %v4394_v59, %v14997_v36  ;;  %v11679_v9 = vadd.f32 %v4395_v51, %v14999_v22  ;;  %v15005_v11 = vld [vmem:[#allocation103_spill] sm:$0xff]  ;;  %v15008_v55 = vld [vmem:[#allocation13_spill] sm:$0xff]  ;;  %v15010_v51 = vld [vmem:[#allocation18_spill] sm:$0xff] }
 0x552   :  { %v11682_v15 = vadd.f32 %v4396_v34, %v15001_v6  ;;  %v11685_v13 = vadd.f32 %v4397_v40, %v15003_v1  ;;  %v11688_v54 = vadd.f32 %v4398_v47, %v15005_v11  ;;  %v15007_v41 = vld [vmem:[#allocation35_spill] sm:$0xff]  ;;  %v4569_v16 = vmul.f32 %v11652_v38, %v15008_v55  ;;  %v15011_v34 = vld [vmem:[#allocation20_spill] sm:$0xff]  ;;  %v15013_v47 = vld [vmem:[#allocation37_spill] sm:$0xff] }
 0x553   :  { %14994 = vst [vmem:[#allocation90_spill] sm:$0xff] %v11670_v61  ;;  %14996 = vst [vmem:[#allocation10_spill] sm:$0xff] %v11673_v18  ;;  %v4568_v42 = vmul.f32 %v11652_v38, %v15007_v41  ;;  %v15009_v59 = vld [vmem:[#allocation15_spill] sm:$0xff]  ;;  %v4571_v19 = vmul.f32 %v11652_v38, %v15010_v51  ;;  %v4572_v52 = vmul.f32 %v11652_v38, %v15011_v34  ;;  %v15012_v40 = vld [vmem:[#allocation36_spill] sm:$0xff] }
 0x554   :  { %14998 = vst [vmem:[#allocation31_spill] sm:$0xff] %v11676_v12  ;;  %15000 = vst [vmem:[#allocation33_spill] sm:$0xff] %v11679_v9  ;;  %v4570_v28 = vmul.f32 %v11652_v38, %v15009_v59  ;;  %v4573_v62 = vmul.f32 %v11652_v38, %v15012_v40  ;;  %v4574_v31 = vmul.f32 %v11652_v38, %v15013_v47  ;;  %v15015_v14 = vld [vmem:[#allocation39_spill] sm:$0xff]  ;;  %v15018_v44 = vld [vmem:[#allocation24_spill] sm:$0xff] }
 0x555   :  { %15002 = vst [vmem:[#allocation32_spill] sm:$0xff] %v11682_v15  ;;  %15004 = vst [vmem:[#allocation34_spill] sm:$0xff] %v11685_v13  ;;  %v4575_v48 = vmul.f32 %v11652_v38, %v15014_v56  ;;  %v4576_v4 = vmul.f32 %v11652_v38, %v15015_v14  ;;  %v4577_v5 = vmul.f32 %v11652_v38, %v15016_v46  ;;  %v15017_v58 = vld [vmem:[#allocation23_spill] sm:$0xff]  ;;  %v15020_v1 = vld [vmem:[#allocation28_spill] sm:$0xff] }
 0x556   :  { %15006 = vst [vmem:[#allocation42_spill] sm:$0xff] %v11688_v54  ;;  %v4578_v60 = vmul.f32 %v11652_v38, %v15017_v58  ;;  %v4579_v36 = vmul.f32 %v11652_v38, %v15018_v44  ;;  %v15019_v22 = vld [vmem:[#allocation27_spill] sm:$0xff]  ;;  %v4581_v11 = vmul.f32 %v11652_v38, %v15020_v1  ;;  %v15021_v41 = vld [vmem:[#allocation29_spill] sm:$0xff]  ;;  %v15022_v59 = vld [vmem:[#allocation8_spill] sm:$0xff] }
 0x557   :  { %v4580_v6 = vmul.f32 %v11652_v38, %v15019_v22  ;;  %v4582_v55 = vmul.f32 %v11652_v38, %v15021_v41  ;;  %v4583_v51 = vmul.f32 %v11652_v38, %v15022_v59  ;;  %v4525_v34 = vld [vmem:[#allocation4 + $0x330] sm:$0xff]  ;;  %v4526_v40 = vld [vmem:[#allocation4 + $0x338] sm:$0xff]  ;;  %v15023_v47 = vld [vmem:[#allocation45_spill] sm:$0xff] }
 0x558   :  { %v4584_v56 = vmul.f32 %v11652_v38, %v15023_v47  ;;  %v15024_v14 = vld [vmem:[#allocation46_spill] sm:$0xff]  ;;  %v15025_v58 = vld [vmem:[#allocation47_spill] sm:$0xff]  ;;  %v15026_v22 = vld [vmem:[#allocation52_spill] sm:$0xff]  ;;  %v4598_v18 = vmul.f32 %v11652_v38, %v4526_v40 }
 0x559   :  { %v4585_v46 = vmul.f32 %v11652_v38, %v15024_v14  ;;  %v4586_v44 = vmul.f32 %v11652_v38, %v15025_v58  ;;  %v4587_v1 = vmul.f32 %v11652_v38, %v15026_v22  ;;  %v15027_v49 = vld [vmem:[#allocation53_spill] sm:$0xff]  ;;  %v15028_v50 = vld [vmem:[#allocation54_spill] sm:$0xff]  ;;  %v15029_v39 = vld [vmem:[#allocation59_spill] sm:$0xff] }
 0x55a   :  { %v4588_v41 = vmul.f32 %v11652_v38, %v15027_v49  ;;  %v4589_v59 = vmul.f32 %v11652_v38, %v15028_v50  ;;  %v4590_v8 = vmul.f32 %v11652_v38, %v15029_v39  ;;  %v15030_v27 = vld [vmem:[#allocation60_spill] sm:$0xff]  ;;  %v15031_v54 = vld [vmem:[#allocation61_spill] sm:$0xff]  ;;  %v15032_v13 = vld [vmem:[#allocation66_spill] sm:$0xff]  ;;  %v4597_v39 = vmul.f32 %v11652_v38, %v4525_v34 }
 0x55b   :  { %v4591_v47 = vmul.f32 %v11652_v38, %v15030_v27  ;;  %v4592_v14 = vmul.f32 %v11652_v38, %v15031_v54  ;;  %v4593_v58 = vmul.f32 %v11652_v38, %v15032_v13  ;;  %v15033_v15 = vld [vmem:[#allocation67_spill] sm:$0xff]  ;;  %v15034_v9 = vld [vmem:[#allocation68_spill] sm:$0xff]  ;;  %v15035_v12 = vld [vmem:[#allocation73_spill] sm:$0xff]  ;;  %v11754_v54 = vadd.f32 %v4569_v16, %v11596_v32 }
 0x55c   :  { %v4594_v22 = vmul.f32 %v11652_v38, %v15033_v15  ;;  %v4595_v49 = vmul.f32 %v11652_v38, %v15034_v9  ;;  %v4596_v50 = vmul.f32 %v11652_v38, %v15035_v12  ;;  %v15036_v27 = vld [vmem:[#allocation30_spill] sm:$0xff]  ;;  %v11757_v13 = vadd.f32 %v4570_v28, %v11599_v23  ;;  %v11780_v23 = vld [vmem:[%s14346_s4 + $0x4] ss:$0 sm:$0xff] }
 0x55d   :  { %v11751_v61 = vadd.f32 %v4568_v42, %v15036_v27  ;;  %v11760_v15 = vadd.f32 %v4571_v19, %v11602_v10  ;;  %v11763_v9 = vadd.f32 %v4572_v52, %v11605_v21  ;;  %v11766_v12 = vadd.f32 %v4573_v62, %v11608_v37  ;;  %15037 = vst [vmem:[#allocation97_spill] sm:$0xff] %v11780_v23  ;;  %v4698_v19 = vld [vmem:[#allocation4 + $0x1e9] sm:$0xff]  ;;  %v4700_v52 = vld [vmem:[#allocation4 + $0x201] sm:$0xff]  ;;  %v4701_v62 = vld [vmem:[#allocation4 + $0x211] sm:$0xff] }
 0x55e   :  { %v11769_v34 = vadd.f32 %v4574_v31, %v11611_v26  ;;  %v11772_v42 = vadd.f32 %v4575_v48, %v11614_v63  ;;  %v11775_v32 = vadd.f32 %v4576_v4, %v11617_v43  ;;  %v11783_v10 = vadd.f32 %v4577_v5, %v11620_v30  ;;  %v4696_v63 = vld [vmem:[#allocation4 + $0x1d1] sm:$0xff]  ;;  %v4697_v43 = vld [vmem:[#allocation4 + $0x1e1] sm:$0xff]  ;;  %v4703_v48 = vld [vmem:[#allocation4 + $0x229] sm:$0xff] }
 0x55f   :  { %v11786_v21 = vadd.f32 %v4578_v60, %v11623_v57  ;;  %v11789_v37 = vadd.f32 %v4579_v36, %v11626_v20  ;;  %v11792_v26 = vadd.f32 %v4580_v6, %v11629_v45  ;;  %v11795_v16 = vadd.f32 %v4581_v11, %v11632_v53  ;;  %v4699_v20 = vld [vmem:[#allocation4 + $0x1f9] sm:$0xff]  ;;  %v4706_v36 = vld [vmem:[#allocation4 + $0x249] sm:$0xff] }
 0x560   :  { %v11798_v28 = vadd.f32 %v4582_v55, %v11635_v29  ;;  %v11801_v30 = vadd.f32 %v4583_v51, %v11638_v3  ;;  %v11804_v57 = vadd.f32 %v4584_v56, %v11641_v17  ;;  %v11807_v45 = vadd.f32 %v4585_v46, %v11644_v35  ;;  %v4702_v3 = vld [vmem:[#allocation4 + $0x219] sm:$0xff]  ;;  %v4704_v17 = vld [vmem:[#allocation4 + $0x231] sm:$0xff]  ;;  %v4714_v27 = vld [vmem:[#allocation4 + $0x2a9] sm:$0xff] }
 0x561   :  { %v11810_v31 = vadd.f32 %v4586_v44, %v11647_v7  ;;  %v11813_v53 = vadd.f32 %v4587_v1, %v11655_v24  ;;  %v11816_v29 = vadd.f32 %v4588_v41, %v11658_v25  ;;  %v11819_v4 = vadd.f32 %v4589_v59, %v11661_v33  ;;  %v15040_v7 = vld [vmem:[#allocation90_spill] sm:$0xff]  ;;  %v4705_v24 = vld [vmem:[#allocation4 + $0x241] sm:$0xff]  ;;  %v4707_v6 = vld [vmem:[#allocation4 + $0x259] sm:$0xff] }
 0x562   :  { %v11822_v5 = vadd.f32 %v4590_v8, %v11664_v0  ;;  %v11825_v35 = vadd.f32 %v4591_v47, %v11667_v2  ;;  %v11828_v60 = vadd.f32 %v4592_v14, %v15040_v7  ;;  %v15042_v25 = vld [vmem:[#allocation10_spill] sm:$0xff]  ;;  %v15044_v55 = vld [vmem:[#allocation31_spill] sm:$0xff]  ;;  %v15046_v33 = vld [vmem:[#allocation33_spill] sm:$0xff]  ;;  %v4777_v38 = vmul.f32 %v11780_v23, %v4705_v24 }
 0x563   :  { %v11831_v11 = vadd.f32 %v4593_v58, %v15042_v25  ;;  %v11834_v51 = vadd.f32 %v4594_v22, %v15044_v55  ;;  %v11837_v40 = vadd.f32 %v4595_v49, %v15046_v33  ;;  %v15048_v8 = vld [vmem:[#allocation32_spill] sm:$0xff]  ;;  %v4709_v56 = vld [vmem:[#allocation4 + $0x271] sm:$0xff]  ;;  %v4711_v47 = vld [vmem:[#allocation4 + $0x289] sm:$0xff]  ;;  %v4768_v22 = vmul.f32 %v11780_v23, %v4696_v63 }
 0x564   :  { %15038 = vst [vmem:[#allocation43_spill] sm:$0xff] %v11822_v5  ;;  %15039 = vst [vmem:[#allocation98_spill] sm:$0xff] %v11825_v35  ;;  %v11840_v0 = vadd.f32 %v4596_v50, %v15048_v8  ;;  %v4708_v2 = vld [vmem:[#allocation4 + $0x261] sm:$0xff]  ;;  %v4710_v46 = vld [vmem:[#allocation4 + $0x279] sm:$0xff]  ;;  %v4769_v49 = vmul.f32 %v11780_v23, %v4697_v43  ;;  %v4770_v25 = vmul.f32 %v11780_v23, %v4698_v19 }
 0x565   :  { %15041 = vst [vmem:[#allocation44_spill] sm:$0xff] %v11828_v60  ;;  %15043 = vst [vmem:[#allocation99_spill] sm:$0xff] %v11831_v11  ;;  %v15050_v44 = vld [vmem:[#allocation34_spill] sm:$0xff]  ;;  %v4713_v58 = vld [vmem:[#allocation4 + $0x2a1] sm:$0xff]  ;;  %v4771_v55 = vmul.f32 %v11780_v23, %v4699_v20  ;;  %v4773_v33 = vmul.f32 %v11780_v23, %v4701_v62  ;;  %v4775_v63 = vmul.f32 %v11780_v23, %v4703_v48 }
 0x566   :  { %15045 = vst [vmem:[#allocation48_spill] sm:$0xff] %v11834_v51  ;;  %15047 = vst [vmem:[#allocation49_spill] sm:$0xff] %v11837_v40  ;;  %v11843_v1 = vadd.f32 %v4597_v39, %v15050_v44  ;;  %v15052_v41 = vld [vmem:[#allocation42_spill] sm:$0xff]  ;;  %v4715_v7 = vld [vmem:[#allocation4 + $0x2b9] sm:$0xff]  ;;  %v4772_v39 = vmul.f32 %v11780_v23, %v4700_v52  ;;  %v4776_v43 = vmul.f32 %v11780_v23, %v4704_v17 }
 0x567   :  { %15049 = vst [vmem:[#allocation100_spill] sm:$0xff] %v11840_v0  ;;  %v11846_v59 = vadd.f32 %v4598_v18, %v15052_v41  ;;  %v4712_v14 = vld [vmem:[#allocation4 + $0x291] sm:$0xff]  ;;  %v4716_v50 = vld [vmem:[#allocation4 + $0x2c1] sm:$0xff]  ;;  %v4718_v8 = vld [vmem:[#allocation4 + $0x2d9] sm:$0xff]  ;;  %v4774_v41 = vmul.f32 %v11780_v23, %v4702_v3  ;;  %v4778_v20 = vmul.f32 %v11780_v23, %v4706_v36  ;;  %v4779_v52 = vmul.f32 %v11780_v23, %v4707_v6 }
 0x568   :  { %15051 = vst [vmem:[#allocation50_spill] sm:$0xff] %v11843_v1  ;;  %v4717_v18 = vld [vmem:[#allocation4 + $0x2d1] sm:$0xff]  ;;  %v4719_v44 = vld [vmem:[#allocation4 + $0x2e9] sm:$0xff]  ;;  %v4721_v1 = vld [vmem:[#allocation4 + $0x301] sm:$0xff]  ;;  %v4780_v62 = vmul.f32 %v11780_v23, %v4708_v2  ;;  %v4781_v0 = vmul.f32 %v11780_v23, %v4709_v56  ;;  %v4782_v48 = vmul.f32 %v11780_v23, %v4710_v46  ;;  %v4783_v17 = vmul.f32 %v11780_v23, %v4711_v47 }
 0x569   :  { %15053 = vst [vmem:[#allocation101_spill] sm:$0xff] %v11846_v59  ;;  %v4720_v59 = vld [vmem:[#allocation4 + $0x2f1] sm:$0xff]  ;;  %v4722_v19 = vld [vmem:[#allocation4 + $0x309] sm:$0xff]  ;;  %v4723_v40 = vld [vmem:[#allocation4 + $0x319] sm:$0xff]  ;;  %v4784_v24 = vmul.f32 %v11780_v23, %v4712_v14  ;;  %v4785_v11 = vmul.f32 %v11780_v23, %v4713_v58  ;;  %v4786_v36 = vmul.f32 %v11780_v23, %v4714_v27  ;;  %v4787_v6 = vmul.f32 %v11780_v23, %v4715_v7 }
 0x56a   :  { %v4724_v51 = vld [vmem:[#allocation4 + $0x321] sm:$0xff]  ;;  %v4725_v3 = vld [vmem:[#allocation4 + $0x331] sm:$0xff]  ;;  %v4726_v60 = vld [vmem:[#allocation4 + $0x339] sm:$0xff]  ;;  %v4788_v2 = vmul.f32 %v11780_v23, %v4716_v50  ;;  %v4789_v56 = vmul.f32 %v11780_v23, %v4717_v18  ;;  %v4790_v35 = vmul.f32 %v11780_v23, %v4718_v8  ;;  %v4791_v5 = vmul.f32 %v11780_v23, %v4719_v44 }
 0x56b   :  { %v4792_v46 = vmul.f32 %v11780_v23, %v4720_v59  ;;  %v4793_v47 = vmul.f32 %v11780_v23, %v4721_v1  ;;  %v4794_v14 = vmul.f32 %v11780_v23, %v4722_v19  ;;  %v4795_v58 = vmul.f32 %v11780_v23, %v4723_v40  ;;  %v15072_v44 = vld [vmem:[#allocation111_spill] sm:$0xff]  ;;  %v15075_v19 = vld [vmem:[#allocation104_spill] sm:$0xff] }
 0x56c   :  { %v4796_v27 = vmul.f32 %v11780_v23, %v4724_v51  ;;  %v4797_v7 = vmul.f32 %v11780_v23, %v4725_v3  ;;  %v4798_v50 = vmul.f32 %v11780_v23, %v4726_v60  ;;  %v11880_v18 = vadd.f32 %v4768_v22, %v11751_v61  ;;  %v15135_v23 = vld [vmem:[#allocation78_spill] sm:$0xff] }
 0x56d   :  { %v11883_v8 = vadd.f32 %v4769_v49, %v11754_v54  ;;  %v11886_v59 = vadd.f32 %v4770_v25, %v11757_v13  ;;  %v11889_v1 = vadd.f32 %v4771_v55, %v11760_v15  ;;  %v11892_v40 = vadd.f32 %v4772_v39, %v11763_v9 }
 0x56e   :  { %v11895_v51 = vadd.f32 %v4773_v33, %v11766_v12  ;;  %v11898_v60 = vadd.f32 %v4774_v41, %v11769_v34  ;;  %v11901_v61 = vadd.f32 %v4775_v63, %v11772_v42  ;;  %v11904_v54 = vadd.f32 %v4776_v43, %v11775_v32  ;;  %v15073_v41 = vld [vmem:[#allocation57_spill] sm:$0xff]  ;;  %v15074_v43 = vld [vmem:[#allocation112_spill] sm:$0xff] }
 0x56f   :  { %v11907_v13 = vadd.f32 %v4777_v38, %v11783_v10  ;;  %v11910_v15 = vadd.f32 %v4778_v20, %v11786_v21  ;;  %v11913_v9 = vadd.f32 %v4779_v52, %v11789_v37  ;;  %v11916_v12 = vadd.f32 %v4780_v62, %v11792_v26  ;;  %v15077_v52 = vld [vmem:[#allocation113_spill] sm:$0xff]  ;;  %v15078_v62 = vld [vmem:[#allocation58_spill] sm:$0xff] }
 0x570   :  { %v11919_v34 = vadd.f32 %v4781_v0, %v11795_v16  ;;  %v11922_v42 = vadd.f32 %v4782_v48, %v11798_v28  ;;  %v11925_v32 = vadd.f32 %v4783_v17, %v11801_v30  ;;  %v11928_v38 = vadd.f32 %v4784_v24, %v11804_v57  ;;  %v15054_v28 = vld [vmem:[#allocation43_spill] sm:$0xff]  ;;  %v15056_v57 = vld [vmem:[#allocation98_spill] sm:$0xff]  ;;  %v15081_v17 = vld [vmem:[#allocation105_spill] sm:$0xff] }
 0x571   :  { %v11931_v10 = vadd.f32 %v4785_v11, %v11807_v45  ;;  %v11934_v21 = vadd.f32 %v4786_v36, %v11810_v31  ;;  %v11937_v37 = vadd.f32 %v4787_v6, %v11813_v53  ;;  %v11940_v26 = vadd.f32 %v4788_v2, %v11816_v29  ;;  %v15058_v45 = vld [vmem:[#allocation44_spill] sm:$0xff]  ;;  %v15060_v31 = vld [vmem:[#allocation99_spill] sm:$0xff]  ;;  %v15064_v29 = vld [vmem:[#allocation49_spill] sm:$0xff] }
 0x572   :  { %v11943_v16 = vadd.f32 %v4789_v56, %v11819_v4  ;;  %v11946_v30 = vadd.f32 %v4790_v35, %v15054_v28  ;;  %v11949_v0 = vadd.f32 %v4791_v5, %v15056_v57  ;;  %v11952_v11 = vadd.f32 %v4792_v46, %v15058_v45  ;;  %v15062_v53 = vld [vmem:[#allocation48_spill] sm:$0xff]  ;;  %v15068_v35 = vld [vmem:[#allocation50_spill] sm:$0xff]  ;;  %v15070_v5 = vld [vmem:[#allocation101_spill] sm:$0xff] }
 0x573   :  { %v11955_v22 = vadd.f32 %v4793_v47, %v15060_v31  ;;  %v11958_v49 = vadd.f32 %v4794_v14, %v15062_v53  ;;  %v11961_v25 = vadd.f32 %v4795_v58, %v15064_v29  ;;  %v15066_v4 = vld [vmem:[#allocation100_spill] sm:$0xff]  ;;  %v11967_v39 = vadd.f32 %v4797_v7, %v15068_v35  ;;  %v15080_v48 = vld [vmem:[#allocation114_spill] sm:$0xff]  ;;  %v15083_v36 = vld [vmem:[#allocation115_spill] sm:$0xff] }
 0x574   :  { %15055 = vst [vmem:[#allocation51_spill] sm:$0xff] %v11946_v30  ;;  %15057 = vst [vmem:[#allocation102_spill] sm:$0xff] %v11949_v0  ;;  %v11964_v55 = vadd.f32 %v4796_v27, %v15066_v4  ;;  %v11970_v33 = vadd.f32 %v4798_v50, %v15070_v5  ;;  %v11974_v63 = vadd.f32 %v15073_v41, %v15072_v44  ;;  %v15084_v6 = vld [vmem:[#allocation62_spill] sm:$0xff]  ;;  %v15086_v56 = vld [vmem:[#allocation116_spill] sm:$0xff] }
 0x575   :  { %15059 = vst [vmem:[#allocation55_spill] sm:$0xff] %v11952_v11  ;;  %15061 = vst [vmem:[#allocation56_spill] sm:$0xff] %v11955_v22  ;;  %v11978_v20 = vadd.f32 %v15075_v19, %v15074_v43  ;;  %v11982_v3 = vadd.f32 %v15078_v62, %v15077_v52  ;;  %v11986_v24 = vadd.f32 %v15081_v17, %v15080_v48  ;;  %v15087_v46 = vld [vmem:[#allocation63_spill] sm:$0xff]  ;;  %v15089_v14 = vld [vmem:[#allocation117_spill] sm:$0xff] }
 0x576   :  { %15063 = vst [vmem:[#allocation103_spill] sm:$0xff] %v11958_v49  ;;  %15065 = vst [vmem:[#allocation35_spill] sm:$0xff] %v11961_v25  ;;  %v11990_v2 = vadd.f32 %v15084_v6, %v15083_v36  ;;  %v11994_v47 = vadd.f32 %v15087_v46, %v15086_v56  ;;  %v15090_v58 = vld [vmem:[#allocation106_spill] sm:$0xff]  ;;  %v15093_v50 = vld [vmem:[#allocation64_spill] sm:$0xff] }
 0x577   :  { %15067 = vst [vmem:[#allocation13_spill] sm:$0xff] %v11964_v55  ;;  %15069 = vst [vmem:[#allocation15_spill] sm:$0xff] %v11967_v39  ;;  %v11998_v27 = vadd.f32 %v15090_v58, %v15089_v14  ;;  %v15092_v7 = vld [vmem:[#allocation118_spill] sm:$0xff]  ;;  %v15095_v57 = vld [vmem:[#allocation119_spill] sm:$0xff] }
 0x578   :  { %15071 = vst [vmem:[#allocation18_spill] sm:$0xff] %v11970_v33  ;;  %15076 = vst [vmem:[#allocation20_spill] sm:$0xff] %v11978_v20  ;;  %v12002_v28 = vadd.f32 %v15093_v50, %v15092_v7  ;;  %v15096_v45 = vld [vmem:[#allocation107_spill] sm:$0xff]  ;;  %v15098_v53 = vld [vmem:[#allocation120_spill] sm:$0xff] }
 0x579   :  { %15079 = vst [vmem:[#allocation36_spill] sm:$0xff] %v11982_v3  ;;  %15082 = vst [vmem:[#allocation37_spill] sm:$0xff] %v11986_v24  ;;  %v12006_v31 = vadd.f32 %v15096_v45, %v15095_v57  ;;  %v15099_v29 = vld [vmem:[#allocation65_spill] sm:$0xff]  ;;  %v15102_v5 = vld [vmem:[#allocation108_spill] sm:$0xff] }
 0x57a   :  { %15085 = vst [vmem:[#allocation17_spill] sm:$0xff] %v11990_v2  ;;  %15088 = vst [vmem:[#allocation39_spill] sm:$0xff] %v11994_v47  ;;  %v12010_v4 = vadd.f32 %v15099_v29, %v15098_v53  ;;  %v15101_v35 = vld [vmem:[#allocation121_spill] sm:$0xff]  ;;  %v15104_v41 = vld [vmem:[#allocation122_spill] sm:$0xff] }
 0x57b   :  { %15091 = vst [vmem:[#allocation22_spill] sm:$0xff] %v11998_v27  ;;  %15094 = vst [vmem:[#allocation23_spill] sm:$0xff] %v12002_v28  ;;  %v12014_v44 = vadd.f32 %v15102_v5, %v15101_v35  ;;  %v15105_v43 = vld [vmem:[#allocation69_spill] sm:$0xff]  ;;  %v15107_v52 = vld [vmem:[#allocation123_spill] sm:$0xff] }
 0x57c   :  { %15097 = vst [vmem:[#allocation24_spill] sm:$0xff] %v12006_v31  ;;  %15100 = vst [vmem:[#allocation27_spill] sm:$0xff] %v12010_v4  ;;  %v12018_v19 = vadd.f32 %v15105_v43, %v15104_v41  ;;  %v15108_v62 = vld [vmem:[#allocation70_spill] sm:$0xff]  ;;  %v15110_v17 = vld [vmem:[#allocation19_spill] sm:$0xff] }
 0x57d   :  { %15103 = vst [vmem:[#allocation28_spill] sm:$0xff] %v12014_v44  ;;  %v12022_v48 = vadd.f32 %v15108_v62, %v15107_v52  ;;  %v15111_v36 = vld [vmem:[#allocation71_spill] sm:$0xff]  ;;  %v15114_v46 = vld [vmem:[#allocation109_spill] sm:$0xff]  ;;  %v15117_v7 = vld [vmem:[#allocation72_spill] sm:$0xff] }
 0x57e   :  { %15106 = vst [vmem:[#allocation29_spill] sm:$0xff] %v12018_v19  ;;  %v12026_v6 = vadd.f32 %v15111_v36, %v15110_v17  ;;  %v15113_v56 = vld [vmem:[#allocation91_spill] sm:$0xff]  ;;  %v15116_v58 = vld [vmem:[#allocation21_spill] sm:$0xff]  ;;  %v15119_v57 = vld [vmem:[#allocation92_spill] sm:$0xff] }
 0x57f   :  { %15109 = vst [vmem:[#allocation8_spill] sm:$0xff] %v12022_v48  ;;  %v12030_v14 = vadd.f32 %v15114_v46, %v15113_v56  ;;  %v12034_v50 = vadd.f32 %v15117_v7, %v15116_v58  ;;  %v15120_v45 = vld [vmem:[#allocation110_spill] sm:$0xff]  ;;  %v15125_v41 = vld [vmem:[#allocation93_spill] sm:$0xff]  ;;  %v15126_v43 = vld [vmem:[#allocation75_spill] sm:$0xff] }
 0x580   :  { %15112 = vst [vmem:[#allocation45_spill] sm:$0xff] %v12026_v6  ;;  %v12038_v53 = vadd.f32 %v15120_v45, %v15119_v57  ;;  %v15122_v29 = vld [vmem:[#allocation38_spill] sm:$0xff]  ;;  %v12046_v52 = vadd.f32 %v15126_v43, %v15125_v41  ;;  %v15128_v62 = vld [vmem:[#allocation40_spill] sm:$0xff]  ;;  %v15131_v56 = vld [vmem:[#allocation25_spill] sm:$0xff] }
 0x581   :  { %15115 = vst [vmem:[#allocation46_spill] sm:$0xff] %v12030_v14  ;;  %15118 = vst [vmem:[#allocation47_spill] sm:$0xff] %v12034_v50  ;;  %v15123_v35 = vld [vmem:[#allocation74_spill] sm:$0xff]  ;;  %v15129_v17 = vld [vmem:[#allocation76_spill] sm:$0xff] }
 0x582   :  { %15121 = vst [vmem:[#allocation52_spill] sm:$0xff] %v12038_v53  ;;  %v12042_v5 = vadd.f32 %v15123_v35, %v15122_v29  ;;  %15127 = vst [vmem:[#allocation54_spill] sm:$0xff] %v12046_v52  ;;  %v12050_v36 = vadd.f32 %v15129_v17, %v15128_v62  ;;  %v15132_v46 = vld [vmem:[#allocation77_spill] sm:$0xff]  ;;  %v15134_v7 = vld [vmem:[#allocation94_spill] sm:$0xff] }
 0x583   :  { %v12054_v58 = vadd.f32 %v15132_v46, %v15131_v56  ;;  %v12058_v57 = vadd.f32 %v15135_v23, %v15134_v7  ;;  %v15137_v45 = vld [vmem:[#allocation41_spill] sm:$0xff]  ;;  %v15138_v53 = vld [vmem:[#allocation79_spill] sm:$0xff]  ;;  %v15143_v43 = vld [vmem:[#allocation26_spill] sm:$0xff] }
 0x584   :  { %15124 = vst [vmem:[#allocation53_spill] sm:$0xff] %v12042_v5  ;;  %15130 = vst [vmem:[#allocation59_spill] sm:$0xff] %v12050_v36  ;;  %v12062_v29 = vadd.f32 %v15138_v53, %v15137_v45  ;;  %v15140_v35 = vld [vmem:[#allocation95_spill] sm:$0xff]  ;;  %v15141_v5 = vld [vmem:[#allocation80_spill] sm:$0xff] }
 0x585   :  { %15133 = vst [vmem:[#allocation60_spill] sm:$0xff] %v12054_v58  ;;  %15136 = vst [vmem:[#allocation61_spill] sm:$0xff] %v12058_v57  ;;  %v12066_v41 = vadd.f32 %v15141_v5, %v15140_v35  ;;  %v15144_v52 = vld [vmem:[#allocation81_spill] sm:$0xff]  ;;  %v15146_v17 = vld [vmem:[#allocation96_spill] sm:$0xff] }
 0x586   :  { %15139 = vst [vmem:[#allocation66_spill] sm:$0xff] %v12062_v29  ;;  %v12070_v62 = vadd.f32 %v15144_v52, %v15143_v43  ;;  %v15147_v36 = vld [vmem:[#allocation82_spill] sm:$0xff]  ;;  %v15149_v46 = vld [vmem:[#allocation9_spill] sm:$0xff]  ;;  %v15150_v58 = vld [vmem:[#allocation83_spill] sm:$0xff] }
 0x587   :  { %15142 = vst [vmem:[#allocation67_spill] sm:$0xff] %v12066_v41  ;;  %v12074_v56 = vadd.f32 %v15147_v36, %v15146_v17  ;;  %v12078_v23 = vadd.f32 %v15150_v58, %v15149_v46  ;;  %v7042_v7 = vld [vmem:[#allocation4 + $0x18] sm:$0xff]  ;;  %v15152_v57 = vld [vmem:[#allocation89_spill] sm:$0xff]  ;;  %v7043_v45 = vld [vmem:[#allocation4 + $0x20] sm:$0xff] }
 0x588   :  { %15145 = vst [vmem:[#allocation68_spill] sm:$0xff] %v12070_v62  ;;  %v12081_v53 = vmul.f32 %v7042_v7, %v15152_v57  ;;  %v12084_v5 = vmul.f32 %v7043_v45, %v15152_v57  ;;  %v7044_v35 = vld [vmem:[#allocation4 + $0x30] sm:$0xff]  ;;  %v7045_v43 = vld [vmem:[#allocation4 + $0x38] sm:$0xff]  ;;  %v7046_v17 = vld [vmem:[#allocation4 + $0x48] sm:$0xff] }
 0x589   :  { %15148 = vst [vmem:[#allocation73_spill] sm:$0xff] %v12074_v56  ;;  %15151 = vst [vmem:[#allocation30_spill] sm:$0xff] %v12078_v23  ;;  %v12087_v52 = vmul.f32 %v7044_v35, %v15152_v57  ;;  %v12090_v36 = vmul.f32 %v7045_v43, %v15152_v57  ;;  %v12093_v58 = vmul.f32 %v7046_v17, %v15152_v57  ;;  %v7047_v46 = vld [vmem:[#allocation4 + $0x50] sm:$0xff]  ;;  %v7048_v23 = vld [vmem:[#allocation4 + $0x60] sm:$0xff] }
 0x58a   :  { %v12096_v7 = vmul.f32 %v7047_v46, %v15152_v57  ;;  %v12099_v45 = vmul.f32 %v7048_v23, %v15152_v57  ;;  %v7049_v56 = vld [vmem:[#allocation4 + $0x68] sm:$0xff]  ;;  %v7050_v62 = vld [vmem:[#allocation4 + $0x78] sm:$0xff]  ;;  %v7051_v41 = vld [vmem:[#allocation4 + $0x80] sm:$0xff] }
 0x58b   :  { %v12102_v35 = vmul.f32 %v7049_v56, %v15152_v57  ;;  %v12105_v43 = vmul.f32 %v7050_v62, %v15152_v57  ;;  %v12108_v17 = vmul.f32 %v7051_v41, %v15152_v57  ;;  %v7052_v29 = vld [vmem:[#allocation4 + $0x90] sm:$0xff]  ;;  %v7053_v50 = vld [vmem:[#allocation4 + $0x98] sm:$0xff]  ;;  %v7054_v14 = vld [vmem:[#allocation4 + $0xa8] sm:$0xff] }
 0x58c   :  { %15153 = vst [vmem:[#allocation90_spill] sm:$0xff] %v12099_v45  ;;  %v12111_v46 = vmul.f32 %v7052_v29, %v15152_v57  ;;  %v12114_v23 = vmul.f32 %v7053_v50, %v15152_v57  ;;  %v12117_v56 = vmul.f32 %v7054_v14, %v15152_v57  ;;  %v4493_v6 = vld [vmem:[#allocation4 + $0x180] sm:$0xff]  ;;  %v7055_v48 = vld [vmem:[#allocation4 + $0xb0] sm:$0xff]  ;;  %v7057_v44 = vld [vmem:[#allocation4 + $0xc8] sm:$0xff] }
 0x58d   :  { %15154 = vst [vmem:[#allocation10_spill] sm:$0xff] %v12102_v35  ;;  %15155 = vst [vmem:[#allocation31_spill] sm:$0xff] %v12105_v43  ;;  %v12120_v62 = vmul.f32 %v7055_v48, %v15152_v57  ;;  %v7056_v19 = vld [vmem:[#allocation4 + $0xc0] sm:$0xff]  ;;  %v12126_v29 = vmul.f32 %v7057_v44, %v15152_v57  ;;  %v7058_v4 = vld [vmem:[#allocation4 + $0xd8] sm:$0xff] }
 0x58e   :  { %15156 = vst [vmem:[#allocation33_spill] sm:$0xff] %v12108_v17  ;;  %15157 = vst [vmem:[#allocation32_spill] sm:$0xff] %v12111_v46  ;;  %v12123_v41 = vmul.f32 %v7056_v19, %v15152_v57  ;;  %v12129_v50 = vmul.f32 %v7058_v4, %v15152_v57  ;;  %v12134_v14 = vld [vmem:[%s14346_s4 + $0x5] ss:$0 sm:$0xff]  ;;  %v4494_v31 = vld [vmem:[#allocation4 + $0x188] sm:$0xff] }
 0x58f   :  { %15158 = vst [vmem:[#allocation34_spill] sm:$0xff] %v12114_v23  ;;  %15159 = vst [vmem:[#allocation42_spill] sm:$0xff] %v12117_v56  ;;  %v7059_v48 = vld [vmem:[#allocation4 + $0xe0] sm:$0xff]  ;;  %v7060_v19 = vld [vmem:[#allocation4 + $0xf0] sm:$0xff] }
 0x590   :  { %15160 = vst [vmem:[#allocation43_spill] sm:$0xff] %v12120_v62  ;;  %15161 = vst [vmem:[#allocation98_spill] sm:$0xff] %v12123_v41  ;;  %v12137_v62 = vmul.f32 %v7059_v48, %v15152_v57  ;;  %v12140_v41 = vmul.f32 %v7060_v19, %v15152_v57  ;;  %v7061_v44 = vld [vmem:[#allocation4 + $0xf8] sm:$0xff]  ;;  %v7062_v4 = vld [vmem:[#allocation4 + $0x108] sm:$0xff] }
 0x591   :  { %15162 = vst [vmem:[#allocation44_spill] sm:$0xff] %v12126_v29  ;;  %15163 = vst [vmem:[#allocation99_spill] sm:$0xff] %v12129_v50  ;;  %v12143_v29 = vmul.f32 %v7061_v44, %v15152_v57  ;;  %v12146_v50 = vmul.f32 %v7062_v4, %v15152_v57  ;;  %v4896_v56 = vld [vmem:[#allocation4 + $0x1d2] sm:$0xff]  ;;  %v4897_v28 = vld [vmem:[#allocation4 + $0x1e2] sm:$0xff] }
 0x592   :  { %15164 = vst [vmem:[#allocation48_spill] sm:$0xff] %v12134_v14  ;;  %15165 = vst [vmem:[#allocation49_spill] sm:$0xff] %v12137_v62  ;;  %v7063_v23 = vld [vmem:[#allocation4 + $0x110] sm:$0xff]  ;;  %v7064_v48 = vld [vmem:[#allocation4 + $0x120] sm:$0xff] }
 0x593   :  { %15166 = vst [vmem:[#allocation100_spill] sm:$0xff] %v12140_v41  ;;  %15167 = vst [vmem:[#allocation50_spill] sm:$0xff] %v12143_v29  ;;  %v12149_v27 = vmul.f32 %v7063_v23, %v15152_v57  ;;  %v12152_v62 = vmul.f32 %v7064_v48, %v15152_v57  ;;  %v7065_v19 = vld [vmem:[#allocation4 + $0x128] sm:$0xff]  ;;  %v7066_v44 = vld [vmem:[#allocation4 + $0x138] sm:$0xff] }
 0x594   :  { %15168 = vst [vmem:[#allocation101_spill] sm:$0xff] %v12146_v50  ;;  %v12155_v41 = vmul.f32 %v7065_v19, %v15152_v57  ;;  %v12158_v29 = vmul.f32 %v7066_v44, %v15152_v57  ;;  %v4898_v4 = vld [vmem:[#allocation4 + $0x1ea] sm:$0xff]  ;;  %v4899_v50 = vld [vmem:[#allocation4 + $0x1fa] sm:$0xff]  ;;  %v4900_v46 = vld [vmem:[#allocation4 + $0x202] sm:$0xff] }
 0x595   :  { %15169 = vst [vmem:[#allocation111_spill] sm:$0xff] %v12149_v27  ;;  %15170 = vst [vmem:[#allocation57_spill] sm:$0xff] %v12152_v62  ;;  %v4901_v47 = vld [vmem:[#allocation4 + $0x212] sm:$0xff]  ;;  %v7067_v17 = vld [vmem:[#allocation4 + $0x140] sm:$0xff] }
 0x596   :  { %15171 = vst [vmem:[#allocation112_spill] sm:$0xff] %v12155_v41  ;;  %15172 = vst [vmem:[#allocation104_spill] sm:$0xff] %v12158_v29  ;;  %v12161_v23 = vmul.f32 %v7067_v17, %v15152_v57  ;;  %v7068_v27 = vld [vmem:[#allocation4 + $0x150] sm:$0xff]  ;;  %v7069_v62 = vld [vmem:[#allocation4 + $0x158] sm:$0xff]  ;;  %v12176_v17 = vmul.f32 %v15152_v57, %v4493_v6 }
 0x597   :  { %v12164_v48 = vmul.f32 %v7068_v27, %v15152_v57  ;;  %v12167_v19 = vmul.f32 %v7069_v62, %v15152_v57  ;;  %v7070_v41 = vld [vmem:[#allocation4 + $0x168] sm:$0xff]  ;;  %v4902_v29 = vld [vmem:[#allocation4 + $0x21a] sm:$0xff]  ;;  %v4904_v43 = vld [vmem:[#allocation4 + $0x232] sm:$0xff]  ;;  %v12179_v27 = vmul.f32 %v15152_v57, %v4494_v31 }
 0x598   :  { %15173 = vst [vmem:[#allocation113_spill] sm:$0xff] %v12161_v23  ;;  %v12170_v44 = vmul.f32 %v7070_v41, %v15152_v57  ;;  %v4903_v2 = vld [vmem:[#allocation4 + $0x22a] sm:$0xff]  ;;  %15178 = vst [vmem:[#allocation62_spill] sm:$0xff] %v12176_v17  ;;  %v15181_v23 = vld [vmem:[#allocation84_spill] sm:$0xff] }
 0x599   :  { %15174 = vst [vmem:[#allocation58_spill] sm:$0xff] %v12164_v48  ;;  %15175 = vst [vmem:[#allocation114_spill] sm:$0xff] %v12167_v19  ;;  %v7071_v24 = vld [vmem:[#allocation4 + $0x170] sm:$0xff]  ;;  %v7072_v48 = vld [vmem:[#allocation4 + $0x1c8] sm:$0xff]  ;;  %v12186_v3 = vadd.f32 %v12081_v53, %v15181_v23  ;;  %v12206_v53 = vadd.f32 %v12096_v7, %v11974_v63 }
 0x59a   :  { %15176 = vst [vmem:[#allocation105_spill] sm:$0xff] %v12170_v44  ;;  %v12173_v35 = vmul.f32 %v7071_v24, %v15152_v57  ;;  %15179 = vst [vmem:[#allocation116_spill] sm:$0xff] %v12179_v27  ;;  %v12182_v62 = vmul.f32 %v7072_v48, %v15152_v57  ;;  %v4905_v19 = vld [vmem:[#allocation4 + $0x242] sm:$0xff]  ;;  %v4906_v41 = vld [vmem:[#allocation4 + $0x24a] sm:$0xff] }
 0x59b   :  { %v4907_v44 = vld [vmem:[#allocation4 + $0x25a] sm:$0xff]  ;;  %15182 = vst [vmem:[#allocation117_spill] sm:$0xff] %v12186_v3  ;;  %v15183_v45 = vld [vmem:[#allocation85_spill] sm:$0xff]  ;;  %v15185_v6 = vld [vmem:[#allocation86_spill] sm:$0xff]  ;;  %v4977_v3 = vmul.f32 %v12134_v14, %v4905_v19 }
 0x59c   :  { %15177 = vst [vmem:[#allocation115_spill] sm:$0xff] %v12173_v35  ;;  %15180 = vst [vmem:[#allocation63_spill] sm:$0xff] %v12182_v62  ;;  %v12190_v24 = vadd.f32 %v12084_v5, %v15183_v45  ;;  %v12194_v17 = vadd.f32 %v12087_v52, %v15185_v6  ;;  %v15187_v31 = vld [vmem:[#allocation87_spill] sm:$0xff]  ;;  %v4908_v57 = vld [vmem:[#allocation4 + $0x262] sm:$0xff]  ;;  %v4968_v52 = vmul.f32 %v12134_v14, %v4896_v56 }
 0x59d   :  { %v12198_v27 = vadd.f32 %v12090_v36, %v15187_v31  ;;  %v4909_v48 = vld [vmem:[#allocation4 + $0x272] sm:$0xff]  ;;  %v4910_v62 = vld [vmem:[#allocation4 + $0x27a] sm:$0xff]  ;;  %15191 = vst [vmem:[#allocation107_spill] sm:$0xff] %v12206_v53  ;;  %v4911_v5 = vld [vmem:[#allocation4 + $0x28a] sm:$0xff]  ;;  %v4969_v6 = vmul.f32 %v12134_v14, %v4897_v28  ;;  %v4975_v56 = vmul.f32 %v12134_v14, %v4903_v2  ;;  %v4976_v28 = vmul.f32 %v12134_v14, %v4904_v43 }
 0x59e   :  { %15184 = vst [vmem:[#allocation106_spill] sm:$0xff] %v12190_v24  ;;  %15186 = vst [vmem:[#allocation118_spill] sm:$0xff] %v12194_v17  ;;  %v15189_v35 = vld [vmem:[#allocation88_spill] sm:$0xff]  ;;  %v4912_v45 = vld [vmem:[#allocation4 + $0x292] sm:$0xff]  ;;  %v4970_v17 = vmul.f32 %v12134_v14, %v4898_v4  ;;  %v4971_v24 = vmul.f32 %v12134_v14, %v4899_v50  ;;  %v4978_v50 = vmul.f32 %v12134_v14, %v4906_v41 }
 0x59f   :  { %15188 = vst [vmem:[#allocation64_spill] sm:$0xff] %v12198_v27  ;;  %v12202_v20 = vadd.f32 %v12093_v58, %v15189_v35  ;;  %v4913_v23 = vld [vmem:[#allocation4 + $0x2a2] sm:$0xff]  ;;  %v4914_v36 = vld [vmem:[#allocation4 + $0x2aa] sm:$0xff]  ;;  %v4915_v31 = vld [vmem:[#allocation4 + $0x2ba] sm:$0xff]  ;;  %v4972_v58 = vmul.f32 %v12134_v14, %v4900_v46  ;;  %v4973_v35 = vmul.f32 %v12134_v14, %v4901_v47  ;;  %v4979_v46 = vmul.f32 %v12134_v14, %v4907_v44 }
 0x5a0   :  { %v4916_v27 = vld [vmem:[#allocation4 + $0x2c2] sm:$0xff]  ;;  %v4917_v63 = vld [vmem:[#allocation4 + $0x2d2] sm:$0xff]  ;;  %v4918_v7 = vld [vmem:[#allocation4 + $0x2da] sm:$0xff]  ;;  %v4980_v47 = vmul.f32 %v12134_v14, %v4908_v57  ;;  %v4981_v55 = vmul.f32 %v12134_v14, %v4909_v48  ;;  %v4982_v2 = vmul.f32 %v12134_v14, %v4910_v62  ;;  %v4983_v43 = vmul.f32 %v12134_v14, %v4911_v5 }
 0x5a1   :  { %15190 = vst [vmem:[#allocation119_spill] sm:$0xff] %v12202_v20  ;;  %v4919_v53 = vld [vmem:[#allocation4 + $0x2ea] sm:$0xff]  ;;  %v4974_v20 = vmul.f32 %v12134_v14, %v4902_v29  ;;  %v4920_v33 = vld [vmem:[#allocation4 + $0x2f2] sm:$0xff]  ;;  %v4921_v39 = vld [vmem:[#allocation4 + $0x302] sm:$0xff]  ;;  %v4984_v19 = vmul.f32 %v12134_v14, %v4912_v45  ;;  %v4985_v22 = vmul.f32 %v12134_v14, %v4913_v23  ;;  %v4986_v41 = vmul.f32 %v12134_v14, %v4914_v36 }
 0x5a2   :  { %v4922_v4 = vld [vmem:[#allocation4 + $0x30a] sm:$0xff]  ;;  %v4923_v25 = vld [vmem:[#allocation4 + $0x31a] sm:$0xff]  ;;  %v4924_v49 = vld [vmem:[#allocation4 + $0x322] sm:$0xff]  ;;  %v4987_v44 = vmul.f32 %v12134_v14, %v4915_v31  ;;  %v4988_v57 = vmul.f32 %v12134_v14, %v4916_v27  ;;  %v4989_v48 = vmul.f32 %v12134_v14, %v4917_v63  ;;  %v4990_v0 = vmul.f32 %v12134_v14, %v4918_v7 }
 0x5a3   :  { %v4925_v29 = vld [vmem:[#allocation4 + $0x332] sm:$0xff]  ;;  %v4926_v11 = vld [vmem:[#allocation4 + $0x33a] sm:$0xff]  ;;  %v4991_v30 = vmul.f32 %v12134_v14, %v4919_v53  ;;  %v4992_v62 = vmul.f32 %v12134_v14, %v4920_v33  ;;  %v4993_v5 = vmul.f32 %v12134_v14, %v4921_v39  ;;  %v4994_v45 = vmul.f32 %v12134_v14, %v4922_v4 }
 0x5a4   :  { %v4995_v23 = vmul.f32 %v12134_v14, %v4923_v25  ;;  %v4996_v36 = vmul.f32 %v12134_v14, %v4924_v49  ;;  %v4997_v31 = vmul.f32 %v12134_v14, %v4925_v29  ;;  %v4998_v27 = vmul.f32 %v12134_v14, %v4926_v11  ;;  %v15235_v4 = vld [vmem:[#allocation10_spill] sm:$0xff]  ;;  %v4690_v14 = vld [vmem:[#allocation4 + $0x159] sm:$0xff] }
 0x5a5   :  { %v12240_v63 = vadd.f32 %v4968_v52, %v11880_v18  ;;  %v12243_v7 = vadd.f32 %v4969_v6, %v11883_v8  ;;  %v12246_v33 = vadd.f32 %v4970_v17, %v11886_v59  ;;  %v12249_v39 = vadd.f32 %v4971_v24, %v11889_v1 }
 0x5a6   :  { %v12252_v25 = vadd.f32 %v4972_v58, %v11892_v40  ;;  %v12255_v49 = vadd.f32 %v4973_v35, %v11895_v51  ;;  %v12258_v11 = vadd.f32 %v4974_v20, %v11898_v60  ;;  %v12261_v18 = vadd.f32 %v4975_v56, %v11901_v61  ;;  %v15232_v58 = vld [vmem:[#allocation20_spill] sm:$0xff]  ;;  %v15233_v35 = vld [vmem:[#allocation90_spill] sm:$0xff] }
 0x5a7   :  { %15192 = vst [vmem:[#allocation120_spill] sm:$0xff] %v12240_v63  ;;  %15193 = vst [vmem:[#allocation65_spill] sm:$0xff] %v12243_v7  ;;  %v12264_v8 = vadd.f32 %v4976_v28, %v11904_v54  ;;  %v12267_v59 = vadd.f32 %v4977_v3, %v11907_v13  ;;  %v12270_v1 = vadd.f32 %v4978_v50, %v11910_v15  ;;  %v15234_v28 = vld [vmem:[#allocation36_spill] sm:$0xff] }
 0x5a8   :  { %15194 = vst [vmem:[#allocation121_spill] sm:$0xff] %v12246_v33  ;;  %15195 = vst [vmem:[#allocation108_spill] sm:$0xff] %v12249_v39  ;;  %v12273_v40 = vadd.f32 %v4979_v46, %v11913_v9  ;;  %v12276_v51 = vadd.f32 %v4980_v47, %v11916_v12  ;;  %v12279_v60 = vadd.f32 %v4981_v55, %v11919_v34  ;;  %v15236_v46 = vld [vmem:[#allocation37_spill] sm:$0xff]  ;;  %v15237_v47 = vld [vmem:[#allocation31_spill] sm:$0xff] }
 0x5a9   :  { %15196 = vst [vmem:[#allocation122_spill] sm:$0xff] %v12252_v25  ;;  %15197 = vst [vmem:[#allocation69_spill] sm:$0xff] %v12255_v49  ;;  %v12282_v61 = vadd.f32 %v4982_v2, %v11922_v42  ;;  %v12285_v54 = vadd.f32 %v4983_v43, %v11925_v32  ;;  %v12288_v13 = vadd.f32 %v4984_v19, %v11928_v38  ;;  %v15214_v32 = vld [vmem:[#allocation51_spill] sm:$0xff]  ;;  %v15216_v38 = vld [vmem:[#allocation102_spill] sm:$0xff] }
 0x5aa   :  { %15198 = vst [vmem:[#allocation123_spill] sm:$0xff] %v12258_v11  ;;  %15199 = vst [vmem:[#allocation70_spill] sm:$0xff] %v12261_v18  ;;  %v12291_v15 = vadd.f32 %v4985_v22, %v11931_v10  ;;  %v12294_v9 = vadd.f32 %v4986_v41, %v11934_v21  ;;  %v12297_v12 = vadd.f32 %v4987_v44, %v11937_v37  ;;  %v15218_v10 = vld [vmem:[#allocation55_spill] sm:$0xff]  ;;  %v15220_v21 = vld [vmem:[#allocation56_spill] sm:$0xff] }
 0x5ab   :  { %15200 = vst [vmem:[#allocation19_spill] sm:$0xff] %v12264_v8  ;;  %15201 = vst [vmem:[#allocation71_spill] sm:$0xff] %v12267_v59  ;;  %v12300_v34 = vadd.f32 %v4988_v57, %v11940_v26  ;;  %v12303_v42 = vadd.f32 %v4989_v48, %v11943_v16  ;;  %v12306_v55 = vadd.f32 %v4990_v0, %v15214_v32  ;;  %v15222_v37 = vld [vmem:[#allocation103_spill] sm:$0xff]  ;;  %v15226_v16 = vld [vmem:[#allocation13_spill] sm:$0xff] }
 0x5ac   :  { %15202 = vst [vmem:[#allocation91_spill] sm:$0xff] %v12270_v1  ;;  %15203 = vst [vmem:[#allocation109_spill] sm:$0xff] %v12273_v40  ;;  %v12309_v20 = vadd.f32 %v4991_v30, %v15216_v38  ;;  %v12312_v22 = vadd.f32 %v4992_v62, %v15218_v10  ;;  %v12315_v3 = vadd.f32 %v4993_v5, %v15220_v21  ;;  %v15224_v26 = vld [vmem:[#allocation35_spill] sm:$0xff]  ;;  %v15230_v30 = vld [vmem:[#allocation18_spill] sm:$0xff] }
 0x5ad   :  { %15204 = vst [vmem:[#allocation21_spill] sm:$0xff] %v12276_v51  ;;  %15205 = vst [vmem:[#allocation72_spill] sm:$0xff] %v12279_v60  ;;  %v12318_v17 = vadd.f32 %v4994_v45, %v15222_v37  ;;  %v12321_v24 = vadd.f32 %v4995_v23, %v15224_v26  ;;  %v12324_v53 = vadd.f32 %v4996_v36, %v15226_v16  ;;  %v15228_v0 = vld [vmem:[#allocation15_spill] sm:$0xff]  ;;  %v15238_v2 = vld [vmem:[#allocation17_spill] sm:$0xff] }
 0x5ae   :  { %15206 = vst [vmem:[#allocation92_spill] sm:$0xff] %v12282_v61  ;;  %15207 = vst [vmem:[#allocation110_spill] sm:$0xff] %v12285_v54  ;;  %v12327_v52 = vadd.f32 %v4997_v31, %v15228_v0  ;;  %v12330_v6 = vadd.f32 %v4998_v27, %v15230_v30  ;;  %v12334_v56 = vadd.f32 %v15233_v35, %v15232_v58  ;;  %v15239_v43 = vld [vmem:[#allocation33_spill] sm:$0xff]  ;;  %v15240_v41 = vld [vmem:[#allocation39_spill] sm:$0xff] }
 0x5af   :  { %15208 = vst [vmem:[#allocation38_spill] sm:$0xff] %v12288_v13  ;;  %15209 = vst [vmem:[#allocation74_spill] sm:$0xff] %v12291_v15  ;;  %v12338_v50 = vadd.f32 %v15235_v4, %v15234_v28  ;;  %v12342_v29 = vadd.f32 %v15237_v47, %v15236_v46  ;;  %v12346_v19 = vadd.f32 %v15239_v43, %v15238_v2  ;;  %v15241_v44 = vld [vmem:[#allocation32_spill] sm:$0xff]  ;;  %v15242_v48 = vld [vmem:[#allocation22_spill] sm:$0xff] }
 0x5b0   :  { %15210 = vst [vmem:[#allocation93_spill] sm:$0xff] %v12294_v9  ;;  %15211 = vst [vmem:[#allocation75_spill] sm:$0xff] %v12297_v12  ;;  %v12350_v57 = vadd.f32 %v15241_v44, %v15240_v41  ;;  %v15243_v62 = vld [vmem:[#allocation34_spill] sm:$0xff]  ;;  %v15244_v45 = vld [vmem:[#allocation23_spill] sm:$0xff] }
 0x5b1   :  { %15212 = vst [vmem:[#allocation40_spill] sm:$0xff] %v12300_v34  ;;  %15213 = vst [vmem:[#allocation76_spill] sm:$0xff] %v12303_v42  ;;  %v12354_v5 = vadd.f32 %v15243_v62, %v15242_v48  ;;  %v15245_v23 = vld [vmem:[#allocation42_spill] sm:$0xff]  ;;  %v15246_v31 = vld [vmem:[#allocation24_spill] sm:$0xff] }
 0x5b2   :  { %15215 = vst [vmem:[#allocation25_spill] sm:$0xff] %v12306_v55  ;;  %15217 = vst [vmem:[#allocation77_spill] sm:$0xff] %v12309_v20  ;;  %v12358_v36 = vadd.f32 %v15245_v23, %v15244_v45  ;;  %v15247_v27 = vld [vmem:[#allocation43_spill] sm:$0xff]  ;;  %v15249_v21 = vld [vmem:[#allocation98_spill] sm:$0xff] }
 0x5b3   :  { %15219 = vst [vmem:[#allocation94_spill] sm:$0xff] %v12312_v22  ;;  %15221 = vst [vmem:[#allocation78_spill] sm:$0xff] %v12315_v3  ;;  %v12362_v32 = vadd.f32 %v15247_v27, %v15246_v31  ;;  %v4663_v38 = vld [vmem:[#allocation4 + $0x19] sm:$0xff]  ;;  %v15252_v30 = vld [vmem:[#allocation29_spill] sm:$0xff] }
 0x5b4   :  { %15223 = vst [vmem:[#allocation41_spill] sm:$0xff] %v12318_v17  ;;  %15225 = vst [vmem:[#allocation79_spill] sm:$0xff] %v12321_v24  ;;  %v15248_v10 = vld [vmem:[#allocation27_spill] sm:$0xff]  ;;  %v15250_v26 = vld [vmem:[#allocation28_spill] sm:$0xff] }
 0x5b5   :  { %15227 = vst [vmem:[#allocation95_spill] sm:$0xff] %v12324_v53  ;;  %15229 = vst [vmem:[#allocation80_spill] sm:$0xff] %v12327_v52  ;;  %v12366_v37 = vadd.f32 %v15249_v21, %v15248_v10  ;;  %v15251_v16 = vld [vmem:[#allocation44_spill] sm:$0xff]  ;;  %v15253_v58 = vld [vmem:[#allocation99_spill] sm:$0xff] }
 0x5b6   :  { %15231 = vst [vmem:[#allocation26_spill] sm:$0xff] %v12330_v6  ;;  %v12370_v0 = vadd.f32 %v15251_v16, %v15250_v26  ;;  %v12374_v35 = vadd.f32 %v15253_v58, %v15252_v30  ;;  %v15254_v28 = vld [vmem:[#allocation8_spill] sm:$0xff]  ;;  %v15255_v4 = vld [vmem:[#allocation49_spill] sm:$0xff]  ;;  %v4665_v2 = vld [vmem:[#allocation4 + $0x31] sm:$0xff] }
 0x5b7   :  { %v12378_v46 = vadd.f32 %v15255_v4, %v15254_v28  ;;  %v4664_v47 = vld [vmem:[#allocation4 + $0x21] sm:$0xff]  ;;  %v4666_v43 = vld [vmem:[#allocation4 + $0x39] sm:$0xff]  ;;  %v4667_v41 = vld [vmem:[#allocation4 + $0x49] sm:$0xff] }
 0x5b8   :  { %v15256_v44 = vld [vmem:[#allocation45_spill] sm:$0xff]  ;;  %v15257_v48 = vld [vmem:[#allocation100_spill] sm:$0xff]  ;;  %v15258_v45 = vld [vmem:[#allocation46_spill] sm:$0xff] }
 0x5b9   :  { %v12382_v62 = vadd.f32 %v15257_v48, %v15256_v44  ;;  %v15259_v23 = vld [vmem:[#allocation50_spill] sm:$0xff]  ;;  %v15260_v27 = vld [vmem:[#allocation47_spill] sm:$0xff]  ;;  %v15261_v10 = vld [vmem:[#allocation101_spill] sm:$0xff] }
 0x5ba   :  { %v12386_v31 = vadd.f32 %v15259_v23, %v15258_v45  ;;  %v12390_v21 = vadd.f32 %v15261_v10, %v15260_v27  ;;  %v15262_v26 = vld [vmem:[#allocation52_spill] sm:$0xff]  ;;  %v15263_v16 = vld [vmem:[#allocation111_spill] sm:$0xff]  ;;  %v4670_v4 = vld [vmem:[#allocation4 + $0x69] sm:$0xff] }
 0x5bb   :  { %v12394_v30 = vadd.f32 %v15263_v16, %v15262_v26  ;;  %v4668_v58 = vld [vmem:[#allocation4 + $0x51] sm:$0xff]  ;;  %v4669_v28 = vld [vmem:[#allocation4 + $0x61] sm:$0xff]  ;;  %v4671_v6 = vld [vmem:[#allocation4 + $0x79] sm:$0xff] }
 0x5bc   :  { %v15264_v52 = vld [vmem:[#allocation53_spill] sm:$0xff]  ;;  %v15267_v48 = vld [vmem:[#allocation54_spill] sm:$0xff]  ;;  %v15268_v24 = vld [vmem:[#allocation112_spill] sm:$0xff] }
 0x5bd   :  { %v15265_v53 = vld [vmem:[#allocation57_spill] sm:$0xff]  ;;  %v12402_v45 = vadd.f32 %v15268_v24, %v15267_v48  ;;  %v15270_v23 = vld [vmem:[#allocation59_spill] sm:$0xff]  ;;  %v15271_v17 = vld [vmem:[#allocation104_spill] sm:$0xff] }
 0x5be   :  { %v12398_v44 = vadd.f32 %v15265_v53, %v15264_v52  ;;  %v12406_v27 = vadd.f32 %v15271_v17, %v15270_v23  ;;  %v15273_v10 = vld [vmem:[#allocation60_spill] sm:$0xff]  ;;  %v15274_v3 = vld [vmem:[#allocation113_spill] sm:$0xff]  ;;  %v4673_v22 = vld [vmem:[#allocation4 + $0x91] sm:$0xff] }
 0x5bf   :  { %15269 = vst [vmem:[#allocation96_spill] sm:$0xff] %v12402_v45  ;;  %v12410_v26 = vadd.f32 %v15274_v3, %v15273_v10  ;;  %v4672_v16 = vld [vmem:[#allocation4 + $0x81] sm:$0xff]  ;;  %v4674_v20 = vld [vmem:[#allocation4 + $0x99] sm:$0xff]  ;;  %v15277_v42 = vld [vmem:[#allocation58_spill] sm:$0xff] }
 0x5c0   :  { %15266 = vst [vmem:[#allocation81_spill] sm:$0xff] %v12398_v44  ;;  %15272 = vst [vmem:[#allocation82_spill] sm:$0xff] %v12406_v27  ;;  %v15276_v55 = vld [vmem:[#allocation61_spill] sm:$0xff]  ;;  %v15279_v53 = vld [vmem:[#allocation66_spill] sm:$0xff] }
 0x5c1   :  { %15275 = vst [vmem:[#allocation9_spill] sm:$0xff] %v12410_v26  ;;  %v12414_v34 = vadd.f32 %v15277_v42, %v15276_v55  ;;  %v15280_v52 = vld [vmem:[#allocation114_spill] sm:$0xff]  ;;  %v15282_v24 = vld [vmem:[#allocation67_spill] sm:$0xff]  ;;  %v15283_v48 = vld [vmem:[#allocation105_spill] sm:$0xff] }
 0x5c2   :  { %v12418_v12 = vadd.f32 %v15280_v52, %v15279_v53  ;;  %v12422_v9 = vadd.f32 %v15283_v48, %v15282_v24  ;;  %v15285_v17 = vld [vmem:[#allocation68_spill] sm:$0xff]  ;;  %v15286_v23 = vld [vmem:[#allocation115_spill] sm:$0xff]  ;;  %v4675_v3 = vld [vmem:[#allocation4 + $0xa9] sm:$0xff] }
 0x5c3   :  { %15278 = vst [vmem:[#allocation83_spill] sm:$0xff] %v12414_v34  ;;  %v12426_v15 = vadd.f32 %v15286_v23, %v15285_v17  ;;  %v4676_v10 = vld [vmem:[#allocation4 + $0xb1] sm:$0xff]  ;;  %v4677_v13 = vld [vmem:[#allocation4 + $0xc1] sm:$0xff]  ;;  %v4678_v24 = vld [vmem:[#allocation4 + $0xc9] sm:$0xff] }
 0x5c4   :  { %15281 = vst [vmem:[#allocation89_spill] sm:$0xff] %v12418_v12  ;;  %15284 = vst [vmem:[#allocation84_spill] sm:$0xff] %v12422_v9  ;;  %v15288_v54 = vld [vmem:[#allocation73_spill] sm:$0xff]  ;;  %v15289_v61 = vld [vmem:[#allocation62_spill] sm:$0xff] }
 0x5c5   :  { %15287 = vst [vmem:[#allocation85_spill] sm:$0xff] %v12426_v15  ;;  %v12430_v60 = vadd.f32 %v15289_v61, %v15288_v54  ;;  %v15291_v42 = vld [vmem:[#allocation30_spill] sm:$0xff]  ;;  %v15292_v55 = vld [vmem:[#allocation116_spill] sm:$0xff]  ;;  %v15295_v52 = vld [vmem:[#allocation63_spill] sm:$0xff] }
 0x5c6   :  { %v12434_v51 = vadd.f32 %v15292_v55, %v15291_v42  ;;  %v15294_v53 = vld [vmem:[#allocation16_spill] sm:$0xff]  ;;  %v15297_v17 = vld [vmem:[#allocation97_spill] sm:$0xff]  ;;  %v4681_v59 = vld [vmem:[#allocation4 + $0xf1] sm:$0xff] }
 0x5c7   :  { %15290 = vst [vmem:[#allocation86_spill] sm:$0xff] %v12430_v60  ;;  %v12438_v40 = vadd.f32 %v15295_v52, %v15294_v53  ;;  %v4679_v48 = vld [vmem:[#allocation4 + $0xd9] sm:$0xff]  ;;  %v4680_v1 = vld [vmem:[#allocation4 + $0xe1] sm:$0xff]  ;;  %v4735_v23 = vmul.f32 %v15297_v17, %v4663_v38  ;;  %v4683_v18 = vld [vmem:[#allocation4 + $0x109] sm:$0xff]  ;;  %v4736_v11 = vmul.f32 %v15297_v17, %v4664_v47  ;;  %v4737_v61 = vmul.f32 %v15297_v17, %v4665_v2 }
 0x5c8   :  { %15293 = vst [vmem:[#allocation87_spill] sm:$0xff] %v12434_v51  ;;  %v4682_v8 = vld [vmem:[#allocation4 + $0xf9] sm:$0xff]  ;;  %v4738_v54 = vmul.f32 %v15297_v17, %v4666_v43  ;;  %v4739_v42 = vmul.f32 %v15297_v17, %v4667_v41  ;;  %v4684_v55 = vld [vmem:[#allocation4 + $0x111] sm:$0xff]  ;;  %v4685_v49 = vld [vmem:[#allocation4 + $0x121] sm:$0xff]  ;;  %v4740_v52 = vmul.f32 %v15297_v17, %v4668_v58  ;;  %v4741_v25 = vmul.f32 %v15297_v17, %v4669_v28 }
 0x5c9   :  { %15296 = vst [vmem:[#allocation88_spill] sm:$0xff] %v12438_v40  ;;  %v4686_v53 = vld [vmem:[#allocation4 + $0x129] sm:$0xff]  ;;  %v4742_v38 = vmul.f32 %v15297_v17, %v4670_v4  ;;  %v4743_v39 = vmul.f32 %v15297_v17, %v4671_v6  ;;  %v4687_v33 = vld [vmem:[#allocation4 + $0x139] sm:$0xff]  ;;  %v4688_v7 = vld [vmem:[#allocation4 + $0x141] sm:$0xff]  ;;  %v4744_v2 = vmul.f32 %v15297_v17, %v4672_v16  ;;  %v4745_v43 = vmul.f32 %v15297_v17, %v4673_v22 }
 0x5ca   :  { %v4689_v47 = vld [vmem:[#allocation4 + $0x151] sm:$0xff]  ;;  %v4746_v41 = vmul.f32 %v15297_v17, %v4674_v20  ;;  %v4747_v63 = vmul.f32 %v15297_v17, %v4675_v3  ;;  %v4691_v40 = vld [vmem:[#allocation4 + $0x169] sm:$0xff]  ;;  %v4748_v28 = vmul.f32 %v15297_v17, %v4676_v10  ;;  %v4749_v4 = vmul.f32 %v15297_v17, %v4677_v13  ;;  %v4693_v60 = vld [vmem:[#allocation4 + $0x181] sm:$0xff] }
 0x5cb   :  { %v4692_v58 = vld [vmem:[#allocation4 + $0x171] sm:$0xff]  ;;  %v4750_v6 = vmul.f32 %v15297_v17, %v4678_v24  ;;  %v4751_v51 = vmul.f32 %v15297_v17, %v4679_v48  ;;  %v4694_v15 = vld [vmem:[#allocation4 + $0x189] sm:$0xff]  ;;  %v4752_v22 = vmul.f32 %v15297_v17, %v4680_v1  ;;  %v4753_v20 = vmul.f32 %v15297_v17, %v4681_v59 }
 0x5cc   :  { %v4695_v16 = vld [vmem:[#allocation4 + $0x1c9] sm:$0xff]  ;;  %v4754_v3 = vmul.f32 %v15297_v17, %v4682_v8  ;;  %v4755_v9 = vmul.f32 %v15297_v17, %v4683_v18  ;;  %v4756_v12 = vmul.f32 %v15297_v17, %v4684_v55  ;;  %v4757_v10 = vmul.f32 %v15297_v17, %v4685_v49 }
 0x5cd   :  { %v4758_v13 = vmul.f32 %v15297_v17, %v4686_v53  ;;  %v4759_v24 = vmul.f32 %v15297_v17, %v4687_v33  ;;  %v4760_v48 = vmul.f32 %v15297_v17, %v4688_v7  ;;  %v4761_v34 = vmul.f32 %v15297_v17, %v4689_v47  ;;  %v15298_v26 = vld [vmem:[#allocation117_spill] sm:$0xff]  ;;  %v15299_v33 = vld [vmem:[#allocation106_spill] sm:$0xff] }
 0x5ce   :  { %v4762_v1 = vmul.f32 %v15297_v17, %v4690_v14  ;;  %v4763_v59 = vmul.f32 %v15297_v17, %v4691_v40  ;;  %v4764_v8 = vmul.f32 %v15297_v17, %v4692_v58  ;;  %v4765_v18 = vmul.f32 %v15297_v17, %v4693_v60  ;;  %v15300_v7 = vld [vmem:[#allocation118_spill] sm:$0xff]  ;;  %v15301_v14 = vld [vmem:[#allocation64_spill] sm:$0xff]  ;;  %v15302_v40 = vld [vmem:[#allocation119_spill] sm:$0xff] }
 0x5cf   :  { %v4766_v55 = vmul.f32 %v15297_v17, %v4694_v15  ;;  %v4767_v49 = vmul.f32 %v15297_v17, %v4695_v16  ;;  %v12474_v53 = vadd.f32 %v4735_v23, %v15298_v26  ;;  %v12477_v27 = vadd.f32 %v4736_v11, %v15299_v33  ;;  %v15303_v60 = vld [vmem:[#allocation107_spill] sm:$0xff] }
 0x5d0   :  { %v12480_v47 = vadd.f32 %v4737_v61, %v15300_v7  ;;  %v12483_v45 = vadd.f32 %v4738_v54, %v15301_v14  ;;  %v12486_v58 = vadd.f32 %v4739_v42, %v15302_v40  ;;  %v12489_v44 = vadd.f32 %v4740_v52, %v15303_v60  ;;  %v4868_v42 = vld [vmem:[#allocation4 + $0x52] sm:$0xff]  ;;  %v4877_v40 = vld [vmem:[#allocation4 + $0xc2] sm:$0xff]  ;;  %v4878_v60 = vld [vmem:[#allocation4 + $0xca] sm:$0xff] }
 0x5d1   :  { %v12492_v15 = vadd.f32 %v4741_v25, %v12334_v56  ;;  %v12495_v26 = vadd.f32 %v4742_v38, %v12338_v50  ;;  %v12498_v11 = vadd.f32 %v4743_v39, %v12342_v29  ;;  %v12501_v17 = vadd.f32 %v4744_v2, %v12346_v19  ;;  %v4863_v50 = vld [vmem:[#allocation4 + $0x1a] sm:$0xff]  ;;  %v4864_v29 = vld [vmem:[#allocation4 + $0x22] sm:$0xff]  ;;  %v4865_v19 = vld [vmem:[#allocation4 + $0x32] sm:$0xff] }
 0x5d2   :  { %v12504_v23 = vadd.f32 %v4745_v43, %v12350_v57  ;;  %v12507_v61 = vadd.f32 %v4746_v41, %v12354_v5  ;;  %v12510_v54 = vadd.f32 %v4747_v63, %v12358_v36  ;;  %v12513_v25 = vadd.f32 %v4748_v28, %v12362_v32  ;;  %v4866_v32 = vld [vmem:[#allocation4 + $0x3a] sm:$0xff]  ;;  %v15310_v41 = vld [vmem:[#allocation82_spill] sm:$0xff] }
 0x5d3   :  { %v12516_v56 = vadd.f32 %v4749_v4, %v12366_v37  ;;  %v12519_v39 = vadd.f32 %v4750_v6, %v12370_v0  ;;  %v12522_v57 = vadd.f32 %v4751_v51, %v12374_v35  ;;  %v12525_v5 = vadd.f32 %v4752_v22, %v12378_v46  ;;  %v4867_v37 = vld [vmem:[#allocation4 + $0x4a] sm:$0xff]  ;;  %v4869_v0 = vld [vmem:[#allocation4 + $0x62] sm:$0xff]  ;;  %v4871_v43 = vld [vmem:[#allocation4 + $0x7a] sm:$0xff] }
 0x5d4   :  { %v12528_v63 = vadd.f32 %v4753_v20, %v12382_v62  ;;  %v12531_v36 = vadd.f32 %v4754_v3, %v12386_v31  ;;  %v12534_v52 = vadd.f32 %v4755_v9, %v12390_v21  ;;  %v12537_v38 = vadd.f32 %v4756_v12, %v12394_v30  ;;  %v15306_v51 = vld [vmem:[#allocation81_spill] sm:$0xff]  ;;  %v15308_v46 = vld [vmem:[#allocation96_spill] sm:$0xff]  ;;  %v15314_v9 = vld [vmem:[#allocation83_spill] sm:$0xff] }
 0x5d5   :  { %v12540_v35 = vadd.f32 %v4757_v10, %v15306_v51  ;;  %v12543_v2 = vadd.f32 %v4758_v13, %v15308_v46  ;;  %v4870_v62 = vld [vmem:[#allocation4 + $0x6a] sm:$0xff]  ;;  %v4872_v31 = vld [vmem:[#allocation4 + $0x82] sm:$0xff]  ;;  %v12546_v28 = vadd.f32 %v4759_v24, %v15310_v41  ;;  %v12552_v21 = vadd.f32 %v4761_v34, %v15314_v9  ;;  %v4873_v16 = vld [vmem:[#allocation4 + $0x92] sm:$0xff] }
 0x5d6   :  { %15304 = vst [vmem:[#allocation51_spill] sm:$0xff] %v12534_v52  ;;  %15305 = vst [vmem:[#allocation102_spill] sm:$0xff] %v12537_v38  ;;  %v15312_v4 = vld [vmem:[#allocation9_spill] sm:$0xff]  ;;  %v4874_v22 = vld [vmem:[#allocation4 + $0x9a] sm:$0xff] }
 0x5d7   :  { %15307 = vst [vmem:[#allocation55_spill] sm:$0xff] %v12540_v35  ;;  %15309 = vst [vmem:[#allocation56_spill] sm:$0xff] %v12543_v2  ;;  %v12549_v6 = vadd.f32 %v4760_v48, %v15312_v4  ;;  %v15316_v12 = vld [vmem:[#allocation89_spill] sm:$0xff]  ;;  %v15318_v3 = vld [vmem:[#allocation84_spill] sm:$0xff] }
 0x5d8   :  { %15311 = vst [vmem:[#allocation103_spill] sm:$0xff] %v12546_v28  ;;  %15315 = vst [vmem:[#allocation13_spill] sm:$0xff] %v12552_v21  ;;  %v12555_v30 = vadd.f32 %v4762_v1, %v15316_v12  ;;  %v4875_v20 = vld [vmem:[#allocation4 + $0xaa] sm:$0xff]  ;;  %v12558_v10 = vadd.f32 %v4763_v59, %v15318_v3  ;;  %v15324_v48 = vld [vmem:[#allocation87_spill] sm:$0xff] }
 0x5d9   :  { %15313 = vst [vmem:[#allocation35_spill] sm:$0xff] %v12549_v6  ;;  %v15320_v13 = vld [vmem:[#allocation85_spill] sm:$0xff]  ;;  %v15322_v24 = vld [vmem:[#allocation86_spill] sm:$0xff]  ;;  %v12567_v14 = vadd.f32 %v4766_v55, %v15324_v48  ;;  %v15326_v1 = vld [vmem:[#allocation88_spill] sm:$0xff] }
 0x5da   :  { %15317 = vst [vmem:[#allocation15_spill] sm:$0xff] %v12555_v30  ;;  %15319 = vst [vmem:[#allocation18_spill] sm:$0xff] %v12558_v10  ;;  %v12561_v33 = vadd.f32 %v4764_v8, %v15320_v13  ;;  %v12564_v7 = vadd.f32 %v4765_v18, %v15322_v24  ;;  %v4876_v34 = vld [vmem:[#allocation4 + $0xb2] sm:$0xff]  ;;  %v12570_v51 = vadd.f32 %v4767_v49, %v15326_v1  ;;  %v4879_v46 = vld [vmem:[#allocation4 + $0xda] sm:$0xff] }
 0x5db   :  { %15325 = vst [vmem:[#allocation36_spill] sm:$0xff] %v12567_v14  ;;  %v4880_v41 = vld [vmem:[#allocation4 + $0xe2] sm:$0xff]  ;;  %v4881_v4 = vld [vmem:[#allocation4 + $0xf2] sm:$0xff]  ;;  %v4882_v18 = vld [vmem:[#allocation4 + $0xfa] sm:$0xff] }
 0x5dc   :  { %15321 = vst [vmem:[#allocation20_spill] sm:$0xff] %v12561_v33  ;;  %15323 = vst [vmem:[#allocation90_spill] sm:$0xff] %v12564_v7  ;;  %v15328_v59 = vld [vmem:[#allocation48_spill] sm:$0xff]  ;;  %v4883_v3 = vld [vmem:[#allocation4 + $0x10a] sm:$0xff] }
 0x5dd   :  { %15327 = vst [vmem:[#allocation10_spill] sm:$0xff] %v12570_v51  ;;  %v4935_v9 = vmul.f32 %v15328_v59, %v4863_v50  ;;  %v4936_v8 = vmul.f32 %v15328_v59, %v4864_v29  ;;  %v4937_v12 = vmul.f32 %v15328_v59, %v4865_v19  ;;  %v4884_v13 = vld [vmem:[#allocation4 + $0x112] sm:$0xff]  ;;  %v4938_v55 = vmul.f32 %v15328_v59, %v4866_v32  ;;  %v4885_v1 = vld [vmem:[#allocation4 + $0x122] sm:$0xff]  ;;  %v4886_v51 = vld [vmem:[#allocation4 + $0x12a] sm:$0xff] }
 0x5de   :  { %v4939_v24 = vmul.f32 %v15328_v59, %v4867_v37  ;;  %v4940_v48 = vmul.f32 %v15328_v59, %v4868_v42  ;;  %v4941_v49 = vmul.f32 %v15328_v59, %v4869_v0  ;;  %v4887_v14 = vld [vmem:[#allocation4 + $0x13a] sm:$0xff]  ;;  %v4942_v50 = vmul.f32 %v15328_v59, %v4870_v62  ;;  %v4888_v33 = vld [vmem:[#allocation4 + $0x142] sm:$0xff]  ;;  %v4889_v10 = vld [vmem:[#allocation4 + $0x152] sm:$0xff] }
 0x5df   :  { %v4943_v29 = vmul.f32 %v15328_v59, %v4871_v43  ;;  %v4944_v19 = vmul.f32 %v15328_v59, %v4872_v31  ;;  %v4945_v7 = vmul.f32 %v15328_v59, %v4873_v16  ;;  %v4890_v32 = vld [vmem:[#allocation4 + $0x15a] sm:$0xff]  ;;  %v4946_v37 = vmul.f32 %v15328_v59, %v4874_v22  ;;  %v4891_v21 = vld [vmem:[#allocation4 + $0x16a] sm:$0xff]  ;;  %v4892_v6 = vld [vmem:[#allocation4 + $0x172] sm:$0xff] }
 0x5e0   :  { %v4947_v42 = vmul.f32 %v15328_v59, %v4875_v20  ;;  %v4948_v0 = vmul.f32 %v15328_v59, %v4876_v34  ;;  %v4949_v30 = vmul.f32 %v15328_v59, %v4877_v40  ;;  %v4893_v62 = vld [vmem:[#allocation4 + $0x182] sm:$0xff]  ;;  %v4950_v43 = vmul.f32 %v15328_v59, %v4878_v60  ;;  %v4894_v2 = vld [vmem:[#allocation4 + $0x18a] sm:$0xff] }
 0x5e1   :  { %v4951_v31 = vmul.f32 %v15328_v59, %v4879_v46  ;;  %v4952_v16 = vmul.f32 %v15328_v59, %v4880_v41  ;;  %v4953_v28 = vmul.f32 %v15328_v59, %v4881_v4  ;;  %v4895_v35 = vld [vmem:[#allocation4 + $0x1ca] sm:$0xff]  ;;  %v4954_v22 = vmul.f32 %v15328_v59, %v4882_v18 }
 0x5e2   :  { %v4955_v20 = vmul.f32 %v15328_v59, %v4883_v3  ;;  %v4956_v34 = vmul.f32 %v15328_v59, %v4884_v13  ;;  %v4957_v40 = vmul.f32 %v15328_v59, %v4885_v1  ;;  %v4958_v38 = vmul.f32 %v15328_v59, %v4886_v51  ;;  %v5099_v1 = vld [vmem:[#allocation4 + $0x200] sm:$0xff] }
 0x5e3   :  { %v4959_v60 = vmul.f32 %v15328_v59, %v4887_v14  ;;  %v4960_v46 = vmul.f32 %v15328_v59, %v4888_v33  ;;  %v4961_v41 = vmul.f32 %v15328_v59, %v4889_v10  ;;  %v4962_v4 = vmul.f32 %v15328_v59, %v4890_v32 }
 0x5e4   :  { %v4963_v52 = vmul.f32 %v15328_v59, %v4891_v21  ;;  %v4964_v18 = vmul.f32 %v15328_v59, %v4892_v6  ;;  %v12603_v3 = vmul.f32 %v15328_v59, %v4893_v62  ;;  %v12606_v13 = vmul.f32 %v15328_v59, %v4894_v2  ;;  %v5102_v62 = vld [vmem:[#allocation4 + $0x228] sm:$0xff] }
 0x5e5   :  { %v12609_v51 = vmul.f32 %v15328_v59, %v4895_v35  ;;  %v12612_v14 = vadd.f32 %v4935_v9, %v12474_v53  ;;  %v12615_v10 = vadd.f32 %v4936_v8, %v12477_v27  ;;  %v12618_v33 = vadd.f32 %v4937_v12, %v12480_v47  ;;  %v5065_v59 = vld [vmem:[#allocation4 + $0x38] sm:$0xff]  ;;  %v5066_v9 = vld [vmem:[#allocation4 + $0x48] sm:$0xff]  ;;  %v5071_v12 = vld [vmem:[#allocation4 + $0x80] sm:$0xff] }
 0x5e6   :  { %15329 = vst [vmem:[#allocation37_spill] sm:$0xff] %v12603_v3  ;;  %15330 = vst [vmem:[#allocation31_spill] sm:$0xff] %v12606_v13  ;;  %v12621_v6 = vadd.f32 %v4938_v55, %v12483_v45  ;;  %v12624_v21 = vadd.f32 %v4939_v24, %v12486_v58  ;;  %v12627_v2 = vadd.f32 %v4940_v48, %v12489_v44  ;;  %v15416_v3 = vld [vmem:[#allocation80_spill] sm:$0xff] }
 0x5e7   :  { %15331 = vst [vmem:[#allocation17_spill] sm:$0xff] %v12609_v51  ;;  %v12630_v35 = vadd.f32 %v4941_v49, %v12492_v15  ;;  %v12633_v53 = vadd.f32 %v4942_v50, %v12495_v26  ;;  %v12636_v27 = vadd.f32 %v4943_v29, %v12498_v11  ;;  %v12639_v47 = vadd.f32 %v4944_v19, %v12501_v17  ;;  %v5064_v26 = vld [vmem:[#allocation4 + $0x30] sm:$0xff]  ;;  %v5097_v49 = vld [vmem:[#allocation4 + $0x1e8] sm:$0xff]  ;;  %v15348_v50 = vld [vmem:[#allocation55_spill] sm:$0xff] }
 0x5e8   :  { %v12642_v45 = vadd.f32 %v4945_v7, %v12504_v23  ;;  %v12645_v58 = vadd.f32 %v4946_v37, %v12507_v61  ;;  %v12648_v44 = vadd.f32 %v4947_v42, %v12510_v54  ;;  %v12651_v15 = vadd.f32 %v4948_v0, %v12513_v25  ;;  %v5067_v11 = vld [vmem:[#allocation4 + $0x50] sm:$0xff]  ;;  %v5068_v54 = vld [vmem:[#allocation4 + $0x60] sm:$0xff]  ;;  %v5069_v7 = vld [vmem:[#allocation4 + $0x68] sm:$0xff] }
 0x5e9   :  { %15332 = vst [vmem:[#allocation33_spill] sm:$0xff] %v12636_v27  ;;  %15333 = vst [vmem:[#allocation39_spill] sm:$0xff] %v12639_v47  ;;  %v12654_v8 = vadd.f32 %v4949_v30, %v12516_v56  ;;  %v12657_v17 = vadd.f32 %v4950_v43, %v12519_v39  ;;  %v12660_v23 = vadd.f32 %v4951_v31, %v12522_v57  ;;  %v5070_v25 = vld [vmem:[#allocation4 + $0x78] sm:$0xff]  ;;  %v15346_v39 = vld [vmem:[#allocation102_spill] sm:$0xff] }
 0x5ea   :  { %15334 = vst [vmem:[#allocation32_spill] sm:$0xff] %v12642_v45  ;;  %15335 = vst [vmem:[#allocation22_spill] sm:$0xff] %v12645_v58  ;;  %v12663_v61 = vadd.f32 %v4952_v16, %v12525_v5  ;;  %v12666_v55 = vadd.f32 %v4953_v28, %v12528_v63  ;;  %v12669_v24 = vadd.f32 %v4954_v22, %v12531_v36  ;;  %v15344_v56 = vld [vmem:[#allocation51_spill] sm:$0xff]  ;;  %v5072_v57 = vld [vmem:[#allocation4 + $0x90] sm:$0xff] }
 0x5eb   :  { %15336 = vst [vmem:[#allocation34_spill] sm:$0xff] %v12648_v44  ;;  %15337 = vst [vmem:[#allocation23_spill] sm:$0xff] %v12651_v15  ;;  %v12672_v30 = vadd.f32 %v4955_v20, %v15344_v56  ;;  %v12675_v48 = vadd.f32 %v4956_v34, %v15346_v39  ;;  %v5098_v5 = vld [vmem:[#allocation4 + $0x1f8] sm:$0xff]  ;;  %v12678_v29 = vadd.f32 %v4957_v40, %v15348_v50  ;;  %v15350_v19 = vld [vmem:[#allocation56_spill] sm:$0xff] }
 0x5ec   :  { %15338 = vst [vmem:[#allocation42_spill] sm:$0xff] %v12654_v8  ;;  %15339 = vst [vmem:[#allocation24_spill] sm:$0xff] %v12657_v17  ;;  %v12681_v32 = vadd.f32 %v4958_v38, %v15350_v19  ;;  %v15352_v63 = vld [vmem:[#allocation103_spill] sm:$0xff]  ;;  %v5100_v42 = vld [vmem:[#allocation4 + $0x210] sm:$0xff] }
 0x5ed   :  { %15340 = vst [vmem:[#allocation43_spill] sm:$0xff] %v12660_v23  ;;  %15341 = vst [vmem:[#allocation27_spill] sm:$0xff] %v12663_v61  ;;  %v12684_v28 = vadd.f32 %v4959_v60, %v15352_v63  ;;  %v15354_v36 = vld [vmem:[#allocation35_spill] sm:$0xff]  ;;  %v5103_v43 = vld [vmem:[#allocation4 + $0x230] sm:$0xff] }
 0x5ee   :  { %15342 = vst [vmem:[#allocation98_spill] sm:$0xff] %v12666_v55  ;;  %15343 = vst [vmem:[#allocation28_spill] sm:$0xff] %v12669_v24  ;;  %v12687_v37 = vadd.f32 %v4960_v46, %v15354_v36  ;;  %v5101_v0 = vld [vmem:[#allocation4 + $0x218] sm:$0xff]  ;;  %v15356_v31 = vld [vmem:[#allocation13_spill] sm:$0xff] }
 0x5ef   :  { %15345 = vst [vmem:[#allocation44_spill] sm:$0xff] %v12672_v30  ;;  %15347 = vst [vmem:[#allocation29_spill] sm:$0xff] %v12675_v48  ;;  %v12690_v16 = vadd.f32 %v4961_v41, %v15356_v31  ;;  %v15358_v22 = vld [vmem:[#allocation15_spill] sm:$0xff]  ;;  %v15360_v34 = vld [vmem:[#allocation18_spill] sm:$0xff] }
 0x5f0   :  { %15349 = vst [vmem:[#allocation99_spill] sm:$0xff] %v12678_v29  ;;  %15351 = vst [vmem:[#allocation8_spill] sm:$0xff] %v12681_v32  ;;  %v12693_v20 = vadd.f32 %v4962_v4, %v15358_v22  ;;  %v12696_v40 = vadd.f32 %v4963_v52, %v15360_v34  ;;  %v15362_v38 = vld [vmem:[#allocation20_spill] sm:$0xff]  ;;  %v5105_v39 = vld [vmem:[#allocation4 + $0x248] sm:$0xff] }
 0x5f1   :  { %15353 = vst [vmem:[#allocation49_spill] sm:$0xff] %v12684_v28  ;;  %15355 = vst [vmem:[#allocation45_spill] sm:$0xff] %v12687_v37  ;;  %v12699_v56 = vadd.f32 %v4964_v18, %v15362_v38  ;;  %v5104_v60 = vld [vmem:[#allocation4 + $0x240] sm:$0xff]  ;;  %v5106_v46 = vld [vmem:[#allocation4 + $0x258] sm:$0xff] }
 0x5f2   :  { %15357 = vst [vmem:[#allocation100_spill] sm:$0xff] %v12690_v16  ;;  %15359 = vst [vmem:[#allocation46_spill] sm:$0xff] %v12693_v20  ;;  %v5107_v50 = vld [vmem:[#allocation4 + $0x260] sm:$0xff]  ;;  %v5108_v19 = vld [vmem:[#allocation4 + $0x270] sm:$0xff] }
 0x5f3   :  { %15361 = vst [vmem:[#allocation50_spill] sm:$0xff] %v12696_v40  ;;  %15363 = vst [vmem:[#allocation47_spill] sm:$0xff] %v12699_v56  ;;  %v5109_v63 = vld [vmem:[#allocation4 + $0x278] sm:$0xff]  ;;  %v12704_v41 = vld [vmem:[%s14346_s4 + $0x6] ss:$0 sm:$0xff] }
 0x5f4   :  { %15364 = vst [vmem:[#allocation101_spill] sm:$0xff] %v12704_v41  ;;  %v5136_v4 = vmul.f32 %v12704_v41, %v5064_v26  ;;  %v5137_v36 = vmul.f32 %v12704_v41, %v5065_v59  ;;  %v5138_v52 = vmul.f32 %v12704_v41, %v5066_v9  ;;  %v5139_v18 = vmul.f32 %v12704_v41, %v5067_v11  ;;  %v5110_v31 = vld [vmem:[#allocation4 + $0x288] sm:$0xff]  ;;  %v5111_v22 = vld [vmem:[#allocation4 + $0x290] sm:$0xff]  ;;  %v5112_v34 = vld [vmem:[#allocation4 + $0x2a0] sm:$0xff] }
 0x5f5   :  { %v5140_v38 = vmul.f32 %v12704_v41, %v5068_v54  ;;  %v5141_v51 = vmul.f32 %v12704_v41, %v5069_v7  ;;  %v5142_v56 = vmul.f32 %v12704_v41, %v5070_v25  ;;  %v5143_v13 = vmul.f32 %v12704_v41, %v5071_v12  ;;  %v5113_v40 = vld [vmem:[#allocation4 + $0x2a8] sm:$0xff]  ;;  %v5114_v20 = vld [vmem:[#allocation4 + $0x2b8] sm:$0xff]  ;;  %v5115_v26 = vld [vmem:[#allocation4 + $0x2c0] sm:$0xff] }
 0x5f6   :  { %v12715_v59 = vmul.f32 %v12704_v41, %v5072_v57  ;;  %v5169_v9 = vmul.f32 %v12704_v41, %v5097_v49  ;;  %v5170_v11 = vmul.f32 %v12704_v41, %v5098_v5  ;;  %v5171_v16 = vmul.f32 %v12704_v41, %v5099_v1  ;;  %v5116_v37 = vld [vmem:[#allocation4 + $0x2d0] sm:$0xff]  ;;  %v5117_v54 = vld [vmem:[#allocation4 + $0x2d8] sm:$0xff]  ;;  %v5118_v28 = vld [vmem:[#allocation4 + $0x2e8] sm:$0xff] }
 0x5f7   :  { %v5172_v7 = vmul.f32 %v12704_v41, %v5100_v42  ;;  %v5173_v25 = vmul.f32 %v12704_v41, %v5101_v0  ;;  %v5174_v12 = vmul.f32 %v12704_v41, %v5102_v62  ;;  %v5175_v32 = vmul.f32 %v12704_v41, %v5103_v43  ;;  %v5119_v29 = vld [vmem:[#allocation4 + $0x2f0] sm:$0xff]  ;;  %v5120_v57 = vld [vmem:[#allocation4 + $0x300] sm:$0xff]  ;;  %v5121_v48 = vld [vmem:[#allocation4 + $0x308] sm:$0xff] }
 0x5f8   :  { %15365 = vst [vmem:[#allocation52_spill] sm:$0xff] %v12715_v59  ;;  %v5176_v49 = vmul.f32 %v12704_v41, %v5104_v60  ;;  %v5177_v5 = vmul.f32 %v12704_v41, %v5105_v39  ;;  %v5178_v1 = vmul.f32 %v12704_v41, %v5106_v46  ;;  %v5179_v30 = vmul.f32 %v12704_v41, %v5107_v50  ;;  %v5122_v24 = vld [vmem:[#allocation4 + $0x318] sm:$0xff]  ;;  %v5123_v55 = vld [vmem:[#allocation4 + $0x320] sm:$0xff]  ;;  %v5124_v42 = vld [vmem:[#allocation4 + $0x330] sm:$0xff] }
 0x5f9   :  { %v5180_v0 = vmul.f32 %v12704_v41, %v5108_v19  ;;  %v5181_v62 = vmul.f32 %v12704_v41, %v5109_v63  ;;  %v5182_v43 = vmul.f32 %v12704_v41, %v5110_v31  ;;  %v5183_v61 = vmul.f32 %v12704_v41, %v5111_v22  ;;  %v5125_v23 = vld [vmem:[#allocation4 + $0x338] sm:$0xff]  ;;  %v5126_v17 = vld [vmem:[#allocation4 + $0x348] sm:$0xff]  ;;  %v5127_v60 = vld [vmem:[#allocation4 + $0x350] sm:$0xff] }
 0x5fa   :  { %v5184_v39 = vmul.f32 %v12704_v41, %v5112_v34  ;;  %v5185_v46 = vmul.f32 %v12704_v41, %v5113_v40  ;;  %v5186_v50 = vmul.f32 %v12704_v41, %v5114_v20  ;;  %v5187_v8 = vmul.f32 %v12704_v41, %v5115_v26  ;;  %v15400_v45 = vld [vmem:[#allocation76_spill] sm:$0xff]  ;;  %v15406_v47 = vld [vmem:[#allocation94_spill] sm:$0xff] }
 0x5fb   :  { %v5188_v15 = vmul.f32 %v12704_v41, %v5116_v37  ;;  %v5189_v19 = vmul.f32 %v12704_v41, %v5117_v54  ;;  %v5190_v63 = vmul.f32 %v12704_v41, %v5118_v28  ;;  %v5191_v31 = vmul.f32 %v12704_v41, %v5119_v29  ;;  %v15408_v59 = vld [vmem:[#allocation78_spill] sm:$0xff] }
 0x5fc   :  { %v5192_v22 = vmul.f32 %v12704_v41, %v5120_v57  ;;  %v5193_v44 = vmul.f32 %v12704_v41, %v5121_v48  ;;  %v5194_v34 = vmul.f32 %v12704_v41, %v5122_v24  ;;  %v5195_v40 = vmul.f32 %v12704_v41, %v5123_v55 }
 0x5fd   :  { %v5196_v20 = vmul.f32 %v12704_v41, %v5124_v42  ;;  %v5197_v26 = vmul.f32 %v12704_v41, %v5125_v23  ;;  %v5198_v37 = vmul.f32 %v12704_v41, %v5126_v17  ;;  %v5199_v54 = vmul.f32 %v12704_v41, %v5127_v60 }
 0x5fe   :  { %v12749_v28 = vadd.f32 %v5136_v4, %v12612_v14  ;;  %v12752_v29 = vadd.f32 %v5137_v36, %v12615_v10  ;;  %v12755_v48 = vadd.f32 %v5138_v52, %v12618_v33  ;;  %v12758_v24 = vadd.f32 %v5139_v18, %v12621_v6  ;;  %v15368_v10 = vld [vmem:[#allocation120_spill] sm:$0xff]  ;;  %v15369_v33 = vld [vmem:[#allocation65_spill] sm:$0xff] }
 0x5ff   :  { %v12761_v55 = vadd.f32 %v5140_v38, %v12624_v21  ;;  %v12764_v23 = vadd.f32 %v5141_v51, %v12627_v2  ;;  %v12767_v17 = vadd.f32 %v5142_v56, %v12630_v35  ;;  %v12770_v14 = vadd.f32 %v5143_v13, %v12633_v53  ;;  %v15370_v6 = vld [vmem:[#allocation121_spill] sm:$0xff]  ;;  %v15371_v21 = vld [vmem:[#allocation108_spill] sm:$0xff]  ;;  %v15372_v51 = vld [vmem:[#allocation122_spill] sm:$0xff] }
 0x600   :  { %v12773_v4 = vadd.f32 %v5169_v9, %v15368_v10  ;;  %v12776_v36 = vadd.f32 %v5170_v11, %v15369_v33  ;;  %v12779_v52 = vadd.f32 %v5171_v16, %v15370_v6  ;;  %v12782_v18 = vadd.f32 %v5172_v7, %v15371_v21  ;;  %v15373_v35 = vld [vmem:[#allocation69_spill] sm:$0xff]  ;;  %v15374_v13 = vld [vmem:[#allocation123_spill] sm:$0xff]  ;;  %v15375_v38 = vld [vmem:[#allocation70_spill] sm:$0xff] }
 0x601   :  { %15366 = vst [vmem:[#allocation111_spill] sm:$0xff] %v12767_v17  ;;  %15367 = vst [vmem:[#allocation53_spill] sm:$0xff] %v12770_v14  ;;  %v12785_v2 = vadd.f32 %v5173_v25, %v15372_v51  ;;  %v12788_v56 = vadd.f32 %v5174_v12, %v15373_v35  ;;  %v12791_v53 = vadd.f32 %v5175_v32, %v15374_v13  ;;  %v15376_v11 = vld [vmem:[#allocation19_spill] sm:$0xff]  ;;  %v15380_v25 = vld [vmem:[#allocation109_spill] sm:$0xff] }
 0x602   :  { %v12794_v9 = vadd.f32 %v5176_v49, %v15375_v38  ;;  %v12797_v57 = vadd.f32 %v5177_v5, %v15376_v11  ;;  %v15377_v16 = vld [vmem:[#allocation71_spill] sm:$0xff]  ;;  %v12806_v10 = vadd.f32 %v5180_v0, %v15380_v25  ;;  %v15382_v33 = vld [vmem:[#allocation21_spill] sm:$0xff]  ;;  %v15384_v32 = vld [vmem:[#allocation72_spill] sm:$0xff]  ;;  %v12836_v14 = vadd.f32 %v5190_v63, %v15400_v45 }
 0x603   :  { %v12800_v42 = vadd.f32 %v5178_v1, %v15377_v16  ;;  %v15378_v7 = vld [vmem:[#allocation91_spill] sm:$0xff]  ;;  %v12809_v6 = vadd.f32 %v5181_v62, %v15382_v33  ;;  %v12812_v21 = vadd.f32 %v5182_v43, %v15384_v32  ;;  %v15386_v49 = vld [vmem:[#allocation92_spill] sm:$0xff]  ;;  %v15388_v5 = vld [vmem:[#allocation110_spill] sm:$0xff]  ;;  %v12845_v17 = vadd.f32 %v5193_v44, %v15406_v47 }
 0x604   :  { %v12803_v60 = vadd.f32 %v5179_v30, %v15378_v7  ;;  %15381 = vst [vmem:[#allocation54_spill] sm:$0xff] %v12806_v10  ;;  %v5264_v12 = vld [vmem:[#allocation4 + $0x31] sm:$0xff]  ;;  %v12815_v51 = vadd.f32 %v5183_v61, %v15386_v49  ;;  %v12818_v35 = vadd.f32 %v5184_v39, %v15388_v5  ;;  %v5265_v1 = vld [vmem:[#allocation4 + $0x39] sm:$0xff]  ;;  %v5266_v13 = vld [vmem:[#allocation4 + $0x49] sm:$0xff]  ;;  %v12848_v27 = vadd.f32 %v5194_v34, %v15408_v59 }
 0x605   :  { %15383 = vst [vmem:[#allocation112_spill] sm:$0xff] %v12809_v6  ;;  %15385 = vst [vmem:[#allocation59_spill] sm:$0xff] %v12812_v21  ;;  %v5267_v30 = vld [vmem:[#allocation4 + $0x51] sm:$0xff]  ;;  %v5268_v38 = vld [vmem:[#allocation4 + $0x61] sm:$0xff] }
 0x606   :  { %15379 = vst [vmem:[#allocation57_spill] sm:$0xff] %v12803_v60  ;;  %15387 = vst [vmem:[#allocation104_spill] sm:$0xff] %v12815_v51  ;;  %v15390_v11 = vld [vmem:[#allocation38_spill] sm:$0xff]  ;;  %v15394_v62 = vld [vmem:[#allocation93_spill] sm:$0xff] }
 0x607   :  { %15389 = vst [vmem:[#allocation60_spill] sm:$0xff] %v12818_v35  ;;  %v12821_v0 = vadd.f32 %v5185_v46, %v15390_v11  ;;  %v15392_v16 = vld [vmem:[#allocation74_spill] sm:$0xff]  ;;  %v12827_v25 = vadd.f32 %v5187_v8, %v15394_v62  ;;  %v15396_v43 = vld [vmem:[#allocation75_spill] sm:$0xff]  ;;  %v15398_v5 = vld [vmem:[#allocation40_spill] sm:$0xff] }
 0x608   :  { %v12824_v7 = vadd.f32 %v5186_v50, %v15392_v16  ;;  %v12830_v33 = vadd.f32 %v5188_v15, %v15396_v43  ;;  %v5269_v61 = vld [vmem:[#allocation4 + $0x69] sm:$0xff]  ;;  %v5270_v32 = vld [vmem:[#allocation4 + $0x79] sm:$0xff]  ;;  %v12833_v58 = vadd.f32 %v5189_v19, %v15398_v5  ;;  %15401 = vst [vmem:[#allocation67_spill] sm:$0xff] %v12836_v14  ;;  %v5299_v8 = vld [vmem:[#allocation4 + $0x201] sm:$0xff] }
 0x609   :  { %15391 = vst [vmem:[#allocation113_spill] sm:$0xff] %v12821_v0  ;;  %15395 = vst [vmem:[#allocation58_spill] sm:$0xff] %v12827_v25  ;;  %v5297_v39 = vld [vmem:[#allocation4 + $0x1e9] sm:$0xff]  ;;  %v5298_v49 = vld [vmem:[#allocation4 + $0x1f9] sm:$0xff] }
 0x60a   :  { %15393 = vst [vmem:[#allocation61_spill] sm:$0xff] %v12824_v7  ;;  %15397 = vst [vmem:[#allocation66_spill] sm:$0xff] %v12830_v33  ;;  %v15402_v46 = vld [vmem:[#allocation25_spill] sm:$0xff]  ;;  %v5300_v62 = vld [vmem:[#allocation4 + $0x211] sm:$0xff] }
 0x60b   :  { %15399 = vst [vmem:[#allocation114_spill] sm:$0xff] %v12833_v58  ;;  %v12839_v11 = vadd.f32 %v5191_v31, %v15402_v46  ;;  %v15404_v50 = vld [vmem:[#allocation77_spill] sm:$0xff]  ;;  %v5301_v15 = vld [vmem:[#allocation4 + $0x219] sm:$0xff]  ;;  %15407 = vst [vmem:[#allocation115_spill] sm:$0xff] %v12845_v17 }
 0x60c   :  { %v12842_v16 = vadd.f32 %v5192_v22, %v15404_v50  ;;  %v5302_v43 = vld [vmem:[#allocation4 + $0x229] sm:$0xff]  ;;  %15409 = vst [vmem:[#allocation73_spill] sm:$0xff] %v12848_v27  ;;  %v15412_v45 = vld [vmem:[#allocation79_spill] sm:$0xff]  ;;  %v5304_v46 = vld [vmem:[#allocation4 + $0x241] sm:$0xff] }
 0x60d   :  { %15403 = vst [vmem:[#allocation105_spill] sm:$0xff] %v12839_v11  ;;  %v15410_v19 = vld [vmem:[#allocation41_spill] sm:$0xff]  ;;  %v12854_v63 = vadd.f32 %v5196_v20, %v15412_v45  ;;  %v5303_v31 = vld [vmem:[#allocation4 + $0x231] sm:$0xff]  ;;  %v5306_v59 = vld [vmem:[#allocation4 + $0x259] sm:$0xff] }
 0x60e   :  { %15405 = vst [vmem:[#allocation68_spill] sm:$0xff] %v12842_v16  ;;  %v12851_v5 = vadd.f32 %v5195_v40, %v15410_v19  ;;  %v5305_v22 = vld [vmem:[#allocation4 + $0x249] sm:$0xff]  ;;  %v15414_v50 = vld [vmem:[#allocation95_spill] sm:$0xff]  ;;  %v12860_v16 = vadd.f32 %v5198_v37, %v15416_v3  ;;  %v5307_v34 = vld [vmem:[#allocation4 + $0x261] sm:$0xff] }
 0x60f   :  { %15413 = vst [vmem:[#allocation30_spill] sm:$0xff] %v12854_v63  ;;  %v12857_v41 = vadd.f32 %v5197_v26, %v15414_v50  ;;  %v15418_v47 = vld [vmem:[#allocation26_spill] sm:$0xff]  ;;  %v12868_v40 = vld [vmem:[%s14346_s4 + $0x7] ss:$0 sm:$0xff]  ;;  %v5309_v19 = vld [vmem:[#allocation4 + $0x279] sm:$0xff] }
 0x610   :  { %15411 = vst [vmem:[#allocation62_spill] sm:$0xff] %v12851_v5  ;;  %15417 = vst [vmem:[#allocation16_spill] sm:$0xff] %v12860_v16  ;;  %v12863_v44 = vadd.f32 %v5199_v54, %v15418_v47  ;;  %v5308_v27 = vld [vmem:[#allocation4 + $0x271] sm:$0xff]  ;;  %v5336_v20 = vmul.f32 %v12868_v40, %v5264_v12  ;;  %v5310_v45 = vld [vmem:[#allocation4 + $0x289] sm:$0xff]  ;;  %v5337_v50 = vmul.f32 %v12868_v40, %v5265_v1 }
 0x611   :  { %15415 = vst [vmem:[#allocation116_spill] sm:$0xff] %v12857_v41  ;;  %15420 = vst [vmem:[#allocation97_spill] sm:$0xff] %v12868_v40  ;;  %v5311_v26 = vld [vmem:[#allocation4 + $0x291] sm:$0xff]  ;;  %v5338_v3 = vmul.f32 %v12868_v40, %v5266_v13  ;;  %v5339_v37 = vmul.f32 %v12868_v40, %v5267_v30  ;;  %v5340_v54 = vmul.f32 %v12868_v40, %v5268_v38  ;;  %v5312_v47 = vld [vmem:[#allocation4 + $0x2a1] sm:$0xff] }
 0x612   :  { %15419 = vst [vmem:[#allocation63_spill] sm:$0xff] %v12863_v44  ;;  %v5313_v44 = vld [vmem:[#allocation4 + $0x2a9] sm:$0xff]  ;;  %v5314_v16 = vld [vmem:[#allocation4 + $0x2b9] sm:$0xff]  ;;  %v5341_v41 = vmul.f32 %v12868_v40, %v5269_v61  ;;  %v12877_v63 = vmul.f32 %v12868_v40, %v5270_v32  ;;  %v5369_v12 = vmul.f32 %v12868_v40, %v5297_v39  ;;  %v5370_v5 = vmul.f32 %v12868_v40, %v5298_v49  ;;  %v5315_v17 = vld [vmem:[#allocation4 + $0x2c1] sm:$0xff] }
 0x613   :  { %v5316_v1 = vld [vmem:[#allocation4 + $0x2d1] sm:$0xff]  ;;  %v5317_v11 = vld [vmem:[#allocation4 + $0x2d9] sm:$0xff]  ;;  %v5371_v13 = vmul.f32 %v12868_v40, %v5299_v8  ;;  %v5372_v30 = vmul.f32 %v12868_v40, %v5300_v62  ;;  %v5373_v38 = vmul.f32 %v12868_v40, %v5301_v15  ;;  %v5374_v14 = vmul.f32 %v12868_v40, %v5302_v43  ;;  %v5318_v58 = vld [vmem:[#allocation4 + $0x2e9] sm:$0xff] }
 0x614   :  { %15421 = vst [vmem:[#allocation117_spill] sm:$0xff] %v12877_v63  ;;  %v5319_v61 = vld [vmem:[#allocation4 + $0x2f1] sm:$0xff]  ;;  %v5320_v33 = vld [vmem:[#allocation4 + $0x301] sm:$0xff]  ;;  %v5375_v32 = vmul.f32 %v12868_v40, %v5303_v31  ;;  %v5376_v39 = vmul.f32 %v12868_v40, %v5304_v46  ;;  %v5377_v49 = vmul.f32 %v12868_v40, %v5305_v22  ;;  %v5378_v63 = vmul.f32 %v12868_v40, %v5306_v59  ;;  %v5321_v25 = vld [vmem:[#allocation4 + $0x309] sm:$0xff] }
 0x615   :  { %v5322_v7 = vld [vmem:[#allocation4 + $0x319] sm:$0xff]  ;;  %v5323_v8 = vld [vmem:[#allocation4 + $0x321] sm:$0xff]  ;;  %v5379_v62 = vmul.f32 %v12868_v40, %v5307_v34  ;;  %v5380_v15 = vmul.f32 %v12868_v40, %v5308_v27  ;;  %v5381_v43 = vmul.f32 %v12868_v40, %v5309_v19  ;;  %v5382_v0 = vmul.f32 %v12868_v40, %v5310_v45  ;;  %v5324_v35 = vld [vmem:[#allocation4 + $0x331] sm:$0xff] }
 0x616   :  { %v5325_v51 = vld [vmem:[#allocation4 + $0x339] sm:$0xff]  ;;  %v5326_v31 = vld [vmem:[#allocation4 + $0x349] sm:$0xff]  ;;  %v5383_v46 = vmul.f32 %v12868_v40, %v5311_v26  ;;  %v5384_v22 = vmul.f32 %v12868_v40, %v5312_v47  ;;  %v5385_v59 = vmul.f32 %v12868_v40, %v5313_v44  ;;  %v5386_v21 = vmul.f32 %v12868_v40, %v5314_v16  ;;  %v5327_v6 = vld [vmem:[#allocation4 + $0x351] sm:$0xff] }
 0x617   :  { %v5387_v34 = vmul.f32 %v12868_v40, %v5315_v17  ;;  %v5388_v27 = vmul.f32 %v12868_v40, %v5316_v1  ;;  %v5389_v19 = vmul.f32 %v12868_v40, %v5317_v11  ;;  %v5390_v45 = vmul.f32 %v12868_v40, %v5318_v58 }
 0x618   :  { %v5391_v10 = vmul.f32 %v12868_v40, %v5319_v61  ;;  %v5392_v60 = vmul.f32 %v12868_v40, %v5320_v33  ;;  %v5393_v26 = vmul.f32 %v12868_v40, %v5321_v25  ;;  %v5394_v47 = vmul.f32 %v12868_v40, %v5322_v7  ;;  %v5464_v33 = vld [vmem:[#allocation4 + $0x32] sm:$0xff] }
 0x619   :  { %v5395_v44 = vmul.f32 %v12868_v40, %v5323_v8  ;;  %v5396_v16 = vmul.f32 %v12868_v40, %v5324_v35  ;;  %v5397_v17 = vmul.f32 %v12868_v40, %v5325_v51  ;;  %v5398_v1 = vmul.f32 %v12868_v40, %v5326_v31  ;;  %v5498_v31 = vld [vmem:[#allocation4 + $0x1fa] sm:$0xff] }
 0x61a   :  { %v5399_v11 = vmul.f32 %v12868_v40, %v5327_v6  ;;  %v12911_v58 = vadd.f32 %v5336_v20, %v12749_v28  ;;  %v12914_v61 = vadd.f32 %v5337_v50, %v12752_v29  ;;  %v12917_v25 = vadd.f32 %v5338_v3, %v12755_v48  ;;  %v15429_v50 = vld [vmem:[#allocation104_spill] sm:$0xff] }
 0x61b   :  { %v12920_v7 = vadd.f32 %v5339_v37, %v12758_v24  ;;  %v12923_v35 = vadd.f32 %v5340_v54, %v12761_v55  ;;  %v12926_v51 = vadd.f32 %v5341_v41, %v12764_v23  ;;  %v12929_v6 = vadd.f32 %v5369_v12, %v12773_v4  ;;  %v15430_v37 = vld [vmem:[#allocation60_spill] sm:$0xff]  ;;  %v5466_v12 = vld [vmem:[#allocation4 + $0x4a] sm:$0xff] }
 0x61c   :  { %v12932_v28 = vadd.f32 %v5370_v5, %v12776_v36  ;;  %v12935_v29 = vadd.f32 %v5371_v13, %v12779_v52  ;;  %v12938_v48 = vadd.f32 %v5372_v30, %v12782_v18  ;;  %v12941_v24 = vadd.f32 %v5373_v38, %v12785_v2  ;;  %v12958_v36 = vld [vmem:[%s14346_s4 + $0x8] ss:$0 sm:$0xff]  ;;  %v15426_v2 = vld [vmem:[#allocation54_spill] sm:$0xff]  ;;  %v15428_v5 = vld [vmem:[#allocation59_spill] sm:$0xff] }
 0x61d   :  { %15422 = vst [vmem:[#allocation106_spill] sm:$0xff] %v12920_v7  ;;  %15423 = vst [vmem:[#allocation118_spill] sm:$0xff] %v12923_v35  ;;  %v12944_v55 = vadd.f32 %v5374_v14, %v12788_v56  ;;  %v12947_v41 = vadd.f32 %v5375_v32, %v12791_v53  ;;  %v12950_v23 = vadd.f32 %v5376_v39, %v12794_v9  ;;  %v15425_v18 = vld [vmem:[#allocation57_spill] sm:$0xff]  ;;  %v15427_v53 = vld [vmem:[#allocation112_spill] sm:$0xff] }
 0x61e   :  { %15424 = vst [vmem:[#allocation64_spill] sm:$0xff] %v12926_v51  ;;  %v12953_v4 = vadd.f32 %v5377_v49, %v12797_v57  ;;  %v12961_v52 = vadd.f32 %v5378_v63, %v12800_v42  ;;  %v12964_v14 = vadd.f32 %v5379_v62, %v15425_v18  ;;  %v12967_v56 = vadd.f32 %v5380_v15, %v15426_v2  ;;  %v5465_v57 = vld [vmem:[#allocation4 + $0x3a] sm:$0xff]  ;;  %v15431_v63 = vld [vmem:[#allocation113_spill] sm:$0xff]  ;;  %v5467_v13 = vld [vmem:[#allocation4 + $0x52] sm:$0xff] }
 0x61f   :  { %v12970_v9 = vadd.f32 %v5381_v43, %v15427_v53  ;;  %v12973_v20 = vadd.f32 %v5382_v0, %v15428_v5  ;;  %v12976_v3 = vadd.f32 %v5383_v46, %v15429_v50  ;;  %v12979_v42 = vadd.f32 %v5384_v22, %v15430_v37  ;;  %v5468_v30 = vld [vmem:[#allocation4 + $0x62] sm:$0xff]  ;;  %v5497_v38 = vld [vmem:[#allocation4 + $0x1ea] sm:$0xff]  ;;  %v5500_v22 = vld [vmem:[#allocation4 + $0x212] sm:$0xff] }
 0x620   :  { %v12982_v54 = vadd.f32 %v5385_v59, %v15431_v63  ;;  %v15433_v32 = vld [vmem:[#allocation61_spill] sm:$0xff]  ;;  %v15435_v49 = vld [vmem:[#allocation58_spill] sm:$0xff]  ;;  %v5501_v59 = vld [vmem:[#allocation4 + $0x21a] sm:$0xff] }
 0x621   :  { %v12985_v39 = vadd.f32 %v5386_v21, %v15433_v32  ;;  %v12988_v8 = vadd.f32 %v5387_v34, %v15435_v49  ;;  %v15437_v0 = vld [vmem:[#allocation66_spill] sm:$0xff]  ;;  %v5499_v46 = vld [vmem:[#allocation4 + $0x202] sm:$0xff]  ;;  %v15441_v18 = vld [vmem:[#allocation67_spill] sm:$0xff] }
 0x622   :  { %15432 = vst [vmem:[#allocation119_spill] sm:$0xff] %v12982_v54  ;;  %v12991_v62 = vadd.f32 %v5388_v27, %v15437_v0  ;;  %v15439_v15 = vld [vmem:[#allocation114_spill] sm:$0xff]  ;;  %v12997_v2 = vadd.f32 %v5390_v45, %v15441_v18  ;;  %v15443_v53 = vld [vmem:[#allocation105_spill] sm:$0xff]  ;;  %v15445_v21 = vld [vmem:[#allocation68_spill] sm:$0xff] }
 0x623   :  { %15434 = vst [vmem:[#allocation107_spill] sm:$0xff] %v12985_v39  ;;  %15436 = vst [vmem:[#allocation81_spill] sm:$0xff] %v12988_v8  ;;  %v12994_v43 = vadd.f32 %v5389_v19, %v15439_v15  ;;  %v13000_v5 = vadd.f32 %v5391_v10, %v15443_v53  ;;  %v13003_v50 = vadd.f32 %v5392_v60, %v15445_v21  ;;  %v15447_v34 = vld [vmem:[#allocation115_spill] sm:$0xff]  ;;  %v5502_v27 = vld [vmem:[#allocation4 + $0x22a] sm:$0xff] }
 0x624   :  { %15438 = vst [vmem:[#allocation96_spill] sm:$0xff] %v12991_v62  ;;  %15442 = vst [vmem:[#allocation9_spill] sm:$0xff] %v12997_v2  ;;  %v13006_v37 = vadd.f32 %v5393_v26, %v15447_v34  ;;  %v5503_v63 = vld [vmem:[#allocation4 + $0x232] sm:$0xff]  ;;  %v5504_v19 = vld [vmem:[#allocation4 + $0x242] sm:$0xff] }
 0x625   :  { %15440 = vst [vmem:[#allocation82_spill] sm:$0xff] %v12994_v43  ;;  %15444 = vst [vmem:[#allocation83_spill] sm:$0xff] %v13000_v5  ;;  %v15449_v32 = vld [vmem:[#allocation73_spill] sm:$0xff]  ;;  %v15451_v0 = vld [vmem:[#allocation62_spill] sm:$0xff] }
 0x626   :  { %15446 = vst [vmem:[#allocation89_spill] sm:$0xff] %v13003_v50  ;;  %15448 = vst [vmem:[#allocation84_spill] sm:$0xff] %v13006_v37  ;;  %v13009_v49 = vadd.f32 %v5394_v47, %v15449_v32  ;;  %v13012_v15 = vadd.f32 %v5395_v44, %v15451_v0  ;;  %v15453_v45 = vld [vmem:[#allocation30_spill] sm:$0xff]  ;;  %v15455_v10 = vld [vmem:[#allocation116_spill] sm:$0xff]  ;;  %v5536_v44 = vmul.f32 %v12958_v36, %v5464_v33 }
 0x627   :  { %v13015_v18 = vadd.f32 %v5396_v16, %v15453_v45  ;;  %v13018_v53 = vadd.f32 %v5397_v17, %v15455_v10  ;;  %v5505_v60 = vld [vmem:[#allocation4 + $0x24a] sm:$0xff]  ;;  %v5506_v21 = vld [vmem:[#allocation4 + $0x25a] sm:$0xff]  ;;  %v5507_v51 = vld [vmem:[#allocation4 + $0x262] sm:$0xff]  ;;  %v5537_v16 = vmul.f32 %v12958_v36, %v5465_v57  ;;  %v5538_v10 = vmul.f32 %v12958_v36, %v5466_v12 }
 0x628   :  { %15450 = vst [vmem:[#allocation85_spill] sm:$0xff] %v13009_v49  ;;  %15452 = vst [vmem:[#allocation86_spill] sm:$0xff] %v13012_v15  ;;  %v15457_v26 = vld [vmem:[#allocation16_spill] sm:$0xff]  ;;  %v15459_v35 = vld [vmem:[#allocation63_spill] sm:$0xff]  ;;  %v5570_v33 = vmul.f32 %v12958_v36, %v5498_v31  ;;  %v5571_v57 = vmul.f32 %v12958_v36, %v5499_v46  ;;  %v5578_v46 = vmul.f32 %v12958_v36, %v5506_v21 }
 0x629   :  { %15454 = vst [vmem:[#allocation87_spill] sm:$0xff] %v13015_v18  ;;  %15456 = vst [vmem:[#allocation88_spill] sm:$0xff] %v13018_v53  ;;  %v13021_v34 = vadd.f32 %v5398_v1, %v15457_v26  ;;  %v13024_v40 = vadd.f32 %v5399_v11, %v15459_v35  ;;  %v5508_v47 = vld [vmem:[#allocation4 + $0x272] sm:$0xff]  ;;  %v5509_v32 = vld [vmem:[#allocation4 + $0x27a] sm:$0xff]  ;;  %v13030_v53 = vmul.f32 %v12958_v36, %v5467_v13 }
 0x62a   :  { %v5510_v7 = vld [vmem:[#allocation4 + $0x28a] sm:$0xff]  ;;  %v5511_v0 = vld [vmem:[#allocation4 + $0x292] sm:$0xff]  ;;  %v5512_v45 = vld [vmem:[#allocation4 + $0x2a2] sm:$0xff]  ;;  %v13033_v1 = vmul.f32 %v12958_v36, %v5468_v30  ;;  %v5569_v11 = vmul.f32 %v12958_v36, %v5497_v38  ;;  %v5573_v18 = vmul.f32 %v12958_v36, %v5501_v59  ;;  %v5575_v30 = vmul.f32 %v12958_v36, %v5503_v63 }
 0x62b   :  { %15458 = vst [vmem:[#allocation48_spill] sm:$0xff] %v13021_v34  ;;  %15460 = vst [vmem:[#allocation51_spill] sm:$0xff] %v13024_v40  ;;  %v5513_v17 = vld [vmem:[#allocation4 + $0x2aa] sm:$0xff]  ;;  %v5514_v35 = vld [vmem:[#allocation4 + $0x2ba] sm:$0xff]  ;;  %v5572_v34 = vmul.f32 %v12958_v36, %v5500_v22  ;;  %v5576_v38 = vmul.f32 %v12958_v36, %v5504_v19  ;;  %v5579_v22 = vmul.f32 %v12958_v36, %v5507_v51 }
 0x62c   :  { %15461 = vst [vmem:[#allocation102_spill] sm:$0xff] %v13030_v53  ;;  %15462 = vst [vmem:[#allocation55_spill] sm:$0xff] %v13033_v1  ;;  %v5515_v26 = vld [vmem:[#allocation4 + $0x2c2] sm:$0xff]  ;;  %v5516_v40 = vld [vmem:[#allocation4 + $0x2d2] sm:$0xff]  ;;  %v5574_v53 = vmul.f32 %v12958_v36, %v5502_v27  ;;  %v5577_v1 = vmul.f32 %v12958_v36, %v5505_v60  ;;  %v5580_v59 = vmul.f32 %v12958_v36, %v5508_v47 }
 0x62d   :  { %v5517_v12 = vld [vmem:[#allocation4 + $0x2da] sm:$0xff]  ;;  %v5518_v15 = vld [vmem:[#allocation4 + $0x2ea] sm:$0xff]  ;;  %v5519_v13 = vld [vmem:[#allocation4 + $0x2f2] sm:$0xff]  ;;  %v5581_v50 = vmul.f32 %v12958_v36, %v5509_v32  ;;  %v5582_v63 = vmul.f32 %v12958_v36, %v5510_v7  ;;  %v5583_v19 = vmul.f32 %v12958_v36, %v5511_v0  ;;  %v5584_v60 = vmul.f32 %v12958_v36, %v5512_v45 }
 0x62e   :  { %v5520_v49 = vld [vmem:[#allocation4 + $0x302] sm:$0xff]  ;;  %v5521_v37 = vld [vmem:[#allocation4 + $0x30a] sm:$0xff]  ;;  %v5522_v31 = vld [vmem:[#allocation4 + $0x31a] sm:$0xff]  ;;  %v5585_v43 = vmul.f32 %v12958_v36, %v5513_v17  ;;  %v5586_v21 = vmul.f32 %v12958_v36, %v5514_v35  ;;  %v5587_v51 = vmul.f32 %v12958_v36, %v5515_v26  ;;  %v5588_v47 = vmul.f32 %v12958_v36, %v5516_v40 }
 0x62f   :  { %v5523_v5 = vld [vmem:[#allocation4 + $0x322] sm:$0xff]  ;;  %v5524_v2 = vld [vmem:[#allocation4 + $0x332] sm:$0xff]  ;;  %v5525_v27 = vld [vmem:[#allocation4 + $0x33a] sm:$0xff]  ;;  %v5589_v32 = vmul.f32 %v12958_v36, %v5517_v12  ;;  %v5590_v39 = vmul.f32 %v12958_v36, %v5518_v15  ;;  %v5591_v7 = vmul.f32 %v12958_v36, %v5519_v13  ;;  %v5592_v0 = vmul.f32 %v12958_v36, %v5520_v49 }
 0x630   :  { %v5526_v62 = vld [vmem:[#allocation4 + $0x34a] sm:$0xff]  ;;  %v5527_v8 = vld [vmem:[#allocation4 + $0x352] sm:$0xff]  ;;  %v5593_v45 = vmul.f32 %v12958_v36, %v5521_v37  ;;  %v5594_v17 = vmul.f32 %v12958_v36, %v5522_v31  ;;  %v5595_v54 = vmul.f32 %v12958_v36, %v5523_v5  ;;  %v5596_v35 = vmul.f32 %v12958_v36, %v5524_v2 }
 0x631   :  { %v5597_v26 = vmul.f32 %v12958_v36, %v5525_v27  ;;  %v5598_v40 = vmul.f32 %v12958_v36, %v5526_v62  ;;  %v5599_v12 = vmul.f32 %v12958_v36, %v5527_v8  ;;  %v13067_v15 = vadd.f32 %v5536_v44, %v12911_v58  ;;  %v15478_v27 = vld [vmem:[#allocation88_spill] sm:$0xff] }
 0x632   :  { %v13070_v13 = vadd.f32 %v5537_v16, %v12914_v61  ;;  %v13073_v37 = vadd.f32 %v5538_v10, %v12917_v25  ;;  %v13076_v49 = vadd.f32 %v5569_v11, %v12929_v6  ;;  %v13079_v2 = vadd.f32 %v5570_v33, %v12932_v28  ;;  %v15473_v10 = vld [vmem:[#allocation89_spill] sm:$0xff]  ;;  %v15474_v11 = vld [vmem:[#allocation84_spill] sm:$0xff] }
 0x633   :  { %15463 = vst [vmem:[#allocation56_spill] sm:$0xff] %v13067_v15  ;;  %v13082_v5 = vadd.f32 %v5571_v57, %v12935_v29  ;;  %v13085_v8 = vadd.f32 %v5572_v34, %v12938_v48  ;;  %v13088_v58 = vadd.f32 %v5573_v18, %v12941_v24  ;;  %v13091_v61 = vadd.f32 %v5574_v53, %v12944_v55  ;;  %v15475_v57 = vld [vmem:[#allocation85_spill] sm:$0xff] }
 0x634   :  { %15464 = vst [vmem:[#allocation103_spill] sm:$0xff] %v13070_v13  ;;  %15465 = vst [vmem:[#allocation35_spill] sm:$0xff] %v13073_v37  ;;  %v13094_v25 = vadd.f32 %v5575_v30, %v12947_v41  ;;  %v13097_v6 = vadd.f32 %v5576_v38, %v12950_v23  ;;  %v13100_v28 = vadd.f32 %v5577_v1, %v12953_v4  ;;  %v15476_v38 = vld [vmem:[#allocation86_spill] sm:$0xff] }
 0x635   :  { %v13103_v29 = vadd.f32 %v5578_v46, %v12961_v52  ;;  %v13106_v48 = vadd.f32 %v5579_v22, %v12964_v14  ;;  %v13109_v24 = vadd.f32 %v5580_v59, %v12967_v56  ;;  %v13112_v55 = vadd.f32 %v5581_v50, %v12970_v9  ;;  %v15466_v52 = vld [vmem:[#allocation119_spill] sm:$0xff]  ;;  %v15468_v56 = vld [vmem:[#allocation81_spill] sm:$0xff]  ;;  %v15469_v9 = vld [vmem:[#allocation96_spill] sm:$0xff] }
 0x636   :  { %v13115_v41 = vadd.f32 %v5582_v63, %v12973_v20  ;;  %v13118_v23 = vadd.f32 %v5583_v19, %v12976_v3  ;;  %v13121_v4 = vadd.f32 %v5584_v60, %v12979_v42  ;;  %v13124_v62 = vadd.f32 %v5585_v43, %v15466_v52  ;;  %v15467_v14 = vld [vmem:[#allocation107_spill] sm:$0xff]  ;;  %v15470_v20 = vld [vmem:[#allocation82_spill] sm:$0xff]  ;;  %v15471_v3 = vld [vmem:[#allocation9_spill] sm:$0xff] }
 0x637   :  { %v13127_v18 = vadd.f32 %v5586_v21, %v15467_v14  ;;  %v13130_v53 = vadd.f32 %v5587_v51, %v15468_v56  ;;  %v13133_v50 = vadd.f32 %v5588_v47, %v15469_v9  ;;  %v13136_v34 = vadd.f32 %v5589_v32, %v15470_v20  ;;  %v15472_v42 = vld [vmem:[#allocation83_spill] sm:$0xff]  ;;  %v5271_v46 = vld [vmem:[#allocation4 + $0x81] sm:$0xff]  ;;  %v5469_v22 = vld [vmem:[#allocation4 + $0x6a] sm:$0xff] }
 0x638   :  { %v13139_v44 = vadd.f32 %v5590_v39, %v15471_v3  ;;  %v13142_v16 = vadd.f32 %v5591_v7, %v15472_v42  ;;  %v5073_v43 = vld [vmem:[#allocation4 + $0x98] sm:$0xff]  ;;  %v13145_v1 = vadd.f32 %v5592_v0, %v15473_v10  ;;  %v13148_v33 = vadd.f32 %v5593_v45, %v15474_v11  ;;  %v15479_v19 = vld [vmem:[#allocation48_spill] sm:$0xff]  ;;  %v5074_v47 = vld [vmem:[#allocation4 + $0xa8] sm:$0xff] }
 0x639   :  { %v13151_v30 = vadd.f32 %v5594_v17, %v15475_v57  ;;  %v13154_v31 = vadd.f32 %v5595_v54, %v15476_v38  ;;  %v15477_v39 = vld [vmem:[#allocation87_spill] sm:$0xff]  ;;  %v13160_v63 = vadd.f32 %v5597_v26, %v15478_v27  ;;  %v13163_v60 = vadd.f32 %v5598_v40, %v15479_v19  ;;  %v15483_v7 = vld [vmem:[#allocation106_spill] sm:$0xff]  ;;  %v15487_v40 = vld [vmem:[#allocation37_spill] sm:$0xff] }
 0x63a   :  { %v13157_v59 = vadd.f32 %v5596_v35, %v15477_v39  ;;  %v15481_v21 = vld [vmem:[#allocation51_spill] sm:$0xff]  ;;  %v15484_v0 = vld [vmem:[#allocation102_spill] sm:$0xff]  ;;  %v5666_v45 = vsel %vm2894_vm13, %v13067_v15, 0.0  ;;  %v5667_v17 = vsel %vm2894_vm13, %v13070_v13, 0.0  ;;  %v5669_v35 = vsel %vm2894_vm13, %v13073_v37, 0.0  ;;  %v15489_v56 = vld [vmem:[#allocation33_spill] sm:$0xff] }
 0x63b   :  { %15480 = vst [vmem:[#allocation13_spill] sm:$0xff] %v13163_v60  ;;  %v13166_v51 = vadd.f32 %v5599_v12, %v15481_v21  ;;  %v5272_v32 = vld [vmem:[#allocation4 + $0x91] sm:$0xff]  ;;  %v13170_v54 = vadd.f32 %v15484_v0, %v15483_v7  ;;  %v15488_v12 = vld [vmem:[#allocation101_spill] sm:$0xff]  ;;  %v15490_v9 = vld [vmem:[#allocation52_spill] sm:$0xff]  ;;  %v5668_v42 = vadd.f32 %v5667_v17, %v5666_v45  ;;  %v5541_v21 = vmul.f32 %v12958_v36, %v5469_v22 }
 0x63c   :  { %v15486_v26 = vld [vmem:[#allocation90_spill] sm:$0xff]  ;;  %v5145_v14 = vmul.f32 %v15488_v12, %v5073_v43  ;;  %v5208_v20 = vadd.f32 %v15490_v9, %v15489_v56  ;;  %v5470_v3 = vld [vmem:[#allocation4 + $0x7a] sm:$0xff]  ;;  %v15491_v57 = vld [vmem:[#allocation97_spill] sm:$0xff]  ;;  %v5146_v43 = vmul.f32 %v15488_v12, %v5074_v47 }
 0x63d   :  { %15482 = vst [vmem:[#allocation15_spill] sm:$0xff] %v13166_v51  ;;  %15485 = vst [vmem:[#allocation18_spill] sm:$0xff] %v13170_v54  ;;  %v13180_v52 = vadd.f32 %v15487_v40, %v15486_v26  ;;  %v5075_v10 = vld [vmem:[#allocation4 + $0xb0] sm:$0xff]  ;;  %v5273_v11 = vld [vmem:[#allocation4 + $0x99] sm:$0xff]  ;;  %v5343_v38 = vmul.f32 %v15491_v57, %v5271_v46  ;;  %v5344_v56 = vmul.f32 %v15491_v57, %v5272_v32 }
 0x63e   :  { %v15492_v39 = vld [vmem:[#allocation111_spill] sm:$0xff]  ;;  %v15493_v27 = vld [vmem:[#allocation117_spill] sm:$0xff]  ;;  %v15494_v7 = vld [vmem:[#allocation118_spill] sm:$0xff]  ;;  %v5670_v17 = vadd.f32 %v5669_v35, %v5668_v42  ;;  %v5147_v47 = vmul.f32 %v15488_v12, %v5075_v10  ;;  %v5345_v32 = vmul.f32 %v15491_v57, %v5273_v11 }
 0x63f   :  { %v5406_v19 = vadd.f32 %v15493_v27, %v15492_v39  ;;  %v15495_v0 = vld [vmem:[#allocation55_spill] sm:$0xff]  ;;  %v5471_v45 = vld [vmem:[#allocation4 + $0x82] sm:$0xff]  ;;  %v5542_v39 = vmul.f32 %v12958_v36, %v5470_v3  ;;  %v5408_v60 = vadd.f32 %v5344_v56, %v5208_v20 }
 0x640   :  { %v13191_v26 = vadd.f32 %v15495_v0, %v15494_v7  ;;  %v15497_v40 = vld [vmem:[#allocation39_spill] sm:$0xff]  ;;  %v5076_v9 = vld [vmem:[#allocation4 + $0xc0] sm:$0xff]  ;;  %v5274_v13 = vld [vmem:[#allocation4 + $0xa9] sm:$0xff]  ;;  %v5671_v7 = vsel %vm2894_vm13, %v13170_v54, 0.0 }
 0x641   :  { %v5209_v37 = vadd.f32 %v5145_v14, %v15497_v40  ;;  %v15498_v46 = vld [vmem:[#allocation53_spill] sm:$0xff]  ;;  %v15499_v27 = vld [vmem:[#allocation64_spill] sm:$0xff]  ;;  %v5472_v40 = vld [vmem:[#allocation4 + $0x92] sm:$0xff]  ;;  %v5672_v35 = vadd.f32 %v5671_v7, %v5670_v17  ;;  %v13207_v3 = vadd.f32 %v5542_v39, %v5406_v19 }
 0x642   :  { %15496 = vst [vmem:[#allocation20_spill] sm:$0xff] %v13191_v26  ;;  %v5407_v15 = vadd.f32 %v5343_v38, %v15498_v46  ;;  %v13199_v22 = vadd.f32 %v5541_v21, %v15499_v27  ;;  %v15501_v0 = vld [vmem:[#allocation32_spill] sm:$0xff]  ;;  %v5077_v42 = vld [vmem:[#allocation4 + $0xc8] sm:$0xff]  ;;  %v5275_v51 = vld [vmem:[#allocation4 + $0xb1] sm:$0xff]  ;;  %v5543_v38 = vmul.f32 %v12958_v36, %v5471_v45  ;;  %v5673_v21 = vsel %vm2894_vm13, %v13191_v26, 0.0 }
 0x643   :  { %v5210_v14 = vadd.f32 %v5146_v43, %v15501_v0  ;;  %15502 = vst [vmem:[#allocation65_spill] sm:$0xff] %v13207_v3  ;;  %v5148_v46 = vmul.f32 %v15488_v12, %v5076_v9  ;;  %v15503_v27 = vld [vmem:[#allocation22_spill] sm:$0xff]  ;;  %v5346_v43 = vmul.f32 %v15491_v57, %v5274_v13  ;;  %v5473_v0 = vld [vmem:[#allocation4 + $0x9a] sm:$0xff]  ;;  %v5674_v11 = vadd.f32 %v5673_v21, %v5672_v35 }
 0x644   :  { %15500 = vst [vmem:[#allocation120_spill] sm:$0xff] %v13199_v22  ;;  %v5211_v10 = vadd.f32 %v5147_v47, %v15503_v27  ;;  %v5078_v54 = vld [vmem:[#allocation4 + $0xd8] sm:$0xff]  ;;  %v5276_v17 = vld [vmem:[#allocation4 + $0xc1] sm:$0xff]  ;;  %v5409_v7 = vadd.f32 %v5345_v32, %v5209_v37  ;;  %v5544_v20 = vmul.f32 %v12958_v36, %v5472_v40  ;;  %v13215_v56 = vadd.f32 %v5543_v38, %v5407_v15  ;;  %v15505_v39 = vld [vmem:[#allocation34_spill] sm:$0xff] }
 0x645   :  { %v5675_v19 = vsel %vm2894_vm13, %v13199_v22, 0.0  ;;  %v5149_v45 = vmul.f32 %v15488_v12, %v5077_v42  ;;  %v5212_v9 = vadd.f32 %v5148_v46, %v15505_v39  ;;  %v5347_v47 = vmul.f32 %v15491_v57, %v5275_v51  ;;  %v5474_v27 = vld [vmem:[#allocation4 + $0xaa] sm:$0xff]  ;;  %v5079_v26 = vld [vmem:[#allocation4 + $0xe0] sm:$0xff]  ;;  %v15507_v38 = vld [vmem:[#allocation23_spill] sm:$0xff] }
 0x646   :  { %15504 = vst [vmem:[#allocation121_spill] sm:$0xff] %v13215_v56  ;;  %v5676_v13 = vadd.f32 %v5675_v19, %v5674_v11  ;;  %v5277_v35 = vld [vmem:[#allocation4 + $0xc9] sm:$0xff]  ;;  %v5410_v21 = vadd.f32 %v5346_v43, %v5210_v14  ;;  %v5545_v37 = vmul.f32 %v12958_v36, %v5473_v0  ;;  %v13223_v32 = vadd.f32 %v5544_v20, %v5408_v60  ;;  %v5475_v39 = vld [vmem:[#allocation4 + $0xb2] sm:$0xff] }
 0x647   :  { %v5677_v15 = vsel %vm2894_vm13, %v13207_v3, 0.0  ;;  %v5150_v40 = vmul.f32 %v15488_v12, %v5078_v54  ;;  %v5213_v42 = vadd.f32 %v5149_v45, %v15507_v38  ;;  %v5348_v46 = vmul.f32 %v15491_v57, %v5276_v17  ;;  %v5080_v22 = vld [vmem:[#allocation4 + $0xf0] sm:$0xff]  ;;  %v5278_v11 = vld [vmem:[#allocation4 + $0xd9] sm:$0xff]  ;;  %v5476_v38 = vld [vmem:[#allocation4 + $0xc2] sm:$0xff] }
 0x648   :  { %15506 = vst [vmem:[#allocation108_spill] sm:$0xff] %v13223_v32  ;;  %v5678_v51 = vadd.f32 %v5677_v15, %v5676_v13  ;;  %v5411_v19 = vadd.f32 %v5347_v47, %v5211_v10  ;;  %v5546_v14 = vmul.f32 %v12958_v36, %v5474_v27  ;;  %v13231_v43 = vadd.f32 %v5545_v37, %v5409_v7  ;;  %v15509_v20 = vld [vmem:[#allocation42_spill] sm:$0xff]  ;;  %v5081_v3 = vld [vmem:[#allocation4 + $0xf8] sm:$0xff]  ;;  %v5279_v13 = vld [vmem:[#allocation4 + $0xe1] sm:$0xff] }
 0x649   :  { %v5679_v60 = vsel %vm2894_vm13, %v13215_v56, 0.0  ;;  %v5151_v0 = vmul.f32 %v15488_v12, %v5079_v26  ;;  %v5214_v54 = vadd.f32 %v5150_v40, %v15509_v20  ;;  %v5349_v45 = vmul.f32 %v15491_v57, %v5277_v35  ;;  %v15511_v37 = vld [vmem:[#allocation24_spill] sm:$0xff]  ;;  %v5477_v20 = vld [vmem:[#allocation4 + $0xca] sm:$0xff] }
 0x64a   :  { %15508 = vst [vmem:[#allocation122_spill] sm:$0xff] %v13231_v43  ;;  %v5680_v17 = vadd.f32 %v5679_v60, %v5678_v51  ;;  %v5412_v15 = vadd.f32 %v5348_v46, %v5212_v9  ;;  %v5547_v10 = vmul.f32 %v12958_v36, %v5475_v39  ;;  %v13239_v47 = vadd.f32 %v5546_v14, %v5410_v21  ;;  %v5082_v56 = vld [vmem:[#allocation4 + $0x108] sm:$0xff]  ;;  %v5280_v51 = vld [vmem:[#allocation4 + $0xf1] sm:$0xff] }
 0x64b   :  { %v5681_v7 = vsel %vm2894_vm13, %v13223_v32, 0.0  ;;  %v5152_v27 = vmul.f32 %v15488_v12, %v5080_v22  ;;  %v5215_v26 = vadd.f32 %v5151_v0, %v15511_v37  ;;  %v5350_v40 = vmul.f32 %v15491_v57, %v5278_v11  ;;  %v15513_v14 = vld [vmem:[#allocation43_spill] sm:$0xff]  ;;  %v5083_v32 = vld [vmem:[#allocation4 + $0x110] sm:$0xff] }
 0x64c   :  { %15510 = vst [vmem:[#allocation69_spill] sm:$0xff] %v13239_v47  ;;  %v5682_v35 = vadd.f32 %v5681_v7, %v5680_v17  ;;  %v5413_v60 = vadd.f32 %v5349_v45, %v5213_v42  ;;  %v5548_v9 = vmul.f32 %v12958_v36, %v5476_v38  ;;  %v13247_v46 = vadd.f32 %v5547_v10, %v5411_v19  ;;  %v5478_v37 = vld [vmem:[#allocation4 + $0xda] sm:$0xff] }
 0x64d   :  { %v5683_v21 = vsel %vm2894_vm13, %v13231_v43, 0.0  ;;  %v5153_v39 = vmul.f32 %v15488_v12, %v5081_v3  ;;  %v5216_v22 = vadd.f32 %v5152_v27, %v15513_v14  ;;  %v5351_v0 = vmul.f32 %v15491_v57, %v5279_v13  ;;  %v5281_v17 = vld [vmem:[#allocation4 + $0xf9] sm:$0xff]  ;;  %v5479_v14 = vld [vmem:[#allocation4 + $0xe2] sm:$0xff] }
 0x64e   :  { %15512 = vst [vmem:[#allocation123_spill] sm:$0xff] %v13247_v46  ;;  %v5684_v11 = vadd.f32 %v5683_v21, %v5682_v35  ;;  %v5414_v7 = vadd.f32 %v5350_v40, %v5214_v54  ;;  %v5549_v42 = vmul.f32 %v12958_v36, %v5477_v20  ;;  %v13255_v45 = vadd.f32 %v5548_v9, %v5412_v15  ;;  %v15515_v10 = vld [vmem:[#allocation27_spill] sm:$0xff]  ;;  %v5084_v43 = vld [vmem:[#allocation4 + $0x120] sm:$0xff]  ;;  %v5282_v35 = vld [vmem:[#allocation4 + $0x109] sm:$0xff] }
 0x64f   :  { %v5685_v19 = vsel %vm2894_vm13, %v13239_v47, 0.0  ;;  %v5154_v38 = vmul.f32 %v15488_v12, %v5082_v56  ;;  %v5217_v3 = vadd.f32 %v5153_v39, %v15515_v10  ;;  %v5352_v27 = vmul.f32 %v15491_v57, %v5280_v51  ;;  %v15517_v9 = vld [vmem:[#allocation98_spill] sm:$0xff]  ;;  %v5085_v47 = vld [vmem:[#allocation4 + $0x128] sm:$0xff] }
 0x650   :  { %15514 = vst [vmem:[#allocation70_spill] sm:$0xff] %v13255_v45  ;;  %v5686_v13 = vadd.f32 %v5685_v19, %v5684_v11  ;;  %v5415_v21 = vadd.f32 %v5351_v0, %v5215_v26  ;;  %v5550_v54 = vmul.f32 %v12958_v36, %v5478_v37  ;;  %v13263_v40 = vadd.f32 %v5549_v42, %v5413_v60  ;;  %v5480_v10 = vld [vmem:[#allocation4 + $0xf2] sm:$0xff]  ;;  %v15519_v42 = vld [vmem:[#allocation28_spill] sm:$0xff] }
 0x651   :  { %v5687_v15 = vsel %vm2894_vm13, %v13247_v46, 0.0  ;;  %v5155_v20 = vmul.f32 %v15488_v12, %v5083_v32  ;;  %v5218_v56 = vadd.f32 %v5154_v38, %v15517_v9  ;;  %v5353_v39 = vmul.f32 %v15491_v57, %v5281_v17  ;;  %v5283_v11 = vld [vmem:[#allocation4 + $0x111] sm:$0xff]  ;;  %v5481_v9 = vld [vmem:[#allocation4 + $0xfa] sm:$0xff] }
 0x652   :  { %15516 = vst [vmem:[#allocation19_spill] sm:$0xff] %v13263_v40  ;;  %v5688_v51 = vadd.f32 %v5687_v15, %v5686_v13  ;;  %v5416_v19 = vadd.f32 %v5352_v27, %v5216_v22  ;;  %v5551_v26 = vmul.f32 %v12958_v36, %v5479_v14  ;;  %v13271_v0 = vadd.f32 %v5550_v54, %v5414_v7  ;;  %v5086_v46 = vld [vmem:[#allocation4 + $0x138] sm:$0xff]  ;;  %v5284_v13 = vld [vmem:[#allocation4 + $0x121] sm:$0xff] }
 0x653   :  { %v5689_v60 = vsel %vm2894_vm13, %v13255_v45, 0.0  ;;  %v5156_v37 = vmul.f32 %v15488_v12, %v5084_v43  ;;  %v5219_v32 = vadd.f32 %v5155_v20, %v15519_v42  ;;  %v5354_v38 = vmul.f32 %v15491_v57, %v5282_v35  ;;  %v15521_v54 = vld [vmem:[#allocation44_spill] sm:$0xff]  ;;  %v5482_v42 = vld [vmem:[#allocation4 + $0x10a] sm:$0xff] }
 0x654   :  { %15518 = vst [vmem:[#allocation71_spill] sm:$0xff] %v13271_v0  ;;  %v5690_v17 = vadd.f32 %v5689_v60, %v5688_v51  ;;  %v5417_v15 = vadd.f32 %v5353_v39, %v5217_v3  ;;  %v5552_v22 = vmul.f32 %v12958_v36, %v5480_v10  ;;  %v13279_v27 = vadd.f32 %v5551_v26, %v5415_v21  ;;  %v5087_v45 = vld [vmem:[#allocation4 + $0x140] sm:$0xff]  ;;  %v5285_v51 = vld [vmem:[#allocation4 + $0x129] sm:$0xff] }
 0x655   :  { %v5691_v7 = vsel %vm2894_vm13, %v13263_v40, 0.0  ;;  %v5157_v14 = vmul.f32 %v15488_v12, %v5085_v47  ;;  %v5220_v43 = vadd.f32 %v5156_v37, %v15521_v54  ;;  %v5355_v20 = vmul.f32 %v15491_v57, %v5283_v11  ;;  %v15523_v26 = vld [vmem:[#allocation29_spill] sm:$0xff]  ;;  %v5483_v54 = vld [vmem:[#allocation4 + $0x112] sm:$0xff] }
 0x656   :  { %15520 = vst [vmem:[#allocation91_spill] sm:$0xff] %v13279_v27  ;;  %v5692_v35 = vadd.f32 %v5691_v7, %v5690_v17  ;;  %v5418_v60 = vadd.f32 %v5354_v38, %v5218_v56  ;;  %v5553_v3 = vmul.f32 %v12958_v36, %v5481_v9  ;;  %v13287_v39 = vadd.f32 %v5552_v22, %v5416_v19  ;;  %v5088_v40 = vld [vmem:[#allocation4 + $0x150] sm:$0xff]  ;;  %v5286_v17 = vld [vmem:[#allocation4 + $0x139] sm:$0xff] }
 0x657   :  { %v5693_v21 = vsel %vm2894_vm13, %v13271_v0, 0.0  ;;  %v5158_v10 = vmul.f32 %v15488_v12, %v5086_v46  ;;  %v5221_v47 = vadd.f32 %v5157_v14, %v15523_v26  ;;  %v5356_v37 = vmul.f32 %v15491_v57, %v5284_v13  ;;  %v15525_v22 = vld [vmem:[#allocation99_spill] sm:$0xff]  ;;  %v5484_v26 = vld [vmem:[#allocation4 + $0x122] sm:$0xff] }
 0x658   :  { %15522 = vst [vmem:[#allocation109_spill] sm:$0xff] %v13287_v39  ;;  %v5694_v11 = vadd.f32 %v5693_v21, %v5692_v35  ;;  %v5419_v7 = vadd.f32 %v5355_v20, %v5219_v32  ;;  %v5554_v56 = vmul.f32 %v12958_v36, %v5482_v42  ;;  %v13295_v38 = vadd.f32 %v5553_v3, %v5417_v15  ;;  %v5089_v0 = vld [vmem:[#allocation4 + $0x158] sm:$0xff]  ;;  %v5287_v35 = vld [vmem:[#allocation4 + $0x141] sm:$0xff] }
 0x659   :  { %v5695_v19 = vsel %vm2894_vm13, %v13279_v27, 0.0  ;;  %v5159_v9 = vmul.f32 %v15488_v12, %v5087_v45  ;;  %v5222_v46 = vadd.f32 %v5158_v10, %v15525_v22  ;;  %v5357_v14 = vmul.f32 %v15491_v57, %v5285_v51  ;;  %v15527_v3 = vld [vmem:[#allocation8_spill] sm:$0xff]  ;;  %v5485_v22 = vld [vmem:[#allocation4 + $0x12a] sm:$0xff] }
 0x65a   :  { %15524 = vst [vmem:[#allocation21_spill] sm:$0xff] %v13295_v38  ;;  %v5696_v13 = vadd.f32 %v5695_v19, %v5694_v11  ;;  %v5420_v21 = vadd.f32 %v5356_v37, %v5220_v43  ;;  %v5555_v32 = vmul.f32 %v12958_v36, %v5483_v54  ;;  %v13303_v20 = vadd.f32 %v5554_v56, %v5418_v60  ;;  %v5090_v27 = vld [vmem:[#allocation4 + $0x168] sm:$0xff]  ;;  %v5288_v11 = vld [vmem:[#allocation4 + $0x151] sm:$0xff] }
 0x65b   :  { %v5697_v15 = vsel %vm2894_vm13, %v13287_v39, 0.0  ;;  %v5160_v42 = vmul.f32 %v15488_v12, %v5088_v40  ;;  %v5223_v45 = vadd.f32 %v5159_v9, %v15527_v3  ;;  %v5358_v10 = vmul.f32 %v15491_v57, %v5286_v17  ;;  %v15529_v56 = vld [vmem:[#allocation49_spill] sm:$0xff]  ;;  %v5486_v3 = vld [vmem:[#allocation4 + $0x13a] sm:$0xff]  ;;  %v5091_v39 = vld [vmem:[#allocation4 + $0x170] sm:$0xff] }
 0x65c   :  { %15526 = vst [vmem:[#allocation72_spill] sm:$0xff] %v13303_v20  ;;  %v5698_v51 = vadd.f32 %v5697_v15, %v5696_v13  ;;  %v5421_v19 = vadd.f32 %v5357_v14, %v5221_v47  ;;  %v5556_v43 = vmul.f32 %v12958_v36, %v5484_v26  ;;  %v13311_v37 = vadd.f32 %v5555_v32, %v5419_v7  ;;  %v5289_v13 = vld [vmem:[#allocation4 + $0x159] sm:$0xff]  ;;  %v15531_v26 = vld [vmem:[#allocation45_spill] sm:$0xff] }
 0x65d   :  { %v5699_v60 = vsel %vm2894_vm13, %v13295_v38, 0.0  ;;  %v5161_v54 = vmul.f32 %v15488_v12, %v5089_v0  ;;  %v5224_v40 = vadd.f32 %v5160_v42, %v15529_v56  ;;  %v5359_v9 = vmul.f32 %v15491_v57, %v5287_v35  ;;  %v13326_v12 = vld [vmem:[%s14346_s4 + $0x6] ss:$0 sm:$0xff]  ;;  %v5093_v38 = vld [vmem:[#allocation4 + $0x188] sm:$0xff] }
 0x65e   :  { %15528 = vst [vmem:[#allocation92_spill] sm:$0xff] %v13311_v37  ;;  %v5700_v17 = vadd.f32 %v5699_v60, %v5698_v51  ;;  %v5422_v15 = vadd.f32 %v5358_v10, %v5222_v46  ;;  %v5557_v47 = vmul.f32 %v12958_v36, %v5485_v22  ;;  %v13319_v14 = vadd.f32 %v5556_v43, %v5420_v21  ;;  %v5487_v42 = vld [vmem:[#allocation4 + $0x142] sm:$0xff] }
 0x65f   :  { %v5701_v7 = vsel %vm2894_vm13, %v13303_v20, 0.0  ;;  %v5162_v0 = vmul.f32 %v13326_v12, %v5090_v27  ;;  %v5225_v35 = vadd.f32 %v5161_v54, %v15531_v26  ;;  %v5360_v32 = vmul.f32 %v15491_v57, %v5288_v11  ;;  %v5092_v10 = vld [vmem:[#allocation4 + $0x180] sm:$0xff]  ;;  %v5290_v22 = vld [vmem:[#allocation4 + $0x169] sm:$0xff]  ;;  %v5488_v26 = vld [vmem:[#allocation4 + $0x152] sm:$0xff] }
 0x660   :  { %15530 = vst [vmem:[#allocation110_spill] sm:$0xff] %v13319_v14  ;;  %v5702_v46 = vadd.f32 %v5701_v7, %v5700_v17  ;;  %v5423_v21 = vadd.f32 %v5359_v9, %v5223_v45  ;;  %v5558_v51 = vmul.f32 %v12958_v36, %v5486_v3  ;;  %v13332_v43 = vadd.f32 %v5557_v47, %v5421_v19  ;;  %v15533_v20 = vld [vmem:[#allocation100_spill] sm:$0xff]  ;;  %v5291_v17 = vld [vmem:[#allocation4 + $0x171] sm:$0xff] }
 0x661   :  { %v5703_v60 = vsel %vm2894_vm13, %v13311_v37, 0.0  ;;  %v5163_v56 = vmul.f32 %v13326_v12, %v5091_v39  ;;  %v5226_v27 = vadd.f32 %v5162_v0, %v15533_v20  ;;  %v5361_v54 = vmul.f32 %v15491_v57, %v5289_v13  ;;  %v15535_v47 = vld [vmem:[#allocation46_spill] sm:$0xff]  ;;  %v5489_v0 = vld [vmem:[#allocation4 + $0x15a] sm:$0xff] }
 0x662   :  { %15532 = vst [vmem:[#allocation38_spill] sm:$0xff] %v13332_v43  ;;  %v5704_v11 = vadd.f32 %v5703_v60, %v5702_v46  ;;  %v5424_v7 = vadd.f32 %v5360_v32, %v5224_v40  ;;  %v5559_v45 = vmul.f32 %v12958_v36, %v5487_v42  ;;  %v13340_v9 = vadd.f32 %v5558_v51, %v5422_v15  ;;  %v5292_v37 = vld [vmem:[#allocation4 + $0x181] sm:$0xff]  ;;  %v15537_v42 = vld [vmem:[#allocation50_spill] sm:$0xff] }
 0x663   :  { %v5705_v19 = vsel %vm2894_vm13, %v13319_v14, 0.0  ;;  %v5164_v3 = vmul.f32 %v13326_v12, %v5092_v10  ;;  %v5227_v39 = vadd.f32 %v5163_v56, %v15535_v47  ;;  %v5362_v20 = vmul.f32 %v15491_v57, %v5290_v22  ;;  %v5490_v56 = vld [vmem:[#allocation4 + $0x16a] sm:$0xff] }
 0x664   :  { %15534 = vst [vmem:[#allocation74_spill] sm:$0xff] %v13340_v9  ;;  %v5706_v13 = vadd.f32 %v5705_v19, %v5704_v11  ;;  %v5425_v46 = vadd.f32 %v5361_v54, %v5225_v35  ;;  %v5560_v60 = vmul.f32 %v12958_v36, %v5488_v26  ;;  %v13348_v40 = vadd.f32 %v5559_v45, %v5423_v21  ;;  %v5293_v22 = vld [vmem:[#allocation4 + $0x189] sm:$0xff]  ;;  %v15538_v54 = vld [vmem:[#allocation36_spill] sm:$0xff]  ;;  %v15539_v26 = vld [vmem:[#allocation31_spill] sm:$0xff] }
 0x665   :  { %v5707_v15 = vsel %vm2894_vm13, %v13332_v43, 0.0  ;;  %v5165_v32 = vmul.f32 %v13326_v12, %v5093_v38  ;;  %v5228_v51 = vadd.f32 %v5164_v3, %v15537_v42  ;;  %v5363_v10 = vmul.f32 %v15491_v57, %v5291_v17  ;;  %v15540_v19 = vld [vmem:[#allocation47_spill] sm:$0xff]  ;;  %v5295_v43 = vld [vmem:[#allocation4 + $0x1a1] sm:$0xff] }
 0x666   :  { %15536 = vst [vmem:[#allocation93_spill] sm:$0xff] %v13348_v40  ;;  %v5708_v47 = vadd.f32 %v5707_v15, %v5706_v13  ;;  %v5426_v14 = vadd.f32 %v5362_v20, %v5226_v27  ;;  %v5561_v11 = vmul.f32 %v12958_v36, %v5489_v0  ;;  %v13356_v35 = vadd.f32 %v5560_v60, %v5424_v7  ;;  %v5491_v42 = vld [vmem:[#allocation4 + $0x172] sm:$0xff]  ;;  %v5096_v13 = vld [vmem:[#allocation4 + $0x1e0] sm:$0xff]  ;;  %v15542_v60 = vld [vmem:[#allocation17_spill] sm:$0xff] }
 0x667   :  { %v5709_v21 = vsel %vm2894_vm13, %v13340_v9, 0.0  ;;  %v5030_v45 = vadd.f32 %v15539_v26, %v15538_v54  ;;  %v5229_v38 = vadd.f32 %v5165_v32, %v15540_v19  ;;  %v5364_v3 = vmul.f32 %v15491_v57, %v5292_v37  ;;  %v15541_v0 = vld [vmem:[#allocation10_spill] sm:$0xff]  ;;  %v15543_v54 = vld [vmem:[#allocation12_spill] sm:$0xff]  ;;  %v15544_v19 = vld [vmem:[#allocation11_spill] sm:$0xff] }
 0x668   :  { %v5710_v17 = vadd.f32 %v5709_v21, %v5708_v47  ;;  %v5427_v15 = vadd.f32 %v5363_v10, %v5227_v39  ;;  %v5562_v27 = vmul.f32 %v12958_v36, %v5490_v56  ;;  %v13365_v20 = vadd.f32 %v5561_v11, %v5425_v46  ;;  %v5492_v26 = vld [vmem:[#allocation4 + $0x182] sm:$0xff] }
 0x669   :  { %v5711_v7 = vsel %vm2894_vm13, %v13348_v40, 0.0  ;;  %v5031_v9 = vadd.f32 %v15542_v60, %v15541_v0  ;;  %v5230_v32 = vadd.f32 %v15543_v54, %v13180_v52  ;;  %v5365_v37 = vmul.f32 %v15491_v57, %v5293_v22  ;;  %v5493_v60 = vld [vmem:[#allocation4 + $0x18a] sm:$0xff]  ;;  %v5494_v52 = vld [vmem:[#allocation4 + $0x19a] sm:$0xff] }
 0x66a   :  { %v5712_v47 = vadd.f32 %v5711_v7, %v5710_v17  ;;  %v5428_v21 = vadd.f32 %v5364_v3, %v5228_v51  ;;  %v5563_v39 = vmul.f32 %v12958_v36, %v5491_v42  ;;  %v13375_v10 = vadd.f32 %v5562_v27, %v5426_v14  ;;  %v5296_v22 = vld [vmem:[#allocation4 + $0x1e1] sm:$0xff]  ;;  %v15545_v17 = vld [vmem:[#allocation14_spill] sm:$0xff] }
 0x66b   :  { %v5713_v46 = vsel %vm2894_vm13, %v13356_v35, 0.0  ;;  %v5367_v56 = vmul.f32 %v15491_v57, %v5295_v43  ;;  %v5168_v11 = vmul.f32 %v13326_v12, %v5096_v13  ;;  %v5231_v0 = vadd.f32 %v15544_v19, %v5030_v45  ;;  %v5495_v43 = vld [vmem:[#allocation4 + $0x1a2] sm:$0xff] }
 0x66c   :  { %v5714_v54 = vadd.f32 %v5713_v46, %v5712_v47  ;;  %v5429_v40 = vadd.f32 %v5365_v37, %v5229_v38  ;;  %v5564_v51 = vmul.f32 %v12958_v36, %v5492_v26  ;;  %v13383_v3 = vadd.f32 %v5563_v39, %v5427_v15  ;;  %v5496_v39 = vld [vmem:[#allocation4 + $0x1e2] sm:$0xff] }
 0x66d   :  { %v5715_v14 = vsel %vm2894_vm13, %v13365_v20, 0.0  ;;  %v5232_v42 = vadd.f32 %v5168_v11, %v5031_v9  ;;  %v5430_v27 = vadd.f32 %v15545_v17, %v5230_v32  ;;  %v5565_v12 = vmul.f32 %v12958_v36, %v5493_v60 }
 0x66e   :  { %v5716_v7 = vadd.f32 %v5715_v14, %v5714_v54  ;;  %v5566_v45 = vmul.f32 %v12958_v36, %v5494_v52  ;;  %v13390_v13 = vadd.f32 %v5564_v51, %v5428_v21  ;;  %v5717_v38 = vsel %vm2894_vm13, %v13375_v10, 0.0 }
 0x66f   :  { %v5368_v15 = vmul.f32 %v15491_v57, %v5296_v22  ;;  %v5431_v26 = vadd.f32 %v5367_v56, %v5231_v0  ;;  %v5567_v47 = vmul.f32 %v12958_v36, %v5495_v43  ;;  %v13396_v9 = vadd.f32 %v5565_v12, %v5429_v40 }
 0x670   :  { %v5718_v37 = vadd.f32 %v5717_v38, %v5716_v7  ;;  %v5719_v32 = vsel %vm2894_vm13, %v13383_v3, 0.0  ;;  %v13400_v19 = vadd.f32 %v5566_v45, %v5430_v27  ;;  %v5721_v21 = vsel %vm2894_vm13, %v13390_v13, 0.0 }
 0x671   :  { %v5432_v11 = vadd.f32 %v5368_v15, %v5232_v42  ;;  %v5568_v57 = vmul.f32 %v12958_v36, %v5496_v39  ;;  %v13405_v52 = vadd.f32 %v5567_v47, %v5431_v26  ;;  %v5723_v40 = vsel %vm2894_vm13, %v13396_v9, 0.0 }
 0x672   :  { %v5720_v46 = vadd.f32 %v5719_v32, %v5718_v37  ;;  %v5725_v54 = vsel %vm2894_vm13, %v13400_v19, 0.0  ;;  %v5731_v17 = vsel %vm2894_vm13, %v13076_v49, 0.0  ;;  %v5733_v43 = vsel %vm2894_vm13, %v13079_v2, 0.0 }
 0x673   :  { %v13409_v0 = vadd.f32 %v5568_v57, %v5432_v11  ;;  %v5727_v51 = vsel %vm2894_vm13, %v13405_v52, 0.0  ;;  %v5735_v12 = vsel %vm2894_vm13, %v13082_v5, 0.0  ;;  %v5737_v38 = vsel %vm2894_vm13, %v13085_v8, 0.0 }
 0x674   :  { %v5722_v60 = vadd.f32 %v5721_v21, %v5720_v46  ;;  %v5739_v37 = vsel %vm2894_vm13, %v13088_v58, 0.0  ;;  %v5741_v47 = vsel %vm2894_vm13, %v13091_v61, 0.0  ;;  %v5743_v39 = vsel %vm2894_vm13, %v13094_v25, 0.0 }
 0x675   :  { %v5729_v42 = vsel %vm2894_vm13, %v13409_v0, 0.0  ;;  %v5745_v11 = vsel %vm2894_vm13, %v13097_v6, 0.0 }
 0x676   :  { %v5724_v56 = vadd.f32 %v5723_v40, %v5722_v60  ;;  %v5747_v60 = vsel %vm2894_vm13, %v13100_v28, 0.0  ;;  %v5749_v40 = vsel %vm2894_vm13, %v13103_v29, 0.0 }
 0x678   :  { %v5726_v22 = vadd.f32 %v5725_v54, %v5724_v56  ;;  %v5751_v54 = vsel %vm2894_vm13, %v13106_v48, 0.0 }
 0x67a   :  { %v5728_v14 = vadd.f32 %v5727_v51, %v5726_v22  ;;  %v5753_v51 = vsel %vm2894_vm13, %v13109_v24, 0.0 }
 0x67c   :  { %v5730_v36 = vadd.f32 %v5729_v42, %v5728_v14  ;;  %v5755_v42 = vsel %vm2894_vm13, %v13112_v55, 0.0 }
 0x67e   :  { %v5732_v27 = vadd.f32 %v5731_v17, %v5730_v36  ;;  %v5757_v17 = vsel %vm2894_vm13, %v13115_v41, 0.0 }
 0x680   :  { %v5734_v7 = vadd.f32 %v5733_v43, %v5732_v27  ;;  %v5759_v43 = vsel %vm2894_vm13, %v13118_v23, 0.0 }
 0x682   :  { %v5736_v45 = vadd.f32 %v5735_v12, %v5734_v7  ;;  %v5761_v12 = vsel %vm2894_vm13, %v13121_v4, 0.0 }
 0x684   :  { %v5738_v15 = vadd.f32 %v5737_v38, %v5736_v45  ;;  %v5763_v38 = vsel %vm2894_vm13, %v13124_v62, 0.0 }
 0x686   :  { %v5740_v26 = vadd.f32 %v5739_v37, %v5738_v15  ;;  %v5765_v37 = vsel %vm2894_vm13, %v13127_v18, 0.0 }
 0x688   :  { %v5742_v32 = vadd.f32 %v5741_v47, %v5740_v26  ;;  %v5767_v47 = vsel %vm2894_vm13, %v13130_v53, 0.0 }
 0x68a   :  { %v5744_v46 = vadd.f32 %v5743_v39, %v5742_v32  ;;  %v5769_v39 = vsel %vm2894_vm13, %v13133_v50, 0.0 }
 0x68c   :  { %v5746_v21 = vadd.f32 %v5745_v11, %v5744_v46  ;;  %v5771_v11 = vsel %vm2894_vm13, %v13136_v34, 0.0 }
 0x68e   :  { %v5748_v57 = vadd.f32 %v5747_v60, %v5746_v21  ;;  %v5773_v60 = vsel %vm2894_vm13, %v13139_v44, 0.0 }
 0x690   :  { %v5750_v56 = vadd.f32 %v5749_v40, %v5748_v57  ;;  %v5775_v40 = vsel %vm2894_vm13, %v13142_v16, 0.0 }
 0x692   :  { %v5752_v22 = vadd.f32 %v5751_v54, %v5750_v56  ;;  %v5777_v54 = vsel %vm2894_vm13, %v13145_v1, 0.0 }
 0x694   :  { %v5754_v14 = vadd.f32 %v5753_v51, %v5752_v22  ;;  %v5779_v51 = vsel %vm2894_vm13, %v13148_v33, 0.0 }
 0x696   :  { %v5756_v36 = vadd.f32 %v5755_v42, %v5754_v14  ;;  %v5781_v42 = vsel %vm2894_vm13, %v13151_v30, 0.0 }
 0x698   :  { %v5758_v27 = vadd.f32 %v5757_v17, %v5756_v36  ;;  %v5783_v17 = vsel %vm2894_vm13, %v13154_v31, 0.0 }
 0x69a   :  { %v5760_v7 = vadd.f32 %v5759_v43, %v5758_v27  ;;  %v5785_v43 = vsel %vm2894_vm13, %v13157_v59, 0.0 }
 0x69c   :  { %v5762_v45 = vadd.f32 %v5761_v12, %v5760_v7  ;;  %v5787_v12 = vsel %vm2894_vm13, %v13160_v63, 0.0 }
 0x69e   :  { %v5764_v15 = vadd.f32 %v5763_v38, %v5762_v45  ;;  %v15546_v38 = vld [vmem:[#allocation13_spill] sm:$0xff] }
 0x6a0   :  { %v5766_v26 = vadd.f32 %v5765_v37, %v5764_v15  ;;  %v5789_v15 = vsel %vm2894_vm13, %v15546_v38, 0.0 }
 0x6a2   :  { %v5768_v32 = vadd.f32 %v5767_v47, %v5766_v26  ;;  %v15547_v26 = vld [vmem:[#allocation15_spill] sm:$0xff] }
 0x6a3   :  { %v5791_v47 = vsel %vm2894_vm13, %v15547_v26, 0.0 }
 0x6a4   :  { %v5770_v46 = vadd.f32 %v5769_v39, %v5768_v32 }
 0x6a6   :  { %v5772_v21 = vadd.f32 %v5771_v11, %v5770_v46 }
 0x6a8   :  { %v5774_v57 = vadd.f32 %v5773_v60, %v5772_v21 }
 0x6aa   :  { %v5776_v56 = vadd.f32 %v5775_v40, %v5774_v57 }
 0x6ac   :  { %v5778_v22 = vadd.f32 %v5777_v54, %v5776_v56  ;;  %v15548_v56 = vld [vmem:[#allocation56_spill] sm:$0xff] }
 0x6ae   :  { %v5780_v14 = vadd.f32 %v5779_v51, %v5778_v22  ;;  %v15549_v22 = vld [vmem:[#allocation103_spill] sm:$0xff] }
 0x6b0   :  { %v5782_v36 = vadd.f32 %v5781_v42, %v5780_v14  ;;  %v15550_v14 = vld [vmem:[#allocation35_spill] sm:$0xff] }
 0x6b2   :  { %v5784_v27 = vadd.f32 %v5783_v17, %v5782_v36  ;;  %v15551_v36 = vld [vmem:[#allocation18_spill] sm:$0xff] }
 0x6b4   :  { %v5786_v7 = vadd.f32 %v5785_v43, %v5784_v27 }
 0x6b6   :  { %v5788_v45 = vadd.f32 %v5787_v12, %v5786_v7  ;;  %v15552_v7 = vld [vmem:[#allocation20_spill] sm:$0xff] }
 0x6b8   :  { %v5790_v37 = vadd.f32 %v5789_v15, %v5788_v45  ;;  %v15553_v15 = vld [vmem:[#allocation120_spill] sm:$0xff] }
 0x6ba   :  { %v5792_v32 = vadd.f32 %v5791_v47, %v5790_v37 }
 0x6bc   :  { %v5793_v39 = vrot.slane %v5792_v32, 4 }
 0x6be   :  { %v5794_v46 = vadd.f32 %v5793_v39, %v5792_v32 }
 0x6c0   :  { %v5795_v11 = vrot.slane %v5794_v46, 2 }
 0x6c2   :  { %v5796_v21 = vadd.f32 %v5795_v11, %v5794_v46  ;;  %v15554_v11 = vld [vmem:[#allocation65_spill] sm:$0xff] }
 0x6c4   :  { %v5797_v60 = vrot.slane %v5796_v21, 1 }
 0x6c6   :  { %v5798_v57 = vadd.f32 %v5797_v60, %v5796_v21 }
 0x6c8   :  { %v13479_v40 = vmul.f32 0.001953125, %v5798_v57 }
 0x6ca   :  { %v13483_v54 = vsub.f32 %v15548_v56, %v13479_v40  ;;  %v13487_v51 = vsub.f32 %v15549_v22, %v13479_v40  ;;  %v13491_v42 = vsub.f32 %v15550_v14, %v13479_v40  ;;  %v13495_v17 = vsub.f32 %v15551_v36, %v13479_v40  ;;  %v15556_v22 = vld [vmem:[#allocation121_spill] sm:$0xff] }
 0x6cb   :  { %v13503_v12 = vsub.f32 %v15552_v7, %v13479_v40  ;;  %v13509_v37 = vsub.f32 %v15553_v15, %v13479_v40  ;;  %v13517_v21 = vsub.f32 %v15554_v11, %v13479_v40  ;;  %v13524_v14 = vsub.f32 %v15556_v22, %v13479_v40  ;;  %v15557_v7 = vld [vmem:[#allocation108_spill] sm:$0xff]  ;;  %v15561_v22 = vld [vmem:[#allocation69_spill] sm:$0xff] }
 0x6cc   :  { %v5864_v27 = vmul.f32 %v13483_v54, %v13483_v54  ;;  %v5865_v43 = vmul.f32 %v13487_v51, %v13487_v51  ;;  %v5866_v45 = vmul.f32 %v13491_v42, %v13491_v42  ;;  %v5867_v47 = vmul.f32 %v13495_v17, %v13495_v17 }
 0x6cd   :  { %15555 = vst [vmem:[#allocation75_spill] sm:$0xff] %v13517_v21  ;;  %v5868_v60 = vmul.f32 %v13503_v12, %v13503_v12  ;;  %v5869_v36 = vmul.f32 %v13509_v37, %v13509_v37  ;;  %v13531_v15 = vsub.f32 %v15557_v7, %v13479_v40 }
 0x6ce   :  { %v5928_v32 = vsel %vm2894_vm13, %v5864_v27, 0.0  ;;  %v5929_v39 = vsel %vm2894_vm13, %v5865_v43, 0.0  ;;  %v5931_v57 = vsel %vm2894_vm13, %v5866_v45, 0.0  ;;  %v5933_v27 = vsel %vm2894_vm13, %v5867_v47, 0.0 }
 0x6cf   :  { %v5930_v46 = vadd.f32 %v5929_v39, %v5928_v32  ;;  %15558 = vst [vmem:[#allocation40_spill] sm:$0xff] %v13531_v15  ;;  %v5870_v32 = vmul.f32 %v13517_v21, %v13517_v21  ;;  %v5935_v45 = vsel %vm2894_vm13, %v5868_v60, 0.0  ;;  %v5937_v47 = vsel %vm2894_vm13, %v5869_v36, 0.0 }
 0x6d0   :  { %v5872_v7 = vmul.f32 %v13531_v15, %v13531_v15 }
 0x6d1   :  { %v5932_v56 = vadd.f32 %v5931_v57, %v5930_v46  ;;  %v15559_v46 = vld [vmem:[#allocation122_spill] sm:$0xff]  ;;  %v5871_v57 = vmul.f32 %v13524_v14, %v13524_v14  ;;  %v5939_v60 = vsel %vm2894_vm13, %v5870_v32, 0.0 }
 0x6d2   :  { %v13538_v11 = vsub.f32 %v15559_v46, %v13479_v40  ;;  %v5943_v32 = vsel %vm2894_vm13, %v5872_v7, 0.0 }
 0x6d3   :  { %v5934_v43 = vadd.f32 %v5933_v27, %v5932_v56  ;;  %v13545_v27 = vsub.f32 %v15561_v22, %v13479_v40  ;;  %v5941_v36 = vsel %vm2894_vm13, %v5871_v57, 0.0 }
 0x6d4   :  { %15560 = vst [vmem:[#allocation76_spill] sm:$0xff] %v13538_v11  ;;  %v5873_v21 = vmul.f32 %v13538_v11, %v13538_v11 }
 0x6d5   :  { %v5936_v39 = vadd.f32 %v5935_v45, %v5934_v43  ;;  %15562 = vst [vmem:[#allocation25_spill] sm:$0xff] %v13545_v27  ;;  %v15563_v45 = vld [vmem:[#allocation123_spill] sm:$0xff]  ;;  %v5874_v15 = vmul.f32 %v13545_v27, %v13545_v27 }
 0x6d6   :  { %v13552_v46 = vsub.f32 %v15563_v45, %v13479_v40  ;;  %v5945_v57 = vsel %vm2894_vm13, %v5873_v21, 0.0 }
 0x6d7   :  { %v5938_v56 = vadd.f32 %v5937_v47, %v5936_v39  ;;  %v15565_v47 = vld [vmem:[#allocation70_spill] sm:$0xff]  ;;  %v5947_v7 = vsel %vm2894_vm13, %v5874_v15, 0.0 }
 0x6d8   :  { %15564 = vst [vmem:[#allocation77_spill] sm:$0xff] %v13552_v46  ;;  %v13559_v22 = vsub.f32 %v15565_v47, %v13479_v40  ;;  %v5875_v11 = vmul.f32 %v13552_v46, %v13552_v46 }
 0x6d9   :  { %v5940_v43 = vadd.f32 %v5939_v60, %v5938_v56  ;;  %v15567_v60 = vld [vmem:[#allocation19_spill] sm:$0xff] }
 0x6da   :  { %15566 = vst [vmem:[#allocation94_spill] sm:$0xff] %v13559_v22  ;;  %v13566_v45 = vsub.f32 %v15567_v60, %v13479_v40  ;;  %v5876_v27 = vmul.f32 %v13559_v22, %v13559_v22  ;;  %v5949_v21 = vsel %vm2894_vm13, %v5875_v11, 0.0 }
 0x6db   :  { %v5942_v39 = vadd.f32 %v5941_v36, %v5940_v43  ;;  %v15569_v36 = vld [vmem:[#allocation71_spill] sm:$0xff] }
 0x6dc   :  { %15568 = vst [vmem:[#allocation78_spill] sm:$0xff] %v13566_v45  ;;  %v13573_v47 = vsub.f32 %v15569_v36, %v13479_v40  ;;  %v5877_v46 = vmul.f32 %v13566_v45, %v13566_v45  ;;  %v5951_v15 = vsel %vm2894_vm13, %v5876_v27, 0.0 }
 0x6dd   :  { %v5944_v56 = vadd.f32 %v5943_v32, %v5942_v39  ;;  %v15571_v32 = vld [vmem:[#allocation91_spill] sm:$0xff] }
 0x6de   :  { %15570 = vst [vmem:[#allocation41_spill] sm:$0xff] %v13573_v47  ;;  %v13580_v60 = vsub.f32 %v15571_v32, %v13479_v40  ;;  %v5878_v22 = vmul.f32 %v13573_v47, %v13573_v47  ;;  %v5953_v11 = vsel %vm2894_vm13, %v5877_v46, 0.0 }
 0x6df   :  { %v5946_v43 = vadd.f32 %v5945_v57, %v5944_v56  ;;  %v15573_v57 = vld [vmem:[#allocation109_spill] sm:$0xff] }
 0x6e0   :  { %15572 = vst [vmem:[#allocation79_spill] sm:$0xff] %v13580_v60  ;;  %v13587_v36 = vsub.f32 %v15573_v57, %v13479_v40  ;;  %v5879_v45 = vmul.f32 %v13580_v60, %v13580_v60  ;;  %v5955_v27 = vsel %vm2894_vm13, %v5878_v22, 0.0 }
 0x6e1   :  { %v5948_v39 = vadd.f32 %v5947_v7, %v5946_v43  ;;  %v15575_v7 = vld [vmem:[#allocation21_spill] sm:$0xff] }
 0x6e2   :  { %15574 = vst [vmem:[#allocation95_spill] sm:$0xff] %v13587_v36  ;;  %v13594_v32 = vsub.f32 %v15575_v7, %v13479_v40  ;;  %v5880_v47 = vmul.f32 %v13587_v36, %v13587_v36  ;;  %v5957_v46 = vsel %vm2894_vm13, %v5879_v45, 0.0 }
 0x6e3   :  { %v5950_v56 = vadd.f32 %v5949_v21, %v5948_v39  ;;  %v15577_v21 = vld [vmem:[#allocation72_spill] sm:$0xff] }
 0x6e4   :  { %15576 = vst [vmem:[#allocation80_spill] sm:$0xff] %v13594_v32  ;;  %v13601_v57 = vsub.f32 %v15577_v21, %v13479_v40  ;;  %v5881_v60 = vmul.f32 %v13594_v32, %v13594_v32  ;;  %v5959_v22 = vsel %vm2894_vm13, %v5880_v47, 0.0 }
 0x6e5   :  { %v5952_v43 = vadd.f32 %v5951_v15, %v5950_v56  ;;  %v15579_v15 = vld [vmem:[#allocation92_spill] sm:$0xff] }
 0x6e6   :  { %15578 = vst [vmem:[#allocation26_spill] sm:$0xff] %v13601_v57  ;;  %v13608_v7 = vsub.f32 %v15579_v15, %v13479_v40  ;;  %v5882_v36 = vmul.f32 %v13601_v57, %v13601_v57  ;;  %v5961_v45 = vsel %vm2894_vm13, %v5881_v60, 0.0 }
 0x6e7   :  { %v5954_v39 = vadd.f32 %v5953_v11, %v5952_v43  ;;  %v15581_v11 = vld [vmem:[#allocation110_spill] sm:$0xff] }
 0x6e8   :  { %15580 = vst [vmem:[#allocation57_spill] sm:$0xff] %v13608_v7  ;;  %v13615_v21 = vsub.f32 %v15581_v11, %v13479_v40  ;;  %v5883_v32 = vmul.f32 %v13608_v7, %v13608_v7  ;;  %v5963_v47 = vsel %vm2894_vm13, %v5882_v36, 0.0 }
 0x6e9   :  { %v5956_v56 = vadd.f32 %v5955_v27, %v5954_v39  ;;  %v15582_v27 = vld [vmem:[#allocation38_spill] sm:$0xff] }
 0x6ea   :  { %v13622_v15 = vsub.f32 %v15582_v27, %v13479_v40  ;;  %v5884_v57 = vmul.f32 %v13615_v21, %v13615_v21  ;;  %v5965_v60 = vsel %vm2894_vm13, %v5883_v32, 0.0 }
 0x6eb   :  { %v5958_v43 = vadd.f32 %v5957_v46, %v5956_v56  ;;  %v15583_v46 = vld [vmem:[#allocation74_spill] sm:$0xff] }
 0x6ec   :  { %v13629_v11 = vsub.f32 %v15583_v46, %v13479_v40  ;;  %v5885_v7 = vmul.f32 %v13622_v15, %v13622_v15  ;;  %v5967_v36 = vsel %vm2894_vm13, %v5884_v57, 0.0 }
 0x6ed   :  { %v5960_v39 = vadd.f32 %v5959_v22, %v5958_v43  ;;  %v15584_v22 = vld [vmem:[#allocation93_spill] sm:$0xff] }
 0x6ee   :  { %v13636_v27 = vsub.f32 %v15584_v22, %v13479_v40  ;;  %v5886_v46 = vmul.f32 %v13629_v11, %v13629_v11  ;;  %v5969_v32 = vsel %vm2894_vm13, %v5885_v7, 0.0 }
 0x6ef   :  { %v5962_v56 = vadd.f32 %v5961_v45, %v5960_v39  ;;  %v13643_v45 = vsub.f32 %v13356_v35, %v13479_v40  ;;  %v13657_v35 = vsub.f32 %v13375_v10, %v13479_v40  ;;  %v13671_v10 = vsub.f32 %v13390_v13, %v13479_v40 }
 0x6f0   :  { %v5887_v22 = vmul.f32 %v13636_v27, %v13636_v27  ;;  %v5971_v57 = vsel %vm2894_vm13, %v5886_v46, 0.0  ;;  %v13685_v13 = vsub.f32 %v13400_v19, %v13479_v40  ;;  %v13699_v19 = vsub.f32 %v13409_v0, %v13479_v40 }
 0x6f1   :  { %v5964_v43 = vadd.f32 %v5963_v47, %v5962_v56  ;;  %v13650_v47 = vsub.f32 %v13365_v20, %v13479_v40  ;;  %v13664_v20 = vsub.f32 %v13383_v3, %v13479_v40  ;;  %v13678_v3 = vsub.f32 %v13396_v9, %v13479_v40 }
 0x6f2   :  { %v5973_v7 = vsel %vm2894_vm13, %v5887_v22, 0.0  ;;  %v13692_v9 = vsub.f32 %v13405_v52, %v13479_v40  ;;  %v13706_v52 = vsub.f32 %v13076_v49, %v13479_v40  ;;  %v13713_v0 = vsub.f32 %v13079_v2, %v13479_v40 }
 0x6f3   :  { %v5966_v39 = vadd.f32 %v5965_v60, %v5964_v43  ;;  %v5888_v60 = vmul.f32 %v13643_v45, %v13643_v45  ;;  %v13720_v49 = vsub.f32 %v13082_v5, %v13479_v40  ;;  %v13727_v2 = vsub.f32 %v13085_v8, %v13479_v40 }
 0x6f4   :  { %v13734_v5 = vsub.f32 %v13088_v58, %v13479_v40  ;;  %v13741_v8 = vsub.f32 %v13091_v61, %v13479_v40  ;;  %v13748_v58 = vsub.f32 %v13094_v25, %v13479_v40  ;;  %v13755_v61 = vsub.f32 %v13097_v6, %v13479_v40 }
 0x6f5   :  { %v5968_v56 = vadd.f32 %v5967_v36, %v5966_v39  ;;  %v5889_v36 = vmul.f32 %v13650_v47, %v13650_v47  ;;  %v5975_v46 = vsel %vm2894_vm13, %v5888_v60, 0.0  ;;  %v13762_v25 = vsub.f32 %v13100_v28, %v13479_v40 }
 0x6f6   :  { %v13769_v6 = vsub.f32 %v13103_v29, %v13479_v40  ;;  %v13776_v28 = vsub.f32 %v13106_v48, %v13479_v40  ;;  %v13783_v29 = vsub.f32 %v13109_v24, %v13479_v40  ;;  %v13790_v48 = vsub.f32 %v13112_v55, %v13479_v40 }
 0x6f7   :  { %v5970_v43 = vadd.f32 %v5969_v32, %v5968_v56  ;;  %v5890_v32 = vmul.f32 %v13657_v35, %v13657_v35  ;;  %v5977_v22 = vsel %vm2894_vm13, %v5889_v36, 0.0  ;;  %v13797_v24 = vsub.f32 %v13115_v41, %v13479_v40 }
 0x6f8   :  { %v13804_v55 = vsub.f32 %v13118_v23, %v13479_v40  ;;  %v13811_v41 = vsub.f32 %v13121_v4, %v13479_v40  ;;  %v13818_v23 = vsub.f32 %v13124_v62, %v13479_v40  ;;  %v13825_v4 = vsub.f32 %v13127_v18, %v13479_v40 }
 0x6f9   :  { %v5972_v39 = vadd.f32 %v5971_v57, %v5970_v43  ;;  %v5891_v57 = vmul.f32 %v13664_v20, %v13664_v20  ;;  %v5979_v60 = vsel %vm2894_vm13, %v5890_v32, 0.0  ;;  %v13832_v62 = vsub.f32 %v13130_v53, %v13479_v40 }
 0x6fa   :  { %v13839_v18 = vsub.f32 %v13133_v50, %v13479_v40  ;;  %v13846_v53 = vsub.f32 %v13136_v34, %v13479_v40  ;;  %v13853_v50 = vsub.f32 %v13139_v44, %v13479_v40  ;;  %v13860_v34 = vsub.f32 %v13142_v16, %v13479_v40 }
 0x6fb   :  { %v5974_v56 = vadd.f32 %v5973_v7, %v5972_v39  ;;  %v5892_v7 = vmul.f32 %v13671_v10, %v13671_v10  ;;  %v5981_v36 = vsel %vm2894_vm13, %v5891_v57, 0.0  ;;  %v13867_v44 = vsub.f32 %v13145_v1, %v13479_v40 }
 0x6fc   :  { %v13874_v16 = vsub.f32 %v13148_v33, %v13479_v40  ;;  %v13881_v1 = vsub.f32 %v13151_v30, %v13479_v40  ;;  %v13888_v33 = vsub.f32 %v13154_v31, %v13479_v40  ;;  %v13895_v30 = vsub.f32 %v13157_v59, %v13479_v40 }
 0x6fd   :  { %v5976_v43 = vadd.f32 %v5975_v46, %v5974_v56  ;;  %v5893_v46 = vmul.f32 %v13678_v3, %v13678_v3  ;;  %v5983_v32 = vsel %vm2894_vm13, %v5892_v7, 0.0  ;;  %15585 = vst [vmem:[#allocation54_spill] sm:$0xff] %v13867_v44  ;;  %v13902_v31 = vsub.f32 %v13160_v63, %v13479_v40 }
 0x6fe   :  { %15586 = vst [vmem:[#allocation112_spill] sm:$0xff] %v13881_v1  ;;  %15587 = vst [vmem:[#allocation59_spill] sm:$0xff] %v13888_v33  ;;  %v13909_v59 = vsub.f32 %v15546_v38, %v13479_v40  ;;  %v13916_v63 = vsub.f32 %v15547_v26, %v13479_v40 }
 0x6ff   :  { %v5978_v39 = vadd.f32 %v5977_v22, %v5976_v43  ;;  %v5894_v22 = vmul.f32 %v13685_v13, %v13685_v13  ;;  %v5985_v57 = vsel %vm2894_vm13, %v5893_v46, 0.0  ;;  %15588 = vst [vmem:[#allocation104_spill] sm:$0xff] %v13895_v30  ;;  %15589 = vst [vmem:[#allocation60_spill] sm:$0xff] %v13902_v31 }
 0x700   :  { %15590 = vst [vmem:[#allocation113_spill] sm:$0xff] %v13909_v59  ;;  %v5926_v38 = vmul.f32 %v13909_v59, %v13909_v59 }
 0x701   :  { %v5980_v56 = vadd.f32 %v5979_v60, %v5978_v39  ;;  %v5895_v60 = vmul.f32 %v13692_v9, %v13692_v9  ;;  %v5987_v7 = vsel %vm2894_vm13, %v5894_v22, 0.0 }
 0x702   :  { %v6051_v26 = vsel %vm2894_vm13, %v5926_v38, 0.0  ;;  %v15591_v38 = vld [vmem:[#allocation75_spill] sm:$0xff] }
 0x703   :  { %v5982_v43 = vadd.f32 %v5981_v36, %v5980_v56  ;;  %v5896_v36 = vmul.f32 %v13699_v19, %v13699_v19  ;;  %v5989_v46 = vsel %vm2894_vm13, %v5895_v60, 0.0 }
 0x705   :  { %v5984_v39 = vadd.f32 %v5983_v32, %v5982_v43  ;;  %v5897_v32 = vmul.f32 %v13706_v52, %v13706_v52  ;;  %v5991_v22 = vsel %vm2894_vm13, %v5896_v36, 0.0 }
 0x707   :  { %v5986_v56 = vadd.f32 %v5985_v57, %v5984_v39  ;;  %v5898_v57 = vmul.f32 %v13713_v0, %v13713_v0  ;;  %v5993_v60 = vsel %vm2894_vm13, %v5897_v32, 0.0 }
 0x709   :  { %v5988_v43 = vadd.f32 %v5987_v7, %v5986_v56  ;;  %v5899_v7 = vmul.f32 %v13720_v49, %v13720_v49  ;;  %v5995_v36 = vsel %vm2894_vm13, %v5898_v57, 0.0 }
 0x70b   :  { %v5990_v39 = vadd.f32 %v5989_v46, %v5988_v43  ;;  %v5900_v46 = vmul.f32 %v13727_v2, %v13727_v2  ;;  %v5997_v32 = vsel %vm2894_vm13, %v5899_v7, 0.0 }
 0x70d   :  { %v5992_v56 = vadd.f32 %v5991_v22, %v5990_v39  ;;  %v5901_v22 = vmul.f32 %v13734_v5, %v13734_v5  ;;  %v5999_v57 = vsel %vm2894_vm13, %v5900_v46, 0.0 }
 0x70f   :  { %v5994_v43 = vadd.f32 %v5993_v60, %v5992_v56  ;;  %v5902_v60 = vmul.f32 %v13741_v8, %v13741_v8  ;;  %v6001_v7 = vsel %vm2894_vm13, %v5901_v22, 0.0 }
 0x711   :  { %v5996_v39 = vadd.f32 %v5995_v36, %v5994_v43  ;;  %v5903_v36 = vmul.f32 %v13748_v58, %v13748_v58  ;;  %v6003_v46 = vsel %vm2894_vm13, %v5902_v60, 0.0 }
 0x713   :  { %v5998_v56 = vadd.f32 %v5997_v32, %v5996_v39  ;;  %v5904_v32 = vmul.f32 %v13755_v61, %v13755_v61  ;;  %v6005_v22 = vsel %vm2894_vm13, %v5903_v36, 0.0 }
 0x715   :  { %v6000_v43 = vadd.f32 %v5999_v57, %v5998_v56  ;;  %v5905_v57 = vmul.f32 %v13762_v25, %v13762_v25  ;;  %v6007_v60 = vsel %vm2894_vm13, %v5904_v32, 0.0 }
 0x717   :  { %v6002_v39 = vadd.f32 %v6001_v7, %v6000_v43  ;;  %v5906_v7 = vmul.f32 %v13769_v6, %v13769_v6  ;;  %v6009_v36 = vsel %vm2894_vm13, %v5905_v57, 0.0 }
 0x719   :  { %v6004_v56 = vadd.f32 %v6003_v46, %v6002_v39  ;;  %v5907_v46 = vmul.f32 %v13776_v28, %v13776_v28  ;;  %v6011_v32 = vsel %vm2894_vm13, %v5906_v7, 0.0 }
 0x71b   :  { %v6006_v43 = vadd.f32 %v6005_v22, %v6004_v56  ;;  %v5908_v22 = vmul.f32 %v13783_v29, %v13783_v29  ;;  %v6013_v57 = vsel %vm2894_vm13, %v5907_v46, 0.0 }
 0x71d   :  { %v6008_v39 = vadd.f32 %v6007_v60, %v6006_v43  ;;  %v5909_v60 = vmul.f32 %v13790_v48, %v13790_v48  ;;  %v6015_v7 = vsel %vm2894_vm13, %v5908_v22, 0.0 }
 0x71f   :  { %v6010_v56 = vadd.f32 %v6009_v36, %v6008_v39  ;;  %v5910_v36 = vmul.f32 %v13797_v24, %v13797_v24  ;;  %v6017_v46 = vsel %vm2894_vm13, %v5909_v60, 0.0 }
 0x721   :  { %v6012_v43 = vadd.f32 %v6011_v32, %v6010_v56  ;;  %v5911_v32 = vmul.f32 %v13804_v55, %v13804_v55  ;;  %v6019_v22 = vsel %vm2894_vm13, %v5910_v36, 0.0 }
 0x723   :  { %v6014_v39 = vadd.f32 %v6013_v57, %v6012_v43  ;;  %v5912_v57 = vmul.f32 %v13811_v41, %v13811_v41  ;;  %v6021_v60 = vsel %vm2894_vm13, %v5911_v32, 0.0 }
 0x725   :  { %v6016_v56 = vadd.f32 %v6015_v7, %v6014_v39  ;;  %v5913_v7 = vmul.f32 %v13818_v23, %v13818_v23  ;;  %v6023_v36 = vsel %vm2894_vm13, %v5912_v57, 0.0 }
 0x727   :  { %v6018_v43 = vadd.f32 %v6017_v46, %v6016_v56  ;;  %v5914_v46 = vmul.f32 %v13825_v4, %v13825_v4  ;;  %v6025_v32 = vsel %vm2894_vm13, %v5913_v7, 0.0 }
 0x729   :  { %v6020_v39 = vadd.f32 %v6019_v22, %v6018_v43  ;;  %v5915_v22 = vmul.f32 %v13832_v62, %v13832_v62  ;;  %v6027_v57 = vsel %vm2894_vm13, %v5914_v46, 0.0 }
 0x72b   :  { %v6022_v56 = vadd.f32 %v6021_v60, %v6020_v39  ;;  %v5916_v60 = vmul.f32 %v13839_v18, %v13839_v18  ;;  %v6029_v7 = vsel %vm2894_vm13, %v5915_v22, 0.0 }
 0x72d   :  { %v6024_v43 = vadd.f32 %v6023_v36, %v6022_v56  ;;  %v5917_v36 = vmul.f32 %v13846_v53, %v13846_v53  ;;  %v6031_v46 = vsel %vm2894_vm13, %v5916_v60, 0.0 }
 0x72f   :  { %v6026_v39 = vadd.f32 %v6025_v32, %v6024_v43  ;;  %v5918_v32 = vmul.f32 %v13853_v50, %v13853_v50  ;;  %v6033_v22 = vsel %vm2894_vm13, %v5917_v36, 0.0 }
 0x731   :  { %v6028_v56 = vadd.f32 %v6027_v57, %v6026_v39  ;;  %v5919_v57 = vmul.f32 %v13860_v34, %v13860_v34  ;;  %v6035_v60 = vsel %vm2894_vm13, %v5918_v32, 0.0 }
 0x733   :  { %v6030_v43 = vadd.f32 %v6029_v7, %v6028_v56  ;;  %v5920_v7 = vmul.f32 %v13867_v44, %v13867_v44  ;;  %v6037_v36 = vsel %vm2894_vm13, %v5919_v57, 0.0 }
 0x735   :  { %v6032_v39 = vadd.f32 %v6031_v46, %v6030_v43  ;;  %v5921_v46 = vmul.f32 %v13874_v16, %v13874_v16  ;;  %v6039_v32 = vsel %vm2894_vm13, %v5920_v7, 0.0 }
 0x737   :  { %v6034_v56 = vadd.f32 %v6033_v22, %v6032_v39  ;;  %v5922_v22 = vmul.f32 %v13881_v1, %v13881_v1  ;;  %v6041_v57 = vsel %vm2894_vm13, %v5921_v46, 0.0 }
 0x739   :  { %v6036_v43 = vadd.f32 %v6035_v60, %v6034_v56  ;;  %v5923_v60 = vmul.f32 %v13888_v33, %v13888_v33  ;;  %v6043_v7 = vsel %vm2894_vm13, %v5922_v22, 0.0  ;;  %v5927_v22 = vmul.f32 %v13916_v63, %v13916_v63 }
 0x73b   :  { %v6038_v39 = vadd.f32 %v6037_v36, %v6036_v43  ;;  %v5924_v36 = vmul.f32 %v13895_v30, %v13895_v30  ;;  %v6045_v46 = vsel %vm2894_vm13, %v5923_v60, 0.0  ;;  %v6053_v30 = vsel %vm2894_vm13, %v5927_v22, 0.0 }
 0x73d   :  { %v6040_v56 = vadd.f32 %v6039_v32, %v6038_v39  ;;  %v5925_v32 = vmul.f32 %v13902_v31, %v13902_v31 }
 0x73f   :  { %v6042_v43 = vadd.f32 %v6041_v57, %v6040_v56  ;;  %v6047_v57 = vsel %vm2894_vm13, %v5924_v36, 0.0 }
 0x741   :  { %v6044_v39 = vadd.f32 %v6043_v7, %v6042_v43  ;;  %v6049_v43 = vsel %vm2894_vm13, %v5925_v32, 0.0 }
 0x743   :  { %v6046_v56 = vadd.f32 %v6045_v46, %v6044_v39 }
 0x745   :  { %v6048_v1 = vadd.f32 %v6047_v57, %v6046_v56 }
 0x747   :  { %v6050_v7 = vadd.f32 %v6049_v43, %v6048_v1  ;;  %v13934_v1 = vld [vmem:[%s14347_s5] ss:$0 sm:$0xff]  ;;  %s7110_s5 = smov 16  }
 0x749   :  { %v6052_v40 = vadd.f32 %v6051_v26, %v6050_v7 }
 0x74b   :  { %v6054_v31 = vadd.f32 %v6053_v30, %v6052_v40 }
 0x74d   :  { %v6055_v60 = vrot.slane %v6054_v31, 4 }
 0x74f   :  { %v6056_v39 = vadd.f32 %v6055_v60, %v6054_v31 }
 0x751   :  { %v6057_v46 = vrot.slane %v6056_v39, 2 }
 0x753   :  { %v6058_v33 = vadd.f32 %v6057_v46, %v6056_v39 }
 0x755   :  { %v6059_v59 = vrot.slane %v6058_v33, 1 }
 0x757   :  { %v6060_v44 = vadd.f32 %v6059_v59, %v6058_v33  ;;  %v13947_v33 = vld [vmem:[%s14348_s6] ss:$0 sm:$0xff]  ;;  %s7111_s6 = smov [#allocation5]  }
 0x758   :  { %s6850_s3 = sshll.u32 %s7111_s6, 4  ;;  %s6851_s3 = int_to_ptr.vmem [resolvable:$true] %s6850_s3 }
 0x759   :  { %v6061_v36 = vmul.f32 0.001953125, %v6060_v44  ;;  %s7076_s16 = scalar_lea.vmem %s6851_s3, 8192  ;;  %p7081_p1 = scmp.lt.s32.totalorder %s6851_s3, %s6851_s3 }
 0x75a   :  { %p7077_p0 = scmp.ne.s32.totalorder %s6851_s3, %s7076_s16  ;;  %p7082_p2 = scmp.lt.s32.totalorder %s7076_s16, %s7076_s16 }
 0x75b   :  { %v6062_v56 = vadd.f32 1e-05, %v6061_v36 }
 0x75c   :  { %p7083_p3 = por %p7082_p2, %p7081_p1 }
 0x75d   :  { %7040 = vrsqrt.f32 %v6062_v56 }
 0x75e   :  { %p7084_p4 = pnand %p7083_p3, %p7077_p0 }
 0x767   :  { %v13929_v57 = vpop.eup %7040 }
 0x768   :  { %v6065_v32 = vmul.f32 %v13929_v57, %v13487_v51  ;;  %v6064_v30 = vmul.f32 %v13929_v57, %v13483_v54  ;;  %v6067_v31 = vmul.f32 %v13929_v57, %v13495_v17  ;;  %v6066_v44 = vmul.f32 %v13929_v57, %v13491_v42 }
 0x769   :  { %v6069_v59 = vmul.f32 %v13929_v57, %v13509_v37  ;;  %v6068_v51 = vmul.f32 %v13929_v57, %v13503_v12  ;;  %v6071_v54 = vmul.f32 %v13929_v57, %v13524_v14  ;;  %v6070_v17 = vmul.f32 %v13929_v57, %v15591_v38 }
 0x76a   :  { %v6135_v22 = vmul.f32 %v13934_v1, %v6065_v32  ;;  %v6134_v42 = vmul.f32 %v13934_v1, %v6064_v30  ;;  %v6137_v43 = vmul.f32 %v13934_v1, %v6067_v31  ;;  %v6136_v7 = vmul.f32 %v13934_v1, %v6066_v44 }
 0x76b   :  { %v6139_v26 = vmul.f32 %v13934_v1, %v6069_v59  ;;  %v6138_v37 = vmul.f32 %v13934_v1, %v6068_v51  ;;  %v6141_v46 = vmul.f32 %v13934_v1, %v6071_v54  ;;  %v6140_v36 = vmul.f32 %v13934_v1, %v6070_v17 }
 0x76c   :  { %v6205_v12 = vadd.f32 %v13947_v33, %v6135_v22  ;;  %v6204_v40 = vadd.f32 %v13947_v33, %v6134_v42  ;;  %v6207_v14 = vadd.f32 %v13947_v33, %v6137_v43  ;;  %v6206_v60 = vadd.f32 %v13947_v33, %v6136_v7  ;;  %v15592_v42 = vld [vmem:[#allocation76_spill] sm:$0xff] }
 0x76d   :  { %v6209_v39 = vadd.f32 %v13947_v33, %v6139_v26  ;;  %v6208_v31 = vadd.f32 %v13947_v33, %v6138_v37  ;;  %v6211_v54 = vadd.f32 %v13947_v33, %v6141_v46  ;;  %v6210_v38 = vadd.f32 %v13947_v33, %v6140_v36  ;;  %v15593_v7 = vld [vmem:[#allocation40_spill] sm:$0xff] }
 0x76e   :  { %vm6269_vm13 = vcmp.ge.f32.partialorder %v6205_v12, 0.0  ;;  %v6333_v56 = vmul.f32 0.01, %v6205_v12  ;;  %vm6268_vm5 = vcmp.ge.f32.partialorder %v6204_v40, 0.0  ;;  %v6332_v32 = vmul.f32 0.01, %v6204_v40 }
 0x76f   :  { %v6335_v30 = vmul.f32 0.01, %v6207_v14  ;;  %vm6271_vm0 = vcmp.ge.f32.partialorder %v6207_v14, 0.0  ;;  %v6334_v51 = vmul.f32 0.01, %v6206_v60  ;;  %vm6270_vm1 = vcmp.ge.f32.partialorder %v6206_v60, 0.0 }
 0x770   :  { %v6397_v44 = vsel %vm6269_vm13, %v6205_v12, %v6333_v56  ;;  %v6396_v59 = vsel %vm6268_vm5, %v6204_v40, %v6332_v32  ;;  %vm6273_vm11 = vcmp.ge.f32.partialorder %v6209_v39, 0.0  ;;  %v6337_v22 = vmul.f32 0.01, %v6209_v39  ;;  %v15594_v40 = vld [vmem:[#allocation77_spill] sm:$0xff] }
 0x771   :  { %6590 = vrot.lane.b32.xlu1 %v6397_v44, %s7110_s5  ;;  %6588 = vrot.lane.b32.xlu0 %v6396_v59, %s7110_s5  ;;  %v6399_v17 = vsel %vm6271_vm0, %v6207_v14, %v6335_v30  ;;  %v6073_v43 = vmul.f32 %v13929_v57, %v15592_v42  ;;  %v6072_v26 = vmul.f32 %v13929_v57, %v15593_v7  ;;  %v6336_v12 = vmul.f32 0.01, %v6208_v31  ;;  %v15595_v32 = vld [vmem:[#allocation25_spill] sm:$0xff]  ;;  %v15596_v30 = vld [vmem:[#allocation78_spill] sm:$0xff] }
 0x772   :  { %v6398_v37 = vsel %vm6270_vm1, %v6206_v60, %v6334_v51  ;;  %v6075_v56 = vmul.f32 %v13929_v57, %v15594_v40  ;;  %v6074_v44 = vmul.f32 %v13929_v57, %v15595_v32  ;;  %vm6272_vm4 = vcmp.ge.f32.partialorder %v6208_v31, 0.0  ;;  %v15597_v59 = vld [vmem:[#allocation94_spill] sm:$0xff] }
 0x773   :  { %v6143_v14 = vmul.f32 %v13934_v1, %v6073_v43  ;;  %v6142_v46 = vmul.f32 %v13934_v1, %v6072_v26  ;;  %v6077_v60 = vmul.f32 %v13929_v57, %v15596_v30  ;;  %v6076_v51 = vmul.f32 %v13929_v57, %v15597_v59 }
 0x774   :  { %v6145_v36 = vmul.f32 %v13934_v1, %v6075_v56  ;;  %v6401_v42 = vsel %vm6273_vm11, %v6209_v39, %v6337_v22  ;;  %v6339_v7 = vmul.f32 0.01, %v6211_v54  ;;  %v6400_v40 = vsel %vm6272_vm4, %v6208_v31, %v6336_v12  ;;  %v15598_v31 = vld [vmem:[#allocation79_spill] sm:$0xff] }
 0x775   :  { %6594 = vrot.lane.b32.xlu1 %v6399_v17, %s7110_s5  ;;  %6592 = vrot.lane.b32.xlu0 %v6398_v37, %s7110_s5  ;;  %v6144_v17 = vmul.f32 %v13934_v1, %v6074_v44  ;;  %v6338_v37 = vmul.f32 0.01, %v6210_v38  ;;  %v6213_v32 = vadd.f32 %v13947_v33, %v6143_v14  ;;  %v6212_v43 = vadd.f32 %v13947_v33, %v6142_v46  ;;  %v15599_v44 = vld [vmem:[#allocation41_spill] sm:$0xff] }
 0x776   :  { %vm6275_vm2 = vcmp.ge.f32.partialorder %v6211_v54, 0.0  ;;  %vm6274_vm12 = vcmp.ge.f32.partialorder %v6210_v38, 0.0  ;;  %v6215_v26 = vadd.f32 %v13947_v33, %v6145_v36  ;;  %v6147_v56 = vmul.f32 %v13934_v1, %v6077_v60 }
 0x777   :  { %v6146_v39 = vmul.f32 %v13934_v1, %v6076_v51  ;;  %v6214_v22 = vadd.f32 %v13947_v33, %v6144_v17  ;;  %v6079_v12 = vmul.f32 %v13929_v57, %v15598_v31  ;;  %v6078_v14 = vmul.f32 %v13929_v57, %v15599_v44  ;;  %v15601_v44 = vld [vmem:[#allocation95_spill] sm:$0xff] }
 0x778   :  { %v6403_v46 = vsel %vm6275_vm2, %v6211_v54, %v6339_v7  ;;  %v6402_v30 = vsel %vm6274_vm12, %v6210_v38, %v6338_v37  ;;  %v6341_v59 = vmul.f32 0.01, %v6213_v32  ;;  %vm6277_vm9 = vcmp.ge.f32.partialorder %v6213_v32, 0.0  ;;  %v15600_v37 = vld [vmem:[#allocation80_spill] sm:$0xff] }
 0x779   :  { %6598 = vrot.lane.b32.xlu1 %v6401_v42, %s7110_s5  ;;  %6596 = vrot.lane.b32.xlu0 %v6400_v40, %s7110_s5  ;;  %v6340_v42 = vmul.f32 0.01, %v6212_v43  ;;  %vm6276_vm7 = vcmp.ge.f32.partialorder %v6212_v43, 0.0  ;;  %vm6279_vm14 = vcmp.ge.f32.partialorder %v6215_v26, 0.0  ;;  %v6217_v36 = vadd.f32 %v13947_v33, %v6147_v56 }
 0x77a   :  { %v6216_v60 = vadd.f32 %v13947_v33, %v6146_v39  ;;  %v6343_v51 = vmul.f32 0.01, %v6215_v26  ;;  %v6342_v17 = vmul.f32 0.01, %v6214_v22  ;;  %v6149_v40 = vmul.f32 %v13934_v1, %v6079_v12 }
 0x77b   :  { %v6148_v54 = vmul.f32 %v13934_v1, %v6078_v14  ;;  %v6405_v38 = vsel %vm6277_vm9, %v6213_v32, %v6341_v59  ;;  %v6404_v7 = vsel %vm6276_vm7, %v6212_v43, %v6340_v42  ;;  %v6081_v31 = vmul.f32 %v13929_v57, %v15600_v37 }
 0x77c   :  { %vm6278_vm3 = vcmp.ge.f32.partialorder %v6214_v22, 0.0  ;;  %vm6281_vm10 = vcmp.ge.f32.partialorder %v6217_v36, 0.0  ;;  %v6345_v56 = vmul.f32 0.01, %v6217_v36  ;;  %v6344_v39 = vmul.f32 0.01, %v6216_v60 }
 0x77d   :  { %6602 = vrot.lane.b32.xlu1 %v6403_v46, %s7110_s5  ;;  %6600 = vrot.lane.b32.xlu0 %v6402_v30, %s7110_s5  ;;  %v6080_v46 = vmul.f32 %v13929_v57, %v15601_v44  ;;  %v15602_v30 = vld [vmem:[#allocation57_spill] sm:$0xff]  ;;  %v6407_v32 = vsel %vm6279_vm14, %v6215_v26, %v6343_v51  ;;  %vm6280_vm15 = vcmp.ge.f32.partialorder %v6216_v60, 0.0  ;;  %v6219_v43 = vadd.f32 %v13947_v33, %v6149_v40 }
 0x77e   :  { %v6083_v12 = vmul.f32 %v13929_v57, %v15602_v30  ;;  %v6218_v14 = vadd.f32 %v13947_v33, %v6148_v54  ;;  %v6406_v59 = vsel %vm6278_vm3, %v6214_v22, %v6342_v17  ;;  %v6151_v42 = vmul.f32 %v13934_v1, %v6081_v31 }
 0x77f   :  { %v6409_v44 = vsel %vm6281_vm10, %v6217_v36, %v6345_v56  ;;  %v6408_v30 = vsel %vm6280_vm15, %v6216_v60, %v6344_v39  ;;  %v6085_v51 = vmul.f32 %v13929_v57, %v13622_v15  ;;  %vm6283_vm6 = vcmp.ge.f32.partialorder %v6219_v43, 0.0 }
 0x780   :  { %v6153_v26 = vmul.f32 %v13934_v1, %v6083_v12  ;;  %v6347_v22 = vmul.f32 0.01, %v6219_v43  ;;  %v6346_v17 = vmul.f32 0.01, %v6218_v14  ;;  %v6084_v40 = vmul.f32 %v13929_v57, %v13615_v21 }
 0x781   :  { %6606 = vrot.lane.b32.xlu1 %v6405_v38, %s7110_s5  ;;  %6604 = vrot.lane.b32.xlu0 %v6404_v7, %s7110_s5  ;;  %v6150_v38 = vmul.f32 %v13934_v1, %v6080_v46  ;;  %v15603_v7 = vld [vmem:[#allocation26_spill] sm:$0xff]  ;;  %vm6282_vm8 = vcmp.ge.f32.partialorder %v6218_v14, 0.0  ;;  %v6221_v54 = vadd.f32 %v13947_v33, %v6151_v42  ;;  %v6155_v15 = vmul.f32 %v13934_v1, %v6085_v51 }
 0x782   :  { %v6082_v37 = vmul.f32 %v13929_v57, %v15603_v7  ;;  %v6223_v36 = vadd.f32 %v13947_v33, %v6153_v26  ;;  %v6411_v60 = vsel %vm6283_vm6, %v6219_v43, %v6347_v22  ;;  %v6410_v56 = vsel %vm6282_vm8, %v6218_v14, %v6346_v17 }
 0x783   :  { %v6220_v31 = vadd.f32 %v13947_v33, %v6150_v38  ;;  %v6154_v39 = vmul.f32 %v13934_v1, %v6084_v40  ;;  %v6087_v21 = vmul.f32 %v13929_v57, %v13636_v27  ;;  %v6349_v12 = vmul.f32 0.01, %v6221_v54 }
 0x784   :  { %v6152_v46 = vmul.f32 %v13934_v1, %v6082_v37  ;;  %v6086_v42 = vmul.f32 %v13929_v57, %v13629_v11  ;;  %vm6285_vm13 = vcmp.ge.f32.partialorder %v6221_v54, 0.0  ;;  %v6351_v43 = vmul.f32 0.01, %v6223_v36 }
 0x785   :  { %6610 = vrot.lane.b32.xlu1 %v6407_v32, %s7110_s5  ;;  %6608 = vrot.lane.b32.xlu0 %v6406_v59, %s7110_s5  ;;  %v6348_v32 = vmul.f32 0.01, %v6220_v31  ;;  %vm6284_vm5 = vcmp.ge.f32.partialorder %v6220_v31, 0.0  ;;  %v6225_v14 = vadd.f32 %v13947_v33, %v6155_v15  ;;  %v6089_v38 = vmul.f32 %v13929_v57, %v13650_v47 }
 0x786   :  { %v6222_v59 = vadd.f32 %v13947_v33, %v6152_v46  ;;  %vm6287_vm0 = vcmp.ge.f32.partialorder %v6223_v36, 0.0  ;;  %v6224_v27 = vadd.f32 %v13947_v33, %v6154_v39  ;;  %v6157_v7 = vmul.f32 %v13934_v1, %v6087_v21 }
 0x787   :  { %v6088_v11 = vmul.f32 %v13929_v57, %v13643_v45  ;;  %v6413_v37 = vsel %vm6285_vm13, %v6221_v54, %v6349_v12  ;;  %v6156_v26 = vmul.f32 %v13934_v1, %v6086_v42  ;;  %v6415_v51 = vsel %vm6287_vm0, %v6223_v36, %v6351_v43 }
 0x788   :  { %vm6286_vm1 = vcmp.ge.f32.partialorder %v6222_v59, 0.0  ;;  %vm6289_vm11 = vcmp.ge.f32.partialorder %v6225_v14, 0.0  ;;  %v6353_v47 = vmul.f32 0.01, %v6225_v14  ;;  %v6159_v22 = vmul.f32 %v13934_v1, %v6089_v38 }
 0x789   :  { %6614 = vrot.lane.b32.xlu1 %v6409_v44, %s7110_s5  ;;  %6612 = vrot.lane.b32.xlu0 %v6408_v30, %s7110_s5  ;;  %v6412_v44 = vsel %vm6284_vm5, %v6220_v31, %v6348_v32  ;;  %v6350_v30 = vmul.f32 0.01, %v6222_v59  ;;  %v6352_v17 = vmul.f32 0.01, %v6224_v27  ;;  %v6227_v40 = vadd.f32 %v13947_v33, %v6157_v7 }
 0x78a   :  { %v6158_v45 = vmul.f32 %v13934_v1, %v6088_v11  ;;  %v6091_v54 = vmul.f32 %v13929_v57, %v13664_v20  ;;  %vm6288_vm4 = vcmp.ge.f32.partialorder %v6224_v27, 0.0  ;;  %v6226_v46 = vadd.f32 %v13947_v33, %v6156_v26 }
 0x78b   :  { %v6414_v31 = vsel %vm6286_vm1, %v6222_v59, %v6350_v30  ;;  %v6090_v15 = vmul.f32 %v13929_v57, %v13657_v35  ;;  %v6417_v36 = vsel %vm6289_vm11, %v6225_v14, %v6353_v47  ;;  %v6416_v39 = vsel %vm6288_vm4, %v6224_v27, %v6352_v17 }
 0x78c   :  { %v6355_v21 = vmul.f32 0.01, %v6227_v40  ;;  %v6228_v20 = vadd.f32 %v13947_v33, %v6158_v45  ;;  %v6161_v12 = vmul.f32 %v13934_v1, %v6091_v54  ;;  %vm6291_vm2 = vcmp.ge.f32.partialorder %v6227_v40, 0.0 }
 0x78d   :  { %6618 = vrot.lane.b32.xlu1 %v6411_v60, %s7110_s5  ;;  %6616 = vrot.lane.b32.xlu0 %v6410_v56, %s7110_s5  ;;  %v6229_v60 = vadd.f32 %v13947_v33, %v6159_v22  ;;  %v6093_v56 = vmul.f32 %v13929_v57, %v13678_v3  ;;  %v6354_v32 = vmul.f32 0.01, %v6226_v46  ;;  %v6160_v35 = vmul.f32 %v13934_v1, %v6090_v15 }
 0x78e   :  { %v6092_v59 = vmul.f32 %v13929_v57, %v13671_v10  ;;  %vm6290_vm12 = vcmp.ge.f32.partialorder %v6226_v46, 0.0  ;;  %v6095_v43 = vmul.f32 %v13929_v57, %v13692_v9  ;;  %v6419_v14 = vsel %vm6291_vm2, %v6227_v40, %v6355_v21 }
 0x78f   :  { %vm6293_vm9 = vcmp.ge.f32.partialorder %v6229_v60, 0.0  ;;  %v6357_v3 = vmul.f32 0.01, %v6229_v60  ;;  %v6163_v42 = vmul.f32 %v13934_v1, %v6093_v56  ;;  %v6356_v38 = vmul.f32 0.01, %v6228_v20 }
 0x790   :  { %v6231_v27 = vadd.f32 %v13947_v33, %v6161_v12  ;;  %v6094_v7 = vmul.f32 %v13929_v57, %v13685_v13  ;;  %v6418_v10 = vsel %vm6290_vm12, %v6226_v46, %v6354_v32  ;;  %vm6292_vm7 = vcmp.ge.f32.partialorder %v6228_v20, 0.0 }
 0x791   :  { %6622 = vrot.lane.b32.xlu1 %v6413_v37, %s7110_s5  ;;  %6620 = vrot.lane.b32.xlu0 %v6412_v44, %s7110_s5  ;;  %v6230_v11 = vadd.f32 %v13947_v33, %v6160_v35  ;;  %v6162_v37 = vmul.f32 %v13934_v1, %v6092_v59  ;;  %v6421_v44 = vsel %vm6293_vm9, %v6229_v60, %v6357_v3 }
 0x792   :  { %v6233_v9 = vadd.f32 %v13947_v33, %v6163_v42  ;;  %v6165_v30 = vmul.f32 %v13934_v1, %v6095_v43  ;;  %v6420_v26 = vsel %vm6292_vm7, %v6228_v20, %v6356_v38  ;;  %vm6295_vm14 = vcmp.ge.f32.partialorder %v6231_v27, 0.0 }
 0x793   :  { %v6164_v13 = vmul.f32 %v13934_v1, %v6094_v7  ;;  %v6358_v47 = vmul.f32 0.01, %v6230_v11  ;;  %v6232_v22 = vadd.f32 %v13947_v33, %v6162_v37  ;;  %v6097_v17 = vmul.f32 %v13929_v57, %v13706_v52 }
 0x794   :  { %v6096_v40 = vmul.f32 %v13929_v57, %v13699_v19  ;;  %vm6294_vm3 = vcmp.ge.f32.partialorder %v6230_v11, 0.0  ;;  %v6361_v45 = vmul.f32 0.01, %v6233_v9  ;;  %v6235_v54 = vadd.f32 %v13947_v33, %v6165_v30 }
 0x795   :  { %6626 = vrot.lane.b32.xlu1 %v6415_v51, %s7110_s5  ;;  %6624 = vrot.lane.b32.xlu0 %v6414_v31, %s7110_s5  ;;  %v6359_v51 = vmul.f32 0.01, %v6231_v27  ;;  %v6099_v31 = vmul.f32 %v13929_v57, %v13720_v49  ;;  %v6098_v46 = vmul.f32 %v13929_v57, %v13713_v0  ;;  %vm6297_vm10 = vcmp.ge.f32.partialorder %v6233_v9, 0.0 }
 0x796   :  { %v6234_v52 = vadd.f32 %v13947_v33, %v6164_v13  ;;  %v6360_v19 = vmul.f32 0.01, %v6232_v22  ;;  %v6167_v60 = vmul.f32 %v13934_v1, %v6097_v17  ;;  %v6166_v56 = vmul.f32 %v13934_v1, %v6096_v40 }
 0x797   :  { %v6423_v15 = vsel %vm6295_vm14, %v6231_v27, %v6359_v51  ;;  %vm6296_vm15 = vcmp.ge.f32.partialorder %v6232_v22, 0.0  ;;  %vm6299_vm6 = vcmp.ge.f32.partialorder %v6235_v54, 0.0  ;;  %v6169_v49 = vmul.f32 %v13934_v1, %v6099_v31 }
 0x798   :  { %v6168_v0 = vmul.f32 %v13934_v1, %v6098_v46  ;;  %v6363_v21 = vmul.f32 0.01, %v6235_v54  ;;  %vm6298_vm8 = vcmp.ge.f32.partialorder %v6234_v52, 0.0  ;;  %v6362_v20 = vmul.f32 0.01, %v6234_v52 }
 0x799   :  { %6630 = vrot.lane.b32.xlu1 %v6417_v36, %s7110_s5  ;;  %6628 = vrot.lane.b32.xlu0 %v6416_v39, %s7110_s5  ;;  %v6422_v36 = vsel %vm6294_vm3, %v6230_v11, %v6358_v47  ;;  %v6425_v39 = vsel %vm6297_vm10, %v6233_v9, %v6361_v45  ;;  %v6101_v12 = vmul.f32 %v13929_v57, %v13734_v5 }
 0x79a   :  { %v6424_v32 = vsel %vm6296_vm15, %v6232_v22, %v6360_v19  ;;  %v6237_v35 = vadd.f32 %v13947_v33, %v6167_v60  ;;  %v6236_v59 = vadd.f32 %v13947_v33, %v6166_v56  ;;  %v6100_v3 = vmul.f32 %v13929_v57, %v13727_v2 }
 0x79b   :  { %v6239_v42 = vadd.f32 %v13947_v33, %v6169_v49  ;;  %v6238_v43 = vadd.f32 %v13947_v33, %v6168_v0  ;;  %v6427_v5 = vsel %vm6299_vm6, %v6235_v54, %v6363_v21  ;;  %v6426_v38 = vsel %vm6298_vm8, %v6234_v52, %v6362_v20 }
 0x79c   :  { %v6171_v27 = vmul.f32 %v13934_v1, %v6101_v12  ;;  %v6365_v7 = vmul.f32 0.01, %v6237_v35  ;;  %v6170_v2 = vmul.f32 %v13934_v1, %v6100_v3  ;;  %v6102_v11 = vmul.f32 %v13929_v57, %v13741_v8 }
 0x79d   :  { %6634 = vrot.lane.b32.xlu1 %v6419_v14, %s7110_s5  ;;  %6632 = vrot.lane.b32.xlu0 %v6418_v10, %s7110_s5  ;;  %v6103_v14 = vmul.f32 %v13929_v57, %v13748_v58  ;;  %v6364_v10 = vmul.f32 0.01, %v6236_v59  ;;  %vm6301_vm13 = vcmp.ge.f32.partialorder %v6237_v35, 0.0  ;;  %vm6300_vm5 = vcmp.ge.f32.partialorder %v6236_v59, 0.0 }
 0x79e   :  { %vm6303_vm0 = vcmp.ge.f32.partialorder %v6239_v42, 0.0  ;;  %v6367_v58 = vmul.f32 0.01, %v6239_v42  ;;  %v6366_v37 = vmul.f32 0.01, %v6238_v43  ;;  %vm6302_vm1 = vcmp.ge.f32.partialorder %v6238_v43, 0.0 }
 0x79f   :  { %v6241_v9 = vadd.f32 %v13947_v33, %v6171_v27  ;;  %v6105_v30 = vmul.f32 %v13929_v57, %v13762_v25  ;;  %v6104_v8 = vmul.f32 %v13929_v57, %v13755_v61  ;;  %v6428_v51 = vsel %vm6300_vm5, %v6236_v59, %v6364_v10 }
 0x7a0   :  { %v6240_v13 = vadd.f32 %v13947_v33, %v6170_v2  ;;  %v6172_v47 = vmul.f32 %v13934_v1, %v6102_v11  ;;  %v6431_v22 = vsel %vm6303_vm0, %v6239_v42, %v6367_v58  ;;  %v6430_v17 = vsel %vm6302_vm1, %v6238_v43, %v6366_v37 }
 0x7a1   :  { %6638 = vrot.lane.b32.xlu1 %v6421_v44, %s7110_s5  ;;  %6636 = vrot.lane.b32.xlu0 %v6420_v26, %s7110_s5  ;;  %v6173_v44 = vmul.f32 %v13934_v1, %v6103_v14  ;;  %v6429_v26 = vsel %vm6301_vm13, %v6237_v35, %v6365_v7  ;;  %v6369_v45 = vmul.f32 0.01, %v6241_v9  ;;  %v6175_v25 = vmul.f32 %v13934_v1, %v6105_v30 }
 0x7a2   :  { %v6174_v54 = vmul.f32 %v13934_v1, %v6104_v8  ;;  %v6107_v61 = vmul.f32 %v13929_v57, %v13776_v28  ;;  %vm6305_vm11 = vcmp.ge.f32.partialorder %v6241_v9, 0.0  ;;  %v6368_v31 = vmul.f32 0.01, %v6240_v13 }
 0x7a3   :  { %v6243_v40 = vadd.f32 %v13947_v33, %v6173_v44  ;;  %v6242_v46 = vadd.f32 %v13947_v33, %v6172_v47  ;;  %vm6304_vm4 = vcmp.ge.f32.partialorder %v6240_v13, 0.0  ;;  %v6109_v52 = vmul.f32 %v13929_v57, %v13790_v48 }
 0x7a4   :  { %v6433_v28 = vsel %vm6305_vm11, %v6241_v9, %v6369_v45  ;;  %v6245_v60 = vadd.f32 %v13947_v33, %v6175_v25  ;;  %v6177_v56 = vmul.f32 %v13934_v1, %v6107_v61  ;;  %v6244_v49 = vadd.f32 %v13947_v33, %v6174_v54 }
 0x7a5   :  { %6642 = vrot.lane.b32.xlu1 %v6423_v15, %s7110_s5  ;;  %6640 = vrot.lane.b32.xlu0 %v6422_v36, %s7110_s5  ;;  %v6106_v15 = vmul.f32 %v13929_v57, %v13769_v6  ;;  %vm6307_vm2 = vcmp.ge.f32.partialorder %v6243_v40, 0.0  ;;  %v6108_v36 = vmul.f32 %v13929_v57, %v13783_v29  ;;  %v6371_v19 = vmul.f32 0.01, %v6243_v40 }
 0x7a6   :  { %v6370_v6 = vmul.f32 0.01, %v6242_v46  ;;  %vm6306_vm12 = vcmp.ge.f32.partialorder %v6242_v46, 0.0  ;;  %v6179_v48 = vmul.f32 %v13934_v1, %v6109_v52  ;;  %v6111_v21 = vmul.f32 %v13929_v57, %v13804_v55 }
 0x7a7   :  { %v6176_v0 = vmul.f32 %v13934_v1, %v6106_v15  ;;  %v6178_v29 = vmul.f32 %v13934_v1, %v6108_v36  ;;  %v6435_v20 = vsel %vm6307_vm2, %v6243_v40, %v6371_v19  ;;  %v6373_v12 = vmul.f32 0.01, %v6245_v60 }
 0x7a8   :  { %v6110_v35 = vmul.f32 %v13929_v57, %v13797_v24  ;;  %v6434_v59 = vsel %vm6306_vm12, %v6242_v46, %v6370_v6  ;;  %vm6309_vm9 = vcmp.ge.f32.partialorder %v6245_v60, 0.0  ;;  %v6372_v3 = vmul.f32 0.01, %v6244_v49 }
 0x7a9   :  { %6646 = vrot.lane.b32.xlu1 %v6425_v39, %s7110_s5  ;;  %6644 = vrot.lane.b32.xlu0 %v6424_v32, %s7110_s5  ;;  %v6432_v39 = vsel %vm6304_vm4, %v6240_v13, %v6368_v31  ;;  %v6247_v32 = vadd.f32 %v13947_v33, %v6177_v56  ;;  %v6246_v42 = vadd.f32 %v13947_v33, %v6176_v0  ;;  %vm6308_vm7 = vcmp.ge.f32.partialorder %v6244_v49, 0.0 }
 0x7aa   :  { %v6249_v55 = vadd.f32 %v13947_v33, %v6179_v48  ;;  %v6248_v43 = vadd.f32 %v13947_v33, %v6178_v29  ;;  %v6181_v14 = vmul.f32 %v13934_v1, %v6111_v21  ;;  %v6437_v24 = vsel %vm6309_vm9, %v6245_v60, %v6373_v12 }
 0x7ab   :  { %v6180_v27 = vmul.f32 %v13934_v1, %v6110_v35  ;;  %v6436_v7 = vsel %vm6308_vm7, %v6244_v49, %v6372_v3  ;;  %vm6311_vm14 = vcmp.ge.f32.partialorder %v6247_v32, 0.0  ;;  %v6374_v10 = vmul.f32 0.01, %v6246_v42  ;;  %v15605_v35 = vld [vmem:[#allocation59_spill] sm:$0xff] }
 0x7ac   :  { %v6112_v2 = vmul.f32 %v13929_v57, %v13811_v41  ;;  %vm6310_vm3 = vcmp.ge.f32.partialorder %v6246_v42, 0.0  ;;  %v6377_v11 = vmul.f32 0.01, %v6249_v55  ;;  %v6376_v58 = vmul.f32 0.01, %v6248_v43 }
 0x7ad   :  { %6650 = vrot.lane.b32.xlu1 %v6427_v5, %s7110_s5  ;;  %6648 = vrot.lane.b32.xlu0 %v6426_v38, %s7110_s5  ;;  %v6113_v5 = vmul.f32 %v13929_v57, %v13818_v23  ;;  %v6375_v38 = vmul.f32 0.01, %v6247_v32  ;;  %v6251_v37 = vadd.f32 %v13947_v33, %v6181_v14  ;;  %vm6313_vm10 = vcmp.ge.f32.partialorder %v6249_v55, 0.0 }
 0x7ae   :  { %vm6312_vm15 = vcmp.ge.f32.partialorder %v6248_v43, 0.0  ;;  %v6250_v9 = vadd.f32 %v13947_v33, %v6180_v27  ;;  %v6438_v30 = vsel %vm6310_vm3, %v6246_v42, %v6374_v10  ;;  %v6182_v8 = vmul.f32 %v13934_v1, %v6112_v2  ;;  %v15607_v10 = vld [vmem:[#allocation60_spill] sm:$0xff] }
 0x7af   :  { %v6183_v23 = vmul.f32 %v13934_v1, %v6113_v5  ;;  %v6439_v44 = vsel %vm6311_vm14, %v6247_v32, %v6375_v38  ;;  %v6115_v41 = vmul.f32 %v13929_v57, %v13832_v62  ;;  %v6440_v13 = vsel %vm6312_vm15, %v6248_v43, %v6376_v58  ;;  %v15606_v43 = vld [vmem:[#allocation112_spill] sm:$0xff] }
 0x7b0   :  { %vm6315_vm6 = vcmp.ge.f32.partialorder %v6251_v37, 0.0  ;;  %vm6314_vm8 = vcmp.ge.f32.partialorder %v6250_v9, 0.0  ;;  %v6117_v40 = vmul.f32 %v13929_v57, %v13846_v53  ;;  %v6252_v62 = vadd.f32 %v13947_v33, %v6182_v8 }
 0x7b1   :  { %6654 = vrot.lane.b32.xlu1 %v6429_v26, %s7110_s5  ;;  %6652 = vrot.lane.b32.xlu0 %v6428_v51, %s7110_s5  ;;  %v6114_v26 = vmul.f32 %v13929_v57, %v13825_v4  ;;  %v6441_v51 = vsel %vm6313_vm10, %v6249_v55, %v6377_v11  ;;  %v6253_v47 = vadd.f32 %v13947_v33, %v6183_v23  ;;  %v15608_v11 = vld [vmem:[#allocation104_spill] sm:$0xff]  ;;  %vm6780_vm3 = vcmask 261248  }
 0x7b2   :  { %v6185_v45 = vmul.f32 %v13934_v1, %v6115_v41  ;;  %v6116_v25 = vmul.f32 %v13929_v57, %v13839_v18  ;;  %v6119_v54 = vmul.f32 %v13929_v57, %v13860_v34  ;;  %v6118_v53 = vmul.f32 %v13929_v57, %v13853_v50 }
 0x7b3   :  { %v6184_v4 = vmul.f32 %v13934_v1, %v6114_v26  ;;  %vm6317_vm13 = vcmp.ge.f32.partialorder %v6253_v47, 0.0  ;;  %v6381_v46 = vmul.f32 0.01, %v6253_v47  ;;  %v6187_v15 = vmul.f32 %v13934_v1, %v6117_v40 }
 0x7b4   :  { %v6380_v52 = vmul.f32 0.01, %v6252_v62  ;;  %v6255_v36 = vadd.f32 %v13947_v33, %v6185_v45  ;;  %vm6316_vm5 = vcmp.ge.f32.partialorder %v6252_v62, 0.0  ;;  %v6189_v34 = vmul.f32 %v13934_v1, %v6119_v54 }
 0x7b5   :  { %6658 = vrot.lane.b32.xlu1 %v6431_v22, %s7110_s5  ;;  %6656 = vrot.lane.b32.xlu0 %v6430_v17, %s7110_s5  ;;  %v6379_v22 = vmul.f32 0.01, %v6251_v37  ;;  %v6378_v17 = vmul.f32 0.01, %v6250_v9  ;;  %v6254_v18 = vadd.f32 %v13947_v33, %v6184_v4  ;;  %v6188_v50 = vmul.f32 %v13934_v1, %v6118_v53 }
 0x7b6   :  { %v6121_v19 = vmul.f32 %v13929_v57, %v13874_v16  ;;  %v6445_v60 = vsel %vm6317_vm13, %v6253_v47, %v6381_v46  ;;  %v6257_v56 = vadd.f32 %v13947_v33, %v6187_v15  ;;  %v6444_v49 = vsel %vm6316_vm5, %v6252_v62, %v6380_v52 }
 0x7b7   :  { %v6443_v61 = vsel %vm6315_vm6, %v6251_v37, %v6379_v22  ;;  %v6442_v31 = vsel %vm6314_vm8, %v6250_v9, %v6378_v17  ;;  %v6383_v0 = vmul.f32 0.01, %v6255_v36  ;;  %v6382_v48 = vmul.f32 0.01, %v6254_v18  ;;  %v15609_v17 = vld [vmem:[#allocation113_spill] sm:$0xff] }
 0x7b8   :  { %vm6319_vm0 = vcmp.ge.f32.partialorder %v6255_v36, 0.0  ;;  %vm6318_vm1 = vcmp.ge.f32.partialorder %v6254_v18, 0.0  ;;  %v6259_v16 = vadd.f32 %v13947_v33, %v6189_v34  ;;  %v6258_v21 = vadd.f32 %v13947_v33, %v6188_v50 }
 0x7b9   :  { %6662 = vrot.lane.b32.xlu1 %v6433_v28, %s7110_s5  ;;  %6660 = vrot.lane.b32.xlu0 %v6432_v39, %s7110_s5  ;;  %v6186_v28 = vmul.f32 %v13934_v1, %v6116_v25  ;;  %v15604_v39 = vld [vmem:[#allocation54_spill] sm:$0xff]  ;;  %v6385_v12 = vmul.f32 0.01, %v6257_v56  ;;  %v6447_v3 = vsel %vm6319_vm0, %v6255_v36, %v6383_v0  ;;  %v6446_v42 = vsel %vm6318_vm1, %v6254_v18, %v6382_v48 }
 0x7ba   :  { %v6120_v6 = vmul.f32 %v13929_v57, %v15604_v39  ;;  %v6122_v14 = vmul.f32 %v13929_v57, %v15606_v43  ;;  %vm6321_vm11 = vcmp.ge.f32.partialorder %v6257_v56, 0.0  ;;  %vm6323_vm2 = vcmp.ge.f32.partialorder %v6259_v16, 0.0 }
 0x7bb   :  { %v6256_v29 = vadd.f32 %v13947_v33, %v6186_v28  ;;  %v6387_v5 = vmul.f32 0.01, %v6259_v16  ;;  %vm6322_vm12 = vcmp.ge.f32.partialorder %v6258_v21, 0.0  ;;  %v6125_v2 = vmul.f32 %v13929_v57, %v15607_v10 }
 0x7bc   :  { %v6190_v32 = vmul.f32 %v13934_v1, %v6120_v6  ;;  %v6124_v58 = vmul.f32 %v13929_v57, %v15608_v11  ;;  %v6449_v37 = vsel %vm6321_vm11, %v6257_v56, %v6385_v12  ;;  %v6127_v22 = vmul.f32 %v13929_v57, %v13916_v63 }
 0x7bd   :  { %6666 = vrot.lane.b32.xlu1 %v6435_v20, %s7110_s5  ;;  %6664 = vrot.lane.b32.xlu0 %v6434_v59, %s7110_s5  ;;  %v6191_v20 = vmul.f32 %v13934_v1, %v6121_v19  ;;  %v6123_v59 = vmul.f32 %v13929_v57, %v15605_v35  ;;  %v6384_v55 = vmul.f32 0.01, %v6256_v29  ;;  %vm6320_vm4 = vcmp.ge.f32.partialorder %v6256_v29, 0.0 }
 0x7be   :  { %v6260_v27 = vadd.f32 %v13947_v33, %v6190_v32  ;;  %v6451_v9 = vsel %vm6323_vm2, %v6259_v16, %v6387_v5  ;;  %v6126_v40 = vmul.f32 %v13929_v57, %v15609_v17 }
 0x7bf   :  { %v6261_v38 = vadd.f32 %v13947_v33, %v6191_v20  ;;  %v6448_v23 = vsel %vm6320_vm4, %v6256_v29, %v6384_v55 }
 0x7c0   :  { %v6388_v41 = vmul.f32 0.01, %v6260_v27  ;;  %vm6324_vm7 = vcmp.ge.f32.partialorder %v6260_v27, 0.0  ;;  %v6196_v63 = vmul.f32 %v13934_v1, %v6126_v40 }
 0x7c1   :  { %6670 = vrot.lane.b32.xlu1 %v6437_v24, %s7110_s5  ;;  %6668 = vrot.lane.b32.xlu0 %v6436_v7, %s7110_s5  ;;  %v6386_v24 = vmul.f32 0.01, %v6258_v21  ;;  %v6193_v7 = vmul.f32 %v13934_v1, %v6123_v59  ;;  %vm6325_vm9 = vcmp.ge.f32.partialorder %v6261_v38, 0.0  ;;  %v6389_v8 = vmul.f32 0.01, %v6261_v38 }
 0x7c2   :  { %v6452_v45 = vsel %vm6324_vm7, %v6260_v27, %v6388_v41 }
 0x7c3   :  { %v6263_v26 = vadd.f32 %v13947_v33, %v6193_v7  ;;  %v6453_v62 = vsel %vm6325_vm9, %v6261_v38, %v6389_v8 }
 0x7c5   :  { %6674 = vrot.lane.b32.xlu1 %v6439_v44, %s7110_s5  ;;  %6672 = vrot.lane.b32.xlu0 %v6438_v30, %s7110_s5  ;;  %v6192_v44 = vmul.f32 %v13934_v1, %v6122_v14  ;;  %v6450_v30 = vsel %vm6322_vm12, %v6258_v21, %v6386_v24  ;;  %v6391_v4 = vmul.f32 0.01, %v6263_v26  ;;  %vm6327_vm14 = vcmp.ge.f32.partialorder %v6263_v26, 0.0 }
 0x7c7   :  { %v6262_v47 = vadd.f32 %v13947_v33, %v6192_v44  ;;  %v6455_v46 = vsel %vm6327_vm14, %v6263_v26, %v6391_v4 }
 0x7c9   :  { %6678 = vrot.lane.b32.xlu1 %v6441_v51, %s7110_s5  ;;  %6676 = vrot.lane.b32.xlu0 %v6440_v13, %s7110_s5  ;;  %v6195_v51 = vmul.f32 %v13934_v1, %v6125_v2  ;;  %v6194_v13 = vmul.f32 %v13934_v1, %v6124_v58  ;;  %v6390_v53 = vmul.f32 0.01, %v6262_v47  ;;  %vm6326_vm10 = vcmp.ge.f32.partialorder %v6262_v47, 0.0 }
 0x7cb   :  { %v6265_v25 = vadd.f32 %v13947_v33, %v6195_v51  ;;  %v6264_v54 = vadd.f32 %v13947_v33, %v6194_v13  ;;  %v6454_v52 = vsel %vm6326_vm10, %v6262_v47, %v6390_v53 }
 0x7cd   :  { %6682 = vrot.lane.b32.xlu1 %v6443_v61, %s7110_s5  ;;  %6680 = vrot.lane.b32.xlu0 %v6442_v31, %s7110_s5  ;;  %v6197_v61 = vmul.f32 %v13934_v1, %v6127_v22  ;;  %v6393_v15 = vmul.f32 0.01, %v6265_v25  ;;  %v6392_v36 = vmul.f32 0.01, %v6264_v54  ;;  %v6266_v1 = vadd.f32 %v13947_v33, %v6196_v63 }
 0x7ce   :  { %vm6329_vm15 = vcmp.ge.f32.partialorder %v6265_v25, 0.0  ;;  %vm6328_vm6 = vcmp.ge.f32.partialorder %v6264_v54, 0.0 }
 0x7cf   :  { %v6267_v18 = vadd.f32 %v13947_v33, %v6197_v61  ;;  %v6457_v50 = vsel %vm6329_vm15, %v6265_v25, %v6393_v15  ;;  %v6456_v19 = vsel %vm6328_vm6, %v6264_v54, %v6392_v36  ;;  %v6394_v56 = vmul.f32 0.01, %v6266_v1 }
 0x7d0   :  { %vm6330_vm13 = vcmp.ge.f32.partialorder %v6266_v1, 0.0 }
 0x7d1   :  { %6686 = vrot.lane.b32.xlu1 %v6445_v60, %s7110_s5  ;;  %6684 = vrot.lane.b32.xlu0 %v6444_v49, %s7110_s5  ;;  %v6395_v60 = vmul.f32 0.01, %v6267_v18  ;;  %vm6331_vm8 = vcmp.ge.f32.partialorder %v6267_v18, 0.0  ;;  %v6458_v49 = vsel %vm6330_vm13, %v6266_v1, %v6394_v56 }
 0x7d3   :  { %v6459_v6 = vsel %vm6331_vm8, %v6267_v18, %v6395_v60 }
 0x7d5   :  { %6690 = vrot.lane.b32.xlu1 %v6447_v3, %s7110_s5  ;;  %6688 = vrot.lane.b32.xlu0 %v6446_v42, %s7110_s5 }
 0x7d9   :  { %6694 = vrot.lane.b32.xlu1 %v6449_v37, %s7110_s5  ;;  %6692 = vrot.lane.b32.xlu0 %v6448_v23, %s7110_s5 }
 0x7dd   :  { %6698 = vrot.lane.b32.xlu1 %v6451_v9, %s7110_s5  ;;  %6696 = vrot.lane.b32.xlu0 %v6450_v30, %s7110_s5 }
 0x7e1   :  { %6702 = vrot.lane.b32.xlu1 %v6453_v62, %s7110_s5  ;;  %6700 = vrot.lane.b32.xlu0 %v6452_v45, %s7110_s5 }
 0x7e3   :  { %v6591_v57 = vpop.permute.xlu1 %6590  ;;  %v6589_v31 = vpop.permute.xlu0 %6588 }
 0x7e4   :  { %6782 = vst.msk [vmem:[#allocation5 + $0x8] sm:$0xff] %vm6780_vm3, %v6591_v57  ;;  %6781 = vst.msk [vmem:[#allocation5] sm:$0xff] %vm6780_vm3, %v6589_v31 }
 0x7e5   :  { %6706 = vrot.lane.b32.xlu1 %v6455_v46, %s7110_s5  ;;  %6704 = vrot.lane.b32.xlu0 %v6454_v52, %s7110_s5 }
 0x7e7   :  { %v6595_v28 = vpop.permute.xlu1 %6594  ;;  %v6593_v34 = vpop.permute.xlu0 %6592 }
 0x7e8   :  { %6784 = vst.msk [vmem:[#allocation5 + $0x18] sm:$0xff] %vm6780_vm3, %v6595_v28  ;;  %6783 = vst.msk [vmem:[#allocation5 + $0x10] sm:$0xff] %vm6780_vm3, %v6593_v34 }
 0x7e9   :  { %6710 = vrot.lane.b32.xlu1 %v6457_v50, %s7110_s5  ;;  %6708 = vrot.lane.b32.xlu0 %v6456_v19, %s7110_s5 }
 0x7eb   :  { %v6599_v33 = vpop.permute.xlu1 %6598  ;;  %v6597_v39 = vpop.permute.xlu0 %6596 }
 0x7ec   :  { %6786 = vst.msk [vmem:[#allocation5 + $0x28] sm:$0xff] %vm6780_vm3, %v6599_v33  ;;  %6785 = vst.msk [vmem:[#allocation5 + $0x20] sm:$0xff] %vm6780_vm3, %v6597_v39 }
 0x7ed   :  { %6714 = vrot.lane.b32.xlu1 %v6459_v6, %s7110_s5  ;;  %6712 = vrot.lane.b32.xlu0 %v6458_v49, %s7110_s5 }
 0x7ef   :  { %v6603_v0 = vpop.permute.xlu1 %6602  ;;  %v6601_v48 = vpop.permute.xlu0 %6600 }
 0x7f0   :  { %6788 = vst.msk [vmem:[#allocation5 + $0x38] sm:$0xff] %vm6780_vm3, %v6603_v0  ;;  %6787 = vst.msk [vmem:[#allocation5 + $0x30] sm:$0xff] %vm6780_vm3, %v6601_v48 }
 0x7f3   :  { %v6607_v29 = vpop.permute.xlu1 %6606  ;;  %v6605_v16 = vpop.permute.xlu0 %6604 }
 0x7f4   :  { %6790 = vst.msk [vmem:[#allocation5 + $0x48] sm:$0xff] %vm6780_vm3, %v6607_v29  ;;  %6789 = vst.msk [vmem:[#allocation5 + $0x40] sm:$0xff] %vm6780_vm3, %v6605_v16 }
 0x7f7   :  { %v6611_v21 = vpop.permute.xlu1 %6610  ;;  %v6609_v20 = vpop.permute.xlu0 %6608 }
 0x7f8   :  { %6792 = vst.msk [vmem:[#allocation5 + $0x58] sm:$0xff] %vm6780_vm3, %v6611_v21  ;;  %6791 = vst.msk [vmem:[#allocation5 + $0x50] sm:$0xff] %vm6780_vm3, %v6609_v20 }
 0x7fb   :  { %v6615_v12 = vpop.permute.xlu1 %6614  ;;  %v6613_v32 = vpop.permute.xlu0 %6612 }
 0x7fc   :  { %6794 = vst.msk [vmem:[#allocation5 + $0x68] sm:$0xff] %vm6780_vm3, %v6615_v12  ;;  %6793 = vst.msk [vmem:[#allocation5 + $0x60] sm:$0xff] %vm6780_vm3, %v6613_v32 }
 0x7ff   :  { %v6619_v35 = vpop.permute.xlu1 %6618  ;;  %v6617_v59 = vpop.permute.xlu0 %6616 }
 0x800   :  { %6796 = vst.msk [vmem:[#allocation5 + $0x78] sm:$0xff] %vm6780_vm3, %v6619_v35  ;;  %6795 = vst.msk [vmem:[#allocation5 + $0x70] sm:$0xff] %vm6780_vm3, %v6617_v59 }
 0x803   :  { %v6623_v3 = vpop.permute.xlu1 %6622  ;;  %v6621_v42 = vpop.permute.xlu0 %6620 }
 0x804   :  { %6798 = vst.msk [vmem:[#allocation5 + $0x88] sm:$0xff] %vm6780_vm3, %v6623_v3  ;;  %6797 = vst.msk [vmem:[#allocation5 + $0x80] sm:$0xff] %vm6780_vm3, %v6621_v42 }
 0x807   :  { %v6627_v55 = vpop.permute.xlu1 %6626  ;;  %v6625_v43 = vpop.permute.xlu0 %6624 }
 0x808   :  { %6800 = vst.msk [vmem:[#allocation5 + $0x98] sm:$0xff] %vm6780_vm3, %v6627_v55  ;;  %6799 = vst.msk [vmem:[#allocation5 + $0x90] sm:$0xff] %vm6780_vm3, %v6625_v43 }
 0x80b   :  { %v6631_v14 = vpop.permute.xlu1 %6630  ;;  %v6629_v5 = vpop.permute.xlu0 %6628 }
 0x80c   :  { %6802 = vst.msk [vmem:[#allocation5 + $0xa8] sm:$0xff] %vm6780_vm3, %v6631_v14  ;;  %6801 = vst.msk [vmem:[#allocation5 + $0xa0] sm:$0xff] %vm6780_vm3, %v6629_v5 }
 0x80f   :  { %v6635_v24 = vpop.permute.xlu1 %6634  ;;  %v6633_v38 = vpop.permute.xlu0 %6632 }
 0x810   :  { %6804 = vst.msk [vmem:[#allocation5 + $0xb8] sm:$0xff] %vm6780_vm3, %v6635_v24  ;;  %6803 = vst.msk [vmem:[#allocation5 + $0xb0] sm:$0xff] %vm6780_vm3, %v6633_v38 }
 0x813   :  { %v6639_v27 = vpop.permute.xlu1 %6638  ;;  %v6637_v7 = vpop.permute.xlu0 %6636 }
 0x814   :  { %6806 = vst.msk [vmem:[#allocation5 + $0xc8] sm:$0xff] %vm6780_vm3, %v6639_v27  ;;  %6805 = vst.msk [vmem:[#allocation5 + $0xc0] sm:$0xff] %vm6780_vm3, %v6637_v7 }
 0x817   :  { %v6643_v10 = vpop.permute.xlu1 %6642  ;;  %v6641_v2 = vpop.permute.xlu0 %6640 }
 0x818   :  { %6808 = vst.msk [vmem:[#allocation5 + $0xd8] sm:$0xff] %vm6780_vm3, %v6643_v10  ;;  %6807 = vst.msk [vmem:[#allocation5 + $0xd0] sm:$0xff] %vm6780_vm3, %v6641_v2 }
 0x81b   :  { %v6647_v11 = vpop.permute.xlu1 %6646  ;;  %v6645_v58 = vpop.permute.xlu0 %6644 }
 0x81c   :  { %6810 = vst.msk [vmem:[#allocation5 + $0xe8] sm:$0xff] %vm6780_vm3, %v6647_v11  ;;  %6809 = vst.msk [vmem:[#allocation5 + $0xe0] sm:$0xff] %vm6780_vm3, %v6645_v58 }
 0x81f   :  { %v6651_v37 = vpop.permute.xlu1 %6650  ;;  %v6649_v23 = vpop.permute.xlu0 %6648 }
 0x820   :  { %6812 = vst.msk [vmem:[#allocation5 + $0xf8] sm:$0xff] %vm6780_vm3, %v6651_v37  ;;  %6811 = vst.msk [vmem:[#allocation5 + $0xf0] sm:$0xff] %vm6780_vm3, %v6649_v23 }
 0x823   :  { %v6655_v44 = vpop.permute.xlu1 %6654  ;;  %v6653_v9 = vpop.permute.xlu0 %6652 }
 0x824   :  { %6814 = vst.msk [vmem:[#allocation5 + $0x108] sm:$0xff] %vm6780_vm3, %v6655_v44  ;;  %6813 = vst.msk [vmem:[#allocation5 + $0x100] sm:$0xff] %vm6780_vm3, %v6653_v9 }
 0x827   :  { %v6659_v30 = vpop.permute.xlu1 %6658  ;;  %v6657_v8 = vpop.permute.xlu0 %6656 }
 0x828   :  { %6816 = vst.msk [vmem:[#allocation5 + $0x118] sm:$0xff] %vm6780_vm3, %v6659_v30  ;;  %6815 = vst.msk [vmem:[#allocation5 + $0x110] sm:$0xff] %vm6780_vm3, %v6657_v8 }
 0x82b   :  { %v6663_v41 = vpop.permute.xlu1 %6662  ;;  %v6661_v26 = vpop.permute.xlu0 %6660 }
 0x82c   :  { %6818 = vst.msk [vmem:[#allocation5 + $0x128] sm:$0xff] %vm6780_vm3, %v6663_v41  ;;  %6817 = vst.msk [vmem:[#allocation5 + $0x120] sm:$0xff] %vm6780_vm3, %v6661_v26 }
 0x82f   :  { %v6667_v51 = vpop.permute.xlu1 %6666  ;;  %v6665_v13 = vpop.permute.xlu0 %6664 }
 0x830   :  { %6820 = vst.msk [vmem:[#allocation5 + $0x138] sm:$0xff] %vm6780_vm3, %v6667_v51  ;;  %6819 = vst.msk [vmem:[#allocation5 + $0x130] sm:$0xff] %vm6780_vm3, %v6665_v13 }
 0x833   :  { %v6671_v47 = vpop.permute.xlu1 %6670  ;;  %v6669_v22 = vpop.permute.xlu0 %6668 }
 0x834   :  { %6822 = vst.msk [vmem:[#allocation5 + $0x148] sm:$0xff] %vm6780_vm3, %v6671_v47  ;;  %6821 = vst.msk [vmem:[#allocation5 + $0x140] sm:$0xff] %vm6780_vm3, %v6669_v22 }
 0x837   :  { %v6675_v17 = vpop.permute.xlu1 %6674  ;;  %v6673_v40 = vpop.permute.xlu0 %6672 }
 0x838   :  { %6824 = vst.msk [vmem:[#allocation5 + $0x158] sm:$0xff] %vm6780_vm3, %v6675_v17  ;;  %6823 = vst.msk [vmem:[#allocation5 + $0x150] sm:$0xff] %vm6780_vm3, %v6673_v40 }
 0x83b   :  { %v6679_v62 = vpop.permute.xlu1 %6678  ;;  %v6677_v45 = vpop.permute.xlu0 %6676 }
 0x83c   :  { %6826 = vst.msk [vmem:[#allocation5 + $0x168] sm:$0xff] %vm6780_vm3, %v6679_v62  ;;  %6825 = vst.msk [vmem:[#allocation5 + $0x160] sm:$0xff] %vm6780_vm3, %v6677_v45 }
 0x83f   :  { %v6683_v4 = vpop.permute.xlu1 %6682  ;;  %v6681_v25 = vpop.permute.xlu0 %6680 }
 0x840   :  { %6828 = vst.msk [vmem:[#allocation5 + $0x178] sm:$0xff] %vm6780_vm3, %v6683_v4  ;;  %6827 = vst.msk [vmem:[#allocation5 + $0x170] sm:$0xff] %vm6780_vm3, %v6681_v25 }
 0x843   :  { %v6687_v54 = vpop.permute.xlu1 %6686  ;;  %v6685_v53 = vpop.permute.xlu0 %6684 }
 0x844   :  { %6830 = vst.msk [vmem:[#allocation5 + $0x188] sm:$0xff] %vm6780_vm3, %v6687_v54  ;;  %6829 = vst.msk [vmem:[#allocation5 + $0x180] sm:$0xff] %vm6780_vm3, %v6685_v53 }
 0x847   :  { %v6691_v61 = vpop.permute.xlu1 %6690  ;;  %v6689_v63 = vpop.permute.xlu0 %6688 }
 0x848   :  { %6832 = vst.msk [vmem:[#allocation5 + $0x198] sm:$0xff] %vm6780_vm3, %v6691_v61  ;;  %6831 = vst.msk [vmem:[#allocation5 + $0x190] sm:$0xff] %vm6780_vm3, %v6689_v63 }
 0x84b   :  { %v6695_v57 = vpop.permute.xlu1 %6694  ;;  %v6693_v31 = vpop.permute.xlu0 %6692 }
 0x84c   :  { %6834 = vst.msk [vmem:[#allocation5 + $0x1a8] sm:$0xff] %vm6780_vm3, %v6695_v57  ;;  %6833 = vst.msk [vmem:[#allocation5 + $0x1a0] sm:$0xff] %vm6780_vm3, %v6693_v31 }
 0x84f   :  { %v6699_v46 = vpop.permute.xlu1 %6698  ;;  %v6697_v15 = vpop.permute.xlu0 %6696 }
 0x850   :  { %6836 = vst.msk [vmem:[#allocation5 + $0x1b8] sm:$0xff] %vm6780_vm3, %v6699_v46  ;;  %6835 = vst.msk [vmem:[#allocation5 + $0x1b0] sm:$0xff] %vm6780_vm3, %v6697_v15 }
 0x853   :  { %v6703_v52 = vpop.permute.xlu1 %6702  ;;  %v6701_v36 = vpop.permute.xlu0 %6700 }
 0x854   :  { %6838 = vst.msk [vmem:[#allocation5 + $0x1c8] sm:$0xff] %vm6780_vm3, %v6703_v52  ;;  %6837 = vst.msk [vmem:[#allocation5 + $0x1c0] sm:$0xff] %vm6780_vm3, %v6701_v36 }
 0x857   :  { %v6707_v18 = vpop.permute.xlu1 %6706  ;;  %v6705_v1 = vpop.permute.xlu0 %6704 }
 0x858   :  { %6840 = vst.msk [vmem:[#allocation5 + $0x1d8] sm:$0xff] %vm6780_vm3, %v6707_v18  ;;  %6839 = vst.msk [vmem:[#allocation5 + $0x1d0] sm:$0xff] %vm6780_vm3, %v6705_v1 }
 0x85b   :  { %v6711_v28 = vpop.permute.xlu1 %6710  ;;  %v6709_v34 = vpop.permute.xlu0 %6708 }
 0x85c   :  { %6842 = vst.msk [vmem:[#allocation5 + $0x1e8] sm:$0xff] %vm6780_vm3, %v6711_v28  ;;  %6841 = vst.msk [vmem:[#allocation5 + $0x1e0] sm:$0xff] %vm6780_vm3, %v6709_v34 }
 0x85f   :  { %v6715_v50 = vpop.permute.xlu1 %6714  ;;  %v6713_v19 = vpop.permute.xlu0 %6712 }
 0x860   :  { %6844 = vst.msk [vmem:[#allocation5 + $0x1f8] sm:$0xff] %vm6780_vm3, %v6715_v50  ;;  %6843 = vst.msk [vmem:[#allocation5 + $0x1f0] sm:$0xff] %vm6780_vm3, %v6713_v19 }
 0x861   :  { %7087 = shalt.err (!%p7084_p4)
}
 0x862   :  { %s7088_s8 = scalar_lea.hbm %s14349_s7, 8192 }
 0x863   :  { %p7089_p5 = scmp.ne.s32.totalorder %s14349_s7, %s7088_s8  ;;  %p7092_p6 = scmp.lt.u32.totalorder %s7088_s8, %s14349_s7 }
 0x865   :  { %p7094_p7 = pnand %p7092_p6, %p7089_p5 }
 0x867   :  { %7097 = shalt.err (!%p7094_p7)
}
 0x868   :  { %s7112_s21 = smov 128   ;;  %s7113_s22 = smov 8  }
 0x869   :  { %6856 = dma.vmem_to_hbm [thread:$0]  %s6851_s3, 8192, %s14349_s7, [#allocation6], %s7112_s21, %s7112_s21, %s7113_s22  }
 0x86a   :  { %7098 = dma.done.wait [#allocation6], 8192  }
 0x86b   :  { %7099 = vsyncadd [#allocation6], 4294959104 }
 0x86c   :  { %6860 = vsyncpa [#allocation6], 1 }

</bundles_post_ra>
